<compile_context>
chip_gen: v6e
topology: v6e:2x2x1
jax: 0.10.0
libtpu: 0.0.40
codegen_flags: <defaults>
</compile_context>

<pallas_src>
import functools

import jax
import jax.numpy as jnp
from jax.experimental import pallas as pl
from jax.experimental.pallas import tpu as pltpu

BN_EPS = 1e-5
_HID = (512, 256, 128, 64)   # fc1..fc4 output widths
_FC4_PAD = 128               # fc4 width zero-padded to a full lane tile
_B_CAP = 1024                # max batch rows per grid step (VMEM-safe on v7x)


def _round_up(n, m):
    return ((n + m - 1) // m) * m


def _choose_tiling(B):
    """Pick (tile_b, num_steps).  Small batches: one big tile.  Large batches:
    an even number of <=_B_CAP-row tiles so both v7x TensorCores get work."""
    if B <= _B_CAP:
        return _round_up(max(B, 8), 8), 1
    steps = _round_up(pl.cdiv(B, _B_CAP), 2)        # even -> balanced on 2 TCs
    tile_b = _round_up(pl.cdiv(B, steps), 8)
    return tile_b, steps


def _make_kernel(out_pad):
    """Fused MLP kernel for a given (lane-padded) logit width."""
    o1 = _HID[0]              # 512
    o2 = o1 + _HID[1]         # 768
    o3 = o2 + _HID[2]         # 896
    o4 = o3 + _FC4_PAD        # 1024   (all slice starts are 128-aligned)

    def kernel(x_ref, w1_ref, w2_ref, w3_ref, w45_ref, b_ref, o_ref):
        h = x_ref[...]                                   # already bfloat16
        # fc1 + folded BN1 + ReLU   (dropout = identity in eval)
        h = jnp.dot(h, w1_ref[...], preferred_element_type=jnp.float32)
        h = jnp.maximum(h + b_ref[:, 0:o1], 0.0).astype(jnp.bfloat16)
        # fc2 + folded BN2 + ReLU
        h = jnp.dot(h, w2_ref[...], preferred_element_type=jnp.float32)
        h = jnp.maximum(h + b_ref[:, o1:o2], 0.0).astype(jnp.bfloat16)
        # fc3 + folded BN3 + ReLU
        h = jnp.dot(h, w3_ref[...], preferred_element_type=jnp.float32)
        h = jnp.maximum(h + b_ref[:, o2:o3], 0.0).astype(jnp.bfloat16)
        # fc4 + ReLU (lane-padded to 128; padded columns stay exactly 0)
        h = jnp.dot(h, w45_ref[:, 0:_FC4_PAD], preferred_element_type=jnp.float32)
        h = jnp.maximum(h + b_ref[:, o3:o4], 0.0).astype(jnp.bfloat16)
        # fc5 logits (lane-padded; sliced to output_size outside the kernel)
        o_ref[...] = (jnp.dot(h, w45_ref[:, _FC4_PAD:_FC4_PAD + out_pad],
                              preferred_element_type=jnp.float32)
                      + b_ref[:, o4:o4 + out_pad])

    return kernel


def init_torch_params(input_size, output_size, key):
    """PyTorch-shaped f32 params: Linear weights (out,in)+bias, BN per-feature stats."""
    dims = [input_size, *_HID, output_size]
    keys = jax.random.split(key, 22)
    p = {}
    k = 0
    for i in range(5):
        fan_in, fan_out = dims[i], dims[i + 1]
        bound = 1.0 / float(fan_in) ** 0.5
        p[f"w{i+1}"] = jax.random.uniform(keys[k], (fan_out, fan_in),
                                          minval=-bound, maxval=bound,
                                          dtype=jnp.float32); k += 1
        p[f"b{i+1}"] = jax.random.uniform(keys[k], (fan_out,),
                                          minval=-bound, maxval=bound,
                                          dtype=jnp.float32); k += 1
    # non-trivial BN running stats so the folding math is actually exercised
    for i, n in zip((1, 2, 3), _HID[:3]):
        p[f"gamma{i}"] = jax.random.uniform(keys[k], (n,), minval=0.5, maxval=1.5,
                                            dtype=jnp.float32); k += 1
        p[f"beta{i}"] = 0.1 * jax.random.normal(keys[k], (n,), dtype=jnp.float32); k += 1
        p[f"mean{i}"] = 0.1 * jax.random.normal(keys[k], (n,), dtype=jnp.float32); k += 1
        p[f"var{i}"] = jax.random.uniform(keys[k], (n,), minval=0.5, maxval=1.5,
                                          dtype=jnp.float32); k += 1
    return p


def prepare_kernel_params(tp, output_size):
    """Fold BN, transpose to (in,out), lane-pad fc4/fc5, pack w4+w5 into one
    bf16 operand, cast weights to bf16, pack all biases into one f32 row."""
    ws, bs = [], []
    for i in (1, 2, 3):
        s = tp[f"gamma{i}"] / jnp.sqrt(tp[f"var{i}"] + BN_EPS)
        t = tp[f"beta{i}"] - tp[f"mean{i}"] * s
        ws.append(tp[f"w{i}"].T * s[None, :])          # (in, out), column-scaled
        bs.append(tp[f"b{i}"] * s + t)
    # fc4: (128, 64) -> (128, 128), zero columns
    w4t = jnp.pad(tp["w4"].T, ((0, 0), (0, _FC4_PAD - _HID[3])))
    b4 = jnp.pad(tp["b4"], (0, _FC4_PAD - _HID[3]))
    # fc5: (64, out) -> (128, out_pad), zero rows/columns
    out_pad = _round_up(output_size, 128)
    w5t = jnp.pad(tp["w5"].T, ((0, _FC4_PAD - _HID[3]), (0, out_pad - output_size)))
    b5 = jnp.pad(tp["b5"], (0, out_pad - output_size))
    w45 = jnp.concatenate([w4t, w5t], axis=1)          # (128, 128 + out_pad)
    bs += [b4, b5]
    weights = tuple(w.astype(jnp.bfloat16) for w in (*ws, w45))
    bias_packed = jnp.concatenate(bs).reshape(1, -1).astype(jnp.float32)
    return weights + (bias_packed,)


@functools.partial(jax.jit, static_argnames=("output_size",))
def chatbot_forward(x, kparams, output_size):
    # PyTorch: if x.dim() == 1: x = x.unsqueeze(0)
    if x.ndim == 1:
        x = x[None, :]
    # bf16 activations in (halves input HBM traffic); f32 logits out.
    x = x.astype(jnp.bfloat16)
    B, in_dim = x.shape
    w1, w2, w3, w45, bias = kparams
    out_pad = w45.shape[1] - _FC4_PAD

    tile_b, steps = _choose_tiling(B)
    b_pad = tile_b * steps
    if b_pad != B:                       # only materialize a padded copy if ragged
        x = jnp.pad(x, ((0, b_pad - B), (0, 0)))

    vmem_spec = pl.BlockSpec(memory_space=pltpu.MemorySpace.VMEM)  # resident, no pipelining
    out = pl.pallas_call(
        _make_kernel(out_pad),
        out_shape=jax.ShapeDtypeStruct((b_pad, out_pad), jnp.float32),
        grid=(steps,),
        in_specs=[
            pl.BlockSpec((tile_b, in_dim), lambda i: (i, 0)),
            vmem_spec,    # w1
            vmem_spec,    # w2
            vmem_spec,    # w3
            vmem_spec,    # packed w4|w5
            vmem_spec,    # packed biases
        ],
        out_specs=pl.BlockSpec((tile_b, out_pad), lambda i: (i, 0)),
        compiler_params=pltpu.CompilerParams(
            dimension_semantics=("parallel",),
            vmem_limit_bytes=32 << 20),
    )(x, w1, w2, w3, w45, bias)
    return out[:B, :output_size]


def _reference_forward(x, tp):
    """Pure-JAX f32 reference matching the PyTorch eval-mode forward."""
    if x.ndim == 1:
        x = x[None, :]
    h = x.astype(jnp.float32)
    for i in (1, 2, 3):
        h = h @ tp[f"w{i}"].T + tp[f"b{i}"]
        h = ((h - tp[f"mean{i}"]) / jnp.sqrt(tp[f"var{i}"] + BN_EPS)
             * tp[f"gamma{i}"] + tp[f"beta{i}"])
        h = jnp.maximum(h, 0.0)
    h = jnp.maximum(h @ tp["w4"].T + tp["b4"], 0.0)
    return h @ tp["w5"].T + tp["b5"]


if __name__ == "__main__":
    INPUT_SIZE = 128    # bag-of-words vocabulary size (small synthetic)
    OUTPUT_SIZE = 32    # number of intent classes (small synthetic)
    BATCH = 2048        # -> 2 grid steps of 1024 rows (even grid, no pad copy)

    key = jax.random.PRNGKey(0)
    pkey, xkey = jax.random.split(key)
    torch_params = init_torch_params(INPUT_SIZE, OUTPUT_SIZE, pkey)
    kparams = prepare_kernel_params(torch_params, OUTPUT_SIZE)

    x = jax.random.uniform(xkey, (BATCH, INPUT_SIZE), dtype=jnp.float32)

    out = jax.block_until_ready(chatbot_forward(x, kparams, OUTPUT_SIZE))
    ref = _reference_forward(x, torch_params)

    assert out.shape == (BATCH, OUTPUT_SIZE), out.shape
    # bf16 activations/weights (f32 accumulate) -> slightly loose tolerance vs f32
    max_err = float(jnp.max(jnp.abs(out - ref)))
    assert max_err < 5e-2, f"mismatch vs reference (max abs err {max_err})"

    # small ragged batch (single-tile path + pad) and 1-D input (unsqueeze) paths
    out_small = jax.block_until_ready(chatbot_forward(x[:50], kparams, OUTPUT_SIZE))
    assert out_small.shape == (50, OUTPUT_SIZE)
    assert float(jnp.max(jnp.abs(out_small - ref[:50]))) < 5e-2

    out1d = jax.block_until_ready(chatbot_forward(x[0], kparams, OUTPUT_SIZE))
    assert out1d.shape == (1, OUTPUT_SIZE)
    assert float(jnp.max(jnp.abs(out1d - ref[:1]))) < 5e-2

    print("KERNEL_OK")
</pallas_src>

<mosaic_0001>
module attributes {stable_mosaic.version = 11 : i64} {
  func.func @kernel(%arg0: i32, %arg1: memref<1024x128xbf16, #tpu.memory_space<vmem>>, %arg2: memref<128x512xbf16, #tpu.memory_space<vmem>>, %arg3: memref<512x256xbf16, #tpu.memory_space<vmem>>, %arg4: memref<256x128xbf16, #tpu.memory_space<vmem>>, %arg5: memref<128x256xbf16, #tpu.memory_space<vmem>>, %arg6: memref<1x1152xf32, #tpu.memory_space<vmem>>, %arg7: memref<1024x128xf32, #tpu.memory_space<vmem>>) attributes {dimension_semantics = [#tpu.dimension_semantics<parallel>], iteration_bounds = array<i64: 2>, scalar_prefetch = 0 : i64, scratch_operands = 0 : i64, tpu.core_type = #tpu.core_type<tc>, window_params = [{transform_indices = @transform_0, window_bounds = array<i64: 1024, 128>}, {pipeline_mode = #tpu.pipeline_mode<synchronous>, transform_indices = @transform_1, window_bounds = array<i64: 128, 512>}, {pipeline_mode = #tpu.pipeline_mode<synchronous>, transform_indices = @transform_2, window_bounds = array<i64: 512, 256>}, {pipeline_mode = #tpu.pipeline_mode<synchronous>, transform_indices = @transform_3, window_bounds = array<i64: 256, 128>}, {pipeline_mode = #tpu.pipeline_mode<synchronous>, transform_indices = @transform_4, window_bounds = array<i64: 128, 256>}, {pipeline_mode = #tpu.pipeline_mode<synchronous>, transform_indices = @transform_5, window_bounds = array<i64: 1, 1152>}, {transform_indices = @transform_6, window_bounds = array<i64: 1024, 128>}]} {
    %c0 = arith.constant 0 : index
    %c0_0 = arith.constant 0 : index
    %0 = vector.load %arg1[%c0, %c0_0] : memref<1024x128xbf16, #tpu.memory_space<vmem>>, vector<1024x128xbf16>
    %c0_1 = arith.constant 0 : index
    %c0_2 = arith.constant 0 : index
    %1 = vector.load %arg2[%c0_1, %c0_2] : memref<128x512xbf16, #tpu.memory_space<vmem>>, vector<128x512xbf16>
    %cst = arith.constant dense<0.000000e+00> : vector<1024x512xf32>
    %2 = tpu.matmul %0, %1, %cst {dimension_numbers = #tpu.dot_dimension_numbers<[1], [0], [0], [1], [0, 0, 1, 1], [], []>} : vector<1024x128xbf16>, vector<128x512xbf16>, vector<1024x512xf32> -> vector<1024x512xf32>
    %c0_3 = arith.constant 0 : index
    %c0_4 = arith.constant 0 : index
    %3 = vector.load %arg6[%c0_3, %c0_4] : memref<1x1152xf32, #tpu.memory_space<vmem>>, vector<1x512xf32>
    %4 = vector.broadcast %3 : vector<1x512xf32> to vector<1024x512xf32>
    %5 = arith.addf %2, %4 : vector<1024x512xf32>
    %cst_5 = arith.constant 0.000000e+00 : f32
    %6 = vector.broadcast %cst_5 : f32 to vector<1024x512xf32>
    %7 = arith.maximumf %5, %6 : vector<1024x512xf32>
    %8 = arith.truncf %7 : vector<1024x512xf32> to vector<1024x512xbf16>
    %c0_6 = arith.constant 0 : index
    %c0_7 = arith.constant 0 : index
    %9 = vector.load %arg3[%c0_6, %c0_7] : memref<512x256xbf16, #tpu.memory_space<vmem>>, vector<512x256xbf16>
    %cst_8 = arith.constant dense<0.000000e+00> : vector<1024x256xf32>
    %10 = tpu.matmul %8, %9, %cst_8 {dimension_numbers = #tpu.dot_dimension_numbers<[1], [0], [0], [1], [0, 0, 1, 1], [], []>} : vector<1024x512xbf16>, vector<512x256xbf16>, vector<1024x256xf32> -> vector<1024x256xf32>
    %c0_9 = arith.constant 0 : index
    %c512 = arith.constant 512 : index
    %11 = vector.load %arg6[%c0_9, %c512] : memref<1x1152xf32, #tpu.memory_space<vmem>>, vector<1x256xf32>
    %12 = vector.broadcast %11 : vector<1x256xf32> to vector<1024x256xf32>
    %13 = arith.addf %10, %12 : vector<1024x256xf32>
    %cst_10 = arith.constant 0.000000e+00 : f32
    %14 = vector.broadcast %cst_10 : f32 to vector<1024x256xf32>
    %15 = arith.maximumf %13, %14 : vector<1024x256xf32>
    %16 = arith.truncf %15 : vector<1024x256xf32> to vector<1024x256xbf16>
    %c0_11 = arith.constant 0 : index
    %c0_12 = arith.constant 0 : index
    %17 = vector.load %arg4[%c0_11, %c0_12] : memref<256x128xbf16, #tpu.memory_space<vmem>>, vector<256x128xbf16>
    %cst_13 = arith.constant dense<0.000000e+00> : vector<1024x128xf32>
    %18 = tpu.matmul %16, %17, %cst_13 {dimension_numbers = #tpu.dot_dimension_numbers<[1], [0], [0], [1], [0, 0, 1, 1], [], []>} : vector<1024x256xbf16>, vector<256x128xbf16>, vector<1024x128xf32> -> vector<1024x128xf32>
    %c0_14 = arith.constant 0 : index
    %c768 = arith.constant 768 : index
    %19 = vector.load %arg6[%c0_14, %c768] : memref<1x1152xf32, #tpu.memory_space<vmem>>, vector<1x128xf32>
    %20 = vector.broadcast %19 : vector<1x128xf32> to vector<1024x128xf32>
    %21 = arith.addf %18, %20 : vector<1024x128xf32>
    %cst_15 = arith.constant 0.000000e+00 : f32
    %22 = vector.broadcast %cst_15 : f32 to vector<1024x128xf32>
    %23 = arith.maximumf %21, %22 : vector<1024x128xf32>
    %24 = arith.truncf %23 : vector<1024x128xf32> to vector<1024x128xbf16>
    %c0_16 = arith.constant 0 : index
    %c0_17 = arith.constant 0 : index
    %25 = vector.load %arg5[%c0_16, %c0_17] : memref<128x256xbf16, #tpu.memory_space<vmem>>, vector<128x128xbf16>
    %cst_18 = arith.constant dense<0.000000e+00> : vector<1024x128xf32>
    %26 = tpu.matmul %24, %25, %cst_18 {dimension_numbers = #tpu.dot_dimension_numbers<[1], [0], [0], [1], [0, 0, 1, 1], [], []>} : vector<1024x128xbf16>, vector<128x128xbf16>, vector<1024x128xf32> -> vector<1024x128xf32>
    %c0_19 = arith.constant 0 : index
    %c896 = arith.constant 896 : index
    %27 = vector.load %arg6[%c0_19, %c896] : memref<1x1152xf32, #tpu.memory_space<vmem>>, vector<1x128xf32>
    %28 = vector.broadcast %27 : vector<1x128xf32> to vector<1024x128xf32>
    %29 = arith.addf %26, %28 : vector<1024x128xf32>
    %cst_20 = arith.constant 0.000000e+00 : f32
    %30 = vector.broadcast %cst_20 : f32 to vector<1024x128xf32>
    %31 = arith.maximumf %29, %30 : vector<1024x128xf32>
    %32 = arith.truncf %31 : vector<1024x128xf32> to vector<1024x128xbf16>
    %c0_21 = arith.constant 0 : index
    %c128 = arith.constant 128 : index
    %33 = vector.load %arg5[%c0_21, %c128] : memref<128x256xbf16, #tpu.memory_space<vmem>>, vector<128x128xbf16>
    %cst_22 = arith.constant dense<0.000000e+00> : vector<1024x128xf32>
    %34 = tpu.matmul %32, %33, %cst_22 {dimension_numbers = #tpu.dot_dimension_numbers<[1], [0], [0], [1], [0, 0, 1, 1], [], []>} : vector<1024x128xbf16>, vector<128x128xbf16>, vector<1024x128xf32> -> vector<1024x128xf32>
    %c0_23 = arith.constant 0 : index
    %c1024 = arith.constant 1024 : index
    %35 = vector.load %arg6[%c0_23, %c1024] : memref<1x1152xf32, #tpu.memory_space<vmem>>, vector<1x128xf32>
    %36 = vector.broadcast %35 : vector<1x128xf32> to vector<1024x128xf32>
    %37 = arith.addf %34, %36 : vector<1024x128xf32>
    %c0_24 = arith.constant 0 : index
    %c0_25 = arith.constant 0 : index
    %38 = vector.load %arg7[%c0_24, %c0_25] : memref<1024x128xf32, #tpu.memory_space<vmem>>, vector<1024x128xf32>
    tpu.vector_store %arg7[%c0_24, %c0_25], %37 {strides = array<i32>} : memref<1024x128xf32, #tpu.memory_space<vmem>>, vector<1024x128xf32>,
    return
  }
  func.func @transform_0(%arg0: i32) -> (i32, i32) {
    %c0_i32 = arith.constant 0 : i32
    %c0_i32_0 = arith.constant 0 : i32
    return %arg0, %c0_i32 : i32, i32
  }
  func.func @transform_1(%arg0: i32) -> (i32, i32) {
    %c0_i32 = arith.constant 0 : i32
    %c0_i32_0 = arith.constant 0 : i32
    %c0_i32_1 = arith.constant 0 : i32
    return %c0_i32, %c0_i32_0 : i32, i32
  }
  func.func @transform_2(%arg0: i32) -> (i32, i32) {
    %c0_i32 = arith.constant 0 : i32
    %c0_i32_0 = arith.constant 0 : i32
    %c0_i32_1 = arith.constant 0 : i32
    return %c0_i32, %c0_i32_0 : i32, i32
  }
  func.func @transform_3(%arg0: i32) -> (i32, i32) {
    %c0_i32 = arith.constant 0 : i32
    %c0_i32_0 = arith.constant 0 : i32
    %c0_i32_1 = arith.constant 0 : i32
    return %c0_i32, %c0_i32_0 : i32, i32
  }
  func.func @transform_4(%arg0: i32) -> (i32, i32) {
    %c0_i32 = arith.constant 0 : i32
    %c0_i32_0 = arith.constant 0 : i32
    %c0_i32_1 = arith.constant 0 : i32
    return %c0_i32, %c0_i32_0 : i32, i32
  }
  func.func @transform_5(%arg0: i32) -> (i32, i32) {
    %c0_i32 = arith.constant 0 : i32
    %c0_i32_0 = arith.constant 0 : i32
    %c0_i32_1 = arith.constant 0 : i32
    return %c0_i32, %c0_i32_0 : i32, i32
  }
  func.func @transform_6(%arg0: i32) -> (i32, i32) {
    %c0_i32 = arith.constant 0 : i32
    %c0_i32_0 = arith.constant 0 : i32
    return %arg0, %c0_i32 : i32, i32
  }
}

</mosaic_0001>

<bundles_post_ra>
// kernel: chatbot_forward.1
= control target key start
LH: loop header
LB: loop body
LE: loop exit
PB: predicated region body
PF: predicated region fallthrough
CT: control target
= control target key end

     0   :  { %s8636_s21 = smov 0   ;;  %s12509_s0 = inlined_call_operand.vmem [shape: bf16[2048,128], index: 0, kind: input, shape index: {}]   ;;  %s12510_s1 = inlined_call_operand.vmem [shape: bf16[128,512], index: 1, kind: input, shape index: {}]   ;;  %s12511_s2 = inlined_call_operand.vmem [shape: bf16[512,256], index: 2, kind: input, shape index: {}]   ;;  %s12512_s3 = inlined_call_operand.vmem [shape: bf16[256,128], index: 3, kind: input, shape index: {}]   ;;  %s12513_s4 = inlined_call_operand.vmem [shape: bf16[128,256], index: 4, kind: input, shape index: {}]   ;;  %s12514_s5 = inlined_call_operand.vmem [shape: f32[1,1152], index: 5, kind: input, shape index: {}]   ;;  %s12515_s6 = inlined_call_operand.vmem [shape: f32[2048,128], index: 6, kind: output, shape index: {}]  }
   0x1 LB: > { %s7702_s22 = sadd.s32 4294967295, %s8598_s21   ;;  %p7706_p0 = scmp.ge.s32.totalorder %s8598_s21, 1  ;;  %s8598_s21 = sphi %s8636_s21, %s16_s21  }
   0x2   : > { %p213_p1 = scmp.lt.s32.totalorder %s8598_s21, 3 }
   0x4   : > { %p214_p2 = pnand %p7706_p0, %p213_p1 }
   0x6   : > { %217 = sbr.rel (%p214_p2) target bundleno = 2234 (0x8ba), region = 44 }
   0xb   : > { %v8349_v0 = vld [vmem:[%s12510_s1 + $0xe4] ss:$16 sps:$4 sm:$0xff]   ;;  %v8351_v1 = vld [vmem:[%s12510_s1 + $0xec] ss:$16 sps:$4 sm:$0xff]   ;;  %v12518_v2 = vmov 0   ;;  %s7707_s17 = sshll.u32 %s7702_s22, 7 }
   0xc   : > { %1014 = vmatprep.mubr.bf16.mxu0 %v12518_v2  ;;  %1687 = vmatprep.mubr.bf16.mxu1 %v12518_v2  ;;  %v8353_v3 = vld [vmem:[%s12510_s1 + $0xe0] ss:$16 sps:$4 sm:$0xff]   ;;  %v8354_v4 = vld [vmem:[%s12510_s1 + $0xe8] ss:$16 sps:$4 sm:$0xff]   ;;  %v8355_v5 = vld [vmem:[%s12510_s1 + $0xc4] ss:$16 sps:$4 sm:$0xff]  }
   0xd   : > { %982 = vmatprep.subr.bf16.mxu0 %v8349_v0  ;;  %1655 = vmatprep.subr.bf16.mxu1 %v8351_v1  ;;  %v8357_v6 = vld [vmem:[%s12510_s1 + $0xcc] ss:$16 sps:$4 sm:$0xff]   ;;  %v8359_v7 = vld [vmem:[%s12510_s1 + $0xc0] ss:$16 sps:$4 sm:$0xff]   ;;  %v8360_v8 = vld [vmem:[%s12510_s1 + $0xc8] ss:$16 sps:$4 sm:$0xff]  }
   0xe   : > { %983 = vmatpush1.bf16.msra.mxu0 %v8353_v3  ;;  %1656 = vmatpush1.bf16.msra.mxu1 %v8354_v4  ;;  %v8361_v9 = vld [vmem:[%s12510_s1 + $0xa4] ss:$16 sps:$4 sm:$0xff]   ;;  %v8363_v10 = vld [vmem:[%s12510_s1 + $0xac] ss:$16 sps:$4 sm:$0xff]   ;;  %v8365_v11 = vld [vmem:[%s12510_s1 + $0xa0] ss:$16 sps:$4 sm:$0xff]  }
   0xf   : > { %984 = vmatprep.subr.bf16.mxu0 %v8355_v5  ;;  %1657 = vmatprep.subr.bf16.mxu1 %v8357_v6  ;;  %v8366_v12 = vld [vmem:[%s12510_s1 + $0xa8] ss:$16 sps:$4 sm:$0xff]   ;;  %v8367_v13 = vld [vmem:[%s12510_s1 + $0x84] ss:$16 sps:$4 sm:$0xff]   ;;  %v8369_v14 = vld [vmem:[%s12510_s1 + $0x8c] ss:$16 sps:$4 sm:$0xff]  }
  0x10   : > { %p244_p3 = scmp.lt.s32.totalorder %s7707_s17, 255  ;;  %v8371_v15 = vld [vmem:[%s12510_s1 + $0x80] ss:$16 sps:$4 sm:$0xff]   ;;  %v8372_v16 = vld [vmem:[%s12510_s1 + $0x88] ss:$16 sps:$4 sm:$0xff]  }
  0x11   : > { %v8373_v17 = vld [vmem:[%s12510_s1 + $0x64] ss:$16 sps:$4 sm:$0xff]   ;;  %v8375_v18 = vld [vmem:[%s12510_s1 + $0x6c] ss:$16 sps:$4 sm:$0xff]   ;;  %v8377_v19 = vld [vmem:[%s12510_s1 + $0x60] ss:$16 sps:$4 sm:$0xff]  }
  0x12   : > { %985 = vmatpush1.bf16.msra.mxu0 %v8359_v7  ;;  %1658 = vmatpush1.bf16.msra.mxu1 %v8360_v8  ;;  %s13164_s17 = smov (!%p244_p3, %s7707_s17), 255  ;;  %v8378_v20 = vld [vmem:[%s12510_s1 + $0x68] ss:$16 sps:$4 sm:$0xff]   ;;  %v8379_v21 = vld [vmem:[%s12510_s1 + $0x44] ss:$16 sps:$4 sm:$0xff]  }
  0x13   : > { %986 = vmatprep.subr.bf16.mxu0 %v8361_v9  ;;  %1659 = vmatprep.subr.bf16.mxu1 %v8363_v10  ;;  %v8381_v22 = vld [vmem:[%s12510_s1 + $0x4c] ss:$16 sps:$4 sm:$0xff]   ;;  %s7708_s24 = sshll.u32 %s13164_s17, 2  ;;  %v8383_v23 = vld [vmem:[%s12510_s1 + $0x40] ss:$16 sps:$4 sm:$0xff]   ;;  %s7710_s13 = sshll.u32 %s13164_s17, 3 }
  0x14   : > { %v8384_v24 = vld [vmem:[%s12510_s1 + $0x48] ss:$16 sps:$4 sm:$0xff]   ;;  %v8385_v25 = vld [vmem:[%s12510_s1 + $0x24] ss:$16 sps:$4 sm:$0xff]   ;;  %s8727_s8 = scalar_lea.vmem %s12509_s0, %s7708_s24  ;;  %v8387_v26 = vld [vmem:[%s12510_s1 + $0x2c] ss:$16 sps:$4 sm:$0xff]   ;;  %s12201_s18 = scalar_lea.vmem %s12515_s6, %s7710_s13 }
  0x15   : > { %v8389_v27 = vld [vmem:[%s12510_s1 + $0x20] ss:$16 sps:$4 sm:$0xff]   ;;  %v8390_v28 = vld [vmem:[%s12510_s1 + $0x28] ss:$16 sps:$4 sm:$0xff]   ;;  %v8391_v29 = vld [vmem:[%s12510_s1 + $0x4] ss:$16 sps:$4 sm:$0xff]  }
  0x16   : > { %987 = vmatpush1.bf16.msra.mxu0 %v8365_v11  ;;  %1660 = vmatpush1.bf16.msra.mxu1 %v8366_v12  ;;  %v8393_v30 = vld [vmem:[%s12510_s1 + $0xc] ss:$16 sps:$4 sm:$0xff]   ;;  %v8395_v31 = vld [vmem:[%s12510_s1] ss:$16 sps:$4 sm:$0xff]   ;;  %v8396_v32 = vld [vmem:[%s12510_s1 + $0x8] ss:$16 sps:$4 sm:$0xff]  }
  0x17   : > { %988 = vmatprep.subr.bf16.mxu0 %v8367_v13  ;;  %1661 = vmatprep.subr.bf16.mxu1 %v8369_v14  ;;  %v8400_v33 = vld [vmem:[%s12511_s2 + $0x74] ss:$8 sps:$4 sm:$0xff]   ;;  %v8397_v34 = vld [vmem:[%s8727_s8] sm:$0xff]   ;;  %v8398_v35 = vld [vmem:[%s12511_s2 + $0x70] ss:$8 sps:$4 sm:$0xff]   ;;  %v418_v13 = vlaneseq }
  0x18   : > { %v8407_v36 = vld [vmem:[%s12511_s2 + $0x64] ss:$8 sps:$4 sm:$0xff]   ;;  %v8405_v37 = vld [vmem:[%s12511_s2 + $0x60] ss:$8 sps:$4 sm:$0xff]   ;;  %v8414_v38 = vld [vmem:[%s12511_s2 + $0x54] ss:$8 sps:$4 sm:$0xff]  }
  0x19   : > { %v8401_v39 = vld [vmem:[%s8727_s8 + $0x8] sm:$0xff]   ;;  %v8412_v40 = vld [vmem:[%s12511_s2 + $0x50] ss:$8 sps:$4 sm:$0xff]   ;;  %v8428_v44 = vld [vmem:[%s12511_s2 + $0x34] ss:$8 sps:$4 sm:$0xff]  }
  0x1a   : > { %989 = vmatpush1.bf16.msra.mxu0 %v8371_v15  ;;  %1662 = vmatpush1.bf16.msra.mxu1 %v8372_v16  ;;  %v8421_v41 = vld [vmem:[%s12511_s2 + $0x44] ss:$8 sps:$4 sm:$0xff]   ;;  %v8402_v42 = vld [vmem:[%s8727_s8 + $0x10] sm:$0xff]   ;;  %v8419_v43 = vld [vmem:[%s12511_s2 + $0x40] ss:$8 sps:$4 sm:$0xff]  }
  0x1b   : > { %990 = vmatprep.subr.bf16.mxu0 %v8373_v17  ;;  %1663 = vmatprep.subr.bf16.mxu1 %v8375_v18  ;;  %v8426_v45 = vld [vmem:[%s12511_s2 + $0x30] ss:$8 sps:$4 sm:$0xff]   ;;  %v8404_v47 = vld [vmem:[%s8727_s8 + $0x20] sm:$0xff]   ;;  %v8408_v50 = vld [vmem:[%s8727_s8 + $0x28] sm:$0xff]   ;;  %v8886_v17 = vshrl.u32 %v418_v13, 7 }
  0x1c   : > { %v8403_v46 = vld [vmem:[%s8727_s8 + $0x18] sm:$0xff]   ;;  %v8433_v48 = vld [vmem:[%s12511_s2 + $0x20] ss:$8 sps:$4 sm:$0xff]   ;;  %v8435_v49 = vld [vmem:[%s12511_s2 + $0x24] ss:$8 sps:$4 sm:$0xff]  }
  0x1d   : > { %v8409_v51 = vld [vmem:[%s8727_s8 + $0x30] sm:$0xff]   ;;  %v8410_v52 = vld [vmem:[%s8727_s8 + $0x38] sm:$0xff]   ;;  %v8411_v53 = vld [vmem:[%s8727_s8 + $0x40] sm:$0xff]   ;;  %12522 = vst [vmem:[#allocation2_spill] sm:$0xff] %v8886_v17  ;;  %v428_v18 = vsub.s32 2, %v8886_v17 }
  0x1e   : > { %991 = vmatpush1.bf16.msra.mxu0 %v8377_v19  ;;  %1664 = vmatpush1.bf16.msra.mxu1 %v8378_v20  ;;  %v8415_v54 = vld [vmem:[%s8727_s8 + $0x48] sm:$0xff]   ;;  %v8440_v55 = vld [vmem:[%s12511_s2 + $0x10] ss:$8 sps:$4 sm:$0xff]   ;;  %v8442_v56 = vld [vmem:[%s12511_s2 + $0x14] ss:$8 sps:$4 sm:$0xff]   ;;  %v12517_v19 = vsub.s32 0, %v8886_v17 }
  0x1f   : > { %992 = vmatprep.subr.bf16.mxu0 %v8379_v21  ;;  %1665 = vmatprep.subr.bf16.mxu1 %v8381_v22  ;;  %v8416_v57 = vld [vmem:[%s8727_s8 + $0x50] sm:$0xff]   ;;  %v8417_v58 = vld [vmem:[%s8727_s8 + $0x58] sm:$0xff]   ;;  %v8418_v59 = vld [vmem:[%s8727_s8 + $0x60] sm:$0xff]  }
  0x20   : > { %v8422_v60 = vld [vmem:[%s8727_s8 + $0x68] sm:$0xff]   ;;  %v8423_v63 = vld [vmem:[%s8727_s8 + $0x70] sm:$0xff]   ;;  %v8424_v0 = vld [vmem:[%s8727_s8 + $0x78] sm:$0xff]  }
  0x21   : > { %v8447_v61 = vld [vmem:[%s12511_s2] ss:$8 sps:$4 sm:$0xff]   ;;  %v8449_v62 = vld [vmem:[%s12511_s2 + $0x4] ss:$8 sps:$4 sm:$0xff]   ;;  %v8454_v4 = vld [vmem:[%s12511_s2 + $0xf0] ss:$8 sps:$4 sm:$0xff]  }
  0x22   : > { %993 = vmatpush1.bf16.msra.mxu0 %v8383_v23  ;;  %1666 = vmatpush1.bf16.msra.mxu1 %v8384_v24  ;;  %v8425_v1 = vld [vmem:[%s8727_s8 + $0x80] sm:$0xff]   ;;  %v8429_v3 = vld [vmem:[%s8727_s8 + $0x88] sm:$0xff]   ;;  %v8456_v5 = vld [vmem:[%s12511_s2 + $0xf4] ss:$8 sps:$4 sm:$0xff]   ;;  %v12516_v23 = vsub.s32 1, %v8886_v17 }
  0x23   : > { %994 = vmatprep.subr.bf16.mxu0 %v8385_v25  ;;  %1667 = vmatprep.subr.bf16.mxu1 %v8387_v26  ;;  %v8430_v6 = vld [vmem:[%s8727_s8 + $0x90] sm:$0xff]   ;;  %v8431_v7 = vld [vmem:[%s8727_s8 + $0x98] sm:$0xff]   ;;  %v8432_v8 = vld [vmem:[%s8727_s8 + $0xa0] sm:$0xff]  }
  0x24   : > { %v8436_v9 = vld [vmem:[%s8727_s8 + $0xa8] sm:$0xff]   ;;  %v8437_v12 = vld [vmem:[%s8727_s8 + $0xb0] sm:$0xff]   ;;  %v8438_v14 = vld [vmem:[%s8727_s8 + $0xb8] sm:$0xff]  }
  0x25   : > { %v8461_v10 = vld [vmem:[%s12511_s2 + $0xe0] ss:$8 sps:$4 sm:$0xff]   ;;  %v8463_v11 = vld [vmem:[%s12511_s2 + $0xe4] ss:$8 sps:$4 sm:$0xff]   ;;  %v8468_v15 = vld [vmem:[%s12511_s2 + $0x174] ss:$8 sps:$4 sm:$0xff]  }
  0x26   : > { %995 = vmatpush1.bf16.msra.mxu0 %v8389_v27  ;;  %1668 = vmatpush1.bf16.msra.mxu1 %v8390_v28  ;;  %v8466_v16 = vld [vmem:[%s12511_s2 + $0x170] ss:$8 sps:$4 sm:$0xff]   ;;  %v416_v20 = vld [vmem:[%s12514_s5] sm:$0xf] }
  0x27   : > { %996 = vmatprep.subr.bf16.mxu0 %v8391_v29  ;;  %1669 = vmatprep.subr.bf16.mxu1 %v8393_v30  ;;  %v8439_v21 = vld [vmem:[%s8727_s8 + $0xc0] sm:$0xff]   ;;  %v8896_v22 = vrot.slane %v416_v20, %v428_v18  ;;  %v8901_v24 = vrot.slane %v416_v20, %v12517_v19  ;;  %v8906_v28 = vrot.slane %v416_v20, %v12516_v23 }
  0x2a   : > { %997 = vmatpush1.bf16.msra.mxu0 %v8395_v31  ;;  %1670 = vmatpush1.bf16.msra.mxu1 %v8396_v32 }
  0x2b   : > { %3492 = vmatprep.subr.bf16.mxu0 %v8400_v33  ;;  %4165 = vmatprep.subr.bf16.mxu1 %v8468_v15 }
  0x2d   : > { %1015 = vmatmul.mubr.bf16.vlgmr.msra.gmra.mxu0 %v8397_v34  ;;  %1688 = vmatmul.mubr.bf16.vlgmr.msra.gmra.mxu1 %v8397_v34  ;;  %v8443_v34 = vld [vmem:[%s8727_s8 + $0xc8] sm:$0xff]  }
  0x2e   : > { %3493 = vmatpush1.bf16.msra.mxu0 %v8398_v35  ;;  %1024 = vmatprep.mubr.bf16.mxu0 %v12518_v2  ;;  %v8471_v35 = vld [vmem:[%s12511_s2 + $0xd0] ss:$8 sps:$4 sm:$0xff]  }
  0x2f   : > { %1697 = vmatprep.mubr.bf16.mxu1 %v12518_v2  ;;  %3494 = vmatprep.subr.bf16.mxu0 %v8407_v36  ;;  %v8473_v36 = vld [vmem:[%s12511_s2 + $0xd4] ss:$8 sps:$4 sm:$0xff]  }
  0x30   : > { %4166 = vmatpush1.bf16.msra.mxu1 %v8466_v16 }
  0x32   : > { %3495 = vmatpush1.bf16.msra.mxu0 %v8405_v37 }
  0x33   : > { %3496 = vmatprep.subr.bf16.mxu0 %v8414_v38 }
  0x35   : > { %1025 = vmatmul.mubr.bf16.gmra.mxu0 %v8401_v39  ;;  %1698 = vmatmul.mubr.bf16.gmra.mxu1 %v8401_v39 }
  0x36   : > { %1034 = vmatprep.mubr.bf16.mxu0 %v12518_v2  ;;  %1707 = vmatprep.mubr.bf16.mxu1 %v12518_v2 }
  0x37   : > { %3497 = vmatpush1.bf16.msra.mxu0 %v8412_v40 }
  0x38   : > { %3498 = vmatprep.subr.bf16.mxu0 %v8421_v41 }
  0x3b   : > { %3499 = vmatpush1.bf16.msra.mxu0 %v8419_v43 }
  0x3c   : > { %3500 = vmatprep.subr.bf16.mxu0 %v8428_v44 }
  0x3d   : > { %1035 = vmatmul.mubr.bf16.gmra.mxu0 %v8402_v42  ;;  %1708 = vmatmul.mubr.bf16.gmra.mxu1 %v8402_v42 }
  0x3e   : > { %1044 = vmatprep.mubr.bf16.mxu0 %v12518_v2  ;;  %1717 = vmatprep.mubr.bf16.mxu1 %v12518_v2 }
  0x3f   : > { %3501 = vmatpush1.bf16.msra.mxu0 %v8426_v45 }
  0x40   : > { %3502 = vmatprep.subr.bf16.mxu0 %v8435_v49 }
  0x43   : > { %3503 = vmatpush1.bf16.msra.mxu0 %v8433_v48 }
  0x44   : > { %3504 = vmatprep.subr.bf16.mxu0 %v8442_v56 }
  0x45   : > { %1045 = vmatmul.mubr.bf16.gmra.mxu0 %v8403_v46  ;;  %1718 = vmatmul.mubr.bf16.gmra.mxu1 %v8403_v46 }
  0x46   : > { %1054 = vmatprep.mubr.bf16.mxu0 %v12518_v2  ;;  %1727 = vmatprep.mubr.bf16.mxu1 %v12518_v2 }
  0x47   : > { %3505 = vmatpush1.bf16.msra.mxu0 %v8440_v55 }
  0x48   : > { %3506 = vmatprep.subr.bf16.mxu0 %v8449_v62 }
  0x4b   : > { %3507 = vmatpush1.bf16.msra.mxu0 %v8447_v61 }
  0x4c   : > { %3508 = vmatprep.subr.bf16.mxu0 %v8456_v5 }
  0x4d   : > { %1055 = vmatmul.mubr.bf16.gmra.mxu0 %v8404_v47  ;;  %1728 = vmatmul.mubr.bf16.gmra.mxu1 %v8404_v47 }
  0x4e   : > { %1064 = vmatprep.mubr.bf16.mxu0 %v12518_v2  ;;  %1737 = vmatprep.mubr.bf16.mxu1 %v12518_v2 }
  0x4f   : > { %3509 = vmatpush2.bf16.msra.mxu0 %v8454_v4 }
  0x50   : > { %3510 = vmatprep.subr.bf16.mxu0 %v8463_v11 }
  0x53   : > { %3511 = vmatpush2.bf16.msra.mxu0 %v8461_v10 }
  0x54   : > { %3512 = vmatprep.subr.bf16.mxu0 %v8473_v36  ;;  %v8476_v36 = vld [vmem:[%s12511_s2 + $0x160] ss:$8 sps:$4 sm:$0xff]  }
  0x55   : > { %1065 = vmatmul.mubr.bf16.gmra.mxu0 %v8408_v50  ;;  %1738 = vmatmul.mubr.bf16.gmra.mxu1 %v8408_v50 }
  0x56   : > { %1074 = vmatprep.mubr.bf16.mxu0 %v12518_v2  ;;  %1747 = vmatprep.mubr.bf16.mxu1 %v12518_v2 }
  0x57   : > { %3513 = vmatpush2.bf16.msra.mxu0 %v8471_v35 }
  0x5d   : > { %1075 = vmatmul.mubr.bf16.gmra.mxu0 %v8409_v51  ;;  %1748 = vmatmul.mubr.bf16.gmra.mxu1 %v8409_v51 }
  0x5e   : > { %1084 = vmatprep.mubr.bf16.mxu0 %v12518_v2  ;;  %1757 = vmatprep.mubr.bf16.mxu1 %v12518_v2 }
  0x65   : > { %1085 = vmatmul.mubr.bf16.gmra.mxu0 %v8410_v52  ;;  %1758 = vmatmul.mubr.bf16.gmra.mxu1 %v8410_v52 }
  0x66   : > { %1094 = vmatprep.mubr.bf16.mxu0 %v12518_v2  ;;  %1767 = vmatprep.mubr.bf16.mxu1 %v12518_v2 }
  0x6d   : > { %1095 = vmatmul.mubr.bf16.gmra.mxu0 %v8411_v53  ;;  %1768 = vmatmul.mubr.bf16.gmra.mxu1 %v8411_v53 }
  0x6e   : > { %1104 = vmatprep.mubr.bf16.mxu0 %v12518_v2  ;;  %1777 = vmatprep.mubr.bf16.mxu1 %v12518_v2 }
  0x75   : > { %1105 = vmatmul.mubr.bf16.gmra.mxu0 %v8415_v54  ;;  %1778 = vmatmul.mubr.bf16.gmra.mxu1 %v8415_v54 }
  0x76   : > { %1114 = vmatprep.mubr.bf16.mxu0 %v12518_v2  ;;  %1787 = vmatprep.mubr.bf16.mxu1 %v12518_v2 }
  0x7d   : > { %1115 = vmatmul.mubr.bf16.gmra.mxu0 %v8416_v57  ;;  %1788 = vmatmul.mubr.bf16.gmra.mxu1 %v8416_v57 }
  0x7e   : > { %1124 = vmatprep.mubr.bf16.mxu0 %v12518_v2  ;;  %1797 = vmatprep.mubr.bf16.mxu1 %v12518_v2 }
  0x85   : > { %1125 = vmatmul.mubr.bf16.gmra.mxu0 %v8417_v58  ;;  %1798 = vmatmul.mubr.bf16.gmra.mxu1 %v8417_v58 }
  0x86   : > { %1134 = vmatprep.mubr.bf16.mxu0 %v12518_v2  ;;  %1807 = vmatprep.mubr.bf16.mxu1 %v12518_v2 }
  0x8d   : > { %1135 = vmatmul.mubr.bf16.gmra.mxu0 %v8418_v59  ;;  %1808 = vmatmul.mubr.bf16.gmra.mxu1 %v8418_v59 }
  0x8e   : > { %1144 = vmatprep.mubr.bf16.mxu0 %v12518_v2  ;;  %1817 = vmatprep.mubr.bf16.mxu1 %v12518_v2 }
  0x95   : > { %1145 = vmatmul.mubr.bf16.gmra.mxu0 %v8422_v60  ;;  %1818 = vmatmul.mubr.bf16.gmra.mxu1 %v8422_v60  ;;  %v8444_v60 = vld [vmem:[%s8727_s8 + $0xd0] sm:$0xff]  }
  0x96   : > { %1154 = vmatprep.mubr.bf16.mxu0 %v12518_v2  ;;  %1827 = vmatprep.mubr.bf16.mxu1 %v12518_v2 }
  0x9d   : > { %1155 = vmatmul.mubr.bf16.gmra.mxu0 %v8423_v63  ;;  %1828 = vmatmul.mubr.bf16.gmra.mxu1 %v8423_v63 }
  0x9e   : > { %1164 = vmatprep.mubr.bf16.mxu0 %v12518_v2  ;;  %1837 = vmatprep.mubr.bf16.mxu1 %v12518_v2 }
  0xa5   : > { %1165 = vmatmul.mubr.bf16.gmra.mxu0 %v8424_v0  ;;  %1838 = vmatmul.mubr.bf16.gmra.mxu1 %v8424_v0 }
  0xa6   : > { %1174 = vmatprep.mubr.bf16.mxu0 %v12518_v2  ;;  %1847 = vmatprep.mubr.bf16.mxu1 %v12518_v2 }
  0xad   : > { %1175 = vmatmul.mubr.bf16.gmra.mxu0 %v8425_v1  ;;  %1848 = vmatmul.mubr.bf16.gmra.mxu1 %v8425_v1 }
  0xae   : > { %1184 = vmatprep.mubr.bf16.mxu0 %v12518_v2  ;;  %1857 = vmatprep.mubr.bf16.mxu1 %v12518_v2 }
  0xb5   : > { %1185 = vmatmul.mubr.bf16.gmra.mxu0 %v8429_v3  ;;  %1858 = vmatmul.mubr.bf16.gmra.mxu1 %v8429_v3 }
  0xb6   : > { %1194 = vmatprep.mubr.bf16.mxu0 %v12518_v2  ;;  %1867 = vmatprep.mubr.bf16.mxu1 %v12518_v2 }
  0xbd   : > { %1195 = vmatmul.mubr.bf16.gmra.mxu0 %v8430_v6  ;;  %1868 = vmatmul.mubr.bf16.gmra.mxu1 %v8430_v6 }
  0xbe   : > { %1204 = vmatprep.mubr.bf16.mxu0 %v12518_v2  ;;  %1877 = vmatprep.mubr.bf16.mxu1 %v12518_v2 }
  0xc5   : > { %1205 = vmatmul.mubr.bf16.gmra.mxu0 %v8431_v7  ;;  %1878 = vmatmul.mubr.bf16.gmra.mxu1 %v8431_v7 }
  0xc6   : > { %1214 = vmatprep.mubr.bf16.mxu0 %v12518_v2  ;;  %1887 = vmatprep.mubr.bf16.mxu1 %v12518_v2 }
  0xcd   : > { %1215 = vmatmul.mubr.bf16.gmra.mxu0 %v8432_v8  ;;  %1888 = vmatmul.mubr.bf16.gmra.mxu1 %v8432_v8 }
  0xce   : > { %1224 = vmatprep.mubr.bf16.mxu0 %v12518_v2  ;;  %1897 = vmatprep.mubr.bf16.mxu1 %v12518_v2 }
  0xd5   : > { %1225 = vmatmul.mubr.bf16.gmra.mxu0 %v8436_v9  ;;  %1898 = vmatmul.mubr.bf16.gmra.mxu1 %v8436_v9 }
  0xd6   : > { %1234 = vmatprep.mubr.bf16.mxu0 %v12518_v2  ;;  %1907 = vmatprep.mubr.bf16.mxu1 %v12518_v2 }
  0xdd   : > { %1235 = vmatmul.mubr.bf16.gmra.mxu0 %v8437_v12  ;;  %1908 = vmatmul.mubr.bf16.gmra.mxu1 %v8437_v12 }
  0xde   : > { %1244 = vmatprep.mubr.bf16.mxu0 %v12518_v2  ;;  %1917 = vmatprep.mubr.bf16.mxu1 %v12518_v2 }
  0xe5   : > { %1245 = vmatmul.mubr.bf16.gmra.mxu0 %v8438_v14  ;;  %1918 = vmatmul.mubr.bf16.gmra.mxu1 %v8438_v14 }
  0xe6   : > { %1254 = vmatprep.mubr.bf16.mxu0 %v12518_v2  ;;  %1927 = vmatprep.mubr.bf16.mxu1 %v12518_v2 }
  0xed   : > { %v1016_v25 = vpop.f32.mrf.mxu0  ;;  %1255 = vmatmul.mubr.bf16.gmra.mxu0 %v8439_v21  ;;  %v1689_v26 = vpop.f32.mrf.mxu1  ;;  %1928 = vmatmul.mubr.bf16.gmra.mxu1 %v8439_v21 }
  0xee   : > { %v1690_v27 = vadd.f32 %v1689_v26, %v8896_v22  ;;  %1264 = vmatprep.mubr.bf16.mxu0 %v12518_v2  ;;  %1937 = vmatprep.mubr.bf16.mxu1 %v12518_v2  ;;  %v1017_v31 = vadd.f32 %v1016_v25, %v8901_v24  ;;  %v8445_v26 = vld [vmem:[%s8727_s8 + $0xd8] sm:$0xff]  }
  0xef   : > { %v1018_v29 = vpop.f32.mrf.mxu0  ;;  %v8910_v30 = vpop.f32.mrf.mxu1 }
  0xf0   : > { %v2330_v37 = vmax.f32 %v1690_v27, 0.0  ;;  %v1019_v38 = vadd.f32 %v1018_v29, %v8906_v28  ;;  %v2328_v43 = vmax.f32 %v1017_v31, 0.0 }
  0xf1   : > { %v1020_v32 = vpop.f32.mrf.mxu0  ;;  %v1693_v33 = vpop.f32.mrf.mxu1 }
  0xf2   : > { %v1021_v39 = vadd.f32 %v1020_v32, %v8901_v24  ;;  %v1694_v40 = vadd.f32 %v1693_v33, %v8896_v22  ;;  %v2329_v49 = vmax.f32 %v1019_v38, 0.0  ;;  %v8478_v33 = vld [vmem:[%s12511_s2 + $0x164] ss:$8 sps:$4 sm:$0xff]  }
  0xf3   : > { %v1022_v41 = vpop.f32.mrf.mxu0  ;;  %v8923_v42 = vpop.f32.mrf.mxu1  ;;  %4167 = vmatprep.subr.bf16.mxu1 %v8478_v33  ;;  %v8481_v33 = vld [vmem:[%s12511_s2 + $0xc0] ss:$8 sps:$4 sm:$0xff]  }
  0xf4   : > { %v2332_v44 = vmax.f32 %v1021_v39, 0.0  ;;  %v2334_v45 = vmax.f32 %v1694_v40, 0.0  ;;  %v1023_v46 = vadd.f32 %v1022_v41, %v8906_v28  ;;  %4168 = vmatpush1.bf16.msra.mxu1 %v8476_v36 }
  0xf5   : > { %v1026_v47 = vpop.f32.mrf.mxu0  ;;  %1265 = vmatmul.mubr.bf16.gmra.mxu0 %v8443_v34  ;;  %v1699_v48 = vpop.f32.mrf.mxu1  ;;  %1938 = vmatmul.mubr.bf16.gmra.mxu1 %v8443_v34 }
  0xf6   : > { %v8926_v50 = vpack.c.bf16 %v2332_v44, %v2328_v43  ;;  %v8928_v51 = vpack.c.bf16 %v2334_v45, %v2330_v37  ;;  %v2333_v52 = vmax.f32 %v1023_v46, 0.0  ;;  %1274 = vmatprep.mubr.bf16.mxu0 %v12518_v2  ;;  %1947 = vmatprep.mubr.bf16.mxu1 %v12518_v2  ;;  %v1700_v53 = vadd.f32 %v1699_v48, %v8896_v22 }
  0xf7   : > { %v1028_v54 = vpop.f32.mrf.mxu0  ;;  %v8933_v55 = vpop.f32.mrf.mxu1  ;;  %v1027_v56 = vadd.f32 %v1026_v47, %v8901_v24 }
  0xf8   : > { %12523 = vst [vmem:[#allocation3_spill] sm:$0xff] %v8928_v51  ;;  %v8936_v57 = vpack.c.bf16 %v2333_v52, %v2329_v49  ;;  %v2338_v61 = vmax.f32 %v1700_v53, 0.0  ;;  %v1029_v62 = vadd.f32 %v1028_v54, %v8906_v28 }
  0xf9   : > { %v1030_v58 = vpop.f32.mrf.mxu0  ;;  %v1703_v59 = vpop.f32.mrf.mxu1  ;;  %v2336_v4 = vmax.f32 %v1027_v56, 0.0 }
  0xfa   : > { %v1031_v63 = vadd.f32 %v1030_v58, %v8901_v24  ;;  %v1704_v0 = vadd.f32 %v1703_v59, %v8896_v22  ;;  %v2337_v10 = vmax.f32 %v1029_v62, 0.0  ;;  %v8446_v59 = vld [vmem:[%s8727_s8 + $0xe0] sm:$0xff]  }
  0xfb   : > { %v1032_v1 = vpop.f32.mrf.mxu0  ;;  %v8942_v3 = vpop.f32.mrf.mxu1 }
  0xfc   : > { %v2340_v5 = vmax.f32 %v1031_v63, 0.0  ;;  %v2342_v6 = vmax.f32 %v1704_v0, 0.0  ;;  %v1033_v7 = vadd.f32 %v1032_v1, %v8906_v28 }
  0xfd   : > { %v1036_v8 = vpop.f32.mrf.mxu0  ;;  %1275 = vmatmul.mubr.bf16.gmra.mxu0 %v8444_v60  ;;  %v1709_v9 = vpop.f32.mrf.mxu1  ;;  %1948 = vmatmul.mubr.bf16.gmra.mxu1 %v8444_v60 }
  0xfe   : > { %v8945_v11 = vpack.c.bf16 %v2340_v5, %v2336_v4  ;;  %v8947_v12 = vpack.c.bf16 %v2342_v6, %v2338_v61  ;;  %v2341_v13 = vmax.f32 %v1033_v7, 0.0  ;;  %1284 = vmatprep.mubr.bf16.mxu0 %v12518_v2  ;;  %1957 = vmatprep.mubr.bf16.mxu1 %v12518_v2  ;;  %v1710_v14 = vadd.f32 %v1709_v9, %v8896_v22 }
  0xff   : > { %v1038_v15 = vpop.f32.mrf.mxu0  ;;  %v8952_v16 = vpop.f32.mrf.mxu1  ;;  %v1037_v18 = vadd.f32 %v1036_v8, %v8901_v24 }
 0x100   : > { %12524 = vst [vmem:[#allocation4_spill] sm:$0xff] %v8945_v11  ;;  %12525 = vst [vmem:[#allocation5_spill] sm:$0xff] %v8947_v12  ;;  %v8955_v20 = vpack.c.bf16 %v2341_v13, %v2337_v10  ;;  %v2346_v27 = vmax.f32 %v1710_v14, 0.0  ;;  %v1039_v29 = vadd.f32 %v1038_v15, %v8906_v28 }
 0x101   : > { %v1040_v21 = vpop.f32.mrf.mxu0  ;;  %v1713_v25 = vpop.f32.mrf.mxu1  ;;  %v2344_v37 = vmax.f32 %v1037_v18, 0.0 }
 0x102   : > { %12526 = vst [vmem:[#allocation6_spill] sm:$0xff] %v8955_v20  ;;  %v1041_v31 = vadd.f32 %v1040_v21, %v8901_v24  ;;  %v1714_v32 = vadd.f32 %v1713_v25, %v8896_v22  ;;  %v2345_v44 = vmax.f32 %v1039_v29, 0.0 }
 0x103   : > { %v1042_v34 = vpop.f32.mrf.mxu0  ;;  %v8964_v35 = vpop.f32.mrf.mxu1 }
 0x104   : > { %v2348_v38 = vmax.f32 %v1041_v31, 0.0  ;;  %v2350_v39 = vmax.f32 %v1714_v32, 0.0  ;;  %v1043_v40 = vadd.f32 %v1042_v34, %v8906_v28  ;;  %v8450_v32 = vld [vmem:[%s8727_s8 + $0xe8] sm:$0xff]  }
 0x105   : > { %v1046_v41 = vpop.f32.mrf.mxu0  ;;  %1285 = vmatmul.mubr.bf16.gmra.mxu0 %v8445_v26  ;;  %v1719_v43 = vpop.f32.mrf.mxu1  ;;  %1958 = vmatmul.mubr.bf16.gmra.mxu1 %v8445_v26  ;;  %v8483_v34 = vld [vmem:[%s12511_s2 + $0xc4] ss:$8 sps:$4 sm:$0xff]  }
 0x106   : > { %v8970_v45 = vpack.c.bf16 %v2348_v38, %v2344_v37  ;;  %v8972_v46 = vpack.c.bf16 %v2350_v39, %v2346_v27  ;;  %v2349_v47 = vmax.f32 %v1043_v40, 0.0  ;;  %1294 = vmatprep.mubr.bf16.mxu0 %v12518_v2  ;;  %1967 = vmatprep.mubr.bf16.mxu1 %v12518_v2  ;;  %v1720_v48 = vadd.f32 %v1719_v43, %v8896_v22 }
 0x107   : > { %v1048_v49 = vpop.f32.mrf.mxu0  ;;  %v8977_v52 = vpop.f32.mrf.mxu1  ;;  %v1047_v53 = vadd.f32 %v1046_v41, %v8901_v24  ;;  %3514 = vmatprep.subr.bf16.mxu0 %v8483_v34 }
 0x108   : > { %12527 = vst [vmem:[#allocation7_spill] sm:$0xff] %v8970_v45  ;;  %12528 = vst [vmem:[#allocation8_spill] sm:$0xff] %v8972_v46  ;;  %v8980_v54 = vpack.c.bf16 %v2349_v47, %v2345_v44  ;;  %v2354_v60 = vmax.f32 %v1720_v48, 0.0  ;;  %v1049_v61 = vadd.f32 %v1048_v49, %v8906_v28  ;;  %3515 = vmatpush2.bf16.msra.mxu0 %v8481_v33 }
 0x109   : > { %v1050_v56 = vpop.f32.mrf.mxu0  ;;  %v1723_v58 = vpop.f32.mrf.mxu1  ;;  %v2352_v4 = vmax.f32 %v1047_v53, 0.0 }
 0x10a   : > { %12529 = vst [vmem:[#allocation9_spill] sm:$0xff] %v8980_v54  ;;  %v1051_v62 = vadd.f32 %v1050_v56, %v8901_v24  ;;  %v1724_v63 = vadd.f32 %v1723_v58, %v8896_v22  ;;  %v2353_v10 = vmax.f32 %v1049_v61, 0.0 }
 0x10b   : > { %v1052_v0 = vpop.f32.mrf.mxu0  ;;  %v8986_v1 = vpop.f32.mrf.mxu1 }
 0x10c   : > { %v2356_v5 = vmax.f32 %v1051_v62, 0.0  ;;  %v2358_v6 = vmax.f32 %v1724_v63, 0.0  ;;  %v1053_v7 = vadd.f32 %v1052_v0, %v8906_v28 }
 0x10d   : > { %v1056_v8 = vpop.f32.mrf.mxu0  ;;  %1295 = vmatmul.mubr.bf16.gmra.mxu0 %v8446_v59  ;;  %v1729_v9 = vpop.f32.mrf.mxu1  ;;  %1968 = vmatmul.mubr.bf16.gmra.mxu1 %v8446_v59 }
 0x10e   : > { %v8989_v13 = vpack.c.bf16 %v2356_v5, %v2352_v4  ;;  %v8991_v14 = vpack.c.bf16 %v2358_v6, %v2354_v60  ;;  %v2357_v15 = vmax.f32 %v1053_v7, 0.0  ;;  %1304 = vmatprep.mubr.bf16.mxu0 %v12518_v2  ;;  %1977 = vmatprep.mubr.bf16.mxu1 %v12518_v2  ;;  %v1730_v18 = vadd.f32 %v1729_v9, %v8896_v22  ;;  %v8451_v7 = vld [vmem:[%s8727_s8 + $0xf0] sm:$0xff]  }
 0x10f   : > { %v1058_v21 = vpop.f32.mrf.mxu0  ;;  %v8996_v25 = vpop.f32.mrf.mxu1  ;;  %v1057_v26 = vadd.f32 %v1056_v8, %v8901_v24 }
 0x110   : > { %12530 = vst [vmem:[#allocation10_spill] sm:$0xff] %v8989_v13  ;;  %12531 = vst [vmem:[#allocation11_spill] sm:$0xff] %v8991_v14  ;;  %v8999_v27 = vpack.c.bf16 %v2357_v15, %v2353_v10  ;;  %v2362_v36 = vmax.f32 %v1730_v18, 0.0  ;;  %v1059_v37 = vadd.f32 %v1058_v21, %v8906_v28 }
 0x111   : > { %v1060_v29 = vpop.f32.mrf.mxu0  ;;  %v1733_v31 = vpop.f32.mrf.mxu1  ;;  %v2360_v43 = vmax.f32 %v1057_v26, 0.0 }
 0x112   : > { %12532 = vst [vmem:[#allocation12_spill] sm:$0xff] %v8999_v27  ;;  %v1061_v38 = vadd.f32 %v1060_v29, %v8901_v24  ;;  %v1734_v39 = vadd.f32 %v1733_v31, %v8896_v22  ;;  %v2361_v56 = vmax.f32 %v1059_v37, 0.0 }
 0x113   : > { %v1062_v40 = vpop.f32.mrf.mxu0  ;;  %v9011_v41 = vpop.f32.mrf.mxu1 }
 0x114   : > { %v2364_v44 = vmax.f32 %v1061_v38, 0.0  ;;  %v2366_v47 = vmax.f32 %v1734_v39, 0.0  ;;  %v1063_v48 = vadd.f32 %v1062_v40, %v8906_v28 }
 0x115   : > { %v1066_v49 = vpop.f32.mrf.mxu0  ;;  %1305 = vmatmul.mubr.bf16.gmra.mxu0 %v8450_v32  ;;  %v1739_v53 = vpop.f32.mrf.mxu1  ;;  %1978 = vmatmul.mubr.bf16.gmra.mxu1 %v8450_v32 }
 0x116   : > { %v9014_v58 = vpack.c.bf16 %v2364_v44, %v2360_v43  ;;  %v9016_v59 = vpack.c.bf16 %v2366_v47, %v2362_v36  ;;  %v2365_v60 = vmax.f32 %v1063_v48, 0.0  ;;  %1314 = vmatprep.mubr.bf16.mxu0 %v12518_v2  ;;  %1987 = vmatprep.mubr.bf16.mxu1 %v12518_v2  ;;  %v1740_v61 = vadd.f32 %v1739_v53, %v8896_v22 }
 0x117   : > { %v1068_v62 = vpop.f32.mrf.mxu0  ;;  %v9021_v63 = vpop.f32.mrf.mxu1  ;;  %v1067_v0 = vadd.f32 %v1066_v49, %v8901_v24 }
 0x118   : > { %12533 = vst [vmem:[#allocation13_spill] sm:$0xff] %v9014_v58  ;;  %12534 = vst [vmem:[#allocation14_spill] sm:$0xff] %v9016_v59  ;;  %v9024_v4 = vpack.c.bf16 %v2365_v60, %v2361_v56  ;;  %v2370_v8 = vmax.f32 %v1740_v61, 0.0  ;;  %v1069_v9 = vadd.f32 %v1068_v62, %v8906_v28  ;;  %v8452_v56 = vld [vmem:[%s8727_s8 + $0xf8] sm:$0xff]  }
 0x119   : > { %v1070_v5 = vpop.f32.mrf.mxu0  ;;  %v1743_v6 = vpop.f32.mrf.mxu1  ;;  %v2368_v26 = vmax.f32 %v1067_v0, 0.0 }
 0x11a   : > { %12535 = vst [vmem:[#allocation15_spill] sm:$0xff] %v9024_v4  ;;  %v1071_v10 = vadd.f32 %v1070_v5, %v8901_v24  ;;  %v1744_v15 = vadd.f32 %v1743_v6, %v8896_v22  ;;  %v2369_v36 = vmax.f32 %v1069_v9, 0.0  ;;  %v8488_v5 = vld [vmem:[%s12511_s2 + $0x154] ss:$8 sps:$4 sm:$0xff]  }
 0x11b   : > { %v1072_v18 = vpop.f32.mrf.mxu0  ;;  %v9030_v21 = vpop.f32.mrf.mxu1  ;;  %4169 = vmatprep.subr.bf16.mxu1 %v8488_v5 }
 0x11c   : > { %v2372_v29 = vmax.f32 %v1071_v10, 0.0  ;;  %v2374_v31 = vmax.f32 %v1744_v15, 0.0  ;;  %v1073_v32 = vadd.f32 %v1072_v18, %v8906_v28 }
 0x11d   : > { %v1076_v33 = vpop.f32.mrf.mxu0  ;;  %1315 = vmatmul.mubr.bf16.gmra.mxu0 %v8451_v7  ;;  %v1749_v34 = vpop.f32.mrf.mxu1  ;;  %1988 = vmatmul.mubr.bf16.gmra.mxu1 %v8451_v7 }
 0x11e   : > { %v9033_v37 = vpack.c.bf16 %v2372_v29, %v2368_v26  ;;  %v9035_v38 = vpack.c.bf16 %v2374_v31, %v2370_v8  ;;  %v2373_v39 = vmax.f32 %v1073_v32, 0.0  ;;  %1324 = vmatprep.mubr.bf16.mxu0 %v12518_v2  ;;  %1997 = vmatprep.mubr.bf16.mxu1 %v12518_v2  ;;  %v1750_v40 = vadd.f32 %v1749_v34, %v8896_v22  ;;  %v8486_v8 = vld [vmem:[%s12511_s2 + $0x150] ss:$8 sps:$4 sm:$0xff]  }
 0x11f   : > { %v1078_v43 = vpop.f32.mrf.mxu0  ;;  %v9040_v44 = vpop.f32.mrf.mxu1  ;;  %v1077_v47 = vadd.f32 %v1076_v33, %v8901_v24  ;;  %4170 = vmatpush1.bf16.msra.mxu1 %v8486_v8 }
 0x120   : > { %12536 = vst [vmem:[#allocation16_spill] sm:$0xff] %v9033_v37  ;;  %12537 = vst [vmem:[#allocation17_spill] sm:$0xff] %v9035_v38  ;;  %v9043_v48 = vpack.c.bf16 %v2373_v39, %v2369_v36  ;;  %v2378_v60 = vmax.f32 %v1750_v40, 0.0  ;;  %v1079_v61 = vadd.f32 %v1078_v43, %v8906_v28 }
 0x121   : > { %v1080_v49 = vpop.f32.mrf.mxu0  ;;  %v1753_v53 = vpop.f32.mrf.mxu1  ;;  %v2376_v9 = vmax.f32 %v1077_v47, 0.0 }
 0x122   : > { %12538 = vst [vmem:[#allocation18_spill] sm:$0xff] %v9043_v48  ;;  %v1081_v62 = vadd.f32 %v1080_v49, %v8901_v24  ;;  %v1754_v0 = vadd.f32 %v1753_v53, %v8896_v22  ;;  %v2377_v31 = vmax.f32 %v1079_v61, 0.0 }
 0x123   : > { %v1082_v6 = vpop.f32.mrf.mxu0  ;;  %v9052_v7 = vpop.f32.mrf.mxu1 }
 0x124   : > { %v2380_v10 = vmax.f32 %v1081_v62, 0.0  ;;  %v2382_v15 = vmax.f32 %v1754_v0, 0.0  ;;  %v1083_v18 = vadd.f32 %v1082_v6, %v8906_v28 }
 0x125   : > { %v1086_v26 = vpop.f32.mrf.mxu0  ;;  %1325 = vmatmul.mubr.bf16.gmra.mxu0 %v8452_v56  ;;  %v1759_v29 = vpop.f32.mrf.mxu1  ;;  %1998 = vmatmul.mubr.bf16.gmra.mxu1 %v8452_v56  ;;  %v8453_v56 = vld [vmem:[%s8727_s8 + $0x100] sm:$0xff]  }
 0x126   : > { %v9058_v32 = vpack.c.bf16 %v2380_v10, %v2376_v9  ;;  %v9060_v33 = vpack.c.bf16 %v2382_v15, %v2378_v60  ;;  %v2381_v34 = vmax.f32 %v1083_v18, 0.0  ;;  %1334 = vmatprep.mubr.bf16.mxu0 %v12518_v2  ;;  %2007 = vmatprep.mubr.bf16.mxu1 %v12518_v2  ;;  %v1760_v36 = vadd.f32 %v1759_v29, %v8896_v22 }
 0x127   : > { %v1088_v39 = vpop.f32.mrf.mxu0  ;;  %v9065_v40 = vpop.f32.mrf.mxu1  ;;  %v1087_v43 = vadd.f32 %v1086_v26, %v8901_v24 }
 0x128   : > { %12539 = vst [vmem:[#allocation19_spill] sm:$0xff] %v9058_v32  ;;  %12540 = vst [vmem:[#allocation20_spill] sm:$0xff] %v9060_v33  ;;  %v9068_v47 = vpack.c.bf16 %v2381_v34, %v2377_v31  ;;  %v2386_v60 = vmax.f32 %v1760_v36, 0.0  ;;  %v1089_v61 = vadd.f32 %v1088_v39, %v8906_v28 }
 0x129   : > { %v1090_v49 = vpop.f32.mrf.mxu0  ;;  %v1763_v53 = vpop.f32.mrf.mxu1  ;;  %v2384_v9 = vmax.f32 %v1087_v43, 0.0 }
 0x12a   : > { %12541 = vst [vmem:[#allocation21_spill] sm:$0xff] %v9068_v47  ;;  %v1091_v62 = vadd.f32 %v1090_v49, %v8901_v24  ;;  %v1764_v0 = vadd.f32 %v1763_v53, %v8896_v22  ;;  %v2385_v29 = vmax.f32 %v1089_v61, 0.0 }
 0x12b   : > { %v1092_v5 = vpop.f32.mrf.mxu0  ;;  %v9074_v6 = vpop.f32.mrf.mxu1 }
 0x12c   : > { %v2388_v10 = vmax.f32 %v1091_v62, 0.0  ;;  %v2390_v8 = vmax.f32 %v1764_v0, 0.0  ;;  %v1093_v15 = vadd.f32 %v1092_v5, %v8906_v28  ;;  %v8457_v0 = vld [vmem:[%s8727_s8 + $0x108] sm:$0xff]   ;;  %v8493_v5 = vld [vmem:[%s12511_s2 + $0xb4] ss:$8 sps:$4 sm:$0xff]  }
 0x12d   : > { %v1096_v18 = vpop.f32.mrf.mxu0  ;;  %1335 = vmatmul.mubr.bf16.gmra.mxu0 %v8453_v56  ;;  %v1769_v26 = vpop.f32.mrf.mxu1  ;;  %2008 = vmatmul.mubr.bf16.gmra.mxu1 %v8453_v56 }
 0x12e   : > { %v9077_v31 = vpack.c.bf16 %v2388_v10, %v2384_v9  ;;  %v9079_v34 = vpack.c.bf16 %v2390_v8, %v2386_v60  ;;  %v2389_v36 = vmax.f32 %v1093_v15, 0.0  ;;  %1344 = vmatprep.mubr.bf16.mxu0 %v12518_v2  ;;  %2017 = vmatprep.mubr.bf16.mxu1 %v12518_v2  ;;  %v1770_v39 = vadd.f32 %v1769_v26, %v8896_v22  ;;  %v8491_v60 = vld [vmem:[%s12511_s2 + $0xb0] ss:$8 sps:$4 sm:$0xff]  }
 0x12f   : > { %v1098_v43 = vpop.f32.mrf.mxu0  ;;  %v9084_v49 = vpop.f32.mrf.mxu1  ;;  %v1097_v53 = vadd.f32 %v1096_v18, %v8901_v24  ;;  %3516 = vmatprep.subr.bf16.mxu0 %v8493_v5 }
 0x130   : > { %12542 = vst [vmem:[#allocation22_spill] sm:$0xff] %v9077_v31  ;;  %12543 = vst [vmem:[#allocation23_spill] sm:$0xff] %v9079_v34  ;;  %v9087_v62 = vpack.c.bf16 %v2389_v36, %v2385_v29  ;;  %v2394_v9 = vmax.f32 %v1770_v39, 0.0  ;;  %v1099_v10 = vadd.f32 %v1098_v43, %v8906_v28  ;;  %3517 = vmatpush2.bf16.msra.mxu0 %v8491_v60  ;;  %v12547_v31 = vmov 0  }
 0x131   : > { %v1100_v56 = vpop.f32.mrf.mxu0  ;;  %v1773_v61 = vpop.f32.mrf.mxu1  ;;  %v2392_v29 = vmax.f32 %v1097_v53, 0.0 }
 0x132   : > { %12544 = vst [vmem:[#allocation24_spill] sm:$0xff] %v9087_v62  ;;  %v1101_v8 = vadd.f32 %v1100_v56, %v8901_v24  ;;  %v1774_v15 = vadd.f32 %v1773_v61, %v8896_v22  ;;  %v2393_v43 = vmax.f32 %v1099_v10, 0.0 }
 0x133   : > { %v1102_v18 = vpop.f32.mrf.mxu0  ;;  %v9099_v26 = vpop.f32.mrf.mxu1 }
 0x134   : > { %v2396_v36 = vmax.f32 %v1101_v8, 0.0  ;;  %v2398_v23 = vmax.f32 %v1774_v15, 0.0  ;;  %v1103_v19 = vadd.f32 %v1102_v18, %v8906_v28  ;;  %v8458_v18 = vld [vmem:[%s8727_s8 + $0x110] sm:$0xff]  }
 0x135   : > { %v1106_v2 = vpop.f32.mrf.mxu0  ;;  %1345 = vmatmul.mubr.bf16.gmra.mxu0 %v8457_v0  ;;  %v1779_v39 = vpop.f32.mrf.mxu1  ;;  %2018 = vmatmul.mubr.bf16.gmra.mxu1 %v8457_v0 }
 0x136   : > { %v9102_v34 = vpack.c.bf16 %v2396_v36, %v2392_v29  ;;  %v9104_v56 = vpack.c.bf16 %v2398_v23, %v2394_v9  ;;  %v2397_v61 = vmax.f32 %v1103_v19, 0.0  ;;  %1354 = vmatprep.mubr.bf16.mxu0 %v12547_v31  ;;  %2027 = vmatprep.mubr.bf16.mxu1 %v12547_v31  ;;  %v1780_v53 = vadd.f32 %v1779_v39, %v8896_v22 }
 0x137   : > { %v1108_v5 = vpop.f32.mrf.mxu0  ;;  %v9109_v8 = vpop.f32.mrf.mxu1  ;;  %v1107_v60 = vadd.f32 %v1106_v2, %v8901_v24 }
 0x138   : > { %12545 = vst [vmem:[#allocation25_spill] sm:$0xff] %v9102_v34  ;;  %12546 = vst [vmem:[#allocation26_spill] sm:$0xff] %v9104_v56  ;;  %v9112_v15 = vpack.c.bf16 %v2397_v61, %v2393_v43  ;;  %v2402_v29 = vmax.f32 %v1780_v53, 0.0  ;;  %v1109_v23 = vadd.f32 %v1108_v5, %v8906_v28 }
 0x139   : > { %v1110_v0 = vpop.f32.mrf.mxu0  ;;  %v1783_v10 = vpop.f32.mrf.mxu1  ;;  %v2400_v39 = vmax.f32 %v1107_v60, 0.0 }
 0x13a   : > { %12548 = vst [vmem:[#allocation27_spill] sm:$0xff] %v9112_v15  ;;  %v1111_v19 = vadd.f32 %v1110_v0, %v8901_v24  ;;  %v1784_v9 = vadd.f32 %v1783_v10, %v8896_v22  ;;  %v2401_v53 = vmax.f32 %v1109_v23, 0.0 }
 0x13b   : > { %v1112_v36 = vpop.f32.mrf.mxu0  ;;  %v9118_v56 = vpop.f32.mrf.mxu1 }
 0x13c   : > { %v2404_v34 = vmax.f32 %v1111_v19, 0.0  ;;  %v2406_v62 = vmax.f32 %v1784_v9, 0.0  ;;  %v1113_v2 = vadd.f32 %v1112_v36, %v8906_v28 }
 0x13d   : > { %v1116_v43 = vpop.f32.mrf.mxu0  ;;  %1355 = vmatmul.mubr.bf16.gmra.mxu0 %v8458_v18  ;;  %v1789_v61 = vpop.f32.mrf.mxu1  ;;  %2028 = vmatmul.mubr.bf16.gmra.mxu1 %v8458_v18 }
 0x13e   : > { %v9121_v15 = vpack.c.bf16 %v2404_v34, %v2400_v39  ;;  %v9123_v5 = vpack.c.bf16 %v2406_v62, %v2402_v29  ;;  %v2405_v0 = vmax.f32 %v1113_v2, 0.0  ;;  %1364 = vmatprep.mubr.bf16.mxu0 %v12547_v31  ;;  %2037 = vmatprep.mubr.bf16.mxu1 %v12547_v31  ;;  %v1790_v60 = vadd.f32 %v1789_v61, %v8896_v22  ;;  %v8459_v34 = vld [vmem:[%s8727_s8 + $0x118] sm:$0xff]   ;;  %v8498_v61 = vld [vmem:[%s12511_s2 + $0x144] ss:$8 sps:$4 sm:$0xff]  }
 0x13f   : > { %v1118_v10 = vpop.f32.mrf.mxu0  ;;  %v9128_v19 = vpop.f32.mrf.mxu1  ;;  %v1117_v9 = vadd.f32 %v1116_v43, %v8901_v24  ;;  %v8496_v43 = vld [vmem:[%s12511_s2 + $0x140] ss:$8 sps:$4 sm:$0xff]   ;;  %4171 = vmatprep.subr.bf16.mxu1 %v8498_v61 }
 0x140   : > { %12549 = vst [vmem:[#allocation28_spill] sm:$0xff] %v9121_v15  ;;  %12550 = vst [vmem:[#allocation29_spill] sm:$0xff] %v9123_v5  ;;  %v9131_v36 = vpack.c.bf16 %v2405_v0, %v2401_v53  ;;  %v2410_v39 = vmax.f32 %v1790_v60, 0.0  ;;  %v1119_v62 = vadd.f32 %v1118_v10, %v8906_v28  ;;  %4172 = vmatpush1.bf16.msra.mxu1 %v8496_v43 }
 0x141   : > { %v1120_v18 = vpop.f32.mrf.mxu0  ;;  %v1793_v23 = vpop.f32.mrf.mxu1  ;;  %v2408_v53 = vmax.f32 %v1117_v9, 0.0 }
 0x142   : > { %12551 = vst [vmem:[#allocation30_spill] sm:$0xff] %v9131_v36  ;;  %v1121_v29 = vadd.f32 %v1120_v18, %v8901_v24  ;;  %v1794_v2 = vadd.f32 %v1793_v23, %v8896_v22  ;;  %v2409_v36 = vmax.f32 %v1119_v62, 0.0 }
 0x143   : > { %v1122_v5 = vpop.f32.mrf.mxu0  ;;  %v9140_v15 = vpop.f32.mrf.mxu1 }
 0x144   : > { %v2412_v0 = vmax.f32 %v1121_v29, 0.0  ;;  %v2414_v60 = vmax.f32 %v1794_v2, 0.0  ;;  %v1123_v10 = vadd.f32 %v1122_v5, %v8906_v28 }
 0x145   : > { %v1126_v18 = vpop.f32.mrf.mxu0  ;;  %1365 = vmatmul.mubr.bf16.gmra.mxu0 %v8459_v34  ;;  %v1799_v23 = vpop.f32.mrf.mxu1  ;;  %2038 = vmatmul.mubr.bf16.gmra.mxu1 %v8459_v34 }
 0x146   : > { %v9146_v33 = vpack.c.bf16 %v2412_v0, %v2408_v53  ;;  %v9148_v32 = vpack.c.bf16 %v2414_v60, %v2410_v39  ;;  %v2413_v47 = vmax.f32 %v1123_v10, 0.0  ;;  %1374 = vmatprep.mubr.bf16.mxu0 %v12547_v31  ;;  %2047 = vmatprep.mubr.bf16.mxu1 %v12547_v31  ;;  %v1800_v9 = vadd.f32 %v1799_v23, %v8896_v22  ;;  %v8460_v53 = vld [vmem:[%s8727_s8 + $0x120] sm:$0xff]  }
 0x147   : > { %v1128_v29 = vpop.f32.mrf.mxu0  ;;  %v9153_v5 = vpop.f32.mrf.mxu1  ;;  %v1127_v2 = vadd.f32 %v1126_v18, %v8901_v24 }
 0x148   : > { %12552 = vst [vmem:[#allocation31_spill] sm:$0xff] %v9146_v33  ;;  %12553 = vst [vmem:[#allocation32_spill] sm:$0xff] %v9148_v32  ;;  %v9156_v61 = vpack.c.bf16 %v2413_v47, %v2409_v36  ;;  %v2418_v39 = vmax.f32 %v1800_v9, 0.0  ;;  %v1129_v0 = vadd.f32 %v1128_v29, %v8906_v28 }
 0x149   : > { %v1130_v34 = vpop.f32.mrf.mxu0  ;;  %v1803_v62 = vpop.f32.mrf.mxu1  ;;  %v2416_v33 = vmax.f32 %v1127_v2, 0.0 }
 0x14a   : > { %12554 = vst [vmem:[#allocation33_spill] sm:$0xff] %v9156_v61  ;;  %v1131_v60 = vadd.f32 %v1130_v34, %v8901_v24  ;;  %v1804_v10 = vadd.f32 %v1803_v62, %v8896_v22  ;;  %v2417_v9 = vmax.f32 %v1129_v0, 0.0 }
 0x14b   : > { %v1132_v32 = vpop.f32.mrf.mxu0  ;;  %v9162_v23 = vpop.f32.mrf.mxu1 }
 0x14c   : > { %v2420_v38 = vmax.f32 %v1131_v60, 0.0  ;;  %v2422_v43 = vmax.f32 %v1804_v10, 0.0  ;;  %v1133_v18 = vadd.f32 %v1132_v32, %v8906_v28 }
 0x14d   : > { %v1136_v47 = vpop.f32.mrf.mxu0  ;;  %1375 = vmatmul.mubr.bf16.gmra.mxu0 %v8460_v53  ;;  %v1809_v36 = vpop.f32.mrf.mxu1  ;;  %2048 = vmatmul.mubr.bf16.gmra.mxu1 %v8460_v53 }
 0x14e   : > { %v9165_v61 = vpack.c.bf16 %v2420_v38, %v2416_v33  ;;  %v9167_v29 = vpack.c.bf16 %v2422_v43, %v2418_v39  ;;  %v2421_v34 = vmax.f32 %v1133_v18, 0.0  ;;  %1384 = vmatprep.mubr.bf16.mxu0 %v12547_v31  ;;  %2057 = vmatprep.mubr.bf16.mxu1 %v12547_v31  ;;  %v1810_v2 = vadd.f32 %v1809_v36, %v8896_v22  ;;  %v8464_v38 = vld [vmem:[%s8727_s8 + $0x128] sm:$0xff]  }
 0x14f   : > { %v1138_v62 = vpop.f32.mrf.mxu0  ;;  %v9172_v60 = vpop.f32.mrf.mxu1  ;;  %v1137_v32 = vadd.f32 %v1136_v47, %v8901_v24  ;;  %v8501_v33 = vld [vmem:[%s12511_s2 + $0xa0] ss:$8 sps:$4 sm:$0xff]   ;;  %v8503_v39 = vld [vmem:[%s12511_s2 + $0xa4] ss:$8 sps:$4 sm:$0xff]  }
 0x150   : > { %12555 = vst [vmem:[#allocation34_spill] sm:$0xff] %v9165_v61  ;;  %12556 = vst [vmem:[#allocation35_spill] sm:$0xff] %v9167_v29  ;;  %v9175_v10 = vpack.c.bf16 %v2421_v34, %v2417_v9  ;;  %v2426_v43 = vmax.f32 %v1810_v2, 0.0  ;;  %v1139_v18 = vadd.f32 %v1138_v62, %v8906_v28  ;;  %3518 = vmatprep.subr.bf16.mxu0 %v8503_v39 }
 0x151   : > { %v1140_v53 = vpop.f32.mrf.mxu0  ;;  %v1813_v0 = vpop.f32.mrf.mxu1  ;;  %v2424_v29 = vmax.f32 %v1137_v32, 0.0  ;;  %3519 = vmatpush2.bf16.msra.mxu0 %v8501_v33 }
 0x152   : > { %12557 = vst [vmem:[#allocation36_spill] sm:$0xff] %v9175_v10  ;;  %v1141_v36 = vadd.f32 %v1140_v53, %v8901_v24  ;;  %v1814_v47 = vadd.f32 %v1813_v0, %v8896_v22  ;;  %v2425_v62 = vmax.f32 %v1139_v18, 0.0 }
 0x153   : > { %v1142_v9 = vpop.f32.mrf.mxu0  ;;  %v9187_v34 = vpop.f32.mrf.mxu1 }
 0x154   : > { %v2428_v61 = vmax.f32 %v1141_v36, 0.0  ;;  %v2430_v10 = vmax.f32 %v1814_v47, 0.0  ;;  %v1143_v37 = vadd.f32 %v1142_v9, %v8906_v28 }
 0x155   : > { %v1146_v48 = vpop.f32.mrf.mxu0  ;;  %1385 = vmatmul.mubr.bf16.gmra.mxu0 %v8464_v38  ;;  %v1819_v2 = vpop.f32.mrf.mxu1  ;;  %2058 = vmatmul.mubr.bf16.gmra.mxu1 %v8464_v38 }
 0x156   : > { %v9190_v59 = vpack.c.bf16 %v2428_v61, %v2424_v29  ;;  %v9192_v53 = vpack.c.bf16 %v2430_v10, %v2426_v43  ;;  %v2429_v0 = vmax.f32 %v1143_v37, 0.0  ;;  %1394 = vmatprep.mubr.bf16.mxu0 %v12547_v31  ;;  %2067 = vmatprep.mubr.bf16.mxu1 %v12547_v31  ;;  %v1820_v32 = vadd.f32 %v1819_v2, %v8896_v22  ;;  %v8465_v61 = vld [vmem:[%s8727_s8 + $0x130] sm:$0xff]  }
 0x157   : > { %v1148_v39 = vpop.f32.mrf.mxu0  ;;  %v9197_v36 = vpop.f32.mrf.mxu1  ;;  %v1147_v33 = vadd.f32 %v1146_v48, %v8901_v24 }
 0x158   : > { %12558 = vst [vmem:[#allocation37_spill] sm:$0xff] %v9190_v59  ;;  %12559 = vst [vmem:[#allocation38_spill] sm:$0xff] %v9192_v53  ;;  %v9200_v47 = vpack.c.bf16 %v2429_v0, %v2425_v62  ;;  %v2434_v29 = vmax.f32 %v1820_v32, 0.0  ;;  %v1149_v10 = vadd.f32 %v1148_v39, %v8906_v28 }
 0x159   : > { %v1150_v38 = vpop.f32.mrf.mxu0  ;;  %v1823_v18 = vpop.f32.mrf.mxu1  ;;  %v2432_v2 = vmax.f32 %v1147_v33, 0.0 }
 0x15a   : > { %12560 = vst [vmem:[#allocation39_spill] sm:$0xff] %v9200_v47  ;;  %v1151_v37 = vadd.f32 %v1150_v38, %v8901_v24  ;;  %v1824_v43 = vadd.f32 %v1823_v18, %v8896_v22  ;;  %v2433_v32 = vmax.f32 %v1149_v10, 0.0 }
 0x15b   : > { %v1152_v9 = vpop.f32.mrf.mxu0  ;;  %v9206_v53 = vpop.f32.mrf.mxu1 }
 0x15c   : > { %v2436_v59 = vmax.f32 %v1151_v37, 0.0  ;;  %v2438_v58 = vmax.f32 %v1824_v43, 0.0  ;;  %v1153_v48 = vadd.f32 %v1152_v9, %v8906_v28 }
 0x15d   : > { %v1156_v62 = vpop.f32.mrf.mxu0  ;;  %1395 = vmatmul.mubr.bf16.gmra.mxu0 %v8465_v61  ;;  %v1829_v0 = vpop.f32.mrf.mxu1  ;;  %2068 = vmatmul.mubr.bf16.gmra.mxu1 %v8465_v61 }
 0x15e   : > { %v9209_v47 = vpack.c.bf16 %v2436_v59, %v2432_v2  ;;  %v9211_v39 = vpack.c.bf16 %v2438_v58, %v2434_v29  ;;  %v2437_v38 = vmax.f32 %v1153_v48, 0.0  ;;  %1404 = vmatprep.mubr.bf16.mxu0 %v12547_v31  ;;  %2077 = vmatprep.mubr.bf16.mxu1 %v12547_v31  ;;  %v1830_v33 = vadd.f32 %v1829_v0, %v8896_v22  ;;  %v8469_v59 = vld [vmem:[%s8727_s8 + $0x138] sm:$0xff]  }
 0x15f   : > { %v1158_v18 = vpop.f32.mrf.mxu0  ;;  %v9216_v37 = vpop.f32.mrf.mxu1  ;;  %v1157_v43 = vadd.f32 %v1156_v62, %v8901_v24  ;;  %v8508_v0 = vld [vmem:[%s12511_s2 + $0x134] ss:$8 sps:$4 sm:$0xff]   ;;  %v8506_v62 = vld [vmem:[%s12511_s2 + $0x130] ss:$8 sps:$4 sm:$0xff]  }
 0x160   : > { %12561 = vst [vmem:[#allocation40_spill] sm:$0xff] %v9209_v47  ;;  %12562 = vst [vmem:[#allocation41_spill] sm:$0xff] %v9211_v39  ;;  %v9219_v9 = vpack.c.bf16 %v2437_v38, %v2433_v32  ;;  %v2442_v2 = vmax.f32 %v1830_v33, 0.0  ;;  %v1159_v58 = vadd.f32 %v1158_v18, %v8906_v28  ;;  %4173 = vmatprep.subr.bf16.mxu1 %v8508_v0 }
 0x161   : > { %v1160_v61 = vpop.f32.mrf.mxu0  ;;  %v1833_v10 = vpop.f32.mrf.mxu1  ;;  %v2440_v32 = vmax.f32 %v1157_v43, 0.0  ;;  %4174 = vmatpush1.bf16.msra.mxu1 %v8506_v62 }
 0x162   : > { %12563 = vst [vmem:[#allocation42_spill] sm:$0xff] %v9219_v9  ;;  %v1161_v29 = vadd.f32 %v1160_v61, %v8901_v24  ;;  %v1834_v48 = vadd.f32 %v1833_v10, %v8896_v22  ;;  %v2441_v9 = vmax.f32 %v1159_v58, 0.0 }
 0x163   : > { %v1162_v39 = vpop.f32.mrf.mxu0  ;;  %v9228_v47 = vpop.f32.mrf.mxu1 }
 0x164   : > { %v2444_v38 = vmax.f32 %v1161_v29, 0.0  ;;  %v2446_v33 = vmax.f32 %v1834_v48, 0.0  ;;  %v1163_v18 = vadd.f32 %v1162_v39, %v8906_v28 }
 0x165   : > { %v1166_v61 = vpop.f32.mrf.mxu0  ;;  %1405 = vmatmul.mubr.bf16.gmra.mxu0 %v8469_v59  ;;  %v1839_v10 = vpop.f32.mrf.mxu1  ;;  %2078 = vmatmul.mubr.bf16.gmra.mxu1 %v8469_v59 }
 0x166   : > { %v9234_v4 = vpack.c.bf16 %v2444_v38, %v2440_v32  ;;  %v9236_v14 = vpack.c.bf16 %v2446_v33, %v2442_v2  ;;  %v2445_v13 = vmax.f32 %v1163_v18, 0.0  ;;  %1414 = vmatprep.mubr.bf16.mxu0 %v12547_v31  ;;  %2087 = vmatprep.mubr.bf16.mxu1 %v12547_v31  ;;  %v1840_v43 = vadd.f32 %v1839_v10, %v8896_v22  ;;  %v8470_v32 = vld [vmem:[%s8727_s8 + $0x140] sm:$0xff]  }
 0x167   : > { %v1168_v29 = vpop.f32.mrf.mxu0  ;;  %v9241_v39 = vpop.f32.mrf.mxu1  ;;  %v1167_v48 = vadd.f32 %v1166_v61, %v8901_v24 }
 0x168   : > { %12564 = vst [vmem:[#allocation43_spill] sm:$0xff] %v9234_v4  ;;  %12565 = vst [vmem:[#allocation44_spill] sm:$0xff] %v9236_v14  ;;  %v9244_v0 = vpack.c.bf16 %v2445_v13, %v2441_v9  ;;  %v2450_v2 = vmax.f32 %v1840_v43, 0.0  ;;  %v1169_v38 = vadd.f32 %v1168_v29, %v8906_v28 }
 0x169   : > { %v1170_v59 = vpop.f32.mrf.mxu0  ;;  %v1843_v58 = vpop.f32.mrf.mxu1  ;;  %v2448_v4 = vmax.f32 %v1167_v48, 0.0 }
 0x16a   : > { %12566 = vst [vmem:[#allocation45_spill] sm:$0xff] %v9244_v0  ;;  %v1171_v33 = vadd.f32 %v1170_v59, %v8901_v24  ;;  %v1844_v18 = vadd.f32 %v1843_v58, %v8896_v22  ;;  %v2449_v43 = vmax.f32 %v1169_v38, 0.0 }
 0x16b   : > { %v1172_v14 = vpop.f32.mrf.mxu0  ;;  %v9250_v10 = vpop.f32.mrf.mxu1 }
 0x16c   : > { %v2452_v27 = vmax.f32 %v1171_v33, 0.0  ;;  %v2454_v62 = vmax.f32 %v1844_v18, 0.0  ;;  %v1173_v61 = vadd.f32 %v1172_v14, %v8906_v28 }
 0x16d   : > { %v1176_v13 = vpop.f32.mrf.mxu0  ;;  %1415 = vmatmul.mubr.bf16.gmra.mxu0 %v8470_v32  ;;  %v1849_v9 = vpop.f32.mrf.mxu1  ;;  %2088 = vmatmul.mubr.bf16.gmra.mxu1 %v8470_v32 }
 0x16e   : > { %v9253_v0 = vpack.c.bf16 %v2452_v27, %v2448_v4  ;;  %v9255_v29 = vpack.c.bf16 %v2454_v62, %v2450_v2  ;;  %v2453_v59 = vmax.f32 %v1173_v61, 0.0  ;;  %1424 = vmatprep.mubr.bf16.mxu0 %v12547_v31  ;;  %2097 = vmatprep.mubr.bf16.mxu1 %v12547_v31  ;;  %v1850_v48 = vadd.f32 %v1849_v9, %v8896_v22  ;;  %v8474_v27 = vld [vmem:[%s8727_s8 + $0x148] sm:$0xff]   ;;  %v8511_v4 = vld [vmem:[%s12511_s2 + $0x90] ss:$8 sps:$4 sm:$0xff]   ;;  %v8513_v2 = vld [vmem:[%s12511_s2 + $0x94] ss:$8 sps:$4 sm:$0xff]  }
 0x16f   : > { %v1178_v58 = vpop.f32.mrf.mxu0  ;;  %v9260_v33 = vpop.f32.mrf.mxu1  ;;  %v1177_v14 = vadd.f32 %v1176_v13, %v8901_v24  ;;  %3520 = vmatprep.subr.bf16.mxu0 %v8513_v2 }
 0x170   : > { %12567 = vst [vmem:[#allocation46_spill] sm:$0xff] %v9253_v0  ;;  %12568 = vst [vmem:[#allocation47_spill] sm:$0xff] %v9255_v29  ;;  %v9263_v18 = vpack.c.bf16 %v2453_v59, %v2449_v43  ;;  %v2458_v62 = vmax.f32 %v1850_v48, 0.0  ;;  %v1179_v61 = vadd.f32 %v1178_v58, %v8906_v28  ;;  %3521 = vmatpush2.bf16.msra.mxu0 %v8511_v4 }
 0x171   : > { %v1180_v32 = vpop.f32.mrf.mxu0  ;;  %v1853_v38 = vpop.f32.mrf.mxu1  ;;  %v2456_v29 = vmax.f32 %v1177_v14, 0.0 }
 0x172   : > { %12569 = vst [vmem:[#allocation48_spill] sm:$0xff] %v9263_v18  ;;  %v1181_v9 = vadd.f32 %v1180_v32, %v8901_v24  ;;  %v1854_v13 = vadd.f32 %v1853_v38, %v8896_v22  ;;  %v2457_v58 = vmax.f32 %v1179_v61, 0.0 }
 0x173   : > { %v1182_v43 = vpop.f32.mrf.mxu0  ;;  %v9275_v59 = vpop.f32.mrf.mxu1 }
 0x174   : > { %v2460_v0 = vmax.f32 %v1181_v9, 0.0  ;;  %v2462_v18 = vmax.f32 %v1854_v13, 0.0  ;;  %v1183_v46 = vadd.f32 %v1182_v43, %v8906_v28 }
 0x175   : > { %v1186_v45 = vpop.f32.mrf.mxu0  ;;  %1425 = vmatmul.mubr.bf16.gmra.mxu0 %v8474_v27  ;;  %v1859_v48 = vpop.f32.mrf.mxu1  ;;  %2098 = vmatmul.mubr.bf16.gmra.mxu1 %v8474_v27 }
 0x176   : > { %v9278_v54 = vpack.c.bf16 %v2460_v0, %v2456_v29  ;;  %v9280_v32 = vpack.c.bf16 %v2462_v18, %v2458_v62  ;;  %v2461_v38 = vmax.f32 %v1183_v46, 0.0  ;;  %1434 = vmatprep.mubr.bf16.mxu0 %v12547_v31  ;;  %2107 = vmatprep.mubr.bf16.mxu1 %v12547_v31  ;;  %v1860_v14 = vadd.f32 %v1859_v48, %v8896_v22  ;;  %v8475_v0 = vld [vmem:[%s8727_s8 + $0x150] sm:$0xff]  }
 0x177   : > { %v1188_v2 = vpop.f32.mrf.mxu0  ;;  %v9285_v9 = vpop.f32.mrf.mxu1  ;;  %v1187_v4 = vadd.f32 %v1186_v45, %v8901_v24 }
 0x178   : > { %12570 = vst [vmem:[#allocation49_spill] sm:$0xff] %v9278_v54  ;;  %12571 = vst [vmem:[#allocation50_spill] sm:$0xff] %v9280_v32  ;;  %v9288_v13 = vpack.c.bf16 %v2461_v38, %v2457_v58  ;;  %v2466_v29 = vmax.f32 %v1860_v14, 0.0  ;;  %v1189_v18 = vadd.f32 %v1188_v2, %v8906_v28 }
 0x179   : > { %v1190_v27 = vpop.f32.mrf.mxu0  ;;  %v1863_v61 = vpop.f32.mrf.mxu1  ;;  %v2464_v48 = vmax.f32 %v1187_v4, 0.0 }
 0x17a   : > { %12572 = vst [vmem:[#allocation51_spill] sm:$0xff] %v9288_v13  ;;  %v1191_v46 = vadd.f32 %v1190_v27, %v8901_v24  ;;  %v1864_v62 = vadd.f32 %v1863_v61, %v8896_v22  ;;  %v2465_v14 = vmax.f32 %v1189_v18, 0.0  ;;  %v8479_v18 = vld [vmem:[%s8727_s8 + $0x158] sm:$0xff]  }
 0x17b   : > { %v1192_v43 = vpop.f32.mrf.mxu0  ;;  %v9294_v32 = vpop.f32.mrf.mxu1 }
 0x17c   : > { %v2468_v54 = vmax.f32 %v1191_v46, 0.0  ;;  %v2470_v12 = vmax.f32 %v1864_v62, 0.0  ;;  %v1193_v45 = vadd.f32 %v1192_v43, %v8906_v28  ;;  %v8516_v43 = vld [vmem:[%s12511_s2 + $0x120] ss:$8 sps:$4 sm:$0xff]  }
 0x17d   : > { %v1196_v58 = vpop.f32.mrf.mxu0  ;;  %1435 = vmatmul.mubr.bf16.gmra.mxu0 %v8475_v0  ;;  %v1869_v38 = vpop.f32.mrf.mxu1  ;;  %2108 = vmatmul.mubr.bf16.gmra.mxu1 %v8475_v0  ;;  %v8518_v0 = vld [vmem:[%s12511_s2 + $0x124] ss:$8 sps:$4 sm:$0xff]  }
 0x17e   : > { %v9297_v13 = vpack.c.bf16 %v2468_v54, %v2464_v48  ;;  %v9299_v2 = vpack.c.bf16 %v2470_v12, %v2466_v29  ;;  %v2469_v27 = vmax.f32 %v1193_v45, 0.0  ;;  %1444 = vmatprep.mubr.bf16.mxu0 %v12547_v31  ;;  %2117 = vmatprep.mubr.bf16.mxu1 %v12547_v31  ;;  %v1870_v4 = vadd.f32 %v1869_v38, %v8896_v22 }
 0x17f   : > { %v1198_v61 = vpop.f32.mrf.mxu0  ;;  %v9304_v46 = vpop.f32.mrf.mxu1  ;;  %v1197_v62 = vadd.f32 %v1196_v58, %v8901_v24  ;;  %4175 = vmatprep.subr.bf16.mxu1 %v8518_v0  ;;  %v8520_v0 = vld [vmem:[%s12511_s2 + $0x110] ss:$8 sps:$4 sm:$0xff]  }
 0x180   : > { %12573 = vst [vmem:[#allocation52_spill] sm:$0xff] %v9297_v13  ;;  %12574 = vst [vmem:[#allocation53_spill] sm:$0xff] %v9299_v2  ;;  %v9310_v54 = vpack.c.bf16 %v2469_v27, %v2465_v14  ;;  %v2474_v48 = vmax.f32 %v1870_v4, 0.0  ;;  %v1199_v45 = vadd.f32 %v1198_v61, %v8906_v28  ;;  %4176 = vmatpush1.bf16.msra.mxu1 %v8516_v43  ;;  %v8522_v4 = vld [vmem:[%s12511_s2 + $0x114] ss:$8 sps:$4 sm:$0xff]  }
 0x181   : > { %v1200_v12 = vpop.f32.mrf.mxu0  ;;  %v1873_v29 = vpop.f32.mrf.mxu1  ;;  %v2472_v14 = vmax.f32 %v1197_v62, 0.0  ;;  %4177 = vmatprep.subr.bf16.mxu1 %v8522_v4 }
 0x182   : > { %12575 = vst [vmem:[#allocation54_spill] sm:$0xff] %v9310_v54  ;;  %v1201_v38 = vadd.f32 %v1200_v12, %v8901_v24  ;;  %v1874_v58 = vadd.f32 %v1873_v29, %v8896_v22  ;;  %v2473_v12 = vmax.f32 %v1199_v45, 0.0  ;;  %v8525_v45 = vld [vmem:[%s12511_s2 + $0x104] ss:$8 sps:$4 sm:$0xff]  }
 0x183   : > { %v1202_v2 = vpop.f32.mrf.mxu0  ;;  %v9319_v13 = vpop.f32.mrf.mxu1 }
 0x184   : > { %v2476_v27 = vmax.f32 %v1201_v38, 0.0  ;;  %v2478_v54 = vmax.f32 %v1874_v58, 0.0  ;;  %v1203_v11 = vadd.f32 %v1202_v2, %v8906_v28  ;;  %4178 = vmatpush1.bf16.msra.mxu1 %v8520_v0 }
 0x185   : > { %v1206_v20 = vpop.f32.mrf.mxu0  ;;  %1445 = vmatmul.mubr.bf16.gmra.mxu0 %v8479_v18  ;;  %v1879_v61 = vpop.f32.mrf.mxu1  ;;  %2118 = vmatmul.mubr.bf16.gmra.mxu1 %v8479_v18 }
 0x186   : > { %v9328_v29 = vpack.c.bf16 %v2476_v27, %v2472_v14  ;;  %v9330_v62 = vpack.c.bf16 %v2478_v54, %v2474_v48  ;;  %v2477_v43 = vmax.f32 %v1203_v11, 0.0  ;;  %1454 = vmatprep.mubr.bf16.mxu0 %v12547_v31  ;;  %2127 = vmatprep.mubr.bf16.mxu1 %v12547_v31  ;;  %v1880_v2 = vadd.f32 %v1879_v61, %v8896_v22  ;;  %v8480_v14 = vld [vmem:[%s8727_s8 + $0x160] sm:$0xff]  }
 0x187   : > { %v1208_v38 = vpop.f32.mrf.mxu0  ;;  %v9335_v58 = vpop.f32.mrf.mxu1  ;;  %v1207_v18 = vadd.f32 %v1206_v20, %v8901_v24  ;;  %v8523_v27 = vld [vmem:[%s12511_s2 + $0x100] ss:$8 sps:$4 sm:$0xff]   ;;  %4179 = vmatprep.subr.bf16.mxu1 %v8525_v45  ;;  %v8530_v45 = vld [vmem:[%s12511_s2 + $0x1f0] ss:$8 sps:$4 sm:$0xff]  }
 0x188   : > { %12576 = vst [vmem:[#allocation55_spill] sm:$0xff] %v9328_v29  ;;  %12577 = vst [vmem:[#allocation56_spill] sm:$0xff] %v9330_v62  ;;  %v9341_v54 = vpack.c.bf16 %v2477_v43, %v2473_v12  ;;  %v2482_v61 = vmax.f32 %v1880_v2, 0.0  ;;  %v1209_v62 = vadd.f32 %v1208_v38, %v8906_v28  ;;  %4180 = vmatpush1.bf16.msra.mxu1 %v8523_v27  ;;  %v8532_v2 = vld [vmem:[%s12511_s2 + $0x1f4] ss:$8 sps:$4 sm:$0xff]  }
 0x189   : > { %12578 = vst [vmem:[#allocation57_spill] sm:$0xff] %v9335_v58  ;;  %v1210_v11 = vpop.f32.mrf.mxu0  ;;  %v1883_v48 = vpop.f32.mrf.mxu1  ;;  %v2480_v12 = vmax.f32 %v1207_v18, 0.0  ;;  %4181 = vmatprep.subr.bf16.mxu1 %v8532_v2  ;;  %v8529_v2 = vld [vmem:[%s12511_s2 + $0x84] ss:$8 sps:$4 sm:$0xff]  }
 0x18a   : > { %12579 = vst [vmem:[#allocation58_spill] sm:$0xff] %v9341_v54  ;;  %v1211_v4 = vadd.f32 %v1210_v11, %v8901_v24  ;;  %v1884_v20 = vadd.f32 %v1883_v48, %v8896_v22  ;;  %v2481_v11 = vmax.f32 %v1209_v62, 0.0  ;;  %v8535_v62 = vld [vmem:[%s12511_s2 + $0x1e4] ss:$8 sps:$4 sm:$0xff]   ;;  %3522 = vmatprep.subr.bf16.mxu0 %v8529_v2 }
 0x18b   : > { %v1212_v0 = vpop.f32.mrf.mxu0  ;;  %v9350_v29 = vpop.f32.mrf.mxu1 }
 0x18c   : > { %12580 = vst [vmem:[#allocation59_spill] sm:$0xff] %v9350_v29  ;;  %v2484_v43 = vmax.f32 %v1211_v4, 0.0  ;;  %v2486_v54 = vmax.f32 %v1884_v20, 0.0  ;;  %v1213_v58 = vadd.f32 %v1212_v0, %v8906_v28  ;;  %4182 = vmatpush2.bf16.msra.mxu1 %v8530_v45 }
 0x18d   : > { %v1216_v51 = vpop.f32.mrf.mxu0  ;;  %1455 = vmatmul.mubr.bf16.gmra.mxu0 %v8480_v14  ;;  %v1889_v38 = vpop.f32.mrf.mxu1  ;;  %2128 = vmatmul.mubr.bf16.gmra.mxu1 %v8480_v14 }
 0x18e   : > { %v9359_v18 = vpack.c.bf16 %v2484_v43, %v2480_v12  ;;  %v9361_v48 = vpack.c.bf16 %v2486_v54, %v2482_v61  ;;  %v2485_v4 = vmax.f32 %v1213_v58, 0.0  ;;  %1464 = vmatprep.mubr.bf16.mxu0 %v12547_v31  ;;  %2137 = vmatprep.mubr.bf16.mxu1 %v12547_v31  ;;  %v1890_v27 = vadd.f32 %v1889_v38, %v8896_v22  ;;  %v8484_v12 = vld [vmem:[%s8727_s8 + $0x168] sm:$0xff]  }
 0x18f   : > { %v1218_v20 = vpop.f32.mrf.mxu0  ;;  %v9366_v0 = vpop.f32.mrf.mxu1  ;;  %v1217_v14 = vadd.f32 %v1216_v51, %v8901_v24  ;;  %v8527_v43 = vld [vmem:[%s12511_s2 + $0x80] ss:$8 sps:$4 sm:$0xff]   ;;  %4183 = vmatprep.subr.bf16.mxu1 %v8535_v62 }
 0x190   : > { %12581 = vst [vmem:[#allocation60_spill] sm:$0xff] %v9359_v18  ;;  %12582 = vst [vmem:[#allocation61_spill] sm:$0xff] %v9361_v48  ;;  %v9372_v54 = vpack.c.bf16 %v2485_v4, %v2481_v11  ;;  %v2490_v38 = vmax.f32 %v1890_v27, 0.0  ;;  %v1219_v51 = vadd.f32 %v1218_v20, %v8906_v28  ;;  %v8533_v11 = vld [vmem:[%s12511_s2 + $0x1e0] ss:$8 sps:$4 sm:$0xff]   ;;  %3523 = vmatpush2.bf16.msra.mxu0 %v8527_v43 }
 0x191   : > { %12583 = vst [vmem:[#allocation62_spill] sm:$0xff] %v9366_v0  ;;  %v1220_v58 = vpop.f32.mrf.mxu0  ;;  %v1893_v61 = vpop.f32.mrf.mxu1  ;;  %4184 = vmatpush2.bf16.msra.mxu1 %v8533_v11  ;;  %v8539_v20 = vld [vmem:[%s12511_s2 + $0x1d4] ss:$8 sps:$4 sm:$0xff]   ;;  %5357 = vmatprep.subr.bf16.mxu0 %v12547_v31 }
 0x192   : > { %12584 = vst [vmem:[#allocation63_spill] sm:$0xff] %v9372_v54  ;;  %v1221_v45 = vadd.f32 %v1220_v58, %v8901_v24  ;;  %v1894_v48 = vadd.f32 %v1893_v61, %v8896_v22  ;;  %v2488_v54 = vmax.f32 %v1217_v14, 0.0  ;;  %v432_v58 = vsub.s32 3, %v8886_v17  ;;  %v8537_v14 = vld [vmem:[%s12511_s2 + $0x1d0] ss:$8 sps:$4 sm:$0xff]   ;;  %4185 = vmatprep.subr.bf16.mxu1 %v8539_v20 }
 0x193   : > { %v1222_v4 = vpop.f32.mrf.mxu0  ;;  %v9387_v18 = vpop.f32.mrf.mxu1  ;;  %v2489_v2 = vmax.f32 %v1219_v51, 0.0  ;;  %v8485_v20 = vld [vmem:[%s8727_s8 + $0x170] sm:$0xff]  }
 0x194   : > { %v2492_v0 = vmax.f32 %v1221_v45, 0.0  ;;  %v2494_v29 = vmax.f32 %v1894_v48, 0.0  ;;  %v1223_v27 = vadd.f32 %v1222_v4, %v8906_v28 }
 0x195   : > { %v1226_v61 = vpop.f32.mrf.mxu0  ;;  %1465 = vmatmul.mubr.bf16.gmra.mxu0 %v8484_v12  ;;  %v1899_v62 = vpop.f32.mrf.mxu1  ;;  %2138 = vmatmul.mubr.bf16.gmra.mxu1 %v8484_v12 }
 0x196   : > { %v9397_v48 = vpack.c.bf16 %v2492_v0, %v2488_v54  ;;  %v9399_v45 = vpack.c.bf16 %v2494_v29, %v2490_v38  ;;  %v2493_v43 = vmax.f32 %v1223_v27, 0.0  ;;  %1474 = vmatprep.mubr.bf16.mxu0 %v12547_v31  ;;  %2147 = vmatprep.mubr.bf16.mxu1 %v12547_v31  ;;  %v1900_v11 = vadd.f32 %v1899_v62, %v8896_v22  ;;  %v8542_v29 = vld [vmem:[%s12511_s2 + $0x1c4] ss:$8 sps:$4 sm:$0xff]   ;;  %v8589_v54 = vld [vmem:[%s12514_s5] sm:$0xf] }
 0x197   : > { %v1228_v4 = vpop.f32.mrf.mxu0  ;;  %v9404_v17 = vpop.f32.mrf.mxu1  ;;  %v1227_v12 = vadd.f32 %v1226_v61, %v8901_v24  ;;  %4186 = vmatpush2.bf16.msra.mxu1 %v8537_v14  ;;  %v9416_v38 = vrot.slane %v8589_v54, %v432_v58  ;;  %v8540_v61 = vld [vmem:[%s12511_s2 + $0x1c0] ss:$8 sps:$4 sm:$0xff]  }
 0x198   : > { %12585 = vst [vmem:[#allocation64_spill] sm:$0xff] %v9397_v48  ;;  %12586 = vst [vmem:[#allocation65_spill] sm:$0xff] %v9399_v45  ;;  %v9411_v0 = vpack.c.bf16 %v2493_v43, %v2489_v2  ;;  %v2498_v62 = vmax.f32 %v1900_v11, 0.0  ;;  %v1229_v14 = vadd.f32 %v1228_v4, %v8906_v28  ;;  %4187 = vmatprep.subr.bf16.mxu1 %v8542_v29  ;;  %v8546_v11 = vld [vmem:[%s12511_s2 + $0x1b4] ss:$8 sps:$4 sm:$0xff]  }
 0x199   : > { %12587 = vst [vmem:[#allocation66_spill] sm:$0xff] %v9404_v17  ;;  %v1230_v51 = vpop.f32.mrf.mxu0  ;;  %v1903_v27 = vpop.f32.mrf.mxu1  ;;  %v2496_v58 = vmax.f32 %v1227_v12, 0.0  ;;  %v1692_v4 = vadd.f32 %v8910_v30, %v9416_v38 }
 0x19a   : > { %12588 = vst [vmem:[#allocation67_spill] sm:$0xff] %v9411_v0  ;;  %v1231_v45 = vadd.f32 %v1230_v51, %v8901_v24  ;;  %v1904_v2 = vadd.f32 %v1903_v27, %v8896_v22  ;;  %v1696_v51 = vadd.f32 %v8923_v42, %v9416_v38  ;;  %v2497_v12 = vmax.f32 %v1229_v14, 0.0 }
 0x19b   : > { %v1232_v43 = vpop.f32.mrf.mxu0  ;;  %v9425_v48 = vpop.f32.mrf.mxu1  ;;  %4188 = vmatpush2.bf16.msra.mxu1 %v8540_v61 }
 0x19c   : > { %12589 = vst [vmem:[#allocation68_spill] sm:$0xff] %v9425_v48  ;;  %v2500_v54 = vmax.f32 %v1231_v45, 0.0  ;;  %v2502_v0 = vmax.f32 %v1904_v2, 0.0  ;;  %v1233_v17 = vadd.f32 %v1232_v43, %v8906_v28  ;;  %v8544_v45 = vld [vmem:[%s12511_s2 + $0x1b0] ss:$8 sps:$4 sm:$0xff]   ;;  %4189 = vmatprep.subr.bf16.mxu1 %v8546_v11  ;;  %v2335_v14 = vmax.f32 %v1696_v51, 0.0 }
 0x19d   : > { %v1236_v29 = vpop.f32.mrf.mxu0  ;;  %1475 = vmatmul.mubr.bf16.gmra.mxu0 %v8485_v20  ;;  %v1909_v27 = vpop.f32.mrf.mxu1  ;;  %2148 = vmatmul.mubr.bf16.gmra.mxu1 %v8485_v20 }
 0x19e   : > { %v9438_v61 = vpack.c.bf16 %v2500_v54, %v2496_v58  ;;  %v9440_v2 = vpack.c.bf16 %v2502_v0, %v2498_v62  ;;  %v2501_v43 = vmax.f32 %v1233_v17, 0.0  ;;  %1484 = vmatprep.mubr.bf16.mxu0 %v12547_v31  ;;  %2157 = vmatprep.mubr.bf16.mxu1 %v12547_v31  ;;  %v1910_v30 = vadd.f32 %v1909_v27, %v8896_v22  ;;  %v8549_v0 = vld [vmem:[%s12511_s2 + $0x1a4] ss:$8 sps:$4 sm:$0xff]   ;;  %v8547_v27 = vld [vmem:[%s12511_s2 + $0x1a0] ss:$8 sps:$4 sm:$0xff]  }
 0x19f   : > { %v1238_v42 = vpop.f32.mrf.mxu0  ;;  %v9445_v48 = vpop.f32.mrf.mxu1  ;;  %v1237_v20 = vadd.f32 %v1236_v29, %v8901_v24  ;;  %4190 = vmatpush2.bf16.msra.mxu1 %v8544_v45  ;;  %v2331_v17 = vmax.f32 %v1692_v4, 0.0 }
 0x1a0   : > { %12590 = vst [vmem:[#allocation69_spill] sm:$0xff] %v9438_v61  ;;  %12591 = vst [vmem:[#allocation70_spill] sm:$0xff] %v9440_v2  ;;  %v9451_v62 = vpack.c.bf16 %v2501_v43, %v2497_v12  ;;  %v8489_v2 = vld [vmem:[%s8727_s8 + $0x178] sm:$0xff]   ;;  %v2506_v61 = vmax.f32 %v1910_v30, 0.0  ;;  %v1239_v11 = vadd.f32 %v1238_v42, %v8906_v28  ;;  %4191 = vmatprep.subr.bf16.mxu1 %v8549_v0 }
 0x1a1   : > { %12592 = vst [vmem:[#allocation71_spill] sm:$0xff] %v9445_v48  ;;  %v1240_v58 = vpop.f32.mrf.mxu0  ;;  %v1913_v54 = vpop.f32.mrf.mxu1  ;;  %v2504_v4 = vmax.f32 %v1237_v20, 0.0  ;;  %v8553_v30 = vld [vmem:[%s12511_s2 + $0x194] ss:$8 sps:$4 sm:$0xff]   ;;  %v1702_v42 = vadd.f32 %v8933_v55, %v9416_v38  ;;  %v8551_v20 = vld [vmem:[%s12511_s2 + $0x190] ss:$8 sps:$4 sm:$0xff]  }
 0x1a2   : > { %12593 = vst [vmem:[#allocation72_spill] sm:$0xff] %v9451_v62  ;;  %v1241_v29 = vadd.f32 %v1240_v58, %v8901_v24  ;;  %v1914_v45 = vadd.f32 %v1913_v54, %v8896_v22  ;;  %v1706_v58 = vadd.f32 %v8942_v3, %v9416_v38 }
 0x1a3   : > { %v1242_v48 = vpop.f32.mrf.mxu0  ;;  %v9460_v12 = vpop.f32.mrf.mxu1  ;;  %4192 = vmatpush2.bf16.msra.mxu1 %v8547_v27  ;;  %v2505_v27 = vmax.f32 %v1239_v11, 0.0 }
 0x1a4   : > { %12594 = vst [vmem:[#allocation73_spill] sm:$0xff] %v9460_v12  ;;  %v2508_v51 = vmax.f32 %v1241_v29, 0.0  ;;  %v2510_v43 = vmax.f32 %v1914_v45, 0.0  ;;  %v1243_v62 = vadd.f32 %v1242_v48, %v8906_v28  ;;  %v9473_v48 = vpack.c.bf16 %v2335_v14, %v2331_v17  ;;  %4193 = vmatprep.subr.bf16.mxu1 %v8553_v30 }
 0x1a5   : > { %v1246_v0 = vpop.f32.mrf.mxu0  ;;  %1485 = vmatmul.mubr.bf16.gmra.mxu0 %v8489_v2  ;;  %v1919_v54 = vpop.f32.mrf.mxu1  ;;  %2158 = vmatmul.mubr.bf16.gmra.mxu1 %v8489_v2  ;;  %v2343_v11 = vmax.f32 %v1706_v58, 0.0 }
 0x1a6   : > { %v9475_v29 = vpack.c.bf16 %v2508_v51, %v2504_v4  ;;  %v9477_v45 = vpack.c.bf16 %v2510_v43, %v2506_v61  ;;  %v2509_v55 = vmax.f32 %v1243_v62, 0.0  ;;  %1494 = vmatprep.mubr.bf16.mxu0 %v12547_v31  ;;  %2167 = vmatprep.mubr.bf16.mxu1 %v12547_v31  ;;  %v1920_v3 = vadd.f32 %v1919_v54, %v8896_v22  ;;  %v8556_v61 = vld [vmem:[%s12511_s2 + $0x184] ss:$8 sps:$4 sm:$0xff]   ;;  %v8554_v54 = vld [vmem:[%s12511_s2 + $0x180] ss:$8 sps:$4 sm:$0xff]  }
 0x1a7   : > { %v1248_v2 = vpop.f32.mrf.mxu0  ;;  %v9482_v12 = vpop.f32.mrf.mxu1  ;;  %v1247_v17 = vadd.f32 %v1246_v0, %v8901_v24  ;;  %4194 = vmatpush2.bf16.msra.mxu1 %v8551_v20  ;;  %v2339_v62 = vmax.f32 %v1702_v42, 0.0  ;;  %v8490_v43 = vld [vmem:[%s8727_s8 + $0x180] sm:$0xff]  }
 0x1a8   : > { %12595 = vst [vmem:[#allocation74_spill] sm:$0xff] %v9475_v29  ;;  %12596 = vst [vmem:[#allocation75_spill] sm:$0xff] %v9477_v45  ;;  %v9488_v14 = vpack.c.bf16 %v2509_v55, %v2505_v27  ;;  %v2514_v45 = vmax.f32 %v1920_v3, 0.0  ;;  %v1249_v30 = vadd.f32 %v1248_v2, %v8906_v28  ;;  %4195 = vmatprep.subr.bf16.mxu1 %v8556_v61 }
 0x1a9   : > { %12597 = vst [vmem:[#allocation76_spill] sm:$0xff] %v9482_v12  ;;  %v1250_v4 = vpop.f32.mrf.mxu0  ;;  %v1923_v51 = vpop.f32.mrf.mxu1  ;;  %v2512_v42 = vmax.f32 %v1247_v17, 0.0  ;;  %v1712_v12 = vadd.f32 %v8952_v16, %v9416_v38  ;;  %v1716_v3 = vadd.f32 %v8964_v35, %v9416_v38  ;;  %v9504_v61 = vpack.c.bf16 %v2343_v11, %v2339_v62 }
 0x1aa   : > { %12598 = vst [vmem:[#allocation77_spill] sm:$0xff] %v9488_v14  ;;  %v1251_v0 = vadd.f32 %v1250_v4, %v8901_v24  ;;  %v1924_v20 = vadd.f32 %v1923_v51, %v8896_v22  ;;  %v2513_v51 = vmax.f32 %v1249_v30, 0.0 }
 0x1ab   : > { %v1252_v29 = vpop.f32.mrf.mxu0  ;;  %v9497_v27 = vpop.f32.mrf.mxu1  ;;  %4196 = vmatpush2.bf16.msra.mxu1 %v8554_v54  ;;  %v2347_v11 = vmax.f32 %v1712_v12, 0.0  ;;  %v2351_v30 = vmax.f32 %v1716_v3, 0.0  ;;  %v1722_v12 = vadd.f32 %v8977_v52, %v9416_v38  ;;  %v1726_v3 = vadd.f32 %v8986_v1, %v9416_v38 }
 0x1ac   : > { %12599 = vst [vmem:[#allocation78_spill] sm:$0xff] %v9497_v27  ;;  %v2516_v58 = vmax.f32 %v1251_v0, 0.0  ;;  %v2518_v55 = vmax.f32 %v1924_v20, 0.0  ;;  %v1253_v14 = vadd.f32 %v1252_v29, %v8906_v28 }
 0x1ad   : > { %v1256_v2 = vpop.f32.mrf.mxu0  ;;  %1495 = vmatmul.mubr.bf16.gmra.mxu0 %v8490_v43  ;;  %v1929_v4 = vpop.f32.mrf.mxu1  ;;  %2168 = vmatmul.mubr.bf16.gmra.mxu1 %v8490_v43 }
 0x1ae   : > { %v9506_v17 = vpack.c.bf16 %v2516_v58, %v2512_v42  ;;  %v9508_v0 = vpack.c.bf16 %v2518_v55, %v2514_v45  ;;  %v2517_v29 = vmax.f32 %v1253_v14, 0.0  ;;  %1504 = vmatprep.mubr.bf16.mxu0 %v12547_v31  ;;  %2177 = vmatprep.mubr.bf16.mxu1 %v12547_v31  ;;  %v1930_v16 = vadd.f32 %v1929_v4, %v8896_v22  ;;  %v8494_v45 = vld [vmem:[%s8727_s8 + $0x188] sm:$0xff]  }
 0x1af   : > { %v1258_v35 = vpop.f32.mrf.mxu0  ;;  %v9513_v54 = vpop.f32.mrf.mxu1  ;;  %v1257_v43 = vadd.f32 %v1256_v2, %v8901_v24 }
 0x1b0   : > { %12600 = vst [vmem:[#allocation79_spill] sm:$0xff] %v9506_v17  ;;  %12601 = vst [vmem:[#allocation80_spill] sm:$0xff] %v9508_v0  ;;  %v9516_v62 = vpack.c.bf16 %v2517_v29, %v2513_v51  ;;  %v2522_v58 = vmax.f32 %v1930_v16, 0.0  ;;  %v1259_v14 = vadd.f32 %v1258_v35, %v8906_v28  ;;  %v9529_v35 = vpack.c.bf16 %v2351_v30, %v2347_v11 }
 0x1b1   : > { %12602 = vst [vmem:[#allocation81_spill] sm:$0xff] %v9513_v54  ;;  %v1260_v20 = vpop.f32.mrf.mxu0  ;;  %v1933_v42 = vpop.f32.mrf.mxu1  ;;  %v2520_v54 = vmax.f32 %v1257_v43, 0.0  ;;  %v2355_v30 = vmax.f32 %v1722_v12, 0.0  ;;  %v1732_v12 = vadd.f32 %v8996_v25, %v9416_v38 }
 0x1b2   : > { %12603 = vst [vmem:[#allocation82_spill] sm:$0xff] %v9516_v62  ;;  %v1261_v55 = vadd.f32 %v1260_v20, %v8901_v24  ;;  %v1934_v0 = vadd.f32 %v1933_v42, %v8896_v22  ;;  %v2521_v20 = vmax.f32 %v1259_v14, 0.0  ;;  %v2359_v14 = vmax.f32 %v1726_v3, 0.0 }
 0x1b3   : > { %v1262_v4 = vpop.f32.mrf.mxu0  ;;  %v9522_v17 = vpop.f32.mrf.mxu1  ;;  %v1736_v3 = vadd.f32 %v9011_v41, %v9416_v38 }
 0x1b4   : > { %v2524_v27 = vmax.f32 %v1261_v55, 0.0  ;;  %v2526_v2 = vmax.f32 %v1934_v0, 0.0  ;;  %v1263_v51 = vadd.f32 %v1262_v4, %v8906_v28 }
 0x1b5   : > { %v1266_v29 = vpop.f32.mrf.mxu0  ;;  %1505 = vmatmul.mubr.bf16.gmra.mxu0 %v8494_v45  ;;  %v1939_v16 = vpop.f32.mrf.mxu1  ;;  %2178 = vmatmul.mubr.bf16.gmra.mxu1 %v8494_v45 }
 0x1b6   : > { %v9531_v42 = vpack.c.bf16 %v2524_v27, %v2520_v54  ;;  %v9533_v43 = vpack.c.bf16 %v2526_v2, %v2522_v58  ;;  %v2525_v0 = vmax.f32 %v1263_v51, 0.0  ;;  %1514 = vmatprep.mubr.bf16.mxu0 %v12547_v31  ;;  %2187 = vmatprep.mubr.bf16.mxu1 %v12547_v31  ;;  %v1940_v52 = vadd.f32 %v1939_v16, %v8896_v22  ;;  %v8495_v58 = vld [vmem:[%s8727_s8 + $0x190] sm:$0xff]  }
 0x1b7   : > { %v1268_v1 = vpop.f32.mrf.mxu0  ;;  %v9538_v55 = vpop.f32.mrf.mxu1  ;;  %v1267_v45 = vadd.f32 %v1266_v29, %v8901_v24 }
 0x1b8   : > { %12604 = vst [vmem:[#allocation83_spill] sm:$0xff] %v9531_v42  ;;  %12605 = vst [vmem:[#allocation84_spill] sm:$0xff] %v9533_v43  ;;  %v9541_v11 = vpack.c.bf16 %v2525_v0, %v2521_v20  ;;  %v2530_v4 = vmax.f32 %v1940_v52, 0.0  ;;  %v1269_v2 = vadd.f32 %v1268_v1, %v8906_v28  ;;  %v9554_v1 = vpack.c.bf16 %v2359_v14, %v2355_v30 }
 0x1b9   : > { %12606 = vst [vmem:[#allocation85_spill] sm:$0xff] %v9538_v55  ;;  %v1270_v27 = vpop.f32.mrf.mxu0  ;;  %v1943_v54 = vpop.f32.mrf.mxu1  ;;  %v2528_v62 = vmax.f32 %v1267_v45, 0.0  ;;  %v2363_v14 = vmax.f32 %v1732_v12, 0.0  ;;  %v1742_v12 = vadd.f32 %v9021_v63, %v9416_v38 }
 0x1ba   : > { %12607 = vst [vmem:[#allocation86_spill] sm:$0xff] %v9541_v11  ;;  %v1271_v51 = vadd.f32 %v1270_v27, %v8901_v24  ;;  %v1944_v43 = vadd.f32 %v1943_v54, %v8896_v22  ;;  %v2529_v27 = vmax.f32 %v1269_v2, 0.0  ;;  %v2367_v2 = vmax.f32 %v1736_v3, 0.0 }
 0x1bb   : > { %v1272_v16 = vpop.f32.mrf.mxu0  ;;  %v9547_v42 = vpop.f32.mrf.mxu1  ;;  %v1746_v3 = vadd.f32 %v9030_v21, %v9416_v38 }
 0x1bc   : > { %v2532_v55 = vmax.f32 %v1271_v51, 0.0  ;;  %v2534_v29 = vmax.f32 %v1944_v43, 0.0  ;;  %v1273_v20 = vadd.f32 %v1272_v16, %v8906_v28 }
 0x1bd   : > { %v1276_v0 = vpop.f32.mrf.mxu0  ;;  %1515 = vmatmul.mubr.bf16.gmra.mxu0 %v8495_v58  ;;  %v1949_v52 = vpop.f32.mrf.mxu1  ;;  %2188 = vmatmul.mubr.bf16.gmra.mxu1 %v8495_v58 }
 0x1be   : > { %v9556_v54 = vpack.c.bf16 %v2532_v55, %v2528_v62  ;;  %v9558_v45 = vpack.c.bf16 %v2534_v29, %v2530_v4  ;;  %v2533_v43 = vmax.f32 %v1273_v20, 0.0  ;;  %1524 = vmatprep.mubr.bf16.mxu0 %v12547_v31  ;;  %2197 = vmatprep.mubr.bf16.mxu1 %v12547_v31  ;;  %v1950_v25 = vadd.f32 %v1949_v52, %v8896_v22  ;;  %v8499_v4 = vld [vmem:[%s8727_s8 + $0x198] sm:$0xff]  }
 0x1bf   : > { %v1278_v41 = vpop.f32.mrf.mxu0  ;;  %v9563_v51 = vpop.f32.mrf.mxu1  ;;  %v1277_v58 = vadd.f32 %v1276_v0, %v8901_v24 }
 0x1c0   : > { %12608 = vst [vmem:[#allocation87_spill] sm:$0xff] %v9556_v54  ;;  %12609 = vst [vmem:[#allocation88_spill] sm:$0xff] %v9558_v45  ;;  %v9566_v30 = vpack.c.bf16 %v2533_v43, %v2529_v27  ;;  %v2538_v16 = vmax.f32 %v1950_v25, 0.0  ;;  %v1279_v29 = vadd.f32 %v1278_v41, %v8906_v28  ;;  %v9579_v41 = vpack.c.bf16 %v2367_v2, %v2363_v14 }
 0x1c1   : > { %12610 = vst [vmem:[#allocation89_spill] sm:$0xff] %v9563_v51  ;;  %v1280_v62 = vpop.f32.mrf.mxu0  ;;  %v1953_v55 = vpop.f32.mrf.mxu1  ;;  %v2536_v11 = vmax.f32 %v1277_v58, 0.0  ;;  %v2371_v2 = vmax.f32 %v1742_v12, 0.0  ;;  %v1752_v12 = vadd.f32 %v9040_v44, %v9416_v38 }
 0x1c2   : > { %12611 = vst [vmem:[#allocation90_spill] sm:$0xff] %v9566_v30  ;;  %v1281_v20 = vadd.f32 %v1280_v62, %v8901_v24  ;;  %v1954_v45 = vadd.f32 %v1953_v55, %v8896_v22  ;;  %v2537_v62 = vmax.f32 %v1279_v29, 0.0  ;;  %v2375_v29 = vmax.f32 %v1746_v3, 0.0 }
 0x1c3   : > { %v1282_v52 = vpop.f32.mrf.mxu0  ;;  %v9572_v54 = vpop.f32.mrf.mxu1  ;;  %v1756_v3 = vadd.f32 %v9052_v7, %v9416_v38 }
 0x1c4   : > { %v2540_v51 = vmax.f32 %v1281_v20, 0.0  ;;  %v2542_v0 = vmax.f32 %v1954_v45, 0.0  ;;  %v1283_v27 = vadd.f32 %v1282_v52, %v8906_v28 }
 0x1c5   : > { %v1286_v43 = vpop.f32.mrf.mxu0  ;;  %1525 = vmatmul.mubr.bf16.gmra.mxu0 %v8499_v4  ;;  %v1959_v25 = vpop.f32.mrf.mxu1  ;;  %2198 = vmatmul.mubr.bf16.gmra.mxu1 %v8499_v4 }
 0x1c6   : > { %v9581_v55 = vpack.c.bf16 %v2540_v51, %v2536_v11  ;;  %v9583_v58 = vpack.c.bf16 %v2542_v0, %v2538_v16  ;;  %v2541_v45 = vmax.f32 %v1283_v27, 0.0  ;;  %1534 = vmatprep.mubr.bf16.mxu0 %v12547_v31  ;;  %2207 = vmatprep.mubr.bf16.mxu1 %v12547_v31  ;;  %v1960_v63 = vadd.f32 %v1959_v25, %v8896_v22  ;;  %v8500_v16 = vld [vmem:[%s8727_s8 + $0x1a0] sm:$0xff]  }
 0x1c7   : > { %v1288_v21 = vpop.f32.mrf.mxu0  ;;  %v9588_v20 = vpop.f32.mrf.mxu1  ;;  %v1287_v4 = vadd.f32 %v1286_v43, %v8901_v24 }
 0x1c8   : > { %12612 = vst [vmem:[#allocation91_spill] sm:$0xff] %v9581_v55  ;;  %12613 = vst [vmem:[#allocation92_spill] sm:$0xff] %v9583_v58  ;;  %v9591_v14 = vpack.c.bf16 %v2541_v45, %v2537_v62  ;;  %v2546_v52 = vmax.f32 %v1960_v63, 0.0  ;;  %v1289_v0 = vadd.f32 %v1288_v21, %v8906_v28  ;;  %v9604_v21 = vpack.c.bf16 %v2375_v29, %v2371_v2 }
 0x1c9   : > { %12614 = vst [vmem:[#allocation93_spill] sm:$0xff] %v9588_v20  ;;  %v1290_v11 = vpop.f32.mrf.mxu0  ;;  %v1963_v51 = vpop.f32.mrf.mxu1  ;;  %v2544_v30 = vmax.f32 %v1287_v4, 0.0  ;;  %v2379_v29 = vmax.f32 %v1752_v12, 0.0  ;;  %v1762_v12 = vadd.f32 %v9065_v40, %v9416_v38 }
 0x1ca   : > { %12615 = vst [vmem:[#allocation94_spill] sm:$0xff] %v9591_v14  ;;  %v1291_v27 = vadd.f32 %v1290_v11, %v8901_v24  ;;  %v1964_v58 = vadd.f32 %v1963_v51, %v8896_v22  ;;  %v2545_v11 = vmax.f32 %v1289_v0, 0.0  ;;  %v2383_v0 = vmax.f32 %v1756_v3, 0.0 }
 0x1cb   : > { %v1292_v25 = vpop.f32.mrf.mxu0  ;;  %v9597_v55 = vpop.f32.mrf.mxu1  ;;  %v1766_v3 = vadd.f32 %v9074_v6, %v9416_v38 }
 0x1cc   : > { %v2548_v20 = vmax.f32 %v1291_v27, 0.0  ;;  %v2550_v43 = vmax.f32 %v1964_v58, 0.0  ;;  %v1293_v62 = vadd.f32 %v1292_v25, %v8906_v28 }
 0x1cd   : > { %v1296_v45 = vpop.f32.mrf.mxu0  ;;  %1535 = vmatmul.mubr.bf16.gmra.mxu0 %v8500_v16  ;;  %v1969_v63 = vpop.f32.mrf.mxu1  ;;  %2208 = vmatmul.mubr.bf16.gmra.mxu1 %v8500_v16 }
 0x1ce   : > { %v9606_v51 = vpack.c.bf16 %v2548_v20, %v2544_v30  ;;  %v9608_v4 = vpack.c.bf16 %v2550_v43, %v2546_v52  ;;  %v2549_v58 = vmax.f32 %v1293_v62, 0.0  ;;  %1544 = vmatprep.mubr.bf16.mxu0 %v12547_v31  ;;  %2217 = vmatprep.mubr.bf16.mxu1 %v12547_v31  ;;  %v1970_v44 = vadd.f32 %v1969_v63, %v8896_v22  ;;  %v8504_v52 = vld [vmem:[%s8727_s8 + $0x1a8] sm:$0xff]  }
 0x1cf   : > { %v1298_v7 = vpop.f32.mrf.mxu0  ;;  %v9613_v27 = vpop.f32.mrf.mxu1  ;;  %v1297_v16 = vadd.f32 %v1296_v45, %v8901_v24 }
 0x1d0   : > { %12616 = vst [vmem:[#allocation95_spill] sm:$0xff] %v9606_v51  ;;  %12617 = vst [vmem:[#allocation96_spill] sm:$0xff] %v9608_v4  ;;  %v9616_v2 = vpack.c.bf16 %v2549_v58, %v2545_v11  ;;  %v2554_v25 = vmax.f32 %v1970_v44, 0.0  ;;  %v1299_v43 = vadd.f32 %v1298_v7, %v8906_v28  ;;  %v9629_v7 = vpack.c.bf16 %v2383_v0, %v2379_v29 }
 0x1d1   : > { %12618 = vst [vmem:[#allocation97_spill] sm:$0xff] %v9613_v27  ;;  %v1300_v30 = vpop.f32.mrf.mxu0  ;;  %v1973_v20 = vpop.f32.mrf.mxu1  ;;  %v2552_v14 = vmax.f32 %v1297_v16, 0.0  ;;  %v2387_v0 = vmax.f32 %v1762_v12, 0.0  ;;  %v1772_v12 = vadd.f32 %v9084_v49, %v9416_v38 }
 0x1d2   : > { %12619 = vst [vmem:[#allocation98_spill] sm:$0xff] %v9616_v2  ;;  %v1301_v62 = vadd.f32 %v1300_v30, %v8901_v24  ;;  %v1974_v4 = vadd.f32 %v1973_v20, %v8896_v22  ;;  %v2553_v30 = vmax.f32 %v1299_v43, 0.0  ;;  %v2391_v43 = vmax.f32 %v1766_v3, 0.0 }
 0x1d3   : > { %v1302_v63 = vpop.f32.mrf.mxu0  ;;  %v9622_v51 = vpop.f32.mrf.mxu1  ;;  %v1776_v3 = vadd.f32 %v9099_v26, %v9416_v38 }
 0x1d4   : > { %v2556_v27 = vmax.f32 %v1301_v62, 0.0  ;;  %v2558_v45 = vmax.f32 %v1974_v4, 0.0  ;;  %v1303_v11 = vadd.f32 %v1302_v63, %v8906_v28 }
 0x1d5   : > { %v1306_v58 = vpop.f32.mrf.mxu0  ;;  %1545 = vmatmul.mubr.bf16.gmra.mxu0 %v8504_v52  ;;  %v1979_v44 = vpop.f32.mrf.mxu1  ;;  %2218 = vmatmul.mubr.bf16.gmra.mxu1 %v8504_v52 }
 0x1d6   : > { %v9631_v20 = vpack.c.bf16 %v2556_v27, %v2552_v14  ;;  %v9633_v16 = vpack.c.bf16 %v2558_v45, %v2554_v25  ;;  %v2557_v4 = vmax.f32 %v1303_v11, 0.0  ;;  %1554 = vmatprep.mubr.bf16.mxu0 %v12547_v31  ;;  %2227 = vmatprep.mubr.bf16.mxu1 %v12547_v31  ;;  %v1980_v40 = vadd.f32 %v1979_v44, %v8896_v22  ;;  %v8505_v25 = vld [vmem:[%s8727_s8 + $0x1b0] sm:$0xff]  }
 0x1d7   : > { %v1308_v6 = vpop.f32.mrf.mxu0  ;;  %v9638_v62 = vpop.f32.mrf.mxu1  ;;  %v1307_v52 = vadd.f32 %v1306_v58, %v8901_v24 }
 0x1d8   : > { %12620 = vst [vmem:[#allocation99_spill] sm:$0xff] %v9631_v20  ;;  %12621 = vst [vmem:[#allocation100_spill] sm:$0xff] %v9633_v16  ;;  %v9641_v29 = vpack.c.bf16 %v2557_v4, %v2553_v30  ;;  %v2562_v63 = vmax.f32 %v1980_v40, 0.0  ;;  %v1309_v45 = vadd.f32 %v1308_v6, %v8906_v28  ;;  %v9654_v6 = vpack.c.bf16 %v2391_v43, %v2387_v0 }
 0x1d9   : > { %12622 = vst [vmem:[#allocation101_spill] sm:$0xff] %v9638_v62  ;;  %v1310_v14 = vpop.f32.mrf.mxu0  ;;  %v1983_v27 = vpop.f32.mrf.mxu1  ;;  %v2560_v2 = vmax.f32 %v1307_v52, 0.0  ;;  %v2395_v43 = vmax.f32 %v1772_v12, 0.0  ;;  %v1782_v12 = vadd.f32 %v9109_v8, %v9416_v38 }
 0x1da   : > { %12623 = vst [vmem:[#allocation102_spill] sm:$0xff] %v9641_v29  ;;  %v1311_v11 = vadd.f32 %v1310_v14, %v8901_v24  ;;  %v1984_v16 = vadd.f32 %v1983_v27, %v8896_v22  ;;  %v2561_v14 = vmax.f32 %v1309_v45, 0.0  ;;  %v2399_v45 = vmax.f32 %v1776_v3, 0.0 }
 0x1db   : > { %v1312_v44 = vpop.f32.mrf.mxu0  ;;  %v9647_v20 = vpop.f32.mrf.mxu1  ;;  %v1786_v3 = vadd.f32 %v9118_v56, %v9416_v38 }
 0x1dc   : > { %v2564_v62 = vmax.f32 %v1311_v11, 0.0  ;;  %v2566_v58 = vmax.f32 %v1984_v16, 0.0  ;;  %v1313_v30 = vadd.f32 %v1312_v44, %v8906_v28 }
 0x1dd   : > { %v1316_v4 = vpop.f32.mrf.mxu0  ;;  %1555 = vmatmul.mubr.bf16.gmra.mxu0 %v8505_v25  ;;  %v1989_v40 = vpop.f32.mrf.mxu1  ;;  %2228 = vmatmul.mubr.bf16.gmra.mxu1 %v8505_v25 }
 0x1de   : > { %v9656_v27 = vpack.c.bf16 %v2564_v62, %v2560_v2  ;;  %v9658_v52 = vpack.c.bf16 %v2566_v58, %v2562_v63  ;;  %v2565_v16 = vmax.f32 %v1313_v30, 0.0  ;;  %1564 = vmatprep.mubr.bf16.mxu0 %v12547_v31  ;;  %2237 = vmatprep.mubr.bf16.mxu1 %v12547_v31  ;;  %v1990_v49 = vadd.f32 %v1989_v40, %v8896_v22  ;;  %v8509_v63 = vld [vmem:[%s8727_s8 + $0x1b8] sm:$0xff]  }
 0x1df   : > { %v1318_v26 = vpop.f32.mrf.mxu0  ;;  %v9663_v11 = vpop.f32.mrf.mxu1  ;;  %v1317_v25 = vadd.f32 %v1316_v4, %v8901_v24 }
 0x1e0   : > { %12624 = vst [vmem:[#allocation103_spill] sm:$0xff] %v9656_v27  ;;  %12625 = vst [vmem:[#allocation104_spill] sm:$0xff] %v9658_v52  ;;  %v9666_v0 = vpack.c.bf16 %v2565_v16, %v2561_v14  ;;  %v2570_v44 = vmax.f32 %v1990_v49, 0.0  ;;  %v1319_v58 = vadd.f32 %v1318_v26, %v8906_v28  ;;  %v9679_v26 = vpack.c.bf16 %v2399_v45, %v2395_v43 }
 0x1e1   : > { %12626 = vst [vmem:[#allocation105_spill] sm:$0xff] %v9663_v11  ;;  %v1320_v2 = vpop.f32.mrf.mxu0  ;;  %v1993_v62 = vpop.f32.mrf.mxu1  ;;  %v2568_v29 = vmax.f32 %v1317_v25, 0.0  ;;  %v2403_v45 = vmax.f32 %v1782_v12, 0.0  ;;  %v1792_v12 = vadd.f32 %v9128_v19, %v9416_v38 }
 0x1e2   : > { %12627 = vst [vmem:[#allocation106_spill] sm:$0xff] %v9666_v0  ;;  %v1321_v30 = vadd.f32 %v1320_v2, %v8901_v24  ;;  %v1994_v52 = vadd.f32 %v1993_v62, %v8896_v22  ;;  %v2569_v2 = vmax.f32 %v1319_v58, 0.0  ;;  %v2407_v58 = vmax.f32 %v1786_v3, 0.0 }
 0x1e3   : > { %v1322_v40 = vpop.f32.mrf.mxu0  ;;  %v9672_v27 = vpop.f32.mrf.mxu1  ;;  %v1796_v3 = vadd.f32 %v9140_v15, %v9416_v38 }
 0x1e4   : > { %v2572_v11 = vmax.f32 %v1321_v30, 0.0  ;;  %v2574_v4 = vmax.f32 %v1994_v52, 0.0  ;;  %v1323_v14 = vadd.f32 %v1322_v40, %v8906_v28 }
 0x1e5   : > { %v1326_v16 = vpop.f32.mrf.mxu0  ;;  %1565 = vmatmul.mubr.bf16.gmra.mxu0 %v8509_v63  ;;  %v1999_v49 = vpop.f32.mrf.mxu1  ;;  %2238 = vmatmul.mubr.bf16.gmra.mxu1 %v8509_v63 }
 0x1e6   : > { %v9681_v62 = vpack.c.bf16 %v2572_v11, %v2568_v29  ;;  %v9683_v25 = vpack.c.bf16 %v2574_v4, %v2570_v44  ;;  %v2573_v52 = vmax.f32 %v1323_v14, 0.0  ;;  %1574 = vmatprep.mubr.bf16.mxu0 %v12547_v31  ;;  %2247 = vmatprep.mubr.bf16.mxu1 %v12547_v31  ;;  %v2000_v8 = vadd.f32 %v1999_v49, %v8896_v22  ;;  %v8510_v44 = vld [vmem:[%s8727_s8 + $0x1c0] sm:$0xff]  }
 0x1e7   : > { %v1328_v56 = vpop.f32.mrf.mxu0  ;;  %v9688_v30 = vpop.f32.mrf.mxu1  ;;  %v1327_v63 = vadd.f32 %v1326_v16, %v8901_v24 }
 0x1e8   : > { %12628 = vst [vmem:[#allocation107_spill] sm:$0xff] %v9681_v62  ;;  %12629 = vst [vmem:[#allocation108_spill] sm:$0xff] %v9683_v25  ;;  %v9691_v43 = vpack.c.bf16 %v2573_v52, %v2569_v2  ;;  %v2578_v40 = vmax.f32 %v2000_v8, 0.0  ;;  %v1329_v4 = vadd.f32 %v1328_v56, %v8906_v28  ;;  %v9704_v56 = vpack.c.bf16 %v2407_v58, %v2403_v45 }
 0x1e9   : > { %12630 = vst [vmem:[#allocation109_spill] sm:$0xff] %v9688_v30  ;;  %v1330_v29 = vpop.f32.mrf.mxu0  ;;  %v2003_v11 = vpop.f32.mrf.mxu1  ;;  %v2576_v0 = vmax.f32 %v1327_v63, 0.0  ;;  %v2411_v58 = vmax.f32 %v1792_v12, 0.0  ;;  %v1802_v12 = vadd.f32 %v9153_v5, %v9416_v38 }
 0x1ea   : > { %12631 = vst [vmem:[#allocation110_spill] sm:$0xff] %v9691_v43  ;;  %v1331_v14 = vadd.f32 %v1330_v29, %v8901_v24  ;;  %v2004_v25 = vadd.f32 %v2003_v11, %v8896_v22  ;;  %v2577_v29 = vmax.f32 %v1329_v4, 0.0  ;;  %v2415_v4 = vmax.f32 %v1796_v3, 0.0 }
 0x1eb   : > { %v1332_v49 = vpop.f32.mrf.mxu0  ;;  %v9697_v62 = vpop.f32.mrf.mxu1  ;;  %v1806_v3 = vadd.f32 %v9162_v23, %v9416_v38 }
 0x1ec   : > { %v2580_v30 = vmax.f32 %v1331_v14, 0.0  ;;  %v2582_v16 = vmax.f32 %v2004_v25, 0.0  ;;  %v1333_v2 = vadd.f32 %v1332_v49, %v8906_v28 }
 0x1ed   : > { %v1336_v52 = vpop.f32.mrf.mxu0  ;;  %1575 = vmatmul.mubr.bf16.gmra.mxu0 %v8510_v44  ;;  %v2009_v8 = vpop.f32.mrf.mxu1  ;;  %2248 = vmatmul.mubr.bf16.gmra.mxu1 %v8510_v44 }
 0x1ee   : > { %v9706_v11 = vpack.c.bf16 %v2580_v30, %v2576_v0  ;;  %v9708_v63 = vpack.c.bf16 %v2582_v16, %v2578_v40  ;;  %v2581_v25 = vmax.f32 %v1333_v2, 0.0  ;;  %1584 = vmatprep.mubr.bf16.mxu0 %v12547_v31  ;;  %2257 = vmatprep.mubr.bf16.mxu1 %v12547_v31  ;;  %v2010_v19 = vadd.f32 %v2009_v8, %v8896_v22  ;;  %v8514_v40 = vld [vmem:[%s8727_s8 + $0x1c8] sm:$0xff]  }
 0x1ef   : > { %v1338_v15 = vpop.f32.mrf.mxu0  ;;  %v9713_v14 = vpop.f32.mrf.mxu1  ;;  %v1337_v44 = vadd.f32 %v1336_v52, %v8901_v24 }
 0x1f0   : > { %12632 = vst [vmem:[#allocation111_spill] sm:$0xff] %v9706_v11  ;;  %12633 = vst [vmem:[#allocation112_spill] sm:$0xff] %v9708_v63  ;;  %v9716_v45 = vpack.c.bf16 %v2581_v25, %v2577_v29  ;;  %v2586_v49 = vmax.f32 %v2010_v19, 0.0  ;;  %v1339_v16 = vadd.f32 %v1338_v15, %v8906_v28  ;;  %v9729_v15 = vpack.c.bf16 %v2415_v4, %v2411_v58 }
 0x1f1   : > { %12634 = vst [vmem:[#allocation113_spill] sm:$0xff] %v9713_v14  ;;  %v1340_v0 = vpop.f32.mrf.mxu0  ;;  %v2013_v30 = vpop.f32.mrf.mxu1  ;;  %v2584_v43 = vmax.f32 %v1337_v44, 0.0  ;;  %v2419_v4 = vmax.f32 %v1802_v12, 0.0  ;;  %v1812_v12 = vadd.f32 %v9172_v60, %v9416_v38 }
 0x1f2   : > { %12635 = vst [vmem:[#allocation114_spill] sm:$0xff] %v9716_v45  ;;  %v1341_v2 = vadd.f32 %v1340_v0, %v8901_v24  ;;  %v2014_v63 = vadd.f32 %v2013_v30, %v8896_v22  ;;  %v2585_v0 = vmax.f32 %v1339_v16, 0.0  ;;  %v2423_v16 = vmax.f32 %v1806_v3, 0.0 }
 0x1f3   : > { %v1342_v8 = vpop.f32.mrf.mxu0  ;;  %v9722_v11 = vpop.f32.mrf.mxu1  ;;  %v1816_v3 = vadd.f32 %v9187_v34, %v9416_v38 }
 0x1f4   : > { %v2588_v14 = vmax.f32 %v1341_v2, 0.0  ;;  %v2590_v52 = vmax.f32 %v2014_v63, 0.0  ;;  %v1343_v29 = vadd.f32 %v1342_v8, %v8906_v28 }
 0x1f5   : > { %v1346_v25 = vpop.f32.mrf.mxu0  ;;  %1585 = vmatmul.mubr.bf16.gmra.mxu0 %v8514_v40  ;;  %v2019_v19 = vpop.f32.mrf.mxu1  ;;  %2258 = vmatmul.mubr.bf16.gmra.mxu1 %v8514_v40 }
 0x1f6   : > { %v9731_v30 = vpack.c.bf16 %v2588_v14, %v2584_v43  ;;  %v9733_v44 = vpack.c.bf16 %v2590_v52, %v2586_v49  ;;  %v2589_v63 = vmax.f32 %v1343_v29, 0.0  ;;  %1594 = vmatprep.mubr.bf16.mxu0 %v12547_v31  ;;  %2267 = vmatprep.mubr.bf16.mxu1 %v12547_v31  ;;  %v2020_v5 = vadd.f32 %v2019_v19, %v8896_v22  ;;  %v8515_v49 = vld [vmem:[%s8727_s8 + $0x1d0] sm:$0xff]  }
 0x1f7   : > { %v1348_v23 = vpop.f32.mrf.mxu0  ;;  %v9738_v2 = vpop.f32.mrf.mxu1  ;;  %v1347_v40 = vadd.f32 %v1346_v25, %v8901_v24 }
 0x1f8   : > { %12636 = vst [vmem:[#allocation115_spill] sm:$0xff] %v9731_v30  ;;  %12637 = vst [vmem:[#allocation116_spill] sm:$0xff] %v9733_v44  ;;  %v9741_v58 = vpack.c.bf16 %v2589_v63, %v2585_v0  ;;  %v2594_v8 = vmax.f32 %v2020_v5, 0.0  ;;  %v1349_v52 = vadd.f32 %v1348_v23, %v8906_v28  ;;  %v9754_v23 = vpack.c.bf16 %v2423_v16, %v2419_v4 }
 0x1f9   : > { %12638 = vst [vmem:[#allocation117_spill] sm:$0xff] %v9738_v2  ;;  %v1350_v43 = vpop.f32.mrf.mxu0  ;;  %v2023_v14 = vpop.f32.mrf.mxu1  ;;  %v2592_v45 = vmax.f32 %v1347_v40, 0.0  ;;  %v2427_v16 = vmax.f32 %v1812_v12, 0.0  ;;  %v1822_v12 = vadd.f32 %v9197_v36, %v9416_v38 }
 0x1fa   : > { %12639 = vst [vmem:[#allocation118_spill] sm:$0xff] %v9741_v58  ;;  %v1351_v29 = vadd.f32 %v1350_v43, %v8901_v24  ;;  %v2024_v44 = vadd.f32 %v2023_v14, %v8896_v22  ;;  %v2593_v43 = vmax.f32 %v1349_v52, 0.0  ;;  %v2431_v52 = vmax.f32 %v1816_v3, 0.0 }
 0x1fb   : > { %v1352_v19 = vpop.f32.mrf.mxu0  ;;  %v9747_v30 = vpop.f32.mrf.mxu1  ;;  %v1826_v3 = vadd.f32 %v9206_v53, %v9416_v38 }
 0x1fc   : > { %v2596_v2 = vmax.f32 %v1351_v29, 0.0  ;;  %v2598_v25 = vmax.f32 %v2024_v44, 0.0  ;;  %v1353_v0 = vadd.f32 %v1352_v19, %v8906_v28 }
 0x1fd   : > { %v1356_v63 = vpop.f32.mrf.mxu0  ;;  %1595 = vmatmul.mubr.bf16.gmra.mxu0 %v8515_v49  ;;  %v2029_v5 = vpop.f32.mrf.mxu1  ;;  %2268 = vmatmul.mubr.bf16.gmra.mxu1 %v8515_v49 }
 0x1fe   : > { %v9756_v14 = vpack.c.bf16 %v2596_v2, %v2592_v45  ;;  %v9758_v40 = vpack.c.bf16 %v2598_v25, %v2594_v8  ;;  %v2597_v44 = vmax.f32 %v1353_v0, 0.0  ;;  %1604 = vmatprep.mubr.bf16.mxu0 %v12547_v31  ;;  %2277 = vmatprep.mubr.bf16.mxu1 %v12547_v31  ;;  %v2030_v60 = vadd.f32 %v2029_v5, %v8896_v22  ;;  %v8519_v8 = vld [vmem:[%s8727_s8 + $0x1d8] sm:$0xff]  }
 0x1ff   : > { %v1358_v34 = vpop.f32.mrf.mxu0  ;;  %v9763_v29 = vpop.f32.mrf.mxu1  ;;  %v1357_v49 = vadd.f32 %v1356_v63, %v8901_v24 }
 0x200   : > { %12640 = vst [vmem:[#allocation119_spill] sm:$0xff] %v9756_v14  ;;  %12641 = vst [vmem:[#allocation120_spill] sm:$0xff] %v9758_v40  ;;  %v9766_v4 = vpack.c.bf16 %v2597_v44, %v2593_v43  ;;  %v2602_v19 = vmax.f32 %v2030_v60, 0.0  ;;  %v1359_v25 = vadd.f32 %v1358_v34, %v8906_v28  ;;  %v9779_v34 = vpack.c.bf16 %v2431_v52, %v2427_v16 }
 0x201   : > { %12642 = vst [vmem:[#allocation121_spill] sm:$0xff] %v9763_v29  ;;  %v1360_v45 = vpop.f32.mrf.mxu0  ;;  %v2033_v2 = vpop.f32.mrf.mxu1  ;;  %v2600_v58 = vmax.f32 %v1357_v49, 0.0  ;;  %v2435_v52 = vmax.f32 %v1822_v12, 0.0  ;;  %v1832_v12 = vadd.f32 %v9216_v37, %v9416_v38 }
 0x202   : > { %12643 = vst [vmem:[#allocation122_spill] sm:$0xff] %v9766_v4  ;;  %v1361_v0 = vadd.f32 %v1360_v45, %v8901_v24  ;;  %v2034_v40 = vadd.f32 %v2033_v2, %v8896_v22  ;;  %v2601_v45 = vmax.f32 %v1359_v25, 0.0  ;;  %v2439_v25 = vmax.f32 %v1826_v3, 0.0 }
 0x203   : > { %v1362_v5 = vpop.f32.mrf.mxu0  ;;  %v9772_v14 = vpop.f32.mrf.mxu1  ;;  %v1836_v3 = vadd.f32 %v9228_v47, %v9416_v38 }
 0x204   : > { %v2604_v29 = vmax.f32 %v1361_v0, 0.0  ;;  %v2606_v63 = vmax.f32 %v2034_v40, 0.0  ;;  %v1363_v43 = vadd.f32 %v1362_v5, %v8906_v28 }
 0x205   : > { %v1366_v44 = vpop.f32.mrf.mxu0  ;;  %1605 = vmatmul.mubr.bf16.gmra.mxu0 %v8519_v8  ;;  %v2039_v60 = vpop.f32.mrf.mxu1  ;;  %2278 = vmatmul.mubr.bf16.gmra.mxu1 %v8519_v8 }
 0x206   : > { %v9781_v2 = vpack.c.bf16 %v2604_v29, %v2600_v58  ;;  %v9783_v49 = vpack.c.bf16 %v2606_v63, %v2602_v19  ;;  %v2605_v40 = vmax.f32 %v1363_v43, 0.0  ;;  %1614 = vmatprep.mubr.bf16.mxu0 %v12547_v31  ;;  %2287 = vmatprep.mubr.bf16.mxu1 %v12547_v31  ;;  %v2040_v36 = vadd.f32 %v2039_v60, %v8896_v22  ;;  %v8526_v19 = vld [vmem:[%s8727_s8 + $0x1e0] sm:$0xff]  }
 0x207   : > { %v1368_v53 = vpop.f32.mrf.mxu0  ;;  %v9788_v0 = vpop.f32.mrf.mxu1  ;;  %v1367_v8 = vadd.f32 %v1366_v44, %v8901_v24 }
 0x208   : > { %12644 = vst [vmem:[#allocation123_spill] sm:$0xff] %v9781_v2  ;;  %12645 = vst [vmem:[#allocation124_spill] sm:$0xff] %v9783_v49  ;;  %v9791_v16 = vpack.c.bf16 %v2605_v40, %v2601_v45  ;;  %v2610_v5 = vmax.f32 %v2040_v36, 0.0  ;;  %v1369_v63 = vadd.f32 %v1368_v53, %v8906_v28  ;;  %v9804_v53 = vpack.c.bf16 %v2439_v25, %v2435_v52 }
 0x209   : > { %12646 = vst [vmem:[#allocation125_spill] sm:$0xff] %v9788_v0  ;;  %v1370_v58 = vpop.f32.mrf.mxu0  ;;  %v2043_v29 = vpop.f32.mrf.mxu1  ;;  %v2608_v4 = vmax.f32 %v1367_v8, 0.0  ;;  %v2443_v25 = vmax.f32 %v1832_v12, 0.0  ;;  %v1842_v12 = vadd.f32 %v9241_v39, %v9416_v38 }
 0x20a   : > { %12647 = vst [vmem:[#allocation126_spill] sm:$0xff] %v9791_v16  ;;  %v1371_v43 = vadd.f32 %v1370_v58, %v8901_v24  ;;  %v2044_v49 = vadd.f32 %v2043_v29, %v8896_v22  ;;  %v2609_v58 = vmax.f32 %v1369_v63, 0.0  ;;  %v2447_v63 = vmax.f32 %v1836_v3, 0.0 }
 0x20b   : > { %v1372_v60 = vpop.f32.mrf.mxu0  ;;  %v9797_v2 = vpop.f32.mrf.mxu1  ;;  %v1846_v3 = vadd.f32 %v9250_v10, %v9416_v38 }
 0x20c   : > { %v2612_v0 = vmax.f32 %v1371_v43, 0.0  ;;  %v2614_v44 = vmax.f32 %v2044_v49, 0.0  ;;  %v1373_v45 = vadd.f32 %v1372_v60, %v8906_v28 }
 0x20d   : > { %v1376_v40 = vpop.f32.mrf.mxu0  ;;  %1615 = vmatmul.mubr.bf16.gmra.mxu0 %v8526_v19  ;;  %v2049_v36 = vpop.f32.mrf.mxu1  ;;  %2288 = vmatmul.mubr.bf16.gmra.mxu1 %v8526_v19 }
 0x20e   : > { %v9806_v29 = vpack.c.bf16 %v2612_v0, %v2608_v4  ;;  %v9808_v8 = vpack.c.bf16 %v2614_v44, %v2610_v5  ;;  %v2613_v49 = vmax.f32 %v1373_v45, 0.0  ;;  %1624 = vmatprep.mubr.bf16.mxu0 %v12547_v31  ;;  %2297 = vmatprep.mubr.bf16.mxu1 %v12547_v31  ;;  %v2050_v37 = vadd.f32 %v2049_v36, %v8896_v22  ;;  %v8536_v5 = vld [vmem:[%s8727_s8 + $0x1e8] sm:$0xff]  }
 0x20f   : > { %v1378_v47 = vpop.f32.mrf.mxu0  ;;  %v9813_v43 = vpop.f32.mrf.mxu1  ;;  %v1377_v19 = vadd.f32 %v1376_v40, %v8901_v24 }
 0x210   : > { %12648 = vst [vmem:[#allocation127_spill] sm:$0xff] %v9806_v29  ;;  %12649 = vst [vmem:[#allocation128_spill] sm:$0xff] %v9808_v8  ;;  %v9816_v52 = vpack.c.bf16 %v2613_v49, %v2609_v58  ;;  %v2618_v60 = vmax.f32 %v2050_v37, 0.0  ;;  %v1379_v44 = vadd.f32 %v1378_v47, %v8906_v28  ;;  %v9829_v47 = vpack.c.bf16 %v2447_v63, %v2443_v25 }
 0x211   : > { %12650 = vst [vmem:[#allocation129_spill] sm:$0xff] %v9813_v43  ;;  %v1380_v4 = vpop.f32.mrf.mxu0  ;;  %v2053_v0 = vpop.f32.mrf.mxu1  ;;  %v2616_v16 = vmax.f32 %v1377_v19, 0.0  ;;  %v2451_v63 = vmax.f32 %v1842_v12, 0.0  ;;  %v1852_v12 = vadd.f32 %v9260_v33, %v9416_v38 }
 0x212   : > { %12651 = vst [vmem:[#allocation130_spill] sm:$0xff] %v9816_v52  ;;  %v1381_v45 = vadd.f32 %v1380_v4, %v8901_v24  ;;  %v2054_v8 = vadd.f32 %v2053_v0, %v8896_v22  ;;  %v2617_v4 = vmax.f32 %v1379_v44, 0.0  ;;  %v2455_v44 = vmax.f32 %v1846_v3, 0.0 }
 0x213   : > { %v1382_v36 = vpop.f32.mrf.mxu0  ;;  %v9822_v29 = vpop.f32.mrf.mxu1  ;;  %v1856_v3 = vadd.f32 %v9275_v59, %v9416_v38 }
 0x214   : > { %v2620_v43 = vmax.f32 %v1381_v45, 0.0  ;;  %v2622_v40 = vmax.f32 %v2054_v8, 0.0  ;;  %v1383_v58 = vadd.f32 %v1382_v36, %v8906_v28 }
 0x215   : > { %v1386_v49 = vpop.f32.mrf.mxu0  ;;  %1625 = vmatmul.mubr.bf16.gmra.mxu0 %v8536_v5  ;;  %v2059_v37 = vpop.f32.mrf.mxu1  ;;  %2298 = vmatmul.mubr.bf16.gmra.mxu1 %v8536_v5 }
 0x216   : > { %v9831_v0 = vpack.c.bf16 %v2620_v43, %v2616_v16  ;;  %v9833_v19 = vpack.c.bf16 %v2622_v40, %v2618_v60  ;;  %v2621_v8 = vmax.f32 %v1383_v58, 0.0  ;;  %1634 = vmatprep.mubr.bf16.mxu0 %v12547_v31  ;;  %2307 = vmatprep.mubr.bf16.mxu1 %v12547_v31  ;;  %v2060_v39 = vadd.f32 %v2059_v37, %v8896_v22  ;;  %v8543_v60 = vld [vmem:[%s8727_s8 + $0x1f0] sm:$0xff]  }
 0x217   : > { %v1388_v10 = vpop.f32.mrf.mxu0  ;;  %v9838_v45 = vpop.f32.mrf.mxu1  ;;  %v1387_v5 = vadd.f32 %v1386_v49, %v8901_v24 }
 0x218   : > { %12652 = vst [vmem:[#allocation131_spill] sm:$0xff] %v9831_v0  ;;  %12653 = vst [vmem:[#allocation132_spill] sm:$0xff] %v9833_v19  ;;  %v9841_v25 = vpack.c.bf16 %v2621_v8, %v2617_v4  ;;  %v2626_v36 = vmax.f32 %v2060_v39, 0.0  ;;  %v1389_v40 = vadd.f32 %v1388_v10, %v8906_v28  ;;  %v9854_v10 = vpack.c.bf16 %v2455_v44, %v2451_v63 }
 0x219   : > { %12654 = vst [vmem:[#allocation133_spill] sm:$0xff] %v9838_v45  ;;  %v1390_v16 = vpop.f32.mrf.mxu0  ;;  %v2063_v43 = vpop.f32.mrf.mxu1  ;;  %v2624_v52 = vmax.f32 %v1387_v5, 0.0  ;;  %v2459_v44 = vmax.f32 %v1852_v12, 0.0  ;;  %v1862_v12 = vadd.f32 %v9285_v9, %v9416_v38 }
 0x21a   : > { %12655 = vst [vmem:[#allocation134_spill] sm:$0xff] %v9841_v25  ;;  %v1391_v58 = vadd.f32 %v1390_v16, %v8901_v24  ;;  %v2064_v19 = vadd.f32 %v2063_v43, %v8896_v22  ;;  %v2625_v16 = vmax.f32 %v1389_v40, 0.0  ;;  %v2463_v40 = vmax.f32 %v1856_v3, 0.0 }
 0x21b   : > { %v1392_v37 = vpop.f32.mrf.mxu0  ;;  %v9847_v0 = vpop.f32.mrf.mxu1  ;;  %v1866_v3 = vadd.f32 %v9294_v32, %v9416_v38 }
 0x21c   : > { %v2628_v45 = vmax.f32 %v1391_v58, 0.0  ;;  %v2630_v49 = vmax.f32 %v2064_v19, 0.0  ;;  %v1393_v4 = vadd.f32 %v1392_v37, %v8906_v28 }
 0x21d   : > { %v1396_v8 = vpop.f32.mrf.mxu0  ;;  %1635 = vmatmul.mubr.bf16.gmra.mxu0 %v8543_v60  ;;  %v2069_v39 = vpop.f32.mrf.mxu1  ;;  %2308 = vmatmul.mubr.bf16.gmra.mxu1 %v8543_v60 }
 0x21e   : > { %v9856_v43 = vpack.c.bf16 %v2628_v45, %v2624_v52  ;;  %v9858_v5 = vpack.c.bf16 %v2630_v49, %v2626_v36  ;;  %v2629_v19 = vmax.f32 %v1393_v4, 0.0  ;;  %1644 = vmatprep.mubr.bf16.mxu0 %v12547_v31  ;;  %2317 = vmatprep.mubr.bf16.mxu1 %v12547_v31  ;;  %v2070_v33 = vadd.f32 %v2069_v39, %v8896_v22  ;;  %v8550_v36 = vld [vmem:[%s8727_s8 + $0x1f8] sm:$0xff]  }
 0x21f   : > { %v1398_v59 = vpop.f32.mrf.mxu0  ;;  %v9863_v58 = vpop.f32.mrf.mxu1  ;;  %v1397_v60 = vadd.f32 %v1396_v8, %v8901_v24 }
 0x220   : > { %12656 = vst [vmem:[#allocation135_spill] sm:$0xff] %v9856_v43  ;;  %12657 = vst [vmem:[#allocation136_spill] sm:$0xff] %v9858_v5  ;;  %v9866_v63 = vpack.c.bf16 %v2629_v19, %v2625_v16  ;;  %v2634_v37 = vmax.f32 %v2070_v33, 0.0  ;;  %v1399_v49 = vadd.f32 %v1398_v59, %v8906_v28  ;;  %v9879_v59 = vpack.c.bf16 %v2463_v40, %v2459_v44 }
 0x221   : > { %12658 = vst [vmem:[#allocation137_spill] sm:$0xff] %v9863_v58  ;;  %v1400_v52 = vpop.f32.mrf.mxu0  ;;  %v2073_v45 = vpop.f32.mrf.mxu1  ;;  %v2632_v25 = vmax.f32 %v1397_v60, 0.0  ;;  %v2467_v44 = vmax.f32 %v1862_v12, 0.0  ;;  %v2471_v40 = vmax.f32 %v1866_v3, 0.0 }
 0x222   : > { %12659 = vst [vmem:[#allocation138_spill] sm:$0xff] %v9866_v63  ;;  %v1401_v4 = vadd.f32 %v1400_v52, %v8901_v24  ;;  %v2074_v5 = vadd.f32 %v2073_v45, %v8896_v22  ;;  %v2633_v52 = vmax.f32 %v1399_v49, 0.0 }
 0x223   : > { %v1402_v39 = vpop.f32.mrf.mxu0  ;;  %v9872_v43 = vpop.f32.mrf.mxu1 }
 0x224   : > { %v2636_v58 = vmax.f32 %v1401_v4, 0.0  ;;  %v2638_v8 = vmax.f32 %v2074_v5, 0.0  ;;  %v1403_v16 = vadd.f32 %v1402_v39, %v8906_v28 }
 0x225   : > { %v1406_v19 = vpop.f32.mrf.mxu0  ;;  %1645 = vmatmul.mubr.bf16.gmra.mxu0 %v8550_v36  ;;  %v2079_v33 = vpop.f32.mrf.mxu1  ;;  %2318 = vmatmul.mubr.bf16.gmra.mxu1 %v8550_v36 }
 0x226   : > { %v9881_v45 = vpack.c.bf16 %v2636_v58, %v2632_v25  ;;  %v9883_v60 = vpack.c.bf16 %v2638_v8, %v2634_v37  ;;  %v2637_v5 = vmax.f32 %v1403_v16, 0.0  ;;  %3524 = vmatprep.mubr.bf16.mxu0 %v8936_v57  ;;  %4197 = vmatprep.mubr.bf16.mxu1 %v9473_v48  ;;  %v2080_v9 = vadd.f32 %v2079_v33, %v8896_v22  ;;  %v8557_v8 = vld [vmem:[%s12512_s3 + $0x38] sm:$0xff]  }
 0x227   : > { %v1408_v4 = vpop.f32.mrf.mxu0  ;;  %v9888_v32 = vpop.f32.mrf.mxu1  ;;  %v1407_v39 = vadd.f32 %v1406_v19, %v8901_v24 }
 0x228   : > { %12660 = vst [vmem:[#allocation139_spill] sm:$0xff] %v9881_v45  ;;  %12661 = vst [vmem:[#allocation140_spill] sm:$0xff] %v9883_v60  ;;  %v9891_v36 = vpack.c.bf16 %v2637_v5, %v2633_v52  ;;  %v2642_v37 = vmax.f32 %v2080_v9, 0.0  ;;  %v1409_v49 = vadd.f32 %v1408_v4, %v8906_v28  ;;  %v1872_v5 = vadd.f32 %v9304_v46, %v9416_v38 }
 0x229   : > { %v1410_v25 = vpop.f32.mrf.mxu0  ;;  %v2083_v58 = vpop.f32.mrf.mxu1  ;;  %v2640_v19 = vmax.f32 %v1407_v39, 0.0  ;;  %v1876_v9 = vadd.f32 %v9319_v13, %v9416_v38  ;;  %v9908_v60 = vpack.c.bf16 %v2471_v40, %v2467_v44  ;;  %v8558_v13 = vld [vmem:[%s12512_s3 + $0x30] sm:$0xff]  }
 0x22a   : > { %12662 = vst [vmem:[#allocation141_spill] sm:$0xff] %v9891_v36  ;;  %v1411_v57 = vadd.f32 %v1410_v25, %v8901_v24  ;;  %v2084_v48 = vadd.f32 %v2083_v58, %v8896_v22  ;;  %v12663_v58 = vld [vmem:[#allocation3_spill] sm:$0xff]  ;;  %v2641_v45 = vmax.f32 %v1409_v49, 0.0 }
 0x22b   : > { %v1412_v16 = vpop.f32.mrf.mxu0  ;;  %v9899_v33 = vpop.f32.mrf.mxu1  ;;  %v2479_v49 = vmax.f32 %v1876_v9, 0.0 }
 0x22c   : > { %v2644_v52 = vmax.f32 %v1411_v57, 0.0  ;;  %v2646_v12 = vmax.f32 %v2084_v48, 0.0  ;;  %v1413_v3 = vadd.f32 %v1412_v16, %v8906_v28  ;;  %v12666_v16 = vld [vmem:[#allocation6_spill] sm:$0xff] }
 0x22d   : > { %v1416_v4 = vpop.f32.mrf.mxu0  ;;  %v2089_v25 = vpop.f32.mrf.mxu1  ;;  %3525 = vmatmul.mubr.bf16.vlgmr.msra.gmra.mxu0 %v8926_v50  ;;  %4198 = vmatmul.mubr.bf16.vlgmr.msra.gmra.mxu1 %v12663_v58 }
 0x22e   : > { %v9910_v39 = vpack.c.bf16 %v2644_v52, %v2640_v19  ;;  %v9912_v57 = vpack.c.bf16 %v2646_v12, %v2642_v37  ;;  %v2645_v48 = vmax.f32 %v1413_v3, 0.0  ;;  %3534 = vmatprep.mubr.bf16.mxu0 %v12666_v16  ;;  %5358 = vmatpush1.bf16.msra.mxu0 %v8557_v8  ;;  %v2090_v46 = vadd.f32 %v2089_v25, %v8896_v22  ;;  %v12669_v16 = vld [vmem:[#allocation57_spill] sm:$0xff] }
 0x22f   : > { %v1418_v50 = vpop.f32.mrf.mxu0  ;;  %v9919_v36 = vpop.f32.mrf.mxu1  ;;  %4207 = vmatprep.mubr.bf16.mxu1 %v9504_v61  ;;  %5359 = vmatprep.subr.bf16.mxu0 %v12547_v31  ;;  %v1417_v44 = vadd.f32 %v1416_v4, %v8901_v24  ;;  %v2475_v37 = vmax.f32 %v1872_v5, 0.0 }
 0x230   : > { %12664 = vst [vmem:[#allocation3_spill] sm:$0xff] %v9910_v39  ;;  %12665 = vst [vmem:[#allocation142_spill] sm:$0xff] %v9912_v57  ;;  %v9924_v40 = vpack.c.bf16 %v2645_v48, %v2641_v45  ;;  %v2650_v52 = vmax.f32 %v2090_v46, 0.0  ;;  %v1419_v12 = vadd.f32 %v1418_v50, %v8906_v28  ;;  %v8559_v45 = vld [vmem:[%s12512_s3 + $0x28] sm:$0xff]   ;;  %v1882_v46 = vadd.f32 %v12669_v16, %v9416_v38  ;;  %v12671_v57 = vld [vmem:[#allocation4_spill] sm:$0xff] }
 0x231   : > { %v1420_v8 = vpop.f32.mrf.mxu0  ;;  %v2093_v19 = vpop.f32.mrf.mxu1  ;;  %v2648_v5 = vmax.f32 %v1417_v44, 0.0  ;;  %v12670_v50 = vld [vmem:[#allocation59_spill] sm:$0xff]  ;;  %v12672_v39 = vld [vmem:[#allocation5_spill] sm:$0xff] }
 0x232   : > { %12667 = vst [vmem:[#allocation6_spill] sm:$0xff] %v9924_v40  ;;  %v1421_v3 = vadd.f32 %v1420_v8, %v8901_v24  ;;  %v2094_v25 = vadd.f32 %v2093_v19, %v8896_v22  ;;  %5360 = vmatpush1.bf16.msra.mxu0 %v8558_v13  ;;  %v1886_v13 = vadd.f32 %v12670_v50, %v9416_v38  ;;  %v2649_v63 = vmax.f32 %v1419_v12, 0.0 }
 0x233   : > { %v1422_v58 = vpop.f32.mrf.mxu0  ;;  %v9929_v61 = vpop.f32.mrf.mxu1  ;;  %5361 = vmatprep.subr.bf16.mxu0 %v12547_v31  ;;  %v9942_v40 = vpack.c.bf16 %v2479_v49, %v2475_v37  ;;  %v2483_v49 = vmax.f32 %v1882_v46, 0.0 }
 0x234   : > { %12668 = vst [vmem:[#allocation143_spill] sm:$0xff] %v9929_v61  ;;  %v2652_v9 = vmax.f32 %v1421_v3, 0.0  ;;  %v2654_v4 = vmax.f32 %v2094_v25, 0.0  ;;  %v1423_v48 = vadd.f32 %v1422_v58, %v8906_v28  ;;  %v12675_v58 = vld [vmem:[#allocation9_spill] sm:$0xff] }
 0x235   : > { %v1426_v8 = vpop.f32.mrf.mxu0  ;;  %v2099_v19 = vpop.f32.mrf.mxu1  ;;  %3535 = vmatmul.mubr.bf16.gmra.mxu0 %v12671_v57  ;;  %4208 = vmatmul.mubr.bf16.gmra.mxu1 %v12672_v39  ;;  %v8560_v39 = vld [vmem:[%s12512_s3 + $0x20] sm:$0xff]  }
 0x236   : > { %v9944_v44 = vpack.c.bf16 %v2652_v9, %v2648_v5  ;;  %v9946_v3 = vpack.c.bf16 %v2654_v4, %v2650_v52  ;;  %v2653_v25 = vmax.f32 %v1423_v48, 0.0  ;;  %3544 = vmatprep.mubr.bf16.mxu0 %v12675_v58  ;;  %4217 = vmatprep.mubr.bf16.mxu1 %v9529_v35  ;;  %v2100_v16 = vadd.f32 %v2099_v19, %v8896_v22  ;;  %v12678_v58 = vld [vmem:[#allocation62_spill] sm:$0xff] }
 0x237   : > { %v1428_v50 = vpop.f32.mrf.mxu0  ;;  %v9951_v61 = vpop.f32.mrf.mxu1  ;;  %5362 = vmatpush1.bf16.msra.mxu0 %v8559_v45  ;;  %v1427_v57 = vadd.f32 %v1426_v8, %v8901_v24  ;;  %v2487_v52 = vmax.f32 %v1886_v13, 0.0 }
 0x238   : > { %12673 = vst [vmem:[#allocation57_spill] sm:$0xff] %v9944_v44  ;;  %12674 = vst [vmem:[#allocation59_spill] sm:$0xff] %v9946_v3  ;;  %5363 = vmatprep.subr.bf16.mxu0 %v12547_v31  ;;  %v9958_v37 = vpack.c.bf16 %v2653_v25, %v2649_v63  ;;  %v2658_v5 = vmax.f32 %v2100_v16, 0.0  ;;  %v1429_v9 = vadd.f32 %v1428_v50, %v8906_v28  ;;  %v8561_v63 = vld [vmem:[%s12512_s3 + $0x18] sm:$0xff]   ;;  %v12680_v3 = vld [vmem:[#allocation8_spill] sm:$0xff] }
 0x239   : > { %v1430_v12 = vpop.f32.mrf.mxu0  ;;  %v2103_v35 = vpop.f32.mrf.mxu1  ;;  %v2656_v8 = vmax.f32 %v1427_v57, 0.0  ;;  %v1892_v16 = vadd.f32 %v12678_v58, %v9416_v38  ;;  %v1896_v50 = vadd.f32 %v9387_v18, %v9416_v38  ;;  %v9976_v44 = vpack.c.bf16 %v2487_v52, %v2483_v49 }
 0x23a   : > { %12676 = vst [vmem:[#allocation4_spill] sm:$0xff] %v9958_v37  ;;  %v1431_v4 = vadd.f32 %v1430_v12, %v8901_v24  ;;  %v2104_v45 = vadd.f32 %v2103_v35, %v8896_v22  ;;  %v2657_v57 = vmax.f32 %v1429_v9, 0.0  ;;  %v12683_v37 = vld [vmem:[#allocation12_spill] sm:$0xff] }
 0x23b   : > { %v1432_v48 = vpop.f32.mrf.mxu0  ;;  %v9963_v19 = vpop.f32.mrf.mxu1  ;;  %5364 = vmatpush1.bf16.msra.mxu0 %v8560_v39  ;;  %v12679_v39 = vld [vmem:[#allocation7_spill] sm:$0xff]  ;;  %v2491_v52 = vmax.f32 %v1892_v16, 0.0  ;;  %v12686_v16 = vld [vmem:[#allocation66_spill] sm:$0xff] }
 0x23c   : > { %12677 = vst [vmem:[#allocation5_spill] sm:$0xff] %v9963_v19  ;;  %v2660_v46 = vmax.f32 %v1431_v4, 0.0  ;;  %v2662_v13 = vmax.f32 %v2104_v45, 0.0  ;;  %v1433_v25 = vadd.f32 %v1432_v48, %v8906_v28  ;;  %5365 = vmatprep.subr.bf16.mxu0 %v12547_v31 }
 0x23d   : > { %v1436_v12 = vpop.f32.mrf.mxu0  ;;  %v2109_v35 = vpop.f32.mrf.mxu1  ;;  %3545 = vmatmul.mubr.bf16.gmra.mxu0 %v12679_v39  ;;  %4218 = vmatmul.mubr.bf16.gmra.mxu1 %v12680_v3 }
 0x23e   : > { %v9978_v4 = vpack.c.bf16 %v2660_v46, %v2656_v8  ;;  %v9980_v45 = vpack.c.bf16 %v2662_v13, %v2658_v5  ;;  %v2661_v48 = vmax.f32 %v1433_v25, 0.0  ;;  %3554 = vmatprep.mubr.bf16.mxu0 %v12683_v37  ;;  %4227 = vmatprep.mubr.bf16.mxu1 %v9554_v1  ;;  %v2110_v18 = vadd.f32 %v2109_v35, %v8896_v22 }
 0x23f   : > { %v1438_v58 = vpop.f32.mrf.mxu0  ;;  %v9985_v19 = vpop.f32.mrf.mxu1  ;;  %5366 = vmatpush1.bf16.msra.mxu0 %v8561_v63  ;;  %v1437_v3 = vadd.f32 %v1436_v12, %v8901_v24  ;;  %v2495_v5 = vmax.f32 %v1896_v50, 0.0  ;;  %v1902_v50 = vadd.f32 %v12686_v16, %v9416_v38 }
 0x240   : > { %12681 = vst [vmem:[#allocation9_spill] sm:$0xff] %v9978_v4  ;;  %12682 = vst [vmem:[#allocation62_spill] sm:$0xff] %v9980_v45  ;;  %5367 = vmatprep.subr.bf16.mxu0 %v12547_v31  ;;  %v9989_v49 = vpack.c.bf16 %v2661_v48, %v2657_v57  ;;  %v2666_v46 = vmax.f32 %v2110_v18, 0.0  ;;  %v1439_v37 = vadd.f32 %v1438_v58, %v8906_v28  ;;  %v12687_v48 = vld [vmem:[#allocation68_spill] sm:$0xff]  ;;  %v12688_v4 = vld [vmem:[#allocation10_spill] sm:$0xff] }
 0x241   : > { %v1440_v9 = vpop.f32.mrf.mxu0  ;;  %v2113_v8 = vpop.f32.mrf.mxu1  ;;  %v2664_v63 = vmax.f32 %v1437_v3, 0.0  ;;  %v1906_v18 = vadd.f32 %v12687_v48, %v9416_v38 }
 0x242   : > { %12684 = vst [vmem:[#allocation7_spill] sm:$0xff] %v9989_v49  ;;  %v1441_v1 = vadd.f32 %v1440_v9, %v8901_v24  ;;  %v2114_v13 = vadd.f32 %v2113_v8, %v8896_v22  ;;  %v12689_v9 = vld [vmem:[#allocation11_spill] sm:$0xff]  ;;  %v10003_v8 = vpack.c.bf16 %v2495_v5, %v2491_v52  ;;  %v2665_v49 = vmax.f32 %v1439_v37, 0.0 }
 0x243   : > { %v1442_v25 = vpop.f32.mrf.mxu0  ;;  %v9994_v35 = vpop.f32.mrf.mxu1  ;;  %v2499_v52 = vmax.f32 %v1902_v50, 0.0  ;;  %v2503_v5 = vmax.f32 %v1906_v18, 0.0  ;;  %v12697_v18 = vld [vmem:[#allocation73_spill] sm:$0xff] }
 0x244   : > { %12685 = vst [vmem:[#allocation8_spill] sm:$0xff] %v9994_v35  ;;  %v2668_v12 = vmax.f32 %v1441_v1, 0.0  ;;  %v2670_v39 = vmax.f32 %v2114_v13, 0.0  ;;  %v1443_v57 = vadd.f32 %v1442_v25, %v8906_v28  ;;  %v12692_v25 = vld [vmem:[#allocation15_spill] sm:$0xff] }
 0x245   : > { %v1446_v45 = vpop.f32.mrf.mxu0  ;;  %v2119_v58 = vpop.f32.mrf.mxu1  ;;  %3555 = vmatmul.mubr.bf16.gmra.mxu0 %v12688_v4  ;;  %4228 = vmatmul.mubr.bf16.gmra.mxu1 %v12689_v9 }
 0x246   : > { %v10005_v3 = vpack.c.bf16 %v2668_v12, %v2664_v63  ;;  %v10007_v1 = vpack.c.bf16 %v2670_v39, %v2666_v46  ;;  %v2669_v13 = vmax.f32 %v1443_v57, 0.0  ;;  %3564 = vmatprep.mubr.bf16.mxu0 %v12692_v25  ;;  %4237 = vmatprep.mubr.bf16.mxu1 %v9579_v41  ;;  %v2120_v16 = vadd.f32 %v2119_v58, %v8896_v22 }
 0x247   : > { %v1448_v48 = vpop.f32.mrf.mxu0  ;;  %v10012_v35 = vpop.f32.mrf.mxu1  ;;  %v1447_v4 = vadd.f32 %v1446_v45, %v8901_v24 }
 0x248   : > { %12690 = vst [vmem:[#allocation12_spill] sm:$0xff] %v10005_v3  ;;  %12691 = vst [vmem:[#allocation66_spill] sm:$0xff] %v10007_v1  ;;  %v10015_v9 = vpack.c.bf16 %v2669_v13, %v2665_v49  ;;  %v2674_v46 = vmax.f32 %v2120_v16, 0.0  ;;  %v1449_v12 = vadd.f32 %v1448_v48, %v8906_v28  ;;  %v12696_v49 = vld [vmem:[#allocation71_spill] sm:$0xff]  ;;  %v1916_v13 = vadd.f32 %v12697_v18, %v9416_v38 }
 0x249   : > { %12693 = vst [vmem:[#allocation68_spill] sm:$0xff] %v10012_v35  ;;  %v1450_v37 = vpop.f32.mrf.mxu0  ;;  %v2123_v63 = vpop.f32.mrf.mxu1  ;;  %v2672_v25 = vmax.f32 %v1447_v4, 0.0  ;;  %v1912_v50 = vadd.f32 %v12696_v49, %v9416_v38 }
 0x24a   : > { %12694 = vst [vmem:[#allocation10_spill] sm:$0xff] %v10015_v9  ;;  %v1451_v39 = vadd.f32 %v1450_v37, %v8901_v24  ;;  %v2124_v41 = vadd.f32 %v2123_v63, %v8896_v22  ;;  %v12698_v9 = vld [vmem:[#allocation13_spill] sm:$0xff]  ;;  %v12699_v37 = vld [vmem:[#allocation14_spill] sm:$0xff]  ;;  %v10029_v63 = vpack.c.bf16 %v2503_v5, %v2499_v52  ;;  %v2511_v5 = vmax.f32 %v1916_v13, 0.0 }
 0x24b   : > { %v1452_v57 = vpop.f32.mrf.mxu0  ;;  %v10020_v58 = vpop.f32.mrf.mxu1  ;;  %v2507_v52 = vmax.f32 %v1912_v50, 0.0 }
 0x24c   : > { %12695 = vst [vmem:[#allocation11_spill] sm:$0xff] %v10020_v58  ;;  %v2676_v1 = vmax.f32 %v1451_v39, 0.0  ;;  %v2678_v3 = vmax.f32 %v2124_v41, 0.0  ;;  %v1453_v45 = vadd.f32 %v1452_v57, %v8906_v28  ;;  %v2673_v58 = vmax.f32 %v1449_v12, 0.0  ;;  %v12702_v57 = vld [vmem:[#allocation18_spill] sm:$0xff] }
 0x24d   : > { %v1456_v16 = vpop.f32.mrf.mxu0  ;;  %v2129_v48 = vpop.f32.mrf.mxu1  ;;  %3565 = vmatmul.mubr.bf16.gmra.mxu0 %v12698_v9  ;;  %4238 = vmatmul.mubr.bf16.gmra.mxu1 %v12699_v37 }
 0x24e   : > { %v10031_v4 = vpack.c.bf16 %v2676_v1, %v2672_v25  ;;  %v10033_v39 = vpack.c.bf16 %v2678_v3, %v2674_v46  ;;  %v2677_v41 = vmax.f32 %v1453_v45, 0.0  ;;  %3574 = vmatprep.mubr.bf16.mxu0 %v12702_v57  ;;  %4247 = vmatprep.mubr.bf16.mxu1 %v9604_v21  ;;  %v2130_v49 = vadd.f32 %v2129_v48, %v8896_v22  ;;  %v8562_v3 = vld [vmem:[%s12512_s3 + $0x10] sm:$0xff]  }
 0x24f   : > { %v1458_v18 = vpop.f32.mrf.mxu0  ;;  %v10038_v35 = vpop.f32.mrf.mxu1  ;;  %v1457_v9 = vadd.f32 %v1456_v16, %v8901_v24  ;;  %5368 = vmatpush1.bf16.msra.mxu0 %v8562_v3  ;;  %v10059_v3 = vpack.c.bf16 %v2511_v5, %v2507_v52 }
 0x250   : > { %12700 = vst [vmem:[#allocation15_spill] sm:$0xff] %v10031_v4  ;;  %12701 = vst [vmem:[#allocation71_spill] sm:$0xff] %v10033_v39  ;;  %v10041_v37 = vpack.c.bf16 %v2677_v41, %v2673_v58  ;;  %v2682_v46 = vmax.f32 %v2130_v49, 0.0  ;;  %v1459_v21 = vadd.f32 %v1458_v18, %v8906_v28  ;;  %5369 = vmatprep.subr.bf16.mxu0 %v12547_v31  ;;  %v12706_v41 = vld [vmem:[#allocation76_spill] sm:$0xff]  ;;  %v12707_v18 = vld [vmem:[#allocation78_spill] sm:$0xff] }
 0x251   : > { %12703 = vst [vmem:[#allocation73_spill] sm:$0xff] %v10038_v35  ;;  %v1460_v1 = vpop.f32.mrf.mxu0  ;;  %v2133_v12 = vpop.f32.mrf.mxu1  ;;  %v2680_v58 = vmax.f32 %v1457_v9, 0.0  ;;  %v1922_v49 = vadd.f32 %v12706_v41, %v9416_v38  ;;  %v1926_v39 = vadd.f32 %v12707_v18, %v9416_v38 }
 0x252   : > { %12704 = vst [vmem:[#allocation13_spill] sm:$0xff] %v10041_v37  ;;  %v1461_v25 = vadd.f32 %v1460_v1, %v8901_v24  ;;  %v2134_v45 = vadd.f32 %v2133_v12, %v8896_v22  ;;  %v12708_v12 = vld [vmem:[#allocation16_spill] sm:$0xff]  ;;  %v12709_v37 = vld [vmem:[#allocation17_spill] sm:$0xff]  ;;  %v2681_v9 = vmax.f32 %v1459_v21, 0.0 }
 0x253   : > { %v1462_v48 = vpop.f32.mrf.mxu0  ;;  %v10049_v57 = vpop.f32.mrf.mxu1  ;;  %v2515_v52 = vmax.f32 %v1922_v49, 0.0  ;;  %v2519_v5 = vmax.f32 %v1926_v39, 0.0  ;;  %v12715_v49 = vld [vmem:[#allocation81_spill] sm:$0xff] }
 0x254   : > { %12705 = vst [vmem:[#allocation14_spill] sm:$0xff] %v10049_v57  ;;  %v2684_v50 = vmax.f32 %v1461_v25, 0.0  ;;  %v2686_v13 = vmax.f32 %v2134_v45, 0.0  ;;  %v1463_v16 = vadd.f32 %v1462_v48, %v8906_v28  ;;  %v12712_v57 = vld [vmem:[#allocation21_spill] sm:$0xff]  ;;  %v1932_v39 = vadd.f32 %v12715_v49, %v9416_v38 }
 0x255   : > { %v1466_v1 = vpop.f32.mrf.mxu0  ;;  %v2139_v4 = vpop.f32.mrf.mxu1  ;;  %3575 = vmatmul.mubr.bf16.gmra.mxu0 %v12708_v12  ;;  %4248 = vmatmul.mubr.bf16.gmra.mxu1 %v12709_v37 }
 0x256   : > { %v10061_v25 = vpack.c.bf16 %v2684_v50, %v2680_v58  ;;  %v10063_v45 = vpack.c.bf16 %v2686_v13, %v2682_v46  ;;  %v2685_v48 = vmax.f32 %v1463_v16, 0.0  ;;  %3584 = vmatprep.mubr.bf16.mxu0 %v12712_v57  ;;  %4257 = vmatprep.mubr.bf16.mxu1 %v9629_v7  ;;  %v2140_v41 = vadd.f32 %v2139_v4, %v8896_v22 }
 0x257   : > { %v1468_v18 = vpop.f32.mrf.mxu0  ;;  %v10068_v35 = vpop.f32.mrf.mxu1  ;;  %v1467_v12 = vadd.f32 %v1466_v1, %v8901_v24 }
 0x258   : > { %12710 = vst [vmem:[#allocation18_spill] sm:$0xff] %v10061_v25  ;;  %12711 = vst [vmem:[#allocation76_spill] sm:$0xff] %v10063_v45  ;;  %v10071_v37 = vpack.c.bf16 %v2685_v48, %v2681_v9  ;;  %v2690_v46 = vmax.f32 %v2140_v41, 0.0  ;;  %v1469_v50 = vadd.f32 %v1468_v18, %v8906_v28  ;;  %v1936_v9 = vadd.f32 %v9522_v17, %v9416_v38  ;;  %v12716_v18 = vld [vmem:[#allocation19_spill] sm:$0xff] }
 0x259   : > { %v1470_v21 = vpop.f32.mrf.mxu0  ;;  %v2143_v58 = vpop.f32.mrf.mxu1  ;;  %v2688_v16 = vmax.f32 %v1467_v12, 0.0 }
 0x25a   : > { %12713 = vst [vmem:[#allocation78_spill] sm:$0xff] %v10071_v37  ;;  %v1471_v57 = vadd.f32 %v1470_v21, %v8901_v24  ;;  %v2144_v7 = vadd.f32 %v2143_v58, %v8896_v22  ;;  %v12717_v21 = vld [vmem:[#allocation20_spill] sm:$0xff]  ;;  %v10085_v58 = vpack.c.bf16 %v2519_v5, %v2515_v52  ;;  %v2689_v37 = vmax.f32 %v1469_v50, 0.0 }
 0x25b   : > { %v1472_v13 = vpop.f32.mrf.mxu0  ;;  %v10076_v4 = vpop.f32.mrf.mxu1  ;;  %v2523_v52 = vmax.f32 %v1932_v39, 0.0  ;;  %v2527_v5 = vmax.f32 %v1936_v9, 0.0  ;;  %v12723_v39 = vld [vmem:[#allocation85_spill] sm:$0xff] }
 0x25c   : > { %12714 = vst [vmem:[#allocation16_spill] sm:$0xff] %v10076_v4  ;;  %v2692_v45 = vmax.f32 %v1471_v57, 0.0  ;;  %v2694_v25 = vmax.f32 %v2144_v7, 0.0  ;;  %v1473_v1 = vadd.f32 %v1472_v13, %v8906_v28  ;;  %v12720_v13 = vld [vmem:[#allocation24_spill] sm:$0xff]  ;;  %v1942_v9 = vadd.f32 %v12723_v39, %v9416_v38 }
 0x25d   : > { %v1476_v48 = vpop.f32.mrf.mxu0  ;;  %v2149_v41 = vpop.f32.mrf.mxu1  ;;  %3585 = vmatmul.mubr.bf16.gmra.mxu0 %v12716_v18  ;;  %4258 = vmatmul.mubr.bf16.gmra.mxu1 %v12717_v21 }
 0x25e   : > { %v10087_v12 = vpack.c.bf16 %v2692_v45, %v2688_v16  ;;  %v10089_v57 = vpack.c.bf16 %v2694_v25, %v2690_v46  ;;  %v2693_v7 = vmax.f32 %v1473_v1, 0.0  ;;  %3594 = vmatprep.mubr.bf16.mxu0 %v12720_v13  ;;  %4267 = vmatprep.mubr.bf16.mxu1 %v9654_v6  ;;  %v2150_v17 = vadd.f32 %v2149_v41, %v8896_v22 }
 0x25f   : > { %v1478_v49 = vpop.f32.mrf.mxu0  ;;  %v10094_v4 = vpop.f32.mrf.mxu1  ;;  %v1477_v18 = vadd.f32 %v1476_v48, %v8901_v24  ;;  %v1946_v48 = vadd.f32 %v9547_v42, %v9416_v38 }
 0x260   : > { %12718 = vst [vmem:[#allocation17_spill] sm:$0xff] %v10087_v12  ;;  %12719 = vst [vmem:[#allocation21_spill] sm:$0xff] %v10089_v57  ;;  %v10097_v21 = vpack.c.bf16 %v2693_v7, %v2689_v37  ;;  %v2698_v25 = vmax.f32 %v2150_v17, 0.0  ;;  %v1479_v46 = vadd.f32 %v1478_v49, %v8906_v28  ;;  %v12724_v49 = vld [vmem:[#allocation22_spill] sm:$0xff] }
 0x261   : > { %v1480_v45 = vpop.f32.mrf.mxu0  ;;  %v2153_v50 = vpop.f32.mrf.mxu1  ;;  %v2696_v13 = vmax.f32 %v1477_v18, 0.0 }
 0x262   : > { %12721 = vst [vmem:[#allocation81_spill] sm:$0xff] %v10097_v21  ;;  %v1481_v16 = vadd.f32 %v1480_v45, %v8901_v24  ;;  %v2154_v6 = vadd.f32 %v2153_v50, %v8896_v22  ;;  %v12725_v45 = vld [vmem:[#allocation23_spill] sm:$0xff]  ;;  %v10111_v50 = vpack.c.bf16 %v2527_v5, %v2523_v52  ;;  %v2697_v21 = vmax.f32 %v1479_v46, 0.0 }
 0x263   : > { %v1482_v1 = vpop.f32.mrf.mxu0  ;;  %v10102_v41 = vpop.f32.mrf.mxu1  ;;  %v2531_v52 = vmax.f32 %v1942_v9, 0.0  ;;  %v2535_v5 = vmax.f32 %v1946_v48, 0.0  ;;  %v12731_v9 = vld [vmem:[#allocation89_spill] sm:$0xff] }
 0x264   : > { %12722 = vst [vmem:[#allocation19_spill] sm:$0xff] %v10102_v41  ;;  %v2700_v57 = vmax.f32 %v1481_v16, 0.0  ;;  %v2702_v12 = vmax.f32 %v2154_v6, 0.0  ;;  %v1483_v37 = vadd.f32 %v1482_v1, %v8906_v28  ;;  %v12728_v1 = vld [vmem:[#allocation27_spill] sm:$0xff]  ;;  %v1952_v48 = vadd.f32 %v12731_v9, %v9416_v38 }
 0x265   : > { %v1486_v7 = vpop.f32.mrf.mxu0  ;;  %v2159_v17 = vpop.f32.mrf.mxu1  ;;  %3595 = vmatmul.mubr.bf16.gmra.mxu0 %v12724_v49  ;;  %4268 = vmatmul.mubr.bf16.gmra.mxu1 %v12725_v45 }
 0x266   : > { %v10113_v18 = vpack.c.bf16 %v2700_v57, %v2696_v13  ;;  %v10115_v16 = vpack.c.bf16 %v2702_v12, %v2698_v25  ;;  %v2701_v6 = vmax.f32 %v1483_v37, 0.0  ;;  %3604 = vmatprep.mubr.bf16.mxu0 %v12728_v1  ;;  %4277 = vmatprep.mubr.bf16.mxu1 %v9679_v26  ;;  %v2160_v42 = vadd.f32 %v2159_v17, %v8896_v22 }
 0x267   : > { %v1488_v39 = vpop.f32.mrf.mxu0  ;;  %v10120_v41 = vpop.f32.mrf.mxu1  ;;  %v1487_v49 = vadd.f32 %v1486_v7, %v8901_v24  ;;  %v1956_v7 = vadd.f32 %v9572_v54, %v9416_v38 }
 0x268   : > { %12726 = vst [vmem:[#allocation20_spill] sm:$0xff] %v10113_v18  ;;  %12727 = vst [vmem:[#allocation24_spill] sm:$0xff] %v10115_v16  ;;  %v10123_v45 = vpack.c.bf16 %v2701_v6, %v2697_v21  ;;  %v2706_v12 = vmax.f32 %v2160_v42, 0.0  ;;  %v1489_v25 = vadd.f32 %v1488_v39, %v8906_v28  ;;  %v12732_v39 = vld [vmem:[#allocation25_spill] sm:$0xff] }
 0x269   : > { %v1490_v57 = vpop.f32.mrf.mxu0  ;;  %v2163_v46 = vpop.f32.mrf.mxu1  ;;  %v2704_v1 = vmax.f32 %v1487_v49, 0.0 }
 0x26a   : > { %12729 = vst [vmem:[#allocation85_spill] sm:$0xff] %v10123_v45  ;;  %v1491_v13 = vadd.f32 %v1490_v57, %v8901_v24  ;;  %v2164_v26 = vadd.f32 %v2163_v46, %v8896_v22  ;;  %v12733_v57 = vld [vmem:[#allocation26_spill] sm:$0xff]  ;;  %v10137_v46 = vpack.c.bf16 %v2535_v5, %v2531_v52  ;;  %v2705_v45 = vmax.f32 %v1489_v25, 0.0 }
 0x26b   : > { %v1492_v37 = vpop.f32.mrf.mxu0  ;;  %v10128_v17 = vpop.f32.mrf.mxu1  ;;  %v2539_v52 = vmax.f32 %v1952_v48, 0.0  ;;  %v2543_v5 = vmax.f32 %v1956_v7, 0.0 }
 0x26c   : > { %12730 = vst [vmem:[#allocation22_spill] sm:$0xff] %v10128_v17  ;;  %v2708_v16 = vmax.f32 %v1491_v13, 0.0  ;;  %v2710_v18 = vmax.f32 %v2164_v26, 0.0  ;;  %v1493_v21 = vadd.f32 %v1492_v37, %v8906_v28  ;;  %v12736_v37 = vld [vmem:[#allocation30_spill] sm:$0xff] }
 0x26d   : > { %v1496_v6 = vpop.f32.mrf.mxu0  ;;  %v2169_v42 = vpop.f32.mrf.mxu1  ;;  %3605 = vmatmul.mubr.bf16.gmra.mxu0 %v12732_v39  ;;  %4278 = vmatmul.mubr.bf16.gmra.mxu1 %v12733_v57 }
 0x26e   : > { %v10139_v49 = vpack.c.bf16 %v2708_v16, %v2704_v1  ;;  %v10141_v13 = vpack.c.bf16 %v2710_v18, %v2706_v12  ;;  %v2709_v26 = vmax.f32 %v1493_v21, 0.0  ;;  %3614 = vmatprep.mubr.bf16.mxu0 %v12736_v37  ;;  %4287 = vmatprep.mubr.bf16.mxu1 %v9704_v56  ;;  %v2170_v54 = vadd.f32 %v2169_v42, %v8896_v22  ;;  %v12740_v37 = vld [vmem:[#allocation93_spill] sm:$0xff] }
 0x26f   : > { %v1498_v9 = vpop.f32.mrf.mxu0  ;;  %v10146_v17 = vpop.f32.mrf.mxu1  ;;  %v1497_v39 = vadd.f32 %v1496_v6, %v8901_v24  ;;  %v8563_v6 = vld [vmem:[%s12512_s3 + $0x8] sm:$0xff]  }
 0x270   : > { %12734 = vst [vmem:[#allocation23_spill] sm:$0xff] %v10139_v49  ;;  %12735 = vst [vmem:[#allocation27_spill] sm:$0xff] %v10141_v13  ;;  %v10149_v57 = vpack.c.bf16 %v2709_v26, %v2705_v45  ;;  %v2714_v18 = vmax.f32 %v2170_v54, 0.0  ;;  %v1499_v12 = vadd.f32 %v1498_v9, %v8906_v28  ;;  %v1962_v54 = vadd.f32 %v12740_v37, %v9416_v38  ;;  %v12741_v13 = vld [vmem:[#allocation28_spill] sm:$0xff]  ;;  %v12742_v49 = vld [vmem:[#allocation29_spill] sm:$0xff] }
 0x271   : > { %12737 = vst [vmem:[#allocation89_spill] sm:$0xff] %v10146_v17  ;;  %v1500_v16 = vpop.f32.mrf.mxu0  ;;  %v2173_v25 = vpop.f32.mrf.mxu1  ;;  %v2712_v45 = vmax.f32 %v1497_v39, 0.0  ;;  %v1966_v9 = vadd.f32 %v9597_v55, %v9416_v38  ;;  %5370 = vmatpush1.bf16.msra.mxu0 %v8563_v6 }
 0x272   : > { %12738 = vst [vmem:[#allocation25_spill] sm:$0xff] %v10149_v57  ;;  %v1501_v1 = vadd.f32 %v1500_v16, %v8901_v24  ;;  %v2174_v56 = vadd.f32 %v2173_v25, %v8896_v22  ;;  %v10166_v57 = vpack.c.bf16 %v2543_v5, %v2539_v52  ;;  %5371 = vmatprep.subr.bf16.mxu0 %v12547_v31  ;;  %v2547_v52 = vmax.f32 %v1962_v54, 0.0  ;;  %v12747_v54 = vld [vmem:[#allocation97_spill] sm:$0xff] }
 0x273   : > { %v1502_v21 = vpop.f32.mrf.mxu0  ;;  %v10154_v42 = vpop.f32.mrf.mxu1  ;;  %v2551_v5 = vmax.f32 %v1966_v9, 0.0  ;;  %v1972_v9 = vadd.f32 %v12747_v54, %v9416_v38 }
 0x274   : > { %12739 = vst [vmem:[#allocation26_spill] sm:$0xff] %v10154_v42  ;;  %v2716_v26 = vmax.f32 %v1501_v1, 0.0  ;;  %v2718_v48 = vmax.f32 %v2174_v56, 0.0  ;;  %v1503_v7 = vadd.f32 %v1502_v21, %v8906_v28  ;;  %v2713_v42 = vmax.f32 %v1499_v12, 0.0  ;;  %v12745_v21 = vld [vmem:[#allocation33_spill] sm:$0xff] }
 0x275   : > { %v1506_v16 = vpop.f32.mrf.mxu0  ;;  %v2179_v25 = vpop.f32.mrf.mxu1  ;;  %3615 = vmatmul.mubr.bf16.gmra.mxu0 %v12741_v13  ;;  %4288 = vmatmul.mubr.bf16.gmra.mxu1 %v12742_v49 }
 0x276   : > { %v10168_v39 = vpack.c.bf16 %v2716_v26, %v2712_v45  ;;  %v10170_v1 = vpack.c.bf16 %v2718_v48, %v2714_v18  ;;  %v2717_v56 = vmax.f32 %v1503_v7, 0.0  ;;  %3624 = vmatprep.mubr.bf16.mxu0 %v12745_v21  ;;  %4297 = vmatprep.mubr.bf16.mxu1 %v9729_v15  ;;  %v2180_v55 = vadd.f32 %v2179_v25, %v8896_v22 }
 0x277   : > { %v1508_v37 = vpop.f32.mrf.mxu0  ;;  %v10175_v17 = vpop.f32.mrf.mxu1  ;;  %v1507_v49 = vadd.f32 %v1506_v16, %v8901_v24 }
 0x278   : > { %12743 = vst [vmem:[#allocation30_spill] sm:$0xff] %v10168_v39  ;;  %12744 = vst [vmem:[#allocation93_spill] sm:$0xff] %v10170_v1  ;;  %v10179_v13 = vpack.c.bf16 %v2717_v56, %v2713_v42  ;;  %v2722_v45 = vmax.f32 %v2180_v55, 0.0  ;;  %v1509_v26 = vadd.f32 %v1508_v37, %v8906_v28  ;;  %v1976_v56 = vadd.f32 %v9622_v51, %v9416_v38  ;;  %v12748_v1 = vld [vmem:[#allocation31_spill] sm:$0xff] }
 0x279   : > { %v1510_v18 = vpop.f32.mrf.mxu0  ;;  %v2183_v12 = vpop.f32.mrf.mxu1  ;;  %v2720_v6 = vmax.f32 %v1507_v49, 0.0 }
 0x27a   : > { %12746 = vst [vmem:[#allocation28_spill] sm:$0xff] %v10179_v13  ;;  %v1511_v15 = vadd.f32 %v1510_v18, %v8901_v24  ;;  %v2184_v48 = vadd.f32 %v2183_v12, %v8896_v22  ;;  %v12749_v18 = vld [vmem:[#allocation32_spill] sm:$0xff]  ;;  %v10193_v12 = vpack.c.bf16 %v2551_v5, %v2547_v52  ;;  %v2721_v39 = vmax.f32 %v1509_v26, 0.0 }
 0x27b   : > { %v1512_v7 = vpop.f32.mrf.mxu0  ;;  %v10184_v25 = vpop.f32.mrf.mxu1  ;;  %v2555_v52 = vmax.f32 %v1972_v9, 0.0  ;;  %v2559_v5 = vmax.f32 %v1976_v56, 0.0  ;;  %v12755_v9 = vld [vmem:[#allocation101_spill] sm:$0xff] }
 0x27c   : > { %v2724_v16 = vmax.f32 %v1511_v15, 0.0  ;;  %v2726_v21 = vmax.f32 %v2184_v48, 0.0  ;;  %v1513_v42 = vadd.f32 %v1512_v7, %v8906_v28  ;;  %v12752_v7 = vld [vmem:[#allocation36_spill] sm:$0xff]  ;;  %v1982_v56 = vadd.f32 %v12755_v9, %v9416_v38 }
 0x27d   : > { %v1516_v55 = vpop.f32.mrf.mxu0  ;;  %v2189_v37 = vpop.f32.mrf.mxu1  ;;  %3625 = vmatmul.mubr.bf16.gmra.mxu0 %v12748_v1  ;;  %4298 = vmatmul.mubr.bf16.gmra.mxu1 %v12749_v18 }
 0x27e   : > { %v10195_v49 = vpack.c.bf16 %v2724_v16, %v2720_v6  ;;  %v10197_v15 = vpack.c.bf16 %v2726_v21, %v2722_v45  ;;  %v2725_v48 = vmax.f32 %v1513_v42, 0.0  ;;  %3634 = vmatprep.mubr.bf16.mxu0 %v12752_v7  ;;  %4307 = vmatprep.mubr.bf16.mxu1 %v9754_v23  ;;  %v2190_v51 = vadd.f32 %v2189_v37, %v8896_v22 }
 0x27f   : > { %v1518_v54 = vpop.f32.mrf.mxu0  ;;  %v10202_v13 = vpop.f32.mrf.mxu1  ;;  %v1517_v1 = vadd.f32 %v1516_v55, %v8901_v24  ;;  %v1986_v55 = vadd.f32 %v9647_v20, %v9416_v38 }
 0x280   : > { %12750 = vst [vmem:[#allocation29_spill] sm:$0xff] %v10195_v49  ;;  %12751 = vst [vmem:[#allocation33_spill] sm:$0xff] %v10197_v15  ;;  %v10205_v18 = vpack.c.bf16 %v2725_v48, %v2721_v39  ;;  %v2730_v45 = vmax.f32 %v2190_v51, 0.0  ;;  %v1519_v16 = vadd.f32 %v1518_v54, %v8906_v28  ;;  %v12756_v54 = vld [vmem:[#allocation34_spill] sm:$0xff] }
 0x281   : > { %v1520_v26 = vpop.f32.mrf.mxu0  ;;  %v2193_v6 = vpop.f32.mrf.mxu1  ;;  %v2728_v7 = vmax.f32 %v1517_v1, 0.0 }
 0x282   : > { %12753 = vst [vmem:[#allocation97_spill] sm:$0xff] %v10205_v18  ;;  %v1521_v21 = vadd.f32 %v1520_v26, %v8901_v24  ;;  %v2194_v23 = vadd.f32 %v2193_v6, %v8896_v22  ;;  %v12757_v26 = vld [vmem:[#allocation35_spill] sm:$0xff]  ;;  %v10219_v6 = vpack.c.bf16 %v2559_v5, %v2555_v52  ;;  %v2729_v18 = vmax.f32 %v1519_v16, 0.0 }
 0x283   : > { %v1522_v42 = vpop.f32.mrf.mxu0  ;;  %v10210_v37 = vpop.f32.mrf.mxu1  ;;  %v2563_v52 = vmax.f32 %v1982_v56, 0.0  ;;  %v2567_v5 = vmax.f32 %v1986_v55, 0.0  ;;  %v12763_v56 = vld [vmem:[#allocation105_spill] sm:$0xff] }
 0x284   : > { %12754 = vst [vmem:[#allocation31_spill] sm:$0xff] %v10210_v37  ;;  %v2732_v15 = vmax.f32 %v1521_v21, 0.0  ;;  %v2734_v49 = vmax.f32 %v2194_v23, 0.0  ;;  %v1523_v39 = vadd.f32 %v1522_v42, %v8906_v28  ;;  %v12760_v42 = vld [vmem:[#allocation39_spill] sm:$0xff]  ;;  %v1992_v55 = vadd.f32 %v12763_v56, %v9416_v38 }
 0x285   : > { %v1526_v48 = vpop.f32.mrf.mxu0  ;;  %v2199_v51 = vpop.f32.mrf.mxu1  ;;  %3635 = vmatmul.mubr.bf16.gmra.mxu0 %v12756_v54  ;;  %4308 = vmatmul.mubr.bf16.gmra.mxu1 %v12757_v26 }
 0x286   : > { %v10221_v1 = vpack.c.bf16 %v2732_v15, %v2728_v7  ;;  %v10223_v21 = vpack.c.bf16 %v2734_v49, %v2730_v45  ;;  %v2733_v23 = vmax.f32 %v1523_v39, 0.0  ;;  %3644 = vmatprep.mubr.bf16.mxu0 %v12760_v42  ;;  %4317 = vmatprep.mubr.bf16.mxu1 %v9779_v34  ;;  %v2200_v20 = vadd.f32 %v2199_v51, %v8896_v22 }
 0x287   : > { %v1528_v9 = vpop.f32.mrf.mxu0  ;;  %v10228_v37 = vpop.f32.mrf.mxu1  ;;  %v1527_v54 = vadd.f32 %v1526_v48, %v8901_v24  ;;  %v1996_v48 = vadd.f32 %v9672_v27, %v9416_v38 }
 0x288   : > { %12758 = vst [vmem:[#allocation32_spill] sm:$0xff] %v10221_v1  ;;  %12759 = vst [vmem:[#allocation36_spill] sm:$0xff] %v10223_v21  ;;  %v10231_v26 = vpack.c.bf16 %v2733_v23, %v2729_v18  ;;  %v2738_v49 = vmax.f32 %v2200_v20, 0.0  ;;  %v1529_v45 = vadd.f32 %v1528_v9, %v8906_v28  ;;  %v12764_v9 = vld [vmem:[#allocation37_spill] sm:$0xff] }
 0x289   : > { %v1530_v15 = vpop.f32.mrf.mxu0  ;;  %v2203_v16 = vpop.f32.mrf.mxu1  ;;  %v2736_v42 = vmax.f32 %v1527_v54, 0.0 }
 0x28a   : > { %12761 = vst [vmem:[#allocation101_spill] sm:$0xff] %v10231_v26  ;;  %v1531_v7 = vadd.f32 %v1530_v15, %v8901_v24  ;;  %v2204_v34 = vadd.f32 %v2203_v16, %v8896_v22  ;;  %v12765_v15 = vld [vmem:[#allocation38_spill] sm:$0xff]  ;;  %v10245_v16 = vpack.c.bf16 %v2567_v5, %v2563_v52  ;;  %v2737_v26 = vmax.f32 %v1529_v45, 0.0 }
 0x28b   : > { %v1532_v39 = vpop.f32.mrf.mxu0  ;;  %v10236_v51 = vpop.f32.mrf.mxu1  ;;  %v2571_v52 = vmax.f32 %v1992_v55, 0.0  ;;  %v2575_v5 = vmax.f32 %v1996_v48, 0.0 }
 0x28c   : > { %12762 = vst [vmem:[#allocation34_spill] sm:$0xff] %v10236_v51  ;;  %v2740_v21 = vmax.f32 %v1531_v7, 0.0  ;;  %v2742_v1 = vmax.f32 %v2204_v34, 0.0  ;;  %v1533_v18 = vadd.f32 %v1532_v39, %v8906_v28  ;;  %v12768_v39 = vld [vmem:[#allocation42_spill] sm:$0xff] }
 0x28d   : > { %v1536_v23 = vpop.f32.mrf.mxu0  ;;  %v2209_v20 = vpop.f32.mrf.mxu1  ;;  %3645 = vmatmul.mubr.bf16.gmra.mxu0 %v12764_v9  ;;  %4318 = vmatmul.mubr.bf16.gmra.mxu1 %v12765_v15 }
 0x28e   : > { %v10247_v54 = vpack.c.bf16 %v2740_v21, %v2736_v42  ;;  %v10249_v7 = vpack.c.bf16 %v2742_v1, %v2738_v49  ;;  %v2741_v34 = vmax.f32 %v1533_v18, 0.0  ;;  %3654 = vmatprep.mubr.bf16.mxu0 %v12768_v39  ;;  %4327 = vmatprep.mubr.bf16.mxu1 %v9804_v53  ;;  %v2210_v27 = vadd.f32 %v2209_v20, %v8896_v22  ;;  %v8564_v18 = vld [vmem:[%s12512_s3] sm:$0xff]  }
 0x28f   : > { %v1538_v56 = vpop.f32.mrf.mxu0  ;;  %v10254_v51 = vpop.f32.mrf.mxu1  ;;  %v1537_v9 = vadd.f32 %v1536_v23, %v8901_v24  ;;  %5372 = vmatpush1.bf16.msra.mxu0 %v8564_v18 }
 0x290   : > { %12766 = vst [vmem:[#allocation35_spill] sm:$0xff] %v10247_v54  ;;  %12767 = vst [vmem:[#allocation39_spill] sm:$0xff] %v10249_v7  ;;  %v10257_v15 = vpack.c.bf16 %v2741_v34, %v2737_v26  ;;  %v2746_v1 = vmax.f32 %v2210_v27, 0.0  ;;  %v1539_v49 = vadd.f32 %v1538_v56, %v8906_v28  ;;  %v12771_v34 = vld [vmem:[#allocation109_spill] sm:$0xff]  ;;  %v2006_v56 = vadd.f32 %v9697_v62, %v9416_v38  ;;  %v12772_v7 = vld [vmem:[#allocation40_spill] sm:$0xff] }
 0x291   : > { %v1540_v21 = vpop.f32.mrf.mxu0  ;;  %v2213_v45 = vpop.f32.mrf.mxu1  ;;  %v2744_v26 = vmax.f32 %v1537_v9, 0.0  ;;  %v2002_v27 = vadd.f32 %v12771_v34, %v9416_v38  ;;  %v12773_v54 = vld [vmem:[#allocation41_spill] sm:$0xff]  ;;  %5373 = vmatprep.subr.bf16.mxu0 %v12547_v31 }
 0x292   : > { %12769 = vst [vmem:[#allocation105_spill] sm:$0xff] %v10257_v15  ;;  %v1541_v42 = vadd.f32 %v1540_v21, %v8901_v24  ;;  %v2214_v53 = vadd.f32 %v2213_v45, %v8896_v22  ;;  %v10274_v15 = vpack.c.bf16 %v2575_v5, %v2571_v52  ;;  %v2745_v9 = vmax.f32 %v1539_v49, 0.0 }
 0x293   : > { %v1542_v20 = vpop.f32.mrf.mxu0  ;;  %v10265_v39 = vpop.f32.mrf.mxu1  ;;  %v2579_v52 = vmax.f32 %v2002_v27, 0.0  ;;  %v2583_v5 = vmax.f32 %v2006_v56, 0.0  ;;  %v12779_v27 = vld [vmem:[#allocation113_spill] sm:$0xff] }
 0x294   : > { %12770 = vst [vmem:[#allocation37_spill] sm:$0xff] %v10265_v39  ;;  %v2748_v23 = vmax.f32 %v1541_v42, 0.0  ;;  %v2750_v55 = vmax.f32 %v2214_v53, 0.0  ;;  %v1543_v48 = vadd.f32 %v1542_v20, %v8906_v28  ;;  %v12776_v20 = vld [vmem:[#allocation45_spill] sm:$0xff]  ;;  %v2012_v56 = vadd.f32 %v12779_v27, %v9416_v38 }
 0x295   : > { %v1546_v21 = vpop.f32.mrf.mxu0  ;;  %v2219_v45 = vpop.f32.mrf.mxu1  ;;  %3655 = vmatmul.mubr.bf16.gmra.mxu0 %v12772_v7  ;;  %4328 = vmatmul.mubr.bf16.gmra.mxu1 %v12773_v54 }
 0x296   : > { %v10276_v42 = vpack.c.bf16 %v2748_v23, %v2744_v26  ;;  %v10278_v53 = vpack.c.bf16 %v2750_v55, %v2746_v1  ;;  %v2749_v18 = vmax.f32 %v1543_v48, 0.0  ;;  %3664 = vmatprep.mubr.bf16.mxu0 %v12776_v20  ;;  %4337 = vmatprep.mubr.bf16.mxu1 %v9829_v47  ;;  %v2220_v62 = vadd.f32 %v2219_v45, %v8896_v22 }
 0x297   : > { %v1548_v34 = vpop.f32.mrf.mxu0  ;;  %v10283_v39 = vpop.f32.mrf.mxu1  ;;  %v1547_v54 = vadd.f32 %v1546_v21, %v8901_v24 }
 0x298   : > { %12774 = vst [vmem:[#allocation38_spill] sm:$0xff] %v10276_v42  ;;  %12775 = vst [vmem:[#allocation42_spill] sm:$0xff] %v10278_v53  ;;  %v10287_v7 = vpack.c.bf16 %v2749_v18, %v2745_v9  ;;  %v2754_v26 = vmax.f32 %v2220_v62, 0.0  ;;  %v1549_v23 = vadd.f32 %v1548_v34, %v8906_v28  ;;  %v2016_v9 = vadd.f32 %v9722_v11, %v9416_v38  ;;  %v12780_v34 = vld [vmem:[#allocation43_spill] sm:$0xff] }
 0x299   : > { %v1550_v1 = vpop.f32.mrf.mxu0  ;;  %v2223_v49 = vpop.f32.mrf.mxu1  ;;  %v2752_v20 = vmax.f32 %v1547_v54, 0.0 }
 0x29a   : > { %12777 = vst [vmem:[#allocation109_spill] sm:$0xff] %v10287_v7  ;;  %v1551_v47 = vadd.f32 %v1550_v1, %v8901_v24  ;;  %v2224_v55 = vadd.f32 %v2223_v49, %v8896_v22  ;;  %v12781_v1 = vld [vmem:[#allocation44_spill] sm:$0xff]  ;;  %v10301_v49 = vpack.c.bf16 %v2583_v5, %v2579_v52  ;;  %v2753_v7 = vmax.f32 %v1549_v23, 0.0 }
 0x29b   : > { %v1552_v48 = vpop.f32.mrf.mxu0  ;;  %v10292_v45 = vpop.f32.mrf.mxu1  ;;  %v2587_v52 = vmax.f32 %v2012_v56, 0.0  ;;  %v2591_v5 = vmax.f32 %v2016_v9, 0.0  ;;  %v12787_v56 = vld [vmem:[#allocation117_spill] sm:$0xff] }
 0x29c   : > { %12778 = vst [vmem:[#allocation40_spill] sm:$0xff] %v10292_v45  ;;  %v2756_v53 = vmax.f32 %v1551_v47, 0.0  ;;  %v2758_v42 = vmax.f32 %v2224_v55, 0.0  ;;  %v1553_v21 = vadd.f32 %v1552_v48, %v8906_v28  ;;  %v12784_v48 = vld [vmem:[#allocation48_spill] sm:$0xff]  ;;  %v2022_v9 = vadd.f32 %v12787_v56, %v9416_v38 }
 0x29d   : > { %v1556_v18 = vpop.f32.mrf.mxu0  ;;  %v2229_v62 = vpop.f32.mrf.mxu1  ;;  %3665 = vmatmul.mubr.bf16.gmra.mxu0 %v12780_v34  ;;  %4338 = vmatmul.mubr.bf16.gmra.mxu1 %v12781_v1 }
 0x29e   : > { %v10303_v54 = vpack.c.bf16 %v2756_v53, %v2752_v20  ;;  %v10305_v47 = vpack.c.bf16 %v2758_v42, %v2754_v26  ;;  %v2757_v55 = vmax.f32 %v1553_v21, 0.0  ;;  %3674 = vmatprep.mubr.bf16.mxu0 %v12784_v48  ;;  %4347 = vmatprep.mubr.bf16.mxu1 %v9854_v10  ;;  %v2230_v11 = vadd.f32 %v2229_v62, %v8896_v22 }
 0x29f   : > { %v1558_v27 = vpop.f32.mrf.mxu0  ;;  %v10310_v45 = vpop.f32.mrf.mxu1  ;;  %v1557_v34 = vadd.f32 %v1556_v18, %v8901_v24  ;;  %v2026_v18 = vadd.f32 %v9747_v30, %v9416_v38 }
 0x2a0   : > { %12782 = vst [vmem:[#allocation41_spill] sm:$0xff] %v10303_v54  ;;  %12783 = vst [vmem:[#allocation45_spill] sm:$0xff] %v10305_v47  ;;  %v10313_v1 = vpack.c.bf16 %v2757_v55, %v2753_v7  ;;  %v2762_v42 = vmax.f32 %v2230_v11, 0.0  ;;  %v1559_v26 = vadd.f32 %v1558_v27, %v8906_v28  ;;  %v12788_v27 = vld [vmem:[#allocation46_spill] sm:$0xff] }
 0x2a1   : > { %v1560_v53 = vpop.f32.mrf.mxu0  ;;  %v2233_v23 = vpop.f32.mrf.mxu1  ;;  %v2760_v48 = vmax.f32 %v1557_v34, 0.0 }
 0x2a2   : > { %12785 = vst [vmem:[#allocation113_spill] sm:$0xff] %v10313_v1  ;;  %v1561_v20 = vadd.f32 %v1560_v53, %v8901_v24  ;;  %v2234_v10 = vadd.f32 %v2233_v23, %v8896_v22  ;;  %v12789_v53 = vld [vmem:[#allocation47_spill] sm:$0xff]  ;;  %v10327_v23 = vpack.c.bf16 %v2591_v5, %v2587_v52  ;;  %v2761_v1 = vmax.f32 %v1559_v26, 0.0 }
 0x2a3   : > { %v1562_v21 = vpop.f32.mrf.mxu0  ;;  %v10318_v62 = vpop.f32.mrf.mxu1  ;;  %v2595_v52 = vmax.f32 %v2022_v9, 0.0  ;;  %v2599_v5 = vmax.f32 %v2026_v18, 0.0  ;;  %v12795_v9 = vld [vmem:[#allocation121_spill] sm:$0xff] }
 0x2a4   : > { %12786 = vst [vmem:[#allocation43_spill] sm:$0xff] %v10318_v62  ;;  %v2764_v47 = vmax.f32 %v1561_v20, 0.0  ;;  %v2766_v54 = vmax.f32 %v2234_v10, 0.0  ;;  %v1563_v7 = vadd.f32 %v1562_v21, %v8906_v28  ;;  %v12792_v21 = vld [vmem:[#allocation51_spill] sm:$0xff]  ;;  %v2032_v18 = vadd.f32 %v12795_v9, %v9416_v38 }
 0x2a5   : > { %v1566_v55 = vpop.f32.mrf.mxu0  ;;  %v2239_v11 = vpop.f32.mrf.mxu1  ;;  %3675 = vmatmul.mubr.bf16.gmra.mxu0 %v12788_v27  ;;  %4348 = vmatmul.mubr.bf16.gmra.mxu1 %v12789_v53 }
 0x2a6   : > { %v10329_v34 = vpack.c.bf16 %v2764_v47, %v2760_v48  ;;  %v10331_v20 = vpack.c.bf16 %v2766_v54, %v2762_v42  ;;  %v2765_v10 = vmax.f32 %v1563_v7, 0.0  ;;  %3684 = vmatprep.mubr.bf16.mxu0 %v12792_v21  ;;  %4357 = vmatprep.mubr.bf16.mxu1 %v9879_v59  ;;  %v2240_v30 = vadd.f32 %v2239_v11, %v8896_v22 }
 0x2a7   : > { %v1568_v56 = vpop.f32.mrf.mxu0  ;;  %v10336_v62 = vpop.f32.mrf.mxu1  ;;  %v1567_v27 = vadd.f32 %v1566_v55, %v8901_v24  ;;  %v2036_v55 = vadd.f32 %v9772_v14, %v9416_v38 }
 0x2a8   : > { %12790 = vst [vmem:[#allocation44_spill] sm:$0xff] %v10329_v34  ;;  %12791 = vst [vmem:[#allocation48_spill] sm:$0xff] %v10331_v20  ;;  %v10339_v53 = vpack.c.bf16 %v2765_v10, %v2761_v1  ;;  %v2770_v54 = vmax.f32 %v2240_v30, 0.0  ;;  %v1569_v42 = vadd.f32 %v1568_v56, %v8906_v28  ;;  %v12796_v56 = vld [vmem:[#allocation49_spill] sm:$0xff] }
 0x2a9   : > { %v1570_v47 = vpop.f32.mrf.mxu0  ;;  %v2243_v26 = vpop.f32.mrf.mxu1  ;;  %v2768_v21 = vmax.f32 %v1567_v27, 0.0 }
 0x2aa   : > { %12793 = vst [vmem:[#allocation117_spill] sm:$0xff] %v10339_v53  ;;  %v1571_v48 = vadd.f32 %v1570_v47, %v8901_v24  ;;  %v2244_v59 = vadd.f32 %v2243_v26, %v8896_v22  ;;  %v12797_v47 = vld [vmem:[#allocation50_spill] sm:$0xff]  ;;  %v10353_v26 = vpack.c.bf16 %v2599_v5, %v2595_v52  ;;  %v2769_v53 = vmax.f32 %v1569_v42, 0.0 }
 0x2ab   : > { %v1572_v7 = vpop.f32.mrf.mxu0  ;;  %v10344_v11 = vpop.f32.mrf.mxu1  ;;  %v2603_v52 = vmax.f32 %v2032_v18, 0.0  ;;  %v2607_v5 = vmax.f32 %v2036_v55, 0.0 }
 0x2ac   : > { %12794 = vst [vmem:[#allocation46_spill] sm:$0xff] %v10344_v11  ;;  %v2772_v20 = vmax.f32 %v1571_v48, 0.0  ;;  %v2774_v34 = vmax.f32 %v2244_v59, 0.0  ;;  %v1573_v1 = vadd.f32 %v1572_v7, %v8906_v28  ;;  %v12800_v7 = vld [vmem:[#allocation54_spill] sm:$0xff] }
 0x2ad   : > { %v1576_v10 = vpop.f32.mrf.mxu0  ;;  %v2249_v30 = vpop.f32.mrf.mxu1  ;;  %3685 = vmatmul.mubr.bf16.gmra.mxu0 %v12796_v56  ;;  %4358 = vmatmul.mubr.bf16.gmra.mxu1 %v12797_v47 }
 0x2ae   : > { %v10355_v27 = vpack.c.bf16 %v2772_v20, %v2768_v21  ;;  %v10357_v48 = vpack.c.bf16 %v2774_v34, %v2770_v54  ;;  %v2773_v59 = vmax.f32 %v1573_v1, 0.0  ;;  %3694 = vmatprep.mubr.bf16.mxu0 %v12800_v7  ;;  %4367 = vmatprep.mubr.bf16.mxu1 %v9908_v60  ;;  %v2250_v14 = vadd.f32 %v2249_v30, %v8896_v22  ;;  %v8565_v1 = vld [vmem:[%s12512_s3 + $0x78] sm:$0xff]  }
 0x2af   : > { %v1578_v9 = vpop.f32.mrf.mxu0  ;;  %v10362_v11 = vpop.f32.mrf.mxu1  ;;  %v1577_v56 = vadd.f32 %v1576_v10, %v8901_v24  ;;  %5374 = vmatpush2.bf16.msra.mxu0 %v8565_v1 }
 0x2b0   : > { %12798 = vst [vmem:[#allocation47_spill] sm:$0xff] %v10355_v27  ;;  %12799 = vst [vmem:[#allocation51_spill] sm:$0xff] %v10357_v48  ;;  %v10365_v47 = vpack.c.bf16 %v2773_v59, %v2769_v53  ;;  %v2778_v34 = vmax.f32 %v2250_v14, 0.0  ;;  %v1579_v54 = vadd.f32 %v1578_v9, %v8906_v28  ;;  %v12803_v59 = vld [vmem:[#allocation125_spill] sm:$0xff]  ;;  %v2046_v9 = vadd.f32 %v9797_v2, %v9416_v38  ;;  %v12804_v48 = vld [vmem:[#allocation52_spill] sm:$0xff] }
 0x2b1   : > { %v1580_v20 = vpop.f32.mrf.mxu0  ;;  %v2253_v42 = vpop.f32.mrf.mxu1  ;;  %v2776_v53 = vmax.f32 %v1577_v56, 0.0  ;;  %v2042_v14 = vadd.f32 %v12803_v59, %v9416_v38  ;;  %v12805_v27 = vld [vmem:[#allocation53_spill] sm:$0xff]  ;;  %5375 = vmatprep.subr.bf16.mxu0 %v12547_v31 }
 0x2b2   : > { %12801 = vst [vmem:[#allocation121_spill] sm:$0xff] %v10365_v47  ;;  %v1581_v21 = vadd.f32 %v1580_v20, %v8901_v24  ;;  %v2254_v60 = vadd.f32 %v2253_v42, %v8896_v22  ;;  %v10382_v47 = vpack.c.bf16 %v2607_v5, %v2603_v52  ;;  %v2777_v56 = vmax.f32 %v1579_v54, 0.0 }
 0x2b3   : > { %v1582_v30 = vpop.f32.mrf.mxu0  ;;  %v10373_v7 = vpop.f32.mrf.mxu1  ;;  %v2611_v52 = vmax.f32 %v2042_v14, 0.0  ;;  %v2615_v5 = vmax.f32 %v2046_v9, 0.0  ;;  %v12811_v14 = vld [vmem:[#allocation129_spill] sm:$0xff] }
 0x2b4   : > { %12802 = vst [vmem:[#allocation49_spill] sm:$0xff] %v10373_v7  ;;  %v2780_v10 = vmax.f32 %v1581_v21, 0.0  ;;  %v2782_v18 = vmax.f32 %v2254_v60, 0.0  ;;  %v1583_v55 = vadd.f32 %v1582_v30, %v8906_v28  ;;  %v12808_v30 = vld [vmem:[#allocation58_spill] sm:$0xff]  ;;  %v2052_v9 = vadd.f32 %v12811_v14, %v9416_v38 }
 0x2b5   : > { %v1586_v20 = vpop.f32.mrf.mxu0  ;;  %v2259_v42 = vpop.f32.mrf.mxu1  ;;  %3695 = vmatmul.mubr.bf16.gmra.mxu0 %v12804_v48  ;;  %4368 = vmatmul.mubr.bf16.gmra.mxu1 %v12805_v27 }
 0x2b6   : > { %v10384_v21 = vpack.c.bf16 %v2780_v10, %v2776_v53  ;;  %v10386_v60 = vpack.c.bf16 %v2782_v18, %v2778_v34  ;;  %v2781_v1 = vmax.f32 %v1583_v55, 0.0  ;;  %3704 = vmatprep.mubr.bf16.mxu0 %v12808_v30  ;;  %4377 = vmatprep.mubr.bf16.mxu1 %v9942_v40  ;;  %v2260_v2 = vadd.f32 %v2259_v42, %v8896_v22 }
 0x2b7   : > { %v1588_v59 = vpop.f32.mrf.mxu0  ;;  %v10391_v7 = vpop.f32.mrf.mxu1  ;;  %v1587_v27 = vadd.f32 %v1586_v20, %v8901_v24 }
 0x2b8   : > { %12806 = vst [vmem:[#allocation50_spill] sm:$0xff] %v10384_v21  ;;  %12807 = vst [vmem:[#allocation54_spill] sm:$0xff] %v10386_v60  ;;  %v10395_v48 = vpack.c.bf16 %v2781_v1, %v2777_v56  ;;  %v2786_v53 = vmax.f32 %v2260_v2, 0.0  ;;  %v1589_v10 = vadd.f32 %v1588_v59, %v8906_v28  ;;  %v2056_v56 = vadd.f32 %v9822_v29, %v9416_v38  ;;  %v12812_v59 = vld [vmem:[#allocation55_spill] sm:$0xff] }
 0x2b9   : > { %v1590_v34 = vpop.f32.mrf.mxu0  ;;  %v2263_v54 = vpop.f32.mrf.mxu1  ;;  %v2784_v30 = vmax.f32 %v1587_v27, 0.0 }
 0x2ba   : > { %12809 = vst [vmem:[#allocation125_spill] sm:$0xff] %v10395_v48  ;;  %v1591_v40 = vadd.f32 %v1590_v34, %v8901_v24  ;;  %v2264_v18 = vadd.f32 %v2263_v54, %v8896_v22  ;;  %v12813_v34 = vld [vmem:[#allocation56_spill] sm:$0xff]  ;;  %v10409_v54 = vpack.c.bf16 %v2615_v5, %v2611_v52  ;;  %v2785_v48 = vmax.f32 %v1589_v10, 0.0 }
 0x2bb   : > { %v1592_v55 = vpop.f32.mrf.mxu0  ;;  %v10400_v42 = vpop.f32.mrf.mxu1  ;;  %v2619_v52 = vmax.f32 %v2052_v9, 0.0  ;;  %v2623_v5 = vmax.f32 %v2056_v56, 0.0  ;;  %v12819_v9 = vld [vmem:[#allocation133_spill] sm:$0xff] }
 0x2bc   : > { %12810 = vst [vmem:[#allocation52_spill] sm:$0xff] %v10400_v42  ;;  %v2788_v60 = vmax.f32 %v1591_v40, 0.0  ;;  %v2790_v21 = vmax.f32 %v2264_v18, 0.0  ;;  %v1593_v20 = vadd.f32 %v1592_v55, %v8906_v28  ;;  %v12816_v55 = vld [vmem:[#allocation63_spill] sm:$0xff]  ;;  %v2062_v56 = vadd.f32 %v12819_v9, %v9416_v38 }
 0x2bd   : > { %v1596_v1 = vpop.f32.mrf.mxu0  ;;  %v2269_v2 = vpop.f32.mrf.mxu1  ;;  %3705 = vmatmul.mubr.bf16.gmra.mxu0 %v12812_v59  ;;  %4378 = vmatmul.mubr.bf16.gmra.mxu1 %v12813_v34 }
 0x2be   : > { %v10411_v27 = vpack.c.bf16 %v2788_v60, %v2784_v30  ;;  %v10413_v40 = vpack.c.bf16 %v2790_v21, %v2786_v53  ;;  %v2789_v18 = vmax.f32 %v1593_v20, 0.0  ;;  %3714 = vmatprep.mubr.bf16.mxu0 %v12816_v55  ;;  %4387 = vmatprep.mubr.bf16.mxu1 %v9976_v44  ;;  %v2270_v29 = vadd.f32 %v2269_v2, %v8896_v22 }
 0x2bf   : > { %v1598_v14 = vpop.f32.mrf.mxu0  ;;  %v10418_v42 = vpop.f32.mrf.mxu1  ;;  %v1597_v59 = vadd.f32 %v1596_v1, %v8901_v24  ;;  %v2066_v1 = vadd.f32 %v9847_v0, %v9416_v38 }
 0x2c0   : > { %12814 = vst [vmem:[#allocation53_spill] sm:$0xff] %v10411_v27  ;;  %12815 = vst [vmem:[#allocation58_spill] sm:$0xff] %v10413_v40  ;;  %v10421_v34 = vpack.c.bf16 %v2789_v18, %v2785_v48  ;;  %v2794_v21 = vmax.f32 %v2270_v29, 0.0  ;;  %v1599_v53 = vadd.f32 %v1598_v14, %v8906_v28  ;;  %v12820_v14 = vld [vmem:[#allocation60_spill] sm:$0xff] }
 0x2c1   : > { %v1600_v60 = vpop.f32.mrf.mxu0  ;;  %v2273_v10 = vpop.f32.mrf.mxu1  ;;  %v2792_v55 = vmax.f32 %v1597_v59, 0.0 }
 0x2c2   : > { %12817 = vst [vmem:[#allocation129_spill] sm:$0xff] %v10421_v34  ;;  %v1601_v30 = vadd.f32 %v1600_v60, %v8901_v24  ;;  %v2274_v44 = vadd.f32 %v2273_v10, %v8896_v22  ;;  %v12821_v60 = vld [vmem:[#allocation61_spill] sm:$0xff]  ;;  %v10435_v10 = vpack.c.bf16 %v2623_v5, %v2619_v52  ;;  %v2793_v34 = vmax.f32 %v1599_v53, 0.0 }
 0x2c3   : > { %v1602_v20 = vpop.f32.mrf.mxu0  ;;  %v10426_v2 = vpop.f32.mrf.mxu1  ;;  %v2627_v52 = vmax.f32 %v2062_v56, 0.0  ;;  %v2631_v5 = vmax.f32 %v2066_v1, 0.0  ;;  %v12827_v56 = vld [vmem:[#allocation137_spill] sm:$0xff] }
 0x2c4   : > { %12818 = vst [vmem:[#allocation55_spill] sm:$0xff] %v10426_v2  ;;  %v2796_v40 = vmax.f32 %v1601_v30, 0.0  ;;  %v2798_v27 = vmax.f32 %v2274_v44, 0.0  ;;  %v1603_v48 = vadd.f32 %v1602_v20, %v8906_v28  ;;  %v12824_v20 = vld [vmem:[#allocation67_spill] sm:$0xff]  ;;  %v2072_v1 = vadd.f32 %v12827_v56, %v9416_v38 }
 0x2c5   : > { %v1606_v18 = vpop.f32.mrf.mxu0  ;;  %v2279_v29 = vpop.f32.mrf.mxu1  ;;  %3715 = vmatmul.mubr.bf16.gmra.mxu0 %v12820_v14  ;;  %4388 = vmatmul.mubr.bf16.gmra.mxu1 %v12821_v60 }
 0x2c6   : > { %v10437_v59 = vpack.c.bf16 %v2796_v40, %v2792_v55  ;;  %v10439_v30 = vpack.c.bf16 %v2798_v27, %v2794_v21  ;;  %v2797_v44 = vmax.f32 %v1603_v48, 0.0  ;;  %3724 = vmatprep.mubr.bf16.mxu0 %v12824_v20  ;;  %4397 = vmatprep.mubr.bf16.mxu1 %v10003_v8  ;;  %v2280_v0 = vadd.f32 %v2279_v29, %v8896_v22 }
 0x2c7   : > { %v1608_v9 = vpop.f32.mrf.mxu0  ;;  %v10444_v2 = vpop.f32.mrf.mxu1  ;;  %v1607_v14 = vadd.f32 %v1606_v18, %v8901_v24  ;;  %v2076_v18 = vadd.f32 %v9872_v43, %v9416_v38 }
 0x2c8   : > { %12822 = vst [vmem:[#allocation56_spill] sm:$0xff] %v10437_v59  ;;  %12823 = vst [vmem:[#allocation63_spill] sm:$0xff] %v10439_v30  ;;  %v10447_v60 = vpack.c.bf16 %v2797_v44, %v2793_v34  ;;  %v2802_v27 = vmax.f32 %v2280_v0, 0.0  ;;  %v1609_v21 = vadd.f32 %v1608_v9, %v8906_v28  ;;  %v12828_v9 = vld [vmem:[#allocation64_spill] sm:$0xff] }
 0x2c9   : > { %v1610_v40 = vpop.f32.mrf.mxu0  ;;  %v2283_v53 = vpop.f32.mrf.mxu1  ;;  %v2800_v20 = vmax.f32 %v1607_v14, 0.0 }
 0x2ca   : > { %12825 = vst [vmem:[#allocation133_spill] sm:$0xff] %v10447_v60  ;;  %v1611_v55 = vadd.f32 %v1610_v40, %v8901_v24  ;;  %v2284_v8 = vadd.f32 %v2283_v53, %v8896_v22  ;;  %v12829_v40 = vld [vmem:[#allocation65_spill] sm:$0xff]  ;;  %v10461_v53 = vpack.c.bf16 %v2631_v5, %v2627_v52  ;;  %v2801_v60 = vmax.f32 %v1609_v21, 0.0 }
 0x2cb   : > { %v1612_v48 = vpop.f32.mrf.mxu0  ;;  %v10452_v29 = vpop.f32.mrf.mxu1  ;;  %v2635_v52 = vmax.f32 %v2072_v1, 0.0  ;;  %v2639_v5 = vmax.f32 %v2076_v18, 0.0 }
 0x2cc   : > { %12826 = vst [vmem:[#allocation60_spill] sm:$0xff] %v10452_v29  ;;  %v2804_v30 = vmax.f32 %v1611_v55, 0.0  ;;  %v2806_v59 = vmax.f32 %v2284_v8, 0.0  ;;  %v1613_v34 = vadd.f32 %v1612_v48, %v8906_v28  ;;  %v12832_v48 = vld [vmem:[#allocation72_spill] sm:$0xff] }
 0x2cd   : > { %v1616_v44 = vpop.f32.mrf.mxu0  ;;  %v2289_v0 = vpop.f32.mrf.mxu1  ;;  %3725 = vmatmul.mubr.bf16.gmra.mxu0 %v12828_v9  ;;  %4398 = vmatmul.mubr.bf16.gmra.mxu1 %v12829_v40 }
 0x2ce   : > { %v10463_v14 = vpack.c.bf16 %v2804_v30, %v2800_v20  ;;  %v10465_v55 = vpack.c.bf16 %v2806_v59, %v2802_v27  ;;  %v2805_v8 = vmax.f32 %v1613_v34, 0.0  ;;  %3734 = vmatprep.mubr.bf16.mxu0 %v12832_v48  ;;  %4407 = vmatprep.mubr.bf16.mxu1 %v10029_v63  ;;  %v2290_v43 = vadd.f32 %v2289_v0, %v8896_v22  ;;  %v8566_v34 = vld [vmem:[%s12512_s3 + $0x70] sm:$0xff]  }
 0x2cf   : > { %v1618_v56 = vpop.f32.mrf.mxu0  ;;  %v10470_v29 = vpop.f32.mrf.mxu1  ;;  %v1617_v9 = vadd.f32 %v1616_v44, %v8901_v24  ;;  %5376 = vmatpush2.bf16.msra.mxu0 %v8566_v34 }
 0x2d0   : > { %12830 = vst [vmem:[#allocation61_spill] sm:$0xff] %v10463_v14  ;;  %12831 = vst [vmem:[#allocation67_spill] sm:$0xff] %v10465_v55  ;;  %v10473_v40 = vpack.c.bf16 %v2805_v8, %v2801_v60  ;;  %v2810_v59 = vmax.f32 %v2290_v43, 0.0  ;;  %v1619_v27 = vadd.f32 %v1618_v56, %v8906_v28  ;;  %v2082_v8 = vadd.f32 %v9888_v32, %v9416_v38  ;;  %v12835_v55 = vld [vmem:[#allocation70_spill] sm:$0xff] }
 0x2d1   : > { %v1620_v30 = vpop.f32.mrf.mxu0  ;;  %v2293_v21 = vpop.f32.mrf.mxu1  ;;  %v2808_v60 = vmax.f32 %v1617_v9, 0.0  ;;  %v2086_v43 = vadd.f32 %v9899_v33, %v9416_v38  ;;  %v10490_v14 = vpack.c.bf16 %v2639_v5, %v2635_v52  ;;  %5377 = vmatprep.subr.bf16.mxu0 %v12547_v31 }
 0x2d2   : > { %12833 = vst [vmem:[#allocation137_spill] sm:$0xff] %v10473_v40  ;;  %v1621_v20 = vadd.f32 %v1620_v30, %v8901_v24  ;;  %v2294_v63 = vadd.f32 %v2293_v21, %v8896_v22  ;;  %v12834_v21 = vld [vmem:[#allocation69_spill] sm:$0xff]  ;;  %v2809_v9 = vmax.f32 %v1619_v27, 0.0  ;;  %v2643_v5 = vmax.f32 %v2082_v8, 0.0 }
 0x2d3   : > { %v1622_v0 = vpop.f32.mrf.mxu0  ;;  %v10481_v48 = vpop.f32.mrf.mxu1  ;;  %v2647_v27 = vmax.f32 %v2086_v43, 0.0  ;;  %v2092_v8 = vadd.f32 %v9919_v36, %v9416_v38  ;;  %v12841_v43 = vld [vmem:[#allocation143_spill] sm:$0xff] }
 0x2d4   : > { %v2812_v44 = vmax.f32 %v1621_v20, 0.0  ;;  %v2814_v1 = vmax.f32 %v2294_v63, 0.0  ;;  %v1623_v18 = vadd.f32 %v1622_v0, %v8906_v28  ;;  %v12838_v0 = vld [vmem:[#allocation77_spill] sm:$0xff] }
 0x2d5   : > { %v1626_v56 = vpop.f32.mrf.mxu0  ;;  %v2299_v30 = vpop.f32.mrf.mxu1  ;;  %3735 = vmatmul.mubr.bf16.gmra.mxu0 %v12834_v21  ;;  %4408 = vmatmul.mubr.bf16.gmra.mxu1 %v12835_v55 }
 0x2d6   : > { %v10492_v20 = vpack.c.bf16 %v2812_v44, %v2808_v60  ;;  %v10494_v63 = vpack.c.bf16 %v2814_v1, %v2810_v59  ;;  %v2813_v34 = vmax.f32 %v1623_v18, 0.0  ;;  %3744 = vmatprep.mubr.bf16.mxu0 %v12838_v0  ;;  %4417 = vmatprep.mubr.bf16.mxu1 %v10059_v3  ;;  %v2300_v32 = vadd.f32 %v2299_v30, %v8896_v22 }
 0x2d7   : > { %v1628_v33 = vpop.f32.mrf.mxu0  ;;  %v10499_v40 = vpop.f32.mrf.mxu1  ;;  %v1627_v55 = vadd.f32 %v1626_v56, %v8901_v24 }
 0x2d8   : > { %12836 = vst [vmem:[#allocation64_spill] sm:$0xff] %v10492_v20  ;;  %12837 = vst [vmem:[#allocation65_spill] sm:$0xff] %v10494_v63  ;;  %v10503_v52 = vpack.c.bf16 %v2813_v34, %v2809_v9  ;;  %v2818_v44 = vmax.f32 %v2300_v32, 0.0  ;;  %v1629_v1 = vadd.f32 %v1628_v33, %v8906_v28  ;;  %v2096_v9 = vadd.f32 %v12841_v43, %v9416_v38  ;;  %v12842_v33 = vld [vmem:[#allocation74_spill] sm:$0xff] }
 0x2d9   : > { %v1630_v59 = vpop.f32.mrf.mxu0  ;;  %v2303_v60 = vpop.f32.mrf.mxu1  ;;  %v2816_v0 = vmax.f32 %v1627_v55, 0.0 }
 0x2da   : > { %12839 = vst [vmem:[#allocation72_spill] sm:$0xff] %v10503_v52  ;;  %v1631_v3 = vadd.f32 %v1630_v59, %v8901_v24  ;;  %v2304_v18 = vadd.f32 %v2303_v60, %v8896_v22  ;;  %v12843_v59 = vld [vmem:[#allocation75_spill] sm:$0xff]  ;;  %v10517_v60 = vpack.c.bf16 %v2647_v27, %v2643_v5  ;;  %v2817_v52 = vmax.f32 %v1629_v1, 0.0 }
 0x2db   : > { %v1632_v30 = vpop.f32.mrf.mxu0  ;;  %v10508_v21 = vpop.f32.mrf.mxu1  ;;  %v2651_v5 = vmax.f32 %v2092_v8, 0.0  ;;  %v2655_v27 = vmax.f32 %v2096_v9, 0.0  ;;  %v2102_v8 = vadd.f32 %v9951_v61, %v9416_v38  ;;  %v12849_v9 = vld [vmem:[#allocation5_spill] sm:$0xff] }
 0x2dc   : > { %12840 = vst [vmem:[#allocation69_spill] sm:$0xff] %v10508_v21  ;;  %v2820_v63 = vmax.f32 %v1631_v3, 0.0  ;;  %v2822_v20 = vmax.f32 %v2304_v18, 0.0  ;;  %v1633_v56 = vadd.f32 %v1632_v30, %v8906_v28  ;;  %v12846_v30 = vld [vmem:[#allocation82_spill] sm:$0xff] }
 0x2dd   : > { %v1636_v34 = vpop.f32.mrf.mxu0  ;;  %v2309_v32 = vpop.f32.mrf.mxu1  ;;  %3745 = vmatmul.mubr.bf16.gmra.mxu0 %v12842_v33  ;;  %4418 = vmatmul.mubr.bf16.gmra.mxu1 %v12843_v59 }
 0x2de   : > { %v10519_v55 = vpack.c.bf16 %v2820_v63, %v2816_v0  ;;  %v10521_v3 = vpack.c.bf16 %v2822_v20, %v2818_v44  ;;  %v2821_v18 = vmax.f32 %v1633_v56, 0.0  ;;  %3754 = vmatprep.mubr.bf16.mxu0 %v12846_v30  ;;  %4427 = vmatprep.mubr.bf16.mxu1 %v10085_v58  ;;  %v2310_v36 = vadd.f32 %v2309_v32, %v8896_v22 }
 0x2df   : > { %v1638_v43 = vpop.f32.mrf.mxu0  ;;  %v10526_v21 = vpop.f32.mrf.mxu1  ;;  %v1637_v33 = vadd.f32 %v1636_v34, %v8901_v24  ;;  %v2106_v34 = vadd.f32 %v12849_v9, %v9416_v38 }
 0x2e0   : > { %12844 = vst [vmem:[#allocation70_spill] sm:$0xff] %v10519_v55  ;;  %12845 = vst [vmem:[#allocation77_spill] sm:$0xff] %v10521_v3  ;;  %v10529_v59 = vpack.c.bf16 %v2821_v18, %v2817_v52  ;;  %v2826_v20 = vmax.f32 %v2310_v36, 0.0  ;;  %v1639_v44 = vadd.f32 %v1638_v43, %v8906_v28  ;;  %v12850_v43 = vld [vmem:[#allocation79_spill] sm:$0xff] }
 0x2e1   : > { %v1640_v63 = vpop.f32.mrf.mxu0  ;;  %v2313_v1 = vpop.f32.mrf.mxu1  ;;  %v2824_v30 = vmax.f32 %v1637_v33, 0.0 }
 0x2e2   : > { %12847 = vst [vmem:[#allocation143_spill] sm:$0xff] %v10529_v59  ;;  %v1641_v0 = vadd.f32 %v1640_v63, %v8901_v24  ;;  %v2314_v58 = vadd.f32 %v2313_v1, %v8896_v22  ;;  %v12851_v63 = vld [vmem:[#allocation80_spill] sm:$0xff]  ;;  %v10543_v1 = vpack.c.bf16 %v2655_v27, %v2651_v5  ;;  %v2825_v59 = vmax.f32 %v1639_v44, 0.0  ;;  %v3160_v5 = vld [vmem:[%s12514_s5 + $0x4] sm:$0x3] }
 0x2e3   : > { %v1642_v56 = vpop.f32.mrf.mxu0  ;;  %v10534_v32 = vpop.f32.mrf.mxu1  ;;  %v2663_v27 = vmax.f32 %v2106_v34, 0.0 }
 0x2e4   : > { %12848 = vst [vmem:[#allocation74_spill] sm:$0xff] %v10534_v32  ;;  %v2828_v3 = vmax.f32 %v1641_v0, 0.0  ;;  %v2830_v55 = vmax.f32 %v2314_v58, 0.0  ;;  %v1643_v52 = vadd.f32 %v1642_v56, %v8906_v28  ;;  %v12854_v56 = vld [vmem:[#allocation86_spill] sm:$0xff] }
 0x2e5   : > { %v1646_v18 = vpop.f32.mrf.mxu0  ;;  %v2319_v36 = vpop.f32.mrf.mxu1  ;;  %3755 = vmatmul.mubr.bf16.gmra.mxu0 %v12850_v43  ;;  %4428 = vmatmul.mubr.bf16.gmra.mxu1 %v12851_v63 }
 0x2e6   : > { %v10545_v33 = vpack.c.bf16 %v2828_v3, %v2824_v30  ;;  %v10547_v0 = vpack.c.bf16 %v2830_v55, %v2826_v20  ;;  %v2829_v58 = vmax.f32 %v1643_v52, 0.0  ;;  %3764 = vmatprep.mubr.bf16.mxu0 %v12854_v56  ;;  %4437 = vmatprep.mubr.bf16.mxu1 %v10111_v50  ;;  %v2320_v61 = vadd.f32 %v2319_v36, %v8896_v22 }
 0x2e7   : > { %v1648_v9 = vpop.f32.mrf.mxu0  ;;  %v10552_v32 = vpop.f32.mrf.mxu1  ;;  %v1647_v43 = vadd.f32 %v1646_v18, %v8901_v24  ;;  %v2659_v55 = vmax.f32 %v2102_v8, 0.0  ;;  %v12858_v18 = vld [vmem:[#allocation2_spill] sm:$0xff] }
 0x2e8   : > { %12852 = vst [vmem:[#allocation75_spill] sm:$0xff] %v10545_v33  ;;  %12853 = vst [vmem:[#allocation82_spill] sm:$0xff] %v10547_v0  ;;  %v10558_v3 = vpack.c.bf16 %v2829_v58, %v2825_v59  ;;  %v2834_v30 = vmax.f32 %v2320_v61, 0.0  ;;  %v1649_v50 = vadd.f32 %v1648_v9, %v8906_v28  ;;  %v12859_v0 = vsub.s32 0, %v12858_v18 }
 0x2e9   : > { %12855 = vst [vmem:[#allocation5_spill] sm:$0xff] %v10552_v32  ;;  %v1650_v20 = vpop.f32.mrf.mxu0  ;;  %v2323_v44 = vpop.f32.mrf.mxu1  ;;  %v12860_v59 = vsub.s32 1, %v12858_v18  ;;  %v2832_v34 = vmax.f32 %v1647_v43, 0.0  ;;  %v10580_v18 = vpack.c.bf16 %v2663_v27, %v2659_v55 }
 0x2ea   : > { %12856 = vst [vmem:[#allocation79_spill] sm:$0xff] %v10558_v3  ;;  %v1651_v52 = vadd.f32 %v1650_v20, %v8901_v24  ;;  %v2324_v36 = vadd.f32 %v2323_v44, %v8896_v22  ;;  %v10567_v33 = vrot.slane %v3160_v5, %v12859_v0  ;;  %v2112_v24 = vadd.f32 %v9985_v19, %v9416_v38  ;;  %v12861_v22 = vld [vmem:[#allocation8_spill] sm:$0xff]  ;;  %v12862_v3 = vld [vmem:[#allocation83_spill] sm:$0xff] }
 0x2eb   : > { %v1652_v63 = vpop.f32.mrf.mxu0  ;;  %v10563_v56 = vpop.f32.mrf.mxu1  ;;  %v10571_v8 = vrot.slane %v3160_v5, %v12860_v59  ;;  %v2116_v20 = vadd.f32 %v12861_v22, %v9416_v38  ;;  %v2833_v5 = vmax.f32 %v1649_v50, 0.0 }
 0x2ec   : > { %12857 = vst [vmem:[#allocation80_spill] sm:$0xff] %v10563_v56  ;;  %v2836_v58 = vmax.f32 %v1651_v52, 0.0  ;;  %v2838_v61 = vmax.f32 %v2324_v36, 0.0  ;;  %v1653_v9 = vadd.f32 %v1652_v63, %v8906_v28  ;;  %v12863_v56 = vld [vmem:[#allocation84_spill] sm:$0xff]  ;;  %v12866_v36 = vld [vmem:[#allocation90_spill] sm:$0xff]  ;;  %v2667_v55 = vmax.f32 %v2112_v24, 0.0 }
 0x2ed   : > { %v3526_v44 = vpop.f32.mrf.mxu0  ;;  %3765 = vmatmul.mubr.bf16.gmra.mxu0 %v12862_v3  ;;  %v4199_v0 = vpop.f32.mrf.mxu1  ;;  %4438 = vmatmul.mubr.bf16.gmra.mxu1 %v12863_v56  ;;  %v2671_v27 = vmax.f32 %v2116_v20, 0.0  ;;  %v12869_v20 = vld [vmem:[#allocation11_spill] sm:$0xff] }
 0x2ee   : > { %v10582_v43 = vpack.c.bf16 %v2836_v58, %v2832_v34  ;;  %v10584_v52 = vpack.c.bf16 %v2838_v61, %v2834_v30  ;;  %v2837_v28 = vmax.f32 %v1653_v9, 0.0  ;;  %3774 = vmatprep.mubr.bf16.mxu0 %v12866_v36  ;;  %4447 = vmatprep.mubr.bf16.mxu1 %v10137_v46  ;;  %v3527_v19 = vadd.f32 %v3526_v44, %v10567_v33  ;;  %v8567_v46 = vld [vmem:[%s12512_s3 + $0x68] sm:$0xff]  }
 0x2ef   : > { %v3528_v63 = vpop.f32.mrf.mxu0  ;;  %v4201_v59 = vpop.f32.mrf.mxu1  ;;  %5378 = vmatpush2.bf16.msra.mxu0 %v8567_v46  ;;  %v12872_v46 = vld [vmem:[#allocation94_spill] sm:$0xff] }
 0x2f0   : > { %12864 = vst [vmem:[#allocation86_spill] sm:$0xff] %v10582_v43  ;;  %12865 = vst [vmem:[#allocation2_spill] sm:$0xff] %v10584_v52  ;;  %v3529_v3 = vadd.f32 %v3528_v63, %v10571_v8  ;;  %v10590_v22 = vpack.c.bf16 %v2837_v28, %v2833_v5  ;;  %v4200_v50 = vadd.f32 %v4199_v0, %v3527_v19  ;;  %v12868_v5 = vld [vmem:[#allocation68_spill] sm:$0xff]  ;;  %v12870_v19 = vld [vmem:[#allocation87_spill] sm:$0xff]  ;;  %5379 = vmatprep.subr.bf16.mxu0 %v12547_v31 }
 0x2f1   : > { %v3530_v56 = vpop.f32.mrf.mxu0  ;;  %v4203_v34 = vpop.f32.mrf.mxu1  ;;  %v2122_v24 = vadd.f32 %v12868_v5, %v9416_v38  ;;  %v2126_v0 = vadd.f32 %v12869_v20, %v9416_v38 }
 0x2f2   : > { %12867 = vst [vmem:[#allocation8_spill] sm:$0xff] %v10590_v22  ;;  %v4202_v30 = vadd.f32 %v4201_v59, %v3529_v3  ;;  %v3531_v58 = vadd.f32 %v3530_v56, %v10567_v33  ;;  %v12871_v59 = vld [vmem:[#allocation88_spill] sm:$0xff]  ;;  %v10603_v3 = vpack.c.bf16 %v2671_v27, %v2667_v55  ;;  %v4838_v56 = vmax.f32 %v4200_v50, 0.0 }
 0x2f3   : > { %v3532_v61 = vpop.f32.mrf.mxu0  ;;  %v4205_v9 = vpop.f32.mrf.mxu1  ;;  %v2675_v27 = vmax.f32 %v2122_v24, 0.0  ;;  %v2679_v50 = vmax.f32 %v2126_v0, 0.0  ;;  %v12877_v0 = vld [vmem:[#allocation91_spill] sm:$0xff] }
 0x2f4   : > { %v4204_v44 = vadd.f32 %v4203_v34, %v3531_v58  ;;  %v3533_v36 = vadd.f32 %v3532_v61, %v10571_v8  ;;  %v4839_v61 = vmax.f32 %v4202_v30, 0.0 }
 0x2f5   : > { %v3536_v28 = vpop.f32.mrf.mxu0  ;;  %3775 = vmatmul.mubr.bf16.gmra.mxu0 %v12870_v19  ;;  %v4209_v63 = vpop.f32.mrf.mxu1  ;;  %4448 = vmatmul.mubr.bf16.gmra.mxu1 %v12871_v59 }
 0x2f6   : > { %v4840_v52 = vmax.f32 %v4204_v44, 0.0  ;;  %v4206_v34 = vadd.f32 %v4205_v9, %v3533_v36  ;;  %v3537_v58 = vadd.f32 %v3536_v28, %v10567_v33  ;;  %3784 = vmatprep.mubr.bf16.mxu0 %v12872_v46  ;;  %4457 = vmatprep.mubr.bf16.mxu1 %v10166_v57 }
 0x2f7   : > { %v3538_v5 = vpop.f32.mrf.mxu0  ;;  %v4211_v20 = vpop.f32.mrf.mxu1 }
 0x2f8   : > { %v10609_v19 = vpack.c.bf16 %v4840_v52, %v4838_v56  ;;  %v4841_v43 = vmax.f32 %v4206_v34, 0.0  ;;  %v4210_v59 = vadd.f32 %v4209_v63, %v3537_v58  ;;  %v3539_v55 = vadd.f32 %v3538_v5, %v10571_v8  ;;  %v12875_v52 = vld [vmem:[#allocation73_spill] sm:$0xff]  ;;  %v12876_v63 = vld [vmem:[#allocation14_spill] sm:$0xff]  ;;  %v12878_v5 = vld [vmem:[#allocation92_spill] sm:$0xff] }
 0x2f9   : > { %v3540_v9 = vpop.f32.mrf.mxu0  ;;  %v4213_v44 = vpop.f32.mrf.mxu1  ;;  %v2132_v56 = vadd.f32 %v12875_v52, %v9416_v38  ;;  %v2136_v34 = vadd.f32 %v12876_v63, %v9416_v38 }
 0x2fa   : > { %12873 = vst [vmem:[#allocation83_spill] sm:$0xff] %v10609_v19  ;;  %v4212_v36 = vadd.f32 %v4211_v20, %v3539_v55  ;;  %v3541_v28 = vadd.f32 %v3540_v9, %v10567_v33  ;;  %v10613_v46 = vpack.c.bf16 %v4841_v43, %v4839_v61  ;;  %v10622_v20 = vpack.c.bf16 %v2679_v50, %v2675_v27 }
 0x2fb   : > { %v3542_v57 = vpop.f32.mrf.mxu0  ;;  %v4215_v30 = vpop.f32.mrf.mxu1  ;;  %v4842_v43 = vmax.f32 %v4210_v59, 0.0  ;;  %v2683_v27 = vmax.f32 %v2132_v56, 0.0  ;;  %v2687_v50 = vmax.f32 %v2136_v34, 0.0  ;;  %v12882_v34 = vld [vmem:[#allocation95_spill] sm:$0xff] }
 0x2fc   : > { %12874 = vst [vmem:[#allocation84_spill] sm:$0xff] %v10613_v46  ;;  %v4214_v22 = vadd.f32 %v4213_v44, %v3541_v28  ;;  %v3543_v32 = vadd.f32 %v3542_v57, %v10571_v8  ;;  %v12879_v44 = vld [vmem:[#allocation98_spill] sm:$0xff]  ;;  %v4843_v28 = vmax.f32 %v4212_v36, 0.0 }
 0x2fd   : > { %v3546_v24 = vpop.f32.mrf.mxu0  ;;  %3785 = vmatmul.mubr.bf16.gmra.mxu0 %v12877_v0  ;;  %v4219_v58 = vpop.f32.mrf.mxu1  ;;  %4458 = vmatmul.mubr.bf16.gmra.mxu1 %v12878_v5 }
 0x2fe   : > { %v4844_v61 = vmax.f32 %v4214_v22, 0.0  ;;  %v4216_v55 = vadd.f32 %v4215_v30, %v3543_v32  ;;  %v3547_v9 = vadd.f32 %v3546_v24, %v10567_v33  ;;  %3794 = vmatprep.mubr.bf16.mxu0 %v12879_v44  ;;  %4467 = vmatprep.mubr.bf16.mxu1 %v10193_v12 }
 0x2ff   : > { %v3548_v57 = vpop.f32.mrf.mxu0  ;;  %v4221_v52 = vpop.f32.mrf.mxu1 }
 0x300   : > { %v10627_v63 = vpack.c.bf16 %v4844_v61, %v4842_v43  ;;  %v4845_v0 = vmax.f32 %v4216_v55, 0.0  ;;  %v4220_v19 = vadd.f32 %v4219_v58, %v3547_v9  ;;  %v3549_v5 = vadd.f32 %v3548_v57, %v10571_v8  ;;  %v12881_v58 = vld [vmem:[#allocation16_spill] sm:$0xff] }
 0x301   : > { %v3550_v59 = vpop.f32.mrf.mxu0  ;;  %v4223_v22 = vpop.f32.mrf.mxu1  ;;  %v2142_v43 = vadd.f32 %v10068_v35, %v9416_v38  ;;  %v2146_v61 = vadd.f32 %v12881_v58, %v9416_v38  ;;  %v12883_v9 = vld [vmem:[#allocation96_spill] sm:$0xff]  ;;  %v10640_v57 = vpack.c.bf16 %v2687_v50, %v2683_v27 }
 0x302   : > { %12880 = vst [vmem:[#allocation90_spill] sm:$0xff] %v10627_v63  ;;  %v4222_v32 = vadd.f32 %v4221_v52, %v3549_v5  ;;  %v3551_v30 = vadd.f32 %v3550_v59, %v10567_v33  ;;  %v10631_v24 = vpack.c.bf16 %v4845_v0, %v4843_v28  ;;  %v4846_v28 = vmax.f32 %v4220_v19, 0.0  ;;  %v12884_v59 = vld [vmem:[#allocation102_spill] sm:$0xff] }
 0x303   : > { %v3552_v44 = vpop.f32.mrf.mxu0  ;;  %v4225_v12 = vpop.f32.mrf.mxu1  ;;  %v2691_v27 = vmax.f32 %v2142_v43, 0.0  ;;  %v2695_v50 = vmax.f32 %v2146_v61, 0.0  ;;  %v12886_v61 = vld [vmem:[#allocation99_spill] sm:$0xff] }
 0x304   : > { %v4224_v36 = vadd.f32 %v4223_v22, %v3551_v30  ;;  %v3553_v46 = vadd.f32 %v3552_v44, %v10571_v8  ;;  %v4847_v35 = vmax.f32 %v4222_v32, 0.0 }
 0x305   : > { %v3556_v56 = vpop.f32.mrf.mxu0  ;;  %3795 = vmatmul.mubr.bf16.gmra.mxu0 %v12882_v34  ;;  %v4229_v55 = vpop.f32.mrf.mxu1  ;;  %4468 = vmatmul.mubr.bf16.gmra.mxu1 %v12883_v9 }
 0x306   : > { %v4848_v52 = vmax.f32 %v4224_v36, 0.0  ;;  %v4226_v0 = vadd.f32 %v4225_v12, %v3553_v46  ;;  %v3557_v5 = vadd.f32 %v3556_v56, %v10567_v33  ;;  %3804 = vmatprep.mubr.bf16.mxu0 %v12884_v59  ;;  %4477 = vmatprep.mubr.bf16.mxu1 %v10219_v6 }
 0x307   : > { %v3558_v22 = vpop.f32.mrf.mxu0  ;;  %v4231_v30 = vpop.f32.mrf.mxu1 }
 0x308   : > { %v10645_v44 = vpack.c.bf16 %v4848_v52, %v4846_v28  ;;  %v4849_v58 = vmax.f32 %v4226_v0, 0.0  ;;  %v4230_v34 = vadd.f32 %v4229_v55, %v3557_v5  ;;  %v3559_v9 = vadd.f32 %v3558_v22, %v10571_v8  ;;  %v12885_v55 = vld [vmem:[#allocation19_spill] sm:$0xff]  ;;  %v12887_v5 = vld [vmem:[#allocation100_spill] sm:$0xff] }
 0x309   : > { %v3560_v19 = vpop.f32.mrf.mxu0  ;;  %v4233_v36 = vpop.f32.mrf.mxu1  ;;  %v2152_v28 = vadd.f32 %v10094_v4, %v9416_v38  ;;  %v2156_v52 = vadd.f32 %v12885_v55, %v9416_v38  ;;  %v10658_v22 = vpack.c.bf16 %v2695_v50, %v2691_v27 }
 0x30a   : > { %v4232_v46 = vadd.f32 %v4231_v30, %v3559_v9  ;;  %v3561_v12 = vadd.f32 %v3560_v19, %v10567_v33  ;;  %v10649_v56 = vpack.c.bf16 %v4849_v58, %v4847_v35  ;;  %v4850_v35 = vmax.f32 %v4230_v34, 0.0  ;;  %v12888_v19 = vld [vmem:[#allocation106_spill] sm:$0xff] }
 0x30b   : > { %v3562_v59 = vpop.f32.mrf.mxu0  ;;  %v4235_v6 = vpop.f32.mrf.mxu1  ;;  %v2699_v27 = vmax.f32 %v2152_v28, 0.0  ;;  %v2703_v50 = vmax.f32 %v2156_v52, 0.0  ;;  %v2162_v28 = vadd.f32 %v10120_v41, %v9416_v38  ;;  %v12891_v52 = vld [vmem:[#allocation22_spill] sm:$0xff] }
 0x30c   : > { %v4234_v32 = vadd.f32 %v4233_v36, %v3561_v12  ;;  %v3563_v63 = vadd.f32 %v3562_v59, %v10571_v8  ;;  %v4851_v4 = vmax.f32 %v4232_v46, 0.0 }
 0x30d   : > { %v3566_v43 = vpop.f32.mrf.mxu0  ;;  %3805 = vmatmul.mubr.bf16.gmra.mxu0 %v12886_v61  ;;  %v4239_v0 = vpop.f32.mrf.mxu1  ;;  %4478 = vmatmul.mubr.bf16.gmra.mxu1 %v12887_v5 }
 0x30e   : > { %v4852_v30 = vmax.f32 %v4234_v32, 0.0  ;;  %v4236_v58 = vadd.f32 %v4235_v6, %v3563_v63  ;;  %v3567_v9 = vadd.f32 %v3566_v43, %v10567_v33  ;;  %3814 = vmatprep.mubr.bf16.mxu0 %v12888_v19  ;;  %4487 = vmatprep.mubr.bf16.mxu1 %v10245_v16  ;;  %v8568_v16 = vld [vmem:[%s12512_s3 + $0x60] sm:$0xff]   ;;  %v12892_v19 = vld [vmem:[#allocation103_spill] sm:$0xff] }
 0x30f   : > { %v3568_v36 = vpop.f32.mrf.mxu0  ;;  %v4241_v12 = vpop.f32.mrf.mxu1  ;;  %5380 = vmatpush2.bf16.msra.mxu0 %v8568_v16 }
 0x310   : > { %v10663_v59 = vpack.c.bf16 %v4852_v30, %v4850_v35  ;;  %v4853_v55 = vmax.f32 %v4236_v58, 0.0  ;;  %v4240_v61 = vadd.f32 %v4239_v0, %v3567_v9  ;;  %v3569_v5 = vadd.f32 %v3568_v36, %v10571_v8  ;;  %5381 = vmatprep.subr.bf16.mxu0 %v12547_v31 }
 0x311   : > { %v3570_v34 = vpop.f32.mrf.mxu0  ;;  %v4243_v32 = vpop.f32.mrf.mxu1  ;;  %v2166_v58 = vadd.f32 %v12891_v52, %v9416_v38 }
 0x312   : > { %12889 = vst [vmem:[#allocation68_spill] sm:$0xff] %v10663_v59  ;;  %v4242_v63 = vadd.f32 %v4241_v12, %v3569_v5  ;;  %v3571_v6 = vadd.f32 %v3570_v34, %v10567_v33  ;;  %v10670_v46 = vpack.c.bf16 %v4853_v55, %v4851_v4  ;;  %v12893_v12 = vld [vmem:[#allocation104_spill] sm:$0xff]  ;;  %v10679_v4 = vpack.c.bf16 %v2703_v50, %v2699_v27 }
 0x313   : > { %v3572_v43 = vpop.f32.mrf.mxu0  ;;  %v4245_v35 = vpop.f32.mrf.mxu1  ;;  %v4854_v55 = vmax.f32 %v4240_v61, 0.0  ;;  %v2707_v61 = vmax.f32 %v2162_v28, 0.0  ;;  %v2711_v50 = vmax.f32 %v2166_v58, 0.0  ;;  %v12899_v58 = vld [vmem:[#allocation107_spill] sm:$0xff] }
 0x314   : > { %12890 = vst [vmem:[#allocation11_spill] sm:$0xff] %v10670_v46  ;;  %v4244_v30 = vadd.f32 %v4243_v32, %v3571_v6  ;;  %v3573_v0 = vadd.f32 %v3572_v43, %v10571_v8  ;;  %v12894_v6 = vld [vmem:[#allocation110_spill] sm:$0xff]  ;;  %v4855_v41 = vmax.f32 %v4242_v63, 0.0 }
 0x315   : > { %v3576_v9 = vpop.f32.mrf.mxu0  ;;  %3815 = vmatmul.mubr.bf16.gmra.mxu0 %v12892_v19  ;;  %v4249_v36 = vpop.f32.mrf.mxu1  ;;  %4488 = vmatmul.mubr.bf16.gmra.mxu1 %v12893_v12 }
 0x316   : > { %v4856_v5 = vmax.f32 %v4244_v30, 0.0  ;;  %v4246_v34 = vadd.f32 %v4245_v35, %v3573_v0  ;;  %v3577_v32 = vadd.f32 %v3576_v9, %v10567_v33  ;;  %3824 = vmatprep.mubr.bf16.mxu0 %v12894_v6  ;;  %4497 = vmatprep.mubr.bf16.mxu1 %v10274_v15 }
 0x317   : > { %v3578_v16 = vpop.f32.mrf.mxu0  ;;  %v4251_v43 = vpop.f32.mrf.mxu1 }
 0x318   : > { %v10685_v52 = vpack.c.bf16 %v4856_v5, %v4854_v55  ;;  %v4857_v19 = vmax.f32 %v4246_v34, 0.0  ;;  %v4250_v12 = vadd.f32 %v4249_v36, %v3577_v32  ;;  %v3579_v27 = vadd.f32 %v3578_v16, %v10571_v8  ;;  %v12897_v55 = vld [vmem:[#allocation89_spill] sm:$0xff]  ;;  %v12898_v36 = vld [vmem:[#allocation26_spill] sm:$0xff]  ;;  %v12900_v16 = vld [vmem:[#allocation108_spill] sm:$0xff] }
 0x319   : > { %v3580_v35 = vpop.f32.mrf.mxu0  ;;  %v4253_v30 = vpop.f32.mrf.mxu1  ;;  %v2172_v5 = vadd.f32 %v12897_v55, %v9416_v38  ;;  %v2176_v34 = vadd.f32 %v12898_v36, %v9416_v38 }
 0x31a   : > { %12895 = vst [vmem:[#allocation87_spill] sm:$0xff] %v10685_v52  ;;  %v4252_v0 = vadd.f32 %v4251_v43, %v3579_v27  ;;  %v3581_v9 = vadd.f32 %v3580_v35, %v10567_v33  ;;  %v10689_v6 = vpack.c.bf16 %v4857_v19, %v4855_v41  ;;  %v10698_v43 = vpack.c.bf16 %v2711_v50, %v2707_v61 }
 0x31b   : > { %v3582_v15 = vpop.f32.mrf.mxu0  ;;  %v4255_v63 = vpop.f32.mrf.mxu1  ;;  %v4858_v41 = vmax.f32 %v4250_v12, 0.0  ;;  %v2715_v61 = vmax.f32 %v2172_v5, 0.0  ;;  %v2719_v50 = vmax.f32 %v2176_v34, 0.0  ;;  %v12902_v34 = vld [vmem:[#allocation111_spill] sm:$0xff] }
 0x31c   : > { %12896 = vst [vmem:[#allocation88_spill] sm:$0xff] %v10689_v6  ;;  %v4254_v59 = vadd.f32 %v4253_v30, %v3581_v9  ;;  %v3583_v46 = vadd.f32 %v3582_v15, %v10571_v8  ;;  %v12901_v30 = vld [vmem:[#allocation114_spill] sm:$0xff]  ;;  %v4859_v9 = vmax.f32 %v4252_v0, 0.0 }
 0x31d   : > { %v3586_v28 = vpop.f32.mrf.mxu0  ;;  %3825 = vmatmul.mubr.bf16.gmra.mxu0 %v12899_v58  ;;  %v4259_v32 = vpop.f32.mrf.mxu1  ;;  %4498 = vmatmul.mubr.bf16.gmra.mxu1 %v12900_v16 }
 0x31e   : > { %v4860_v19 = vmax.f32 %v4254_v59, 0.0  ;;  %v4256_v27 = vadd.f32 %v4255_v63, %v3583_v46  ;;  %v3587_v35 = vadd.f32 %v3586_v28, %v10567_v33  ;;  %3834 = vmatprep.mubr.bf16.mxu0 %v12901_v30  ;;  %4507 = vmatprep.mubr.bf16.mxu1 %v10301_v49 }
 0x31f   : > { %v3588_v15 = vpop.f32.mrf.mxu0  ;;  %v4261_v55 = vpop.f32.mrf.mxu1 }
 0x320   : > { %v10703_v36 = vpack.c.bf16 %v4860_v19, %v4858_v41  ;;  %v4861_v58 = vmax.f32 %v4256_v27, 0.0  ;;  %v4260_v52 = vadd.f32 %v4259_v32, %v3587_v35  ;;  %v3589_v16 = vadd.f32 %v3588_v15, %v10571_v8  ;;  %v12903_v27 = vld [vmem:[#allocation112_spill] sm:$0xff] }
 0x321   : > { %v3590_v12 = vpop.f32.mrf.mxu0  ;;  %v4263_v59 = vpop.f32.mrf.mxu1  ;;  %v2182_v41 = vadd.f32 %v10175_v17, %v9416_v38  ;;  %v2186_v32 = vadd.f32 %v10184_v25, %v9416_v38  ;;  %v10716_v35 = vpack.c.bf16 %v2719_v50, %v2715_v61 }
 0x322   : > { %v4262_v46 = vadd.f32 %v4261_v55, %v3589_v16  ;;  %v3591_v63 = vadd.f32 %v3590_v12, %v10567_v33  ;;  %v10707_v28 = vpack.c.bf16 %v4861_v58, %v4859_v9  ;;  %v4862_v9 = vmax.f32 %v4260_v52, 0.0  ;;  %v12904_v16 = vld [vmem:[#allocation118_spill] sm:$0xff] }
 0x323   : > { %v3592_v30 = vpop.f32.mrf.mxu0  ;;  %v4265_v49 = vpop.f32.mrf.mxu1  ;;  %v2723_v61 = vmax.f32 %v2182_v41, 0.0  ;;  %v2727_v50 = vmax.f32 %v2186_v32, 0.0  ;;  %v12906_v32 = vld [vmem:[#allocation115_spill] sm:$0xff] }
 0x324   : > { %v4264_v0 = vadd.f32 %v4263_v59, %v3591_v63  ;;  %v3593_v6 = vadd.f32 %v3592_v30, %v10571_v8  ;;  %v4863_v17 = vmax.f32 %v4262_v46, 0.0 }
 0x325   : > { %v3596_v5 = vpop.f32.mrf.mxu0  ;;  %3835 = vmatmul.mubr.bf16.gmra.mxu0 %v12902_v34  ;;  %v4269_v19 = vpop.f32.mrf.mxu1  ;;  %4508 = vmatmul.mubr.bf16.gmra.mxu1 %v12903_v27 }
 0x326   : > { %v4864_v15 = vmax.f32 %v4264_v0, 0.0  ;;  %v4266_v55 = vadd.f32 %v4265_v49, %v3593_v6  ;;  %v3597_v58 = vadd.f32 %v3596_v5, %v10567_v33  ;;  %3844 = vmatprep.mubr.bf16.mxu0 %v12904_v16  ;;  %4517 = vmatprep.mubr.bf16.mxu1 %v10327_v23 }
 0x327   : > { %v3598_v12 = vpop.f32.mrf.mxu0  ;;  %v4271_v25 = vpop.f32.mrf.mxu1 }
 0x328   : > { %v10721_v59 = vpack.c.bf16 %v4864_v15, %v4862_v9  ;;  %v4865_v63 = vmax.f32 %v4266_v55, 0.0  ;;  %v4270_v30 = vadd.f32 %v4269_v19, %v3597_v58  ;;  %v3599_v34 = vadd.f32 %v3598_v12, %v10571_v8  ;;  %v12905_v19 = vld [vmem:[#allocation31_spill] sm:$0xff]  ;;  %v12907_v58 = vld [vmem:[#allocation116_spill] sm:$0xff] }
 0x329   : > { %v3600_v52 = vpop.f32.mrf.mxu0  ;;  %v4273_v0 = vpop.f32.mrf.mxu1  ;;  %v2192_v9 = vadd.f32 %v10202_v13, %v9416_v38  ;;  %v2196_v15 = vadd.f32 %v12905_v19, %v9416_v38  ;;  %v10734_v12 = vpack.c.bf16 %v2727_v50, %v2723_v61 }
 0x32a   : > { %v4272_v6 = vadd.f32 %v4271_v25, %v3599_v34  ;;  %v3601_v49 = vadd.f32 %v3600_v52, %v10567_v33  ;;  %v10725_v5 = vpack.c.bf16 %v4865_v63, %v4863_v17  ;;  %v4866_v17 = vmax.f32 %v4270_v30, 0.0  ;;  %v12908_v52 = vld [vmem:[#allocation122_spill] sm:$0xff] }
 0x32b   : > { %v3602_v27 = vpop.f32.mrf.mxu0  ;;  %v4275_v23 = vpop.f32.mrf.mxu1  ;;  %v2731_v61 = vmax.f32 %v2192_v9, 0.0  ;;  %v2735_v50 = vmax.f32 %v2196_v15, 0.0  ;;  %v2202_v9 = vadd.f32 %v10228_v37, %v9416_v38  ;;  %v12911_v15 = vld [vmem:[#allocation34_spill] sm:$0xff] }
 0x32c   : > { %v4274_v46 = vadd.f32 %v4273_v0, %v3601_v49  ;;  %v3603_v16 = vadd.f32 %v3602_v27, %v10571_v8  ;;  %v4867_v13 = vmax.f32 %v4272_v6, 0.0 }
 0x32d   : > { %v3606_v41 = vpop.f32.mrf.mxu0  ;;  %3845 = vmatmul.mubr.bf16.gmra.mxu0 %v12906_v32  ;;  %v4279_v55 = vpop.f32.mrf.mxu1  ;;  %4518 = vmatmul.mubr.bf16.gmra.mxu1 %v12907_v58 }
 0x32e   : > { %v4868_v25 = vmax.f32 %v4274_v46, 0.0  ;;  %v4276_v63 = vadd.f32 %v4275_v23, %v3603_v16  ;;  %v3607_v34 = vadd.f32 %v3606_v41, %v10567_v33  ;;  %3854 = vmatprep.mubr.bf16.mxu0 %v12908_v52  ;;  %4527 = vmatprep.mubr.bf16.mxu1 %v10353_v26  ;;  %v8569_v26 = vld [vmem:[%s12512_s3 + $0x58] sm:$0xff]   ;;  %v12912_v52 = vld [vmem:[#allocation119_spill] sm:$0xff] }
 0x32f   : > { %v3608_v0 = vpop.f32.mrf.mxu0  ;;  %v4281_v49 = vpop.f32.mrf.mxu1  ;;  %5382 = vmatpush2.bf16.msra.mxu0 %v8569_v26 }
 0x330   : > { %v10739_v27 = vpack.c.bf16 %v4868_v25, %v4866_v17  ;;  %v4869_v19 = vmax.f32 %v4276_v63, 0.0  ;;  %v4280_v32 = vadd.f32 %v4279_v55, %v3607_v34  ;;  %v3609_v58 = vadd.f32 %v3608_v0, %v10571_v8  ;;  %5383 = vmatprep.subr.bf16.mxu0 %v12547_v31 }
 0x331   : > { %v3610_v30 = vpop.f32.mrf.mxu0  ;;  %v4283_v46 = vpop.f32.mrf.mxu1  ;;  %v2206_v63 = vadd.f32 %v12911_v15, %v9416_v38 }
 0x332   : > { %12909 = vst [vmem:[#allocation94_spill] sm:$0xff] %v10739_v27  ;;  %v4282_v23 = vadd.f32 %v4281_v49, %v3609_v58  ;;  %v3611_v16 = vadd.f32 %v3610_v30, %v10567_v33  ;;  %v10746_v6 = vpack.c.bf16 %v4869_v19, %v4867_v13  ;;  %v12913_v49 = vld [vmem:[#allocation120_spill] sm:$0xff]  ;;  %v10755_v13 = vpack.c.bf16 %v2735_v50, %v2731_v61 }
 0x333   : > { %v3612_v41 = vpop.f32.mrf.mxu0  ;;  %v4285_v17 = vpop.f32.mrf.mxu1  ;;  %v4870_v19 = vmax.f32 %v4280_v32, 0.0  ;;  %v2739_v32 = vmax.f32 %v2202_v9, 0.0  ;;  %v2743_v50 = vmax.f32 %v2206_v63, 0.0  ;;  %v12917_v63 = vld [vmem:[#allocation123_spill] sm:$0xff] }
 0x334   : > { %12910 = vst [vmem:[#allocation73_spill] sm:$0xff] %v10746_v6  ;;  %v4284_v25 = vadd.f32 %v4283_v46, %v3611_v16  ;;  %v3613_v55 = vadd.f32 %v3612_v41, %v10571_v8  ;;  %v12914_v16 = vld [vmem:[#allocation126_spill] sm:$0xff]  ;;  %v4871_v37 = vmax.f32 %v4282_v23, 0.0 }
 0x335   : > { %v3616_v34 = vpop.f32.mrf.mxu0  ;;  %3855 = vmatmul.mubr.bf16.gmra.mxu0 %v12912_v52  ;;  %v4289_v0 = vpop.f32.mrf.mxu1  ;;  %4528 = vmatmul.mubr.bf16.gmra.mxu1 %v12913_v49 }
 0x336   : > { %v4872_v58 = vmax.f32 %v4284_v25, 0.0  ;;  %v4286_v30 = vadd.f32 %v4285_v17, %v3613_v55  ;;  %v3617_v46 = vadd.f32 %v3616_v34, %v10567_v33  ;;  %3864 = vmatprep.mubr.bf16.mxu0 %v12914_v16  ;;  %4537 = vmatprep.mubr.bf16.mxu1 %v10382_v47 }
 0x337   : > { %v3618_v26 = vpop.f32.mrf.mxu0  ;;  %v4291_v41 = vpop.f32.mrf.mxu1 }
 0x338   : > { %v10761_v15 = vpack.c.bf16 %v4872_v58, %v4870_v19  ;;  %v4873_v52 = vmax.f32 %v4286_v30, 0.0  ;;  %v4290_v49 = vadd.f32 %v4289_v0, %v3617_v46  ;;  %v3619_v61 = vadd.f32 %v3618_v26, %v10571_v8  ;;  %v12916_v0 = vld [vmem:[#allocation37_spill] sm:$0xff]  ;;  %v12918_v46 = vld [vmem:[#allocation124_spill] sm:$0xff] }
 0x339   : > { %v3620_v17 = vpop.f32.mrf.mxu0  ;;  %v4293_v25 = vpop.f32.mrf.mxu1  ;;  %v2212_v19 = vadd.f32 %v10254_v51, %v9416_v38  ;;  %v2216_v58 = vadd.f32 %v12916_v0, %v9416_v38  ;;  %v10774_v26 = vpack.c.bf16 %v2743_v50, %v2739_v32 }
 0x33a   : > { %12915 = vst [vmem:[#allocation14_spill] sm:$0xff] %v10761_v15  ;;  %v4292_v55 = vadd.f32 %v4291_v41, %v3619_v61  ;;  %v3621_v34 = vadd.f32 %v3620_v17, %v10567_v33  ;;  %v10765_v16 = vpack.c.bf16 %v4873_v52, %v4871_v37  ;;  %v4874_v37 = vmax.f32 %v4290_v49, 0.0  ;;  %v12919_v17 = vld [vmem:[#allocation130_spill] sm:$0xff] }
 0x33b   : > { %v3622_v47 = vpop.f32.mrf.mxu0  ;;  %v4295_v23 = vpop.f32.mrf.mxu1  ;;  %v2747_v32 = vmax.f32 %v2212_v19, 0.0  ;;  %v2751_v50 = vmax.f32 %v2216_v58, 0.0  ;;  %v12922_v58 = vld [vmem:[#allocation127_spill] sm:$0xff] }
 0x33c   : > { %v4294_v27 = vadd.f32 %v4293_v25, %v3621_v34  ;;  %v3623_v6 = vadd.f32 %v3622_v47, %v10571_v8  ;;  %v4875_v51 = vmax.f32 %v4292_v55, 0.0 }
 0x33d   : > { %v3626_v9 = vpop.f32.mrf.mxu0  ;;  %3865 = vmatmul.mubr.bf16.gmra.mxu0 %v12917_v63  ;;  %v4299_v30 = vpop.f32.mrf.mxu1  ;;  %4538 = vmatmul.mubr.bf16.gmra.mxu1 %v12918_v46 }
 0x33e   : > { %v4876_v41 = vmax.f32 %v4294_v27, 0.0  ;;  %v4296_v52 = vadd.f32 %v4295_v23, %v3623_v6  ;;  %v3627_v61 = vadd.f32 %v3626_v9, %v10567_v33  ;;  %3874 = vmatprep.mubr.bf16.mxu0 %v12919_v17  ;;  %4547 = vmatprep.mubr.bf16.mxu1 %v10409_v54 }
 0x33f   : > { %v3628_v25 = vpop.f32.mrf.mxu0  ;;  %v4301_v34 = vpop.f32.mrf.mxu1 }
 0x340   : > { %v10779_v47 = vpack.c.bf16 %v4876_v41, %v4874_v37  ;;  %v4877_v0 = vmax.f32 %v4296_v52, 0.0  ;;  %v4300_v63 = vadd.f32 %v4299_v30, %v3627_v61  ;;  %v3629_v46 = vadd.f32 %v3628_v25, %v10571_v8  ;;  %v12921_v30 = vld [vmem:[#allocation40_spill] sm:$0xff] }
 0x341   : > { %v3630_v49 = vpop.f32.mrf.mxu0  ;;  %v4303_v27 = vpop.f32.mrf.mxu1  ;;  %v2222_v37 = vadd.f32 %v10283_v39, %v9416_v38  ;;  %v2226_v41 = vadd.f32 %v12921_v30, %v9416_v38  ;;  %v12923_v61 = vld [vmem:[#allocation128_spill] sm:$0xff]  ;;  %v10792_v25 = vpack.c.bf16 %v2751_v50, %v2747_v32 }
 0x342   : > { %12920 = vst [vmem:[#allocation91_spill] sm:$0xff] %v10779_v47  ;;  %v4302_v6 = vadd.f32 %v4301_v34, %v3629_v46  ;;  %v3631_v23 = vadd.f32 %v3630_v49, %v10567_v33  ;;  %v10783_v9 = vpack.c.bf16 %v4877_v0, %v4875_v51  ;;  %v4878_v51 = vmax.f32 %v4300_v63, 0.0  ;;  %v12924_v49 = vld [vmem:[#allocation134_spill] sm:$0xff] }
 0x343   : > { %v3632_v17 = vpop.f32.mrf.mxu0  ;;  %v4305_v54 = vpop.f32.mrf.mxu1  ;;  %v2755_v32 = vmax.f32 %v2222_v37, 0.0  ;;  %v2759_v50 = vmax.f32 %v2226_v41, 0.0  ;;  %v12926_v41 = vld [vmem:[#allocation131_spill] sm:$0xff] }
 0x344   : > { %v4304_v55 = vadd.f32 %v4303_v27, %v3631_v23  ;;  %v3633_v15 = vadd.f32 %v3632_v17, %v10571_v8  ;;  %v4879_v39 = vmax.f32 %v4302_v6, 0.0 }
 0x345   : > { %v3636_v19 = vpop.f32.mrf.mxu0  ;;  %3875 = vmatmul.mubr.bf16.gmra.mxu0 %v12922_v58  ;;  %v4309_v52 = vpop.f32.mrf.mxu1  ;;  %4548 = vmatmul.mubr.bf16.gmra.mxu1 %v12923_v61 }
 0x346   : > { %v4880_v34 = vmax.f32 %v4304_v55, 0.0  ;;  %v4306_v0 = vadd.f32 %v4305_v54, %v3633_v15  ;;  %v3637_v46 = vadd.f32 %v3636_v19, %v10567_v33  ;;  %3884 = vmatprep.mubr.bf16.mxu0 %v12924_v49  ;;  %4557 = vmatprep.mubr.bf16.mxu1 %v10435_v10 }
 0x347   : > { %v3638_v27 = vpop.f32.mrf.mxu0  ;;  %v4311_v23 = vpop.f32.mrf.mxu1 }
 0x348   : > { %v10797_v17 = vpack.c.bf16 %v4880_v34, %v4878_v51  ;;  %v4881_v30 = vmax.f32 %v4306_v0, 0.0  ;;  %v4310_v58 = vadd.f32 %v4309_v52, %v3637_v46  ;;  %v3639_v61 = vadd.f32 %v3638_v27, %v10571_v8  ;;  %v12925_v52 = vld [vmem:[#allocation43_spill] sm:$0xff]  ;;  %v12927_v46 = vld [vmem:[#allocation132_spill] sm:$0xff] }
 0x349   : > { %v3640_v63 = vpop.f32.mrf.mxu0  ;;  %v4313_v55 = vpop.f32.mrf.mxu1  ;;  %v2232_v51 = vadd.f32 %v10310_v45, %v9416_v38  ;;  %v2236_v34 = vadd.f32 %v12925_v52, %v9416_v38  ;;  %v10810_v27 = vpack.c.bf16 %v2759_v50, %v2755_v32 }
 0x34a   : > { %v4312_v15 = vadd.f32 %v4311_v23, %v3639_v61  ;;  %v3641_v54 = vadd.f32 %v3640_v63, %v10567_v33  ;;  %v10801_v19 = vpack.c.bf16 %v4881_v30, %v4879_v39  ;;  %v4882_v39 = vmax.f32 %v4310_v58, 0.0  ;;  %v12928_v63 = vld [vmem:[#allocation138_spill] sm:$0xff] }
 0x34b   : > { %v3642_v49 = vpop.f32.mrf.mxu0  ;;  %v4315_v10 = vpop.f32.mrf.mxu1  ;;  %v2763_v32 = vmax.f32 %v2232_v51, 0.0  ;;  %v2767_v50 = vmax.f32 %v2236_v34, 0.0  ;;  %v2242_v51 = vadd.f32 %v10336_v62, %v9416_v38  ;;  %v12931_v34 = vld [vmem:[#allocation46_spill] sm:$0xff] }
 0x34c   : > { %v4314_v6 = vadd.f32 %v4313_v55, %v3641_v54  ;;  %v3643_v47 = vadd.f32 %v3642_v49, %v10571_v8  ;;  %v4883_v45 = vmax.f32 %v4312_v15, 0.0 }
 0x34d   : > { %v3646_v37 = vpop.f32.mrf.mxu0  ;;  %3885 = vmatmul.mubr.bf16.gmra.mxu0 %v12926_v41  ;;  %v4319_v0 = vpop.f32.mrf.mxu1  ;;  %4558 = vmatmul.mubr.bf16.gmra.mxu1 %v12927_v46 }
 0x34e   : > { %v4884_v23 = vmax.f32 %v4314_v6, 0.0  ;;  %v4316_v30 = vadd.f32 %v4315_v10, %v3643_v47  ;;  %v3647_v61 = vadd.f32 %v3646_v37, %v10567_v33  ;;  %3894 = vmatprep.mubr.bf16.mxu0 %v12928_v63  ;;  %4567 = vmatprep.mubr.bf16.mxu1 %v10461_v53  ;;  %v8570_v53 = vld [vmem:[%s12512_s3 + $0x50] sm:$0xff]   ;;  %v12932_v63 = vld [vmem:[#allocation135_spill] sm:$0xff] }
 0x34f   : > { %v3648_v55 = vpop.f32.mrf.mxu0  ;;  %v4321_v54 = vpop.f32.mrf.mxu1  ;;  %5384 = vmatpush2.bf16.msra.mxu0 %v8570_v53 }
 0x350   : > { %v10815_v49 = vpack.c.bf16 %v4884_v23, %v4882_v39  ;;  %v4885_v52 = vmax.f32 %v4316_v30, 0.0  ;;  %v4320_v41 = vadd.f32 %v4319_v0, %v3647_v61  ;;  %v3649_v46 = vadd.f32 %v3648_v55, %v10571_v8  ;;  %5385 = vmatprep.subr.bf16.mxu0 %v12547_v31 }
 0x351   : > { %v3650_v58 = vpop.f32.mrf.mxu0  ;;  %v4323_v6 = vpop.f32.mrf.mxu1  ;;  %v2246_v30 = vadd.f32 %v12931_v34, %v9416_v38 }
 0x352   : > { %12929 = vst [vmem:[#allocation92_spill] sm:$0xff] %v10815_v49  ;;  %v4322_v47 = vadd.f32 %v4321_v54, %v3649_v46  ;;  %v3651_v10 = vadd.f32 %v3650_v58, %v10567_v33  ;;  %v10822_v15 = vpack.c.bf16 %v4885_v52, %v4883_v45  ;;  %v12933_v54 = vld [vmem:[#allocation136_spill] sm:$0xff]  ;;  %v10831_v45 = vpack.c.bf16 %v2767_v50, %v2763_v32 }
 0x353   : > { %v3652_v37 = vpop.f32.mrf.mxu0  ;;  %v4325_v39 = vpop.f32.mrf.mxu1  ;;  %v4886_v52 = vmax.f32 %v4320_v41, 0.0  ;;  %v2771_v41 = vmax.f32 %v2242_v51, 0.0  ;;  %v2775_v50 = vmax.f32 %v2246_v30, 0.0  ;;  %v12937_v30 = vld [vmem:[#allocation139_spill] sm:$0xff] }
 0x354   : > { %12930 = vst [vmem:[#allocation98_spill] sm:$0xff] %v10822_v15  ;;  %v4324_v23 = vadd.f32 %v4323_v6, %v3651_v10  ;;  %v3653_v0 = vadd.f32 %v3652_v37, %v10571_v8  ;;  %v12934_v10 = vld [vmem:[#allocation141_spill] sm:$0xff]  ;;  %v4887_v62 = vmax.f32 %v4322_v47, 0.0 }
 0x355   : > { %v3656_v61 = vpop.f32.mrf.mxu0  ;;  %3895 = vmatmul.mubr.bf16.gmra.mxu0 %v12932_v63  ;;  %v4329_v55 = vpop.f32.mrf.mxu1  ;;  %4568 = vmatmul.mubr.bf16.gmra.mxu1 %v12933_v54 }
 0x356   : > { %v4888_v46 = vmax.f32 %v4324_v23, 0.0  ;;  %v4326_v58 = vadd.f32 %v4325_v39, %v3653_v0  ;;  %v3657_v6 = vadd.f32 %v3656_v61, %v10567_v33  ;;  %3904 = vmatprep.mubr.bf16.mxu0 %v12934_v10  ;;  %4577 = vmatprep.mubr.bf16.mxu1 %v10490_v14 }
 0x357   : > { %v3658_v53 = vpop.f32.mrf.mxu0  ;;  %v4331_v37 = vpop.f32.mrf.mxu1 }
 0x358   : > { %v10837_v34 = vpack.c.bf16 %v4888_v46, %v4886_v52  ;;  %v4889_v63 = vmax.f32 %v4326_v58, 0.0  ;;  %v4330_v54 = vadd.f32 %v4329_v55, %v3657_v6  ;;  %v3659_v32 = vadd.f32 %v3658_v53, %v10571_v8  ;;  %v12936_v55 = vld [vmem:[#allocation49_spill] sm:$0xff]  ;;  %v12938_v6 = vld [vmem:[#allocation140_spill] sm:$0xff] }
 0x359   : > { %v3660_v39 = vpop.f32.mrf.mxu0  ;;  %v4333_v23 = vpop.f32.mrf.mxu1  ;;  %v2252_v52 = vadd.f32 %v10362_v11, %v9416_v38  ;;  %v2256_v46 = vadd.f32 %v12936_v55, %v9416_v38  ;;  %v10850_v53 = vpack.c.bf16 %v2775_v50, %v2771_v41 }
 0x35a   : > { %12935 = vst [vmem:[#allocation16_spill] sm:$0xff] %v10837_v34  ;;  %v4332_v0 = vadd.f32 %v4331_v37, %v3659_v32  ;;  %v3661_v61 = vadd.f32 %v3660_v39, %v10567_v33  ;;  %v10841_v10 = vpack.c.bf16 %v4889_v63, %v4887_v62  ;;  %v4890_v62 = vmax.f32 %v4330_v54, 0.0  ;;  %v12939_v39 = vld [vmem:[#allocation6_spill] sm:$0xff] }
 0x35b   : > { %v3662_v14 = vpop.f32.mrf.mxu0  ;;  %v4335_v47 = vpop.f32.mrf.mxu1  ;;  %v2779_v41 = vmax.f32 %v2252_v52, 0.0  ;;  %v2783_v50 = vmax.f32 %v2256_v46, 0.0  ;;  %v12942_v46 = vld [vmem:[#allocation3_spill] sm:$0xff] }
 0x35c   : > { %v4334_v49 = vadd.f32 %v4333_v23, %v3661_v61  ;;  %v3663_v15 = vadd.f32 %v3662_v14, %v10571_v8  ;;  %v4891_v11 = vmax.f32 %v4332_v0, 0.0 }
 0x35d   : > { %v3666_v51 = vpop.f32.mrf.mxu0  ;;  %3905 = vmatmul.mubr.bf16.gmra.mxu0 %v12937_v30  ;;  %v4339_v58 = vpop.f32.mrf.mxu1  ;;  %4578 = vmatmul.mubr.bf16.gmra.mxu1 %v12938_v6 }
 0x35e   : > { %v4892_v37 = vmax.f32 %v4334_v49, 0.0  ;;  %v4336_v63 = vadd.f32 %v4335_v47, %v3663_v15  ;;  %v3667_v32 = vadd.f32 %v3666_v51, %v10567_v33  ;;  %3914 = vmatprep.mubr.bf16.mxu0 %v12939_v39  ;;  %4587 = vmatprep.mubr.bf16.mxu1 %v10517_v60 }
 0x35f   : > { %v3668_v23 = vpop.f32.mrf.mxu0  ;;  %v4341_v61 = vpop.f32.mrf.mxu1 }
 0x360   : > { %v10855_v14 = vpack.c.bf16 %v4892_v37, %v4890_v62  ;;  %v4893_v55 = vmax.f32 %v4336_v63, 0.0  ;;  %v4340_v30 = vadd.f32 %v4339_v58, %v3667_v32  ;;  %v3669_v6 = vadd.f32 %v3668_v23, %v10571_v8  ;;  %v12941_v58 = vld [vmem:[#allocation52_spill] sm:$0xff]  ;;  %v12943_v32 = vld [vmem:[#allocation142_spill] sm:$0xff] }
 0x361   : > { %v3670_v54 = vpop.f32.mrf.mxu0  ;;  %v4343_v49 = vpop.f32.mrf.mxu1  ;;  %v2262_v62 = vadd.f32 %v10391_v7, %v9416_v38  ;;  %v2266_v37 = vadd.f32 %v12941_v58, %v9416_v38  ;;  %v10868_v23 = vpack.c.bf16 %v2783_v50, %v2779_v41 }
 0x362   : > { %12940 = vst [vmem:[#allocation95_spill] sm:$0xff] %v10855_v14  ;;  %v4342_v15 = vadd.f32 %v4341_v61, %v3669_v6  ;;  %v3671_v47 = vadd.f32 %v3670_v54, %v10567_v33  ;;  %v10859_v51 = vpack.c.bf16 %v4893_v55, %v4891_v11  ;;  %v4894_v11 = vmax.f32 %v4340_v30, 0.0  ;;  %v12944_v54 = vld [vmem:[#allocation4_spill] sm:$0xff] }
 0x363   : > { %v3672_v39 = vpop.f32.mrf.mxu0  ;;  %v4345_v60 = vpop.f32.mrf.mxu1  ;;  %v2787_v41 = vmax.f32 %v2262_v62, 0.0  ;;  %v2791_v50 = vmax.f32 %v2266_v37, 0.0  ;;  %v12946_v37 = vld [vmem:[#allocation57_spill] sm:$0xff] }
 0x364   : > { %v4344_v0 = vadd.f32 %v4343_v49, %v3671_v47  ;;  %v3673_v34 = vadd.f32 %v3672_v39, %v10571_v8  ;;  %v4895_v7 = vmax.f32 %v4342_v15, 0.0 }
 0x365   : > { %v3676_v52 = vpop.f32.mrf.mxu0  ;;  %3915 = vmatmul.mubr.bf16.gmra.mxu0 %v12942_v46  ;;  %v4349_v63 = vpop.f32.mrf.mxu1  ;;  %4588 = vmatmul.mubr.bf16.gmra.mxu1 %v12943_v32 }
 0x366   : > { %v4896_v61 = vmax.f32 %v4344_v0, 0.0  ;;  %v4346_v55 = vadd.f32 %v4345_v60, %v3673_v34  ;;  %v3677_v6 = vadd.f32 %v3676_v52, %v10567_v33  ;;  %3924 = vmatprep.mubr.bf16.mxu0 %v12944_v54  ;;  %4597 = vmatprep.mubr.bf16.mxu1 %v10543_v1 }
 0x367   : > { %v3678_v49 = vpop.f32.mrf.mxu0  ;;  %v4351_v47 = vpop.f32.mrf.mxu1 }
 0x368   : > { %v10873_v39 = vpack.c.bf16 %v4896_v61, %v4894_v11  ;;  %v4897_v58 = vmax.f32 %v4346_v55, 0.0  ;;  %v4350_v46 = vadd.f32 %v4349_v63, %v3677_v6  ;;  %v3679_v32 = vadd.f32 %v3678_v49, %v10571_v8  ;;  %v12945_v63 = vld [vmem:[#allocation55_spill] sm:$0xff] }
 0x369   : > { %v3680_v30 = vpop.f32.mrf.mxu0  ;;  %v4353_v0 = vpop.f32.mrf.mxu1  ;;  %v2272_v11 = vadd.f32 %v10418_v42, %v9416_v38  ;;  %v2276_v61 = vadd.f32 %v12945_v63, %v9416_v38  ;;  %v12947_v6 = vld [vmem:[#allocation59_spill] sm:$0xff]  ;;  %v10886_v49 = vpack.c.bf16 %v2791_v50, %v2787_v41 }
 0x36a   : > { %v4352_v34 = vadd.f32 %v4351_v47, %v3679_v32  ;;  %v3681_v60 = vadd.f32 %v3680_v30, %v10567_v33  ;;  %v10877_v52 = vpack.c.bf16 %v4897_v58, %v4895_v7  ;;  %v4898_v7 = vmax.f32 %v4350_v46, 0.0  ;;  %v12948_v30 = vld [vmem:[#allocation7_spill] sm:$0xff] }
 0x36b   : > { %v3682_v54 = vpop.f32.mrf.mxu0  ;;  %v4355_v1 = vpop.f32.mrf.mxu1  ;;  %v2795_v41 = vmax.f32 %v2272_v11, 0.0  ;;  %v2799_v50 = vmax.f32 %v2276_v61, 0.0  ;;  %v2282_v11 = vadd.f32 %v10444_v2, %v9416_v38  ;;  %v12950_v61 = vld [vmem:[#allocation60_spill] sm:$0xff] }
 0x36c   : > { %v4354_v15 = vadd.f32 %v4353_v0, %v3681_v60  ;;  %v3683_v14 = vadd.f32 %v3682_v54, %v10571_v8  ;;  %v4899_v42 = vmax.f32 %v4352_v34, 0.0 }
 0x36d   : > { %v3686_v62 = vpop.f32.mrf.mxu0  ;;  %3925 = vmatmul.mubr.bf16.gmra.mxu0 %v12946_v37  ;;  %v4359_v55 = vpop.f32.mrf.mxu1  ;;  %4598 = vmatmul.mubr.bf16.gmra.mxu1 %v12947_v6 }
 0x36e   : > { %v4900_v47 = vmax.f32 %v4354_v15, 0.0  ;;  %v4356_v58 = vadd.f32 %v4355_v1, %v3683_v14  ;;  %v3687_v32 = vadd.f32 %v3686_v62, %v10567_v33  ;;  %3934 = vmatprep.mubr.bf16.mxu0 %v12948_v30  ;;  %4607 = vmatprep.mubr.bf16.mxu1 %v10580_v18  ;;  %v8571_v18 = vld [vmem:[%s12512_s3 + $0x48] sm:$0xff]   ;;  %v12951_v30 = vld [vmem:[#allocation9_spill] sm:$0xff] }
 0x36f   : > { %v3688_v0 = vpop.f32.mrf.mxu0  ;;  %v4361_v60 = vpop.f32.mrf.mxu1  ;;  %5386 = vmatpush2.bf16.msra.mxu0 %v8571_v18 }
 0x370   : > { %v10891_v54 = vpack.c.bf16 %v4900_v47, %v4898_v7  ;;  %v4901_v63 = vmax.f32 %v4356_v58, 0.0  ;;  %v4360_v37 = vadd.f32 %v4359_v55, %v3687_v32  ;;  %v3689_v6 = vadd.f32 %v3688_v0, %v10571_v8  ;;  %5387 = vmatprep.subr.bf16.mxu0 %v12547_v31 }
 0x371   : > { %v3690_v46 = vpop.f32.mrf.mxu0  ;;  %v4363_v15 = vpop.f32.mrf.mxu1  ;;  %v2286_v58 = vadd.f32 %v12950_v61, %v9416_v38 }
 0x372   : > { %12949 = vst [vmem:[#allocation96_spill] sm:$0xff] %v10891_v54  ;;  %v4362_v14 = vadd.f32 %v4361_v60, %v3689_v6  ;;  %v3691_v1 = vadd.f32 %v3690_v46, %v10567_v33  ;;  %v10898_v34 = vpack.c.bf16 %v4901_v63, %v4899_v42  ;;  %v12952_v60 = vld [vmem:[#allocation62_spill] sm:$0xff]  ;;  %v10907_v42 = vpack.c.bf16 %v2799_v50, %v2795_v41 }
 0x373   : > { %v3692_v62 = vpop.f32.mrf.mxu0  ;;  %v4365_v7 = vpop.f32.mrf.mxu1  ;;  %v4902_v63 = vmax.f32 %v4360_v37, 0.0  ;;  %v2803_v37 = vmax.f32 %v2282_v11, 0.0  ;;  %v2807_v50 = vmax.f32 %v2286_v58, 0.0  ;;  %v2292_v11 = vadd.f32 %v10470_v29, %v9416_v38 }
 0x374   : > { %v4364_v47 = vadd.f32 %v4363_v15, %v3691_v1  ;;  %v3693_v55 = vadd.f32 %v3692_v62, %v10571_v8  ;;  %v12953_v1 = vld [vmem:[#allocation10_spill] sm:$0xff]  ;;  %v4903_v2 = vmax.f32 %v4362_v14, 0.0  ;;  %v2296_v58 = vadd.f32 %v10481_v48, %v9416_v38 }
 0x375   : > { %v3696_v32 = vpop.f32.mrf.mxu0  ;;  %3935 = vmatmul.mubr.bf16.gmra.mxu0 %v12951_v30  ;;  %v4369_v0 = vpop.f32.mrf.mxu1  ;;  %4608 = vmatmul.mubr.bf16.gmra.mxu1 %v12952_v60 }
 0x376   : > { %v4904_v6 = vmax.f32 %v4364_v47, 0.0  ;;  %v4366_v46 = vadd.f32 %v4365_v7, %v3693_v55  ;;  %v3697_v15 = vadd.f32 %v3696_v32, %v10567_v33  ;;  %3944 = vmatprep.mubr.bf16.mxu0 %v12953_v1  ;;  %4617 = vmatprep.mubr.bf16.mxu1 %v10603_v3 }
 0x377   : > { %v3698_v18 = vpop.f32.mrf.mxu0  ;;  %v4371_v62 = vpop.f32.mrf.mxu1 }
 0x378   : > { %v10913_v61 = vpack.c.bf16 %v4904_v6, %v4902_v63  ;;  %v4905_v30 = vmax.f32 %v4366_v46, 0.0  ;;  %v4370_v60 = vadd.f32 %v4369_v0, %v3697_v15  ;;  %v3699_v41 = vadd.f32 %v3698_v18, %v10571_v8  ;;  %v8572_v0 = vld [vmem:[%s12513_s4 + $0x70] ss:$8 sps:$4 sm:$0xff]   ;;  %v12955_v15 = vld [vmem:[#allocation66_spill] sm:$0xff] }
 0x379   : > { %v3700_v7 = vpop.f32.mrf.mxu0  ;;  %v4373_v47 = vpop.f32.mrf.mxu1  ;;  %v12954_v6 = vld [vmem:[#allocation12_spill] sm:$0xff]  ;;  %8052 = vmatprep.subr.bf16.mxu1 %v8572_v0 }
 0x37a   : > { %v4372_v55 = vadd.f32 %v4371_v62, %v3699_v41  ;;  %v3701_v32 = vadd.f32 %v3700_v7, %v10567_v33  ;;  %v10917_v1 = vpack.c.bf16 %v4905_v30, %v4903_v2  ;;  %v10929_v2 = vpack.c.bf16 %v2807_v50, %v2803_v37  ;;  %v12956_v7 = vld [vmem:[#allocation13_spill] sm:$0xff]  ;;  %8053 = vmatpush3.bf16.msra.mxu1 %v8572_v0 }
 0x37b   : > { %v3702_v3 = vpop.f32.mrf.mxu0  ;;  %v4375_v14 = vpop.f32.mrf.mxu1  ;;  %v4906_v18 = vmax.f32 %v4370_v60, 0.0  ;;  %v2811_v60 = vmax.f32 %v2292_v11, 0.0 }
 0x37c   : > { %v4374_v54 = vadd.f32 %v4373_v47, %v3701_v32  ;;  %v3703_v31 = vadd.f32 %v3702_v3, %v10571_v8  ;;  %v4907_v29 = vmax.f32 %v4372_v55, 0.0 }
 0x37d   : > { %v3706_v63 = vpop.f32.mrf.mxu0  ;;  %3945 = vmatmul.mubr.bf16.gmra.mxu0 %v12954_v6  ;;  %v4379_v46 = vpop.f32.mrf.mxu1  ;;  %4618 = vmatmul.mubr.bf16.gmra.mxu1 %v12955_v15 }
 0x37e   : > { %v4908_v62 = vmax.f32 %v4374_v54, 0.0  ;;  %v4376_v30 = vadd.f32 %v4375_v14, %v3703_v31  ;;  %v3707_v41 = vadd.f32 %v3706_v63, %v10567_v33  ;;  %3954 = vmatprep.mubr.bf16.mxu0 %v12956_v7  ;;  %4627 = vmatprep.mubr.bf16.mxu1 %v10622_v20  ;;  %v2815_v54 = vmax.f32 %v2296_v58, 0.0  ;;  %v12959_v58 = vld [vmem:[#allocation15_spill] sm:$0xff] }
 0x37f   : > { %v3708_v47 = vpop.f32.mrf.mxu0  ;;  %v4381_v48 = vpop.f32.mrf.mxu1 }
 0x380   : > { %v10934_v32 = vpack.c.bf16 %v4908_v62, %v4906_v18  ;;  %v4909_v3 = vmax.f32 %v4376_v30, 0.0  ;;  %v4380_v6 = vadd.f32 %v4379_v46, %v3707_v41  ;;  %v3709_v37 = vadd.f32 %v3708_v47, %v10571_v8  ;;  %v12958_v62 = vld [vmem:[#allocation69_spill] sm:$0xff]  ;;  %v12960_v41 = vld [vmem:[#allocation71_spill] sm:$0xff] }
 0x381   : > { %v3710_v50 = vpop.f32.mrf.mxu0  ;;  %v4383_v14 = vpop.f32.mrf.mxu1  ;;  %v2302_v46 = vadd.f32 %v10499_v40, %v9416_v38  ;;  %v2306_v0 = vadd.f32 %v12958_v62, %v9416_v38  ;;  %v10947_v47 = vpack.c.bf16 %v2815_v54, %v2811_v60 }
 0x382   : > { %12957 = vst [vmem:[#allocation102_spill] sm:$0xff] %v10934_v32  ;;  %v4382_v31 = vadd.f32 %v4381_v48, %v3709_v37  ;;  %v3711_v63 = vadd.f32 %v3710_v50, %v10567_v33  ;;  %v10938_v15 = vpack.c.bf16 %v4909_v3, %v4907_v29  ;;  %v4910_v29 = vmax.f32 %v4380_v6, 0.0  ;;  %v12961_v50 = vld [vmem:[#allocation78_spill] sm:$0xff] }
 0x383   : > { %v3712_v20 = vpop.f32.mrf.mxu0  ;;  %v4385_v55 = vpop.f32.mrf.mxu1  ;;  %v2819_v60 = vmax.f32 %v2302_v46, 0.0  ;;  %v2823_v54 = vmax.f32 %v2306_v0, 0.0  ;;  %v12963_v0 = vld [vmem:[#allocation18_spill] sm:$0xff] }
 0x384   : > { %v4384_v7 = vadd.f32 %v4383_v14, %v3711_v63  ;;  %v3713_v18 = vadd.f32 %v3712_v20, %v10571_v8  ;;  %v4911_v40 = vmax.f32 %v4382_v31, 0.0 }
 0x385   : > { %v3716_v11 = vpop.f32.mrf.mxu0  ;;  %3955 = vmatmul.mubr.bf16.gmra.mxu0 %v12959_v58  ;;  %v4389_v30 = vpop.f32.mrf.mxu1  ;;  %4628 = vmatmul.mubr.bf16.gmra.mxu1 %v12960_v41 }
 0x386   : > { %v4912_v48 = vmax.f32 %v4384_v7, 0.0  ;;  %v4386_v3 = vadd.f32 %v4385_v55, %v3713_v18  ;;  %v3717_v37 = vadd.f32 %v3716_v11, %v10567_v33  ;;  %3964 = vmatprep.mubr.bf16.mxu0 %v12961_v50  ;;  %4637 = vmatprep.mubr.bf16.mxu1 %v10640_v57 }
 0x387   : > { %v3718_v14 = vpop.f32.mrf.mxu0  ;;  %v4391_v63 = vpop.f32.mrf.mxu1 }
 0x388   : > { %v10952_v20 = vpack.c.bf16 %v4912_v48, %v4910_v29  ;;  %v4913_v62 = vmax.f32 %v4386_v3, 0.0  ;;  %v4390_v58 = vadd.f32 %v4389_v30, %v3717_v37  ;;  %v3719_v41 = vadd.f32 %v3718_v14, %v10571_v8  ;;  %v12962_v30 = vld [vmem:[#allocation74_spill] sm:$0xff]  ;;  %v12964_v37 = vld [vmem:[#allocation76_spill] sm:$0xff] }
 0x389   : > { %v3720_v6 = vpop.f32.mrf.mxu0  ;;  %v4393_v7 = vpop.f32.mrf.mxu1  ;;  %v2312_v29 = vadd.f32 %v10526_v21, %v9416_v38  ;;  %v2316_v48 = vadd.f32 %v12962_v30, %v9416_v38  ;;  %v10965_v14 = vpack.c.bf16 %v2823_v54, %v2819_v60 }
 0x38a   : > { %v4392_v55 = vadd.f32 %v4391_v63, %v3719_v41  ;;  %v3721_v18 = vadd.f32 %v3720_v6, %v10567_v33  ;;  %v10956_v11 = vpack.c.bf16 %v4913_v62, %v4911_v40  ;;  %v4914_v40 = vmax.f32 %v4390_v58, 0.0  ;;  %v12965_v6 = vld [vmem:[#allocation81_spill] sm:$0xff] }
 0x38b   : > { %v3722_v50 = vpop.f32.mrf.mxu0  ;;  %v4395_v57 = vpop.f32.mrf.mxu1  ;;  %v2827_v60 = vmax.f32 %v2312_v29, 0.0  ;;  %v2831_v54 = vmax.f32 %v2316_v48, 0.0  ;;  %v12968_v29 = vld [vmem:[#allocation5_spill] sm:$0xff] }
 0x38c   : > { %v4394_v31 = vadd.f32 %v4393_v7, %v3721_v18  ;;  %v3723_v32 = vadd.f32 %v3722_v50, %v10571_v8  ;;  %v4915_v21 = vmax.f32 %v4392_v55, 0.0  ;;  %v2322_v48 = vadd.f32 %v12968_v29, %v9416_v38 }
 0x38d   : > { %v3726_v46 = vpop.f32.mrf.mxu0  ;;  %3965 = vmatmul.mubr.bf16.gmra.mxu0 %v12963_v0  ;;  %v4399_v3 = vpop.f32.mrf.mxu1  ;;  %4638 = vmatmul.mubr.bf16.gmra.mxu1 %v12964_v37 }
 0x38e   : > { %v4916_v63 = vmax.f32 %v4394_v31, 0.0  ;;  %v4396_v62 = vadd.f32 %v4395_v57, %v3723_v32  ;;  %v3727_v41 = vadd.f32 %v3726_v46, %v10567_v33  ;;  %3974 = vmatprep.mubr.bf16.mxu0 %v12965_v6  ;;  %4647 = vmatprep.mubr.bf16.mxu1 %v10658_v22  ;;  %v8573_v22 = vld [vmem:[%s12512_s3 + $0x40] sm:$0xff]  }
 0x38f   : > { %v3728_v7 = vpop.f32.mrf.mxu0  ;;  %v4401_v18 = vpop.f32.mrf.mxu1  ;;  %5388 = vmatpush2.bf16.msra.mxu0 %v8573_v22  ;;  %v12972_v22 = vld [vmem:[#allocation85_spill] sm:$0xff] }
 0x390   : > { %v10970_v50 = vpack.c.bf16 %v4916_v63, %v4914_v40  ;;  %v4917_v30 = vmax.f32 %v4396_v62, 0.0  ;;  %v4400_v0 = vadd.f32 %v4399_v3, %v3727_v41  ;;  %v3729_v37 = vadd.f32 %v3728_v7, %v10571_v8  ;;  %v12969_v62 = vld [vmem:[#allocation80_spill] sm:$0xff]  ;;  %v12970_v7 = vld [vmem:[#allocation17_spill] sm:$0xff] }
 0x391   : > { %v3730_v58 = vpop.f32.mrf.mxu0  ;;  %v4403_v31 = vpop.f32.mrf.mxu1  ;;  %v2326_v41 = vadd.f32 %v12969_v62, %v9416_v38 }
 0x392   : > { %12966 = vst [vmem:[#allocation19_spill] sm:$0xff] %v10970_v50  ;;  %v4402_v32 = vadd.f32 %v4401_v18, %v3729_v37  ;;  %v3731_v57 = vadd.f32 %v3730_v58, %v10567_v33  ;;  %v10977_v55 = vpack.c.bf16 %v4917_v30, %v4915_v21  ;;  %v12971_v37 = vld [vmem:[#allocation21_spill] sm:$0xff]  ;;  %v10986_v21 = vpack.c.bf16 %v2831_v54, %v2827_v60 }
 0x393   : > { %v3732_v46 = vpop.f32.mrf.mxu0  ;;  %v4405_v40 = vpop.f32.mrf.mxu1  ;;  %v4918_v30 = vmax.f32 %v4400_v0, 0.0  ;;  %v2835_v60 = vmax.f32 %v2322_v48, 0.0  ;;  %v2839_v54 = vmax.f32 %v2326_v41, 0.0 }
 0x394   : > { %12967 = vst [vmem:[#allocation99_spill] sm:$0xff] %v10977_v55  ;;  %v4404_v63 = vadd.f32 %v4403_v31, %v3731_v57  ;;  %v3733_v3 = vadd.f32 %v3732_v46, %v10571_v8  ;;  %v4919_v46 = vmax.f32 %v4402_v32, 0.0 }
 0x395   : > { %v3736_v6 = vpop.f32.mrf.mxu0  ;;  %3975 = vmatmul.mubr.bf16.gmra.mxu0 %v12970_v7  ;;  %v4409_v18 = vpop.f32.mrf.mxu1  ;;  %4648 = vmatmul.mubr.bf16.gmra.mxu1 %v12971_v37  ;;  %v11000_v48 = vpack.c.bf16 %v2839_v54, %v2835_v60 }
 0x396   : > { %v4920_v58 = vmax.f32 %v4404_v63, 0.0  ;;  %v4406_v31 = vadd.f32 %v4405_v40, %v3733_v3  ;;  %v3737_v57 = vadd.f32 %v3736_v6, %v10567_v33  ;;  %3984 = vmatprep.mubr.bf16.mxu0 %v12972_v22  ;;  %4657 = vmatprep.mubr.bf16.mxu1 %v10679_v4 }
 0x397   : > { %v3738_v29 = vpop.f32.mrf.mxu0  ;;  %v4411_v38 = vpop.f32.mrf.mxu1 }
 0x398   : > { %v10991_v62 = vpack.c.bf16 %v4920_v58, %v4918_v30  ;;  %v4921_v7 = vmax.f32 %v4406_v31, 0.0  ;;  %v4410_v50 = vadd.f32 %v4409_v18, %v3737_v57  ;;  %v3739_v37 = vadd.f32 %v3738_v29, %v10571_v8  ;;  %v12973_v58 = vld [vmem:[#allocation20_spill] sm:$0xff] }
 0x399   : > { %v3740_v0 = vpop.f32.mrf.mxu0  ;;  %v4413_v63 = vpop.f32.mrf.mxu1  ;;  %v12974_v31 = vld [vmem:[#allocation24_spill] sm:$0xff] }
 0x39a   : > { %v4412_v40 = vadd.f32 %v4411_v38, %v3739_v37  ;;  %v3741_v3 = vadd.f32 %v3740_v0, %v10567_v33  ;;  %v10995_v6 = vpack.c.bf16 %v4921_v7, %v4919_v46  ;;  %v4922_v41 = vmax.f32 %v4410_v50, 0.0  ;;  %v12975_v46 = vld [vmem:[#allocation25_spill] sm:$0xff] }
 0x39b   : > { %v3742_v22 = vpop.f32.mrf.mxu0  ;;  %v4415_v4 = vpop.f32.mrf.mxu1 }
 0x39c   : > { %v4414_v32 = vadd.f32 %v4413_v63, %v3741_v3  ;;  %v3743_v55 = vadd.f32 %v3742_v22, %v10571_v8  ;;  %v4923_v7 = vmax.f32 %v4412_v40, 0.0 }
 0x39d   : > { %v3746_v30 = vpop.f32.mrf.mxu0  ;;  %3985 = vmatmul.mubr.bf16.gmra.mxu0 %v12973_v58  ;;  %v4419_v18 = vpop.f32.mrf.mxu1  ;;  %4658 = vmatmul.mubr.bf16.gmra.mxu1 %v12974_v31 }
 0x39e   : > { %v4924_v57 = vmax.f32 %v4414_v32, 0.0  ;;  %v4416_v29 = vadd.f32 %v4415_v4, %v3743_v55  ;;  %v3747_v38 = vadd.f32 %v3746_v30, %v10567_v33  ;;  %3994 = vmatprep.mubr.bf16.mxu0 %v12975_v46  ;;  %4667 = vmatprep.mubr.bf16.mxu1 %v10698_v43  ;;  %v12977_v46 = vld [vmem:[#allocation23_spill] sm:$0xff] }
 0x39f   : > { %v3748_v37 = vpop.f32.mrf.mxu0  ;;  %v4421_v0 = vpop.f32.mrf.mxu1 }
 0x3a0   : > { %v11005_v63 = vpack.c.bf16 %v4924_v57, %v4922_v41  ;;  %v4925_v3 = vmax.f32 %v4416_v29, 0.0  ;;  %v4420_v22 = vadd.f32 %v4419_v18, %v3747_v38  ;;  %v3749_v58 = vadd.f32 %v3748_v37, %v10571_v8  ;;  %v12978_v57 = vld [vmem:[#allocation27_spill] sm:$0xff] }
 0x3a1   : > { %v3750_v60 = vpop.f32.mrf.mxu0  ;;  %v4423_v54 = vpop.f32.mrf.mxu1 }
 0x3a2   : > { %12976 = vst [vmem:[#allocation100_spill] sm:$0xff] %v11005_v63  ;;  %v4422_v50 = vadd.f32 %v4421_v0, %v3749_v58  ;;  %v3751_v55 = vadd.f32 %v3750_v60, %v10567_v33  ;;  %v11009_v4 = vpack.c.bf16 %v4925_v3, %v4923_v7  ;;  %v4926_v18 = vmax.f32 %v4420_v22, 0.0  ;;  %v12979_v0 = vld [vmem:[#allocation28_spill] sm:$0xff]  ;;  %v12981_v63 = vld [vmem:[#allocation30_spill] sm:$0xff] }
 0x3a3   : > { %v3752_v32 = vpop.f32.mrf.mxu0  ;;  %v4425_v30 = vpop.f32.mrf.mxu1 }
 0x3a4   : > { %v4424_v31 = vadd.f32 %v4423_v54, %v3751_v55  ;;  %v3753_v43 = vadd.f32 %v3752_v32, %v10571_v8  ;;  %v4927_v7 = vmax.f32 %v4422_v50, 0.0 }
 0x3a5   : > { %v3756_v40 = vpop.f32.mrf.mxu0  ;;  %3995 = vmatmul.mubr.bf16.gmra.mxu0 %v12977_v46  ;;  %v4429_v41 = vpop.f32.mrf.mxu1  ;;  %4668 = vmatmul.mubr.bf16.gmra.mxu1 %v12978_v57 }
 0x3a6   : > { %v4928_v29 = vmax.f32 %v4424_v31, 0.0  ;;  %v4426_v38 = vadd.f32 %v4425_v30, %v3753_v43  ;;  %v3757_v37 = vadd.f32 %v3756_v40, %v10567_v33  ;;  %4004 = vmatprep.mubr.bf16.mxu0 %v12979_v0  ;;  %4677 = vmatprep.mubr.bf16.mxu1 %v10716_v35 }
 0x3a7   : > { %v3758_v3 = vpop.f32.mrf.mxu0  ;;  %v4431_v58 = vpop.f32.mrf.mxu1 }
 0x3a8   : > { %v11017_v60 = vpack.c.bf16 %v4928_v29, %v4926_v18  ;;  %v4929_v54 = vmax.f32 %v4426_v38, 0.0  ;;  %v4430_v55 = vadd.f32 %v4429_v41, %v3757_v37  ;;  %v3759_v32 = vadd.f32 %v3758_v3, %v10571_v8  ;;  %v12982_v29 = vld [vmem:[#allocation93_spill] sm:$0xff] }
 0x3a9   : > { %v3760_v46 = vpop.f32.mrf.mxu0  ;;  %v4433_v57 = vpop.f32.mrf.mxu1 }
 0x3aa   : > { %12980 = vst [vmem:[#allocation106_spill] sm:$0xff] %v11017_v60  ;;  %v4432_v22 = vadd.f32 %v4431_v58, %v3759_v32  ;;  %v3761_v30 = vadd.f32 %v3760_v46, %v10567_v33  ;;  %v11021_v31 = vpack.c.bf16 %v4929_v54, %v4927_v7  ;;  %v4930_v41 = vmax.f32 %v4430_v55, 0.0  ;;  %v12983_v58 = vld [vmem:[#allocation97_spill] sm:$0xff] }
 0x3ab   : > { %v3762_v43 = vpop.f32.mrf.mxu0  ;;  %v4435_v40 = vpop.f32.mrf.mxu1  ;;  %v12984_v60 = vld [vmem:[#allocation29_spill] sm:$0xff] }
 0x3ac   : > { %v4434_v0 = vadd.f32 %v4433_v57, %v3761_v30  ;;  %v3763_v35 = vadd.f32 %v3762_v43, %v10571_v8  ;;  %v4931_v7 = vmax.f32 %v4432_v22, 0.0 }
 0x3ad   : > { %v3766_v50 = vpop.f32.mrf.mxu0  ;;  %4005 = vmatmul.mubr.bf16.gmra.mxu0 %v12981_v63  ;;  %v4439_v18 = vpop.f32.mrf.mxu1  ;;  %4678 = vmatmul.mubr.bf16.gmra.mxu1 %v12982_v29 }
 0x3ae   : > { %v4932_v38 = vmax.f32 %v4434_v0, 0.0  ;;  %v4436_v37 = vadd.f32 %v4435_v40, %v3763_v35  ;;  %v3767_v3 = vadd.f32 %v3766_v50, %v10567_v33  ;;  %4014 = vmatprep.mubr.bf16.mxu0 %v12983_v58  ;;  %4687 = vmatprep.mubr.bf16.mxu1 %v10734_v12 }
 0x3af   : > { %v3768_v54 = vpop.f32.mrf.mxu0  ;;  %v4441_v32 = vpop.f32.mrf.mxu1 }
 0x3b0   : > { %v11029_v46 = vpack.c.bf16 %v4932_v38, %v4930_v41  ;;  %v4933_v57 = vmax.f32 %v4436_v37, 0.0  ;;  %v4440_v30 = vadd.f32 %v4439_v18, %v3767_v3  ;;  %v3769_v63 = vadd.f32 %v3768_v54, %v10571_v8  ;;  %v12985_v38 = vld [vmem:[#allocation33_spill] sm:$0xff] }
 0x3b1   : > { %v3770_v43 = vpop.f32.mrf.mxu0  ;;  %v4443_v29 = vpop.f32.mrf.mxu1 }
 0x3b2   : > { %v4442_v55 = vadd.f32 %v4441_v32, %v3769_v63  ;;  %v3771_v40 = vadd.f32 %v3770_v43, %v10567_v33  ;;  %v11033_v0 = vpack.c.bf16 %v4933_v57, %v4931_v7  ;;  %v4934_v18 = vmax.f32 %v4440_v30, 0.0  ;;  %v12986_v32 = vld [vmem:[#allocation101_spill] sm:$0xff] }
 0x3b3   : > { %v3772_v35 = vpop.f32.mrf.mxu0  ;;  %v4445_v50 = vpop.f32.mrf.mxu1 }
 0x3b4   : > { %v4444_v58 = vadd.f32 %v4443_v29, %v3771_v40  ;;  %v3773_v12 = vadd.f32 %v3772_v35, %v10571_v8  ;;  %v4935_v7 = vmax.f32 %v4442_v55, 0.0  ;;  %v8574_v55 = vld [vmem:[%s12513_s4 + $0x60] ss:$8 sps:$4 sm:$0xff]  }
 0x3b5   : > { %v3776_v22 = vpop.f32.mrf.mxu0  ;;  %4015 = vmatmul.mubr.bf16.gmra.mxu0 %v12984_v60  ;;  %v4449_v41 = vpop.f32.mrf.mxu1  ;;  %4688 = vmatmul.mubr.bf16.gmra.mxu1 %v12985_v38 }
 0x3b6   : > { %v4936_v37 = vmax.f32 %v4444_v58, 0.0  ;;  %v4446_v3 = vadd.f32 %v4445_v50, %v3773_v12  ;;  %v3777_v54 = vadd.f32 %v3776_v22, %v10567_v33  ;;  %4024 = vmatprep.mubr.bf16.mxu0 %v12986_v32  ;;  %4697 = vmatprep.mubr.bf16.mxu1 %v10755_v13 }
 0x3b7   : > { %v3778_v57 = vpop.f32.mrf.mxu0  ;;  %v4451_v63 = vpop.f32.mrf.mxu1  ;;  %8054 = vmatprep.subr.bf16.mxu1 %v8574_v55 }
 0x3b8   : > { %v11041_v43 = vpack.c.bf16 %v4936_v37, %v4934_v18  ;;  %v4937_v29 = vmax.f32 %v4446_v3, 0.0  ;;  %v4450_v40 = vadd.f32 %v4449_v41, %v3777_v54  ;;  %v3779_v60 = vadd.f32 %v3778_v57, %v10571_v8  ;;  %v12989_v41 = vld [vmem:[#allocation32_spill] sm:$0xff]  ;;  %8055 = vmatpush3.bf16.msra.mxu1 %v8574_v55 }
 0x3b9   : > { %v3780_v35 = vpop.f32.mrf.mxu0  ;;  %v4453_v38 = vpop.f32.mrf.mxu1  ;;  %v12990_v3 = vld [vmem:[#allocation36_spill] sm:$0xff] }
 0x3ba   : > { %12987 = vst [vmem:[#allocation22_spill] sm:$0xff] %v11041_v43  ;;  %v4452_v30 = vadd.f32 %v4451_v63, %v3779_v60  ;;  %v3781_v50 = vadd.f32 %v3780_v35, %v10567_v33  ;;  %v11045_v58 = vpack.c.bf16 %v4937_v29, %v4935_v7  ;;  %v4938_v54 = vmax.f32 %v4450_v40, 0.0  ;;  %v12991_v29 = vld [vmem:[#allocation105_spill] sm:$0xff] }
 0x3bb   : > { %v3782_v12 = vpop.f32.mrf.mxu0  ;;  %v4455_v22 = vpop.f32.mrf.mxu1 }
 0x3bc   : > { %12988 = vst [vmem:[#allocation103_spill] sm:$0xff] %v11045_v58  ;;  %v4454_v32 = vadd.f32 %v4453_v38, %v3781_v50  ;;  %v3783_v13 = vadd.f32 %v3782_v12, %v10571_v8  ;;  %v4939_v60 = vmax.f32 %v4452_v30, 0.0 }
 0x3bd   : > { %v3786_v18 = vpop.f32.mrf.mxu0  ;;  %4025 = vmatmul.mubr.bf16.gmra.mxu0 %v12989_v41  ;;  %v4459_v37 = vpop.f32.mrf.mxu1  ;;  %4698 = vmatmul.mubr.bf16.gmra.mxu1 %v12990_v3 }
 0x3be   : > { %v4940_v57 = vmax.f32 %v4454_v32, 0.0  ;;  %v4456_v63 = vadd.f32 %v4455_v22, %v3783_v13  ;;  %v3787_v7 = vadd.f32 %v3786_v18, %v10567_v33  ;;  %4034 = vmatprep.mubr.bf16.mxu0 %v12991_v29  ;;  %4707 = vmatprep.mubr.bf16.mxu1 %v10774_v26 }
 0x3bf   : > { %v3788_v35 = vpop.f32.mrf.mxu0  ;;  %v4461_v38 = vpop.f32.mrf.mxu1 }
 0x3c0   : > { %v11056_v50 = vpack.c.bf16 %v4940_v57, %v4938_v54  ;;  %v4941_v12 = vmax.f32 %v4456_v63, 0.0  ;;  %v4460_v41 = vadd.f32 %v4459_v37, %v3787_v7  ;;  %v3789_v43 = vadd.f32 %v3788_v35, %v10571_v8  ;;  %v12993_v54 = vld [vmem:[#allocation35_spill] sm:$0xff]  ;;  %v12995_v35 = vld [vmem:[#allocation109_spill] sm:$0xff] }
 0x3c1   : > { %v3790_v40 = vpop.f32.mrf.mxu0  ;;  %v4463_v32 = vpop.f32.mrf.mxu1  ;;  %v12994_v37 = vld [vmem:[#allocation39_spill] sm:$0xff] }
 0x3c2   : > { %12992 = vst [vmem:[#allocation104_spill] sm:$0xff] %v11056_v50  ;;  %v4462_v22 = vadd.f32 %v4461_v38, %v3789_v43  ;;  %v3791_v13 = vadd.f32 %v3790_v40, %v10567_v33  ;;  %v11060_v18 = vpack.c.bf16 %v4941_v12, %v4939_v60  ;;  %v4942_v63 = vmax.f32 %v4460_v41, 0.0  ;;  %v12997_v50 = vld [vmem:[#allocation38_spill] sm:$0xff] }
 0x3c3   : > { %v3792_v3 = vpop.f32.mrf.mxu0  ;;  %v4465_v26 = vpop.f32.mrf.mxu1 }
 0x3c4   : > { %v4464_v30 = vadd.f32 %v4463_v32, %v3791_v13  ;;  %v3793_v29 = vadd.f32 %v3792_v3, %v10571_v8  ;;  %v4943_v60 = vmax.f32 %v4462_v22, 0.0 }
 0x3c5   : > { %v3796_v58 = vpop.f32.mrf.mxu0  ;;  %4035 = vmatmul.mubr.bf16.gmra.mxu0 %v12993_v54  ;;  %v4469_v57 = vpop.f32.mrf.mxu1  ;;  %4708 = vmatmul.mubr.bf16.gmra.mxu1 %v12994_v37 }
 0x3c6   : > { %v4944_v55 = vmax.f32 %v4464_v30, 0.0  ;;  %v4466_v7 = vadd.f32 %v4465_v26, %v3793_v29  ;;  %v3797_v43 = vadd.f32 %v3796_v58, %v10567_v33  ;;  %4044 = vmatprep.mubr.bf16.mxu0 %v12995_v35  ;;  %4717 = vmatprep.mubr.bf16.mxu1 %v10792_v25 }
 0x3c7   : > { %v3798_v38 = vpop.f32.mrf.mxu0  ;;  %v4471_v12 = vpop.f32.mrf.mxu1 }
 0x3c8   : > { %v11068_v40 = vpack.c.bf16 %v4944_v55, %v4942_v63  ;;  %v4945_v32 = vmax.f32 %v4466_v7, 0.0  ;;  %v4470_v13 = vadd.f32 %v4469_v57, %v3797_v43  ;;  %v3799_v3 = vadd.f32 %v3798_v38, %v10571_v8  ;;  %v12998_v55 = vld [vmem:[#allocation42_spill] sm:$0xff] }
 0x3c9   : > { %v3800_v54 = vpop.f32.mrf.mxu0  ;;  %v4473_v37 = vpop.f32.mrf.mxu1 }
 0x3ca   : > { %12996 = vst [vmem:[#allocation110_spill] sm:$0xff] %v11068_v40  ;;  %v4472_v41 = vadd.f32 %v4471_v12, %v3799_v3  ;;  %v3801_v26 = vadd.f32 %v3800_v54, %v10567_v33  ;;  %v11072_v30 = vpack.c.bf16 %v4945_v32, %v4943_v60  ;;  %v4946_v57 = vmax.f32 %v4470_v13, 0.0  ;;  %v12999_v12 = vld [vmem:[#allocation113_spill] sm:$0xff] }
 0x3cb   : > { %v3802_v58 = vpop.f32.mrf.mxu0  ;;  %v4475_v29 = vpop.f32.mrf.mxu1  ;;  %v13001_v40 = vld [vmem:[#allocation41_spill] sm:$0xff] }
 0x3cc   : > { %v4474_v35 = vadd.f32 %v4473_v37, %v3801_v26  ;;  %v3803_v25 = vadd.f32 %v3802_v58, %v10571_v8  ;;  %v4947_v60 = vmax.f32 %v4472_v41, 0.0 }
 0x3cd   : > { %v3806_v22 = vpop.f32.mrf.mxu0  ;;  %4045 = vmatmul.mubr.bf16.gmra.mxu0 %v12997_v50  ;;  %v4479_v63 = vpop.f32.mrf.mxu1  ;;  %4718 = vmatmul.mubr.bf16.gmra.mxu1 %v12998_v55 }
 0x3ce   : > { %v4948_v7 = vmax.f32 %v4474_v35, 0.0  ;;  %v4476_v43 = vadd.f32 %v4475_v29, %v3803_v25  ;;  %v3807_v38 = vadd.f32 %v3806_v22, %v10567_v33  ;;  %4054 = vmatprep.mubr.bf16.mxu0 %v12999_v12  ;;  %4727 = vmatprep.mubr.bf16.mxu1 %v10810_v27 }
 0x3cf   : > { %v3808_v32 = vpop.f32.mrf.mxu0  ;;  %v4481_v3 = vpop.f32.mrf.mxu1 }
 0x3d0   : > { %v11080_v54 = vpack.c.bf16 %v4948_v7, %v4946_v57  ;;  %v4949_v37 = vmax.f32 %v4476_v43, 0.0  ;;  %v4480_v26 = vadd.f32 %v4479_v63, %v3807_v38  ;;  %v3809_v50 = vadd.f32 %v3808_v32, %v10571_v8  ;;  %v13002_v7 = vld [vmem:[#allocation45_spill] sm:$0xff] }
 0x3d1   : > { %v3810_v58 = vpop.f32.mrf.mxu0  ;;  %v4483_v55 = vpop.f32.mrf.mxu1 }
 0x3d2   : > { %13000 = vst [vmem:[#allocation89_spill] sm:$0xff] %v11080_v54  ;;  %v4482_v13 = vadd.f32 %v4481_v3, %v3809_v50  ;;  %v3811_v29 = vadd.f32 %v3810_v58, %v10567_v33  ;;  %v11084_v35 = vpack.c.bf16 %v4949_v37, %v4947_v60  ;;  %v4950_v63 = vmax.f32 %v4480_v26, 0.0  ;;  %v13003_v3 = vld [vmem:[#allocation117_spill] sm:$0xff]  ;;  %v13005_v54 = vld [vmem:[#allocation44_spill] sm:$0xff] }
 0x3d3   : > { %v3812_v25 = vpop.f32.mrf.mxu0  ;;  %v4485_v22 = vpop.f32.mrf.mxu1 }
 0x3d4   : > { %v4484_v12 = vadd.f32 %v4483_v55, %v3811_v29  ;;  %v3813_v27 = vadd.f32 %v3812_v25, %v10571_v8  ;;  %v4951_v60 = vmax.f32 %v4482_v13, 0.0 }
 0x3d5   : > { %v3816_v41 = vpop.f32.mrf.mxu0  ;;  %4055 = vmatmul.mubr.bf16.gmra.mxu0 %v13001_v40  ;;  %v4489_v57 = vpop.f32.mrf.mxu1  ;;  %4728 = vmatmul.mubr.bf16.gmra.mxu1 %v13002_v7 }
 0x3d6   : > { %v4952_v43 = vmax.f32 %v4484_v12, 0.0  ;;  %v4486_v38 = vadd.f32 %v4485_v22, %v3813_v27  ;;  %v3817_v32 = vadd.f32 %v3816_v41, %v10567_v33  ;;  %4064 = vmatprep.mubr.bf16.mxu0 %v13003_v3  ;;  %4737 = vmatprep.mubr.bf16.mxu1 %v10831_v45 }
 0x3d7   : > { %v3818_v37 = vpop.f32.mrf.mxu0  ;;  %v4491_v50 = vpop.f32.mrf.mxu1 }
 0x3d8   : > { %v11092_v58 = vpack.c.bf16 %v4952_v43, %v4950_v63  ;;  %v4953_v55 = vmax.f32 %v4486_v38, 0.0  ;;  %v4490_v29 = vadd.f32 %v4489_v57, %v3817_v32  ;;  %v3819_v40 = vadd.f32 %v3818_v37, %v10571_v8  ;;  %v13006_v43 = vld [vmem:[#allocation48_spill] sm:$0xff] }
 0x3d9   : > { %v3820_v25 = vpop.f32.mrf.mxu0  ;;  %v4493_v7 = vpop.f32.mrf.mxu1 }
 0x3da   : > { %13004 = vst [vmem:[#allocation26_spill] sm:$0xff] %v11092_v58  ;;  %v4492_v26 = vadd.f32 %v4491_v50, %v3819_v40  ;;  %v3821_v22 = vadd.f32 %v3820_v25, %v10567_v33  ;;  %v11096_v12 = vpack.c.bf16 %v4953_v55, %v4951_v60  ;;  %v4954_v57 = vmax.f32 %v4490_v29, 0.0  ;;  %v13007_v50 = vld [vmem:[#allocation121_spill] sm:$0xff]  ;;  %v13009_v58 = vld [vmem:[#allocation47_spill] sm:$0xff] }
 0x3db   : > { %v3822_v27 = vpop.f32.mrf.mxu0  ;;  %v4495_v41 = vpop.f32.mrf.mxu1 }
 0x3dc   : > { %v4494_v3 = vadd.f32 %v4493_v7, %v3821_v22  ;;  %v3823_v45 = vadd.f32 %v3822_v27, %v10571_v8  ;;  %v4955_v60 = vmax.f32 %v4492_v26, 0.0 }
 0x3dd   : > { %v3826_v13 = vpop.f32.mrf.mxu0  ;;  %4065 = vmatmul.mubr.bf16.gmra.mxu0 %v13005_v54  ;;  %v4499_v63 = vpop.f32.mrf.mxu1  ;;  %4738 = vmatmul.mubr.bf16.gmra.mxu1 %v13006_v43 }
 0x3de   : > { %v4956_v38 = vmax.f32 %v4494_v3, 0.0  ;;  %v4496_v32 = vadd.f32 %v4495_v41, %v3823_v45  ;;  %v3827_v37 = vadd.f32 %v3826_v13, %v10567_v33  ;;  %4074 = vmatprep.mubr.bf16.mxu0 %v13007_v50  ;;  %4747 = vmatprep.mubr.bf16.mxu1 %v10850_v53 }
 0x3df   : > { %v3828_v55 = vpop.f32.mrf.mxu0  ;;  %v4501_v40 = vpop.f32.mrf.mxu1 }
 0x3e0   : > { %v11104_v25 = vpack.c.bf16 %v4956_v38, %v4954_v57  ;;  %v4957_v7 = vmax.f32 %v4496_v32, 0.0  ;;  %v4500_v22 = vadd.f32 %v4499_v63, %v3827_v37  ;;  %v3829_v54 = vadd.f32 %v3828_v55, %v10571_v8  ;;  %v13010_v38 = vld [vmem:[#allocation51_spill] sm:$0xff] }
 0x3e1   : > { %v3830_v27 = vpop.f32.mrf.mxu0  ;;  %v4503_v43 = vpop.f32.mrf.mxu1 }
 0x3e2   : > { %13008 = vst [vmem:[#allocation107_spill] sm:$0xff] %v11104_v25  ;;  %v4502_v29 = vadd.f32 %v4501_v40, %v3829_v54  ;;  %v3831_v41 = vadd.f32 %v3830_v27, %v10567_v33  ;;  %v11108_v3 = vpack.c.bf16 %v4957_v7, %v4955_v60  ;;  %v4958_v63 = vmax.f32 %v4500_v22, 0.0  ;;  %v13011_v40 = vld [vmem:[#allocation125_spill] sm:$0xff]  ;;  %v13013_v25 = vld [vmem:[#allocation50_spill] sm:$0xff] }
 0x3e3   : > { %v3832_v45 = vpop.f32.mrf.mxu0  ;;  %v4505_v13 = vpop.f32.mrf.mxu1 }
 0x3e4   : > { %v4504_v50 = vadd.f32 %v4503_v43, %v3831_v41  ;;  %v3833_v53 = vadd.f32 %v3832_v45, %v10571_v8  ;;  %v4959_v60 = vmax.f32 %v4502_v29, 0.0 }
 0x3e5   : > { %v3836_v26 = vpop.f32.mrf.mxu0  ;;  %4075 = vmatmul.mubr.bf16.gmra.mxu0 %v13009_v58  ;;  %v4509_v57 = vpop.f32.mrf.mxu1  ;;  %4748 = vmatmul.mubr.bf16.gmra.mxu1 %v13010_v38 }
 0x3e6   : > { %v4960_v32 = vmax.f32 %v4504_v50, 0.0  ;;  %v4506_v37 = vadd.f32 %v4505_v13, %v3833_v53  ;;  %v3837_v55 = vadd.f32 %v3836_v26, %v10567_v33  ;;  %4084 = vmatprep.mubr.bf16.mxu0 %v13011_v40  ;;  %4757 = vmatprep.mubr.bf16.mxu1 %v10868_v23 }
 0x3e7   : > { %v3838_v7 = vpop.f32.mrf.mxu0  ;;  %v4511_v54 = vpop.f32.mrf.mxu1 }
 0x3e8   : > { %v11116_v27 = vpack.c.bf16 %v4960_v32, %v4958_v63  ;;  %v4961_v43 = vmax.f32 %v4506_v37, 0.0  ;;  %v4510_v41 = vadd.f32 %v4509_v57, %v3837_v55  ;;  %v3839_v58 = vadd.f32 %v3838_v7, %v10571_v8  ;;  %v13014_v32 = vld [vmem:[#allocation54_spill] sm:$0xff] }
 0x3e9   : > { %v3840_v45 = vpop.f32.mrf.mxu0  ;;  %v4513_v38 = vpop.f32.mrf.mxu1 }
 0x3ea   : > { %13012 = vst [vmem:[#allocation108_spill] sm:$0xff] %v11116_v27  ;;  %v4512_v22 = vadd.f32 %v4511_v54, %v3839_v58  ;;  %v3841_v13 = vadd.f32 %v3840_v45, %v10567_v33  ;;  %v11120_v50 = vpack.c.bf16 %v4961_v43, %v4959_v60  ;;  %v4962_v57 = vmax.f32 %v4510_v41, 0.0  ;;  %v13015_v54 = vld [vmem:[#allocation129_spill] sm:$0xff] }
 0x3eb   : > { %v3842_v53 = vpop.f32.mrf.mxu0  ;;  %v4515_v26 = vpop.f32.mrf.mxu1  ;;  %v13016_v27 = vld [vmem:[#allocation53_spill] sm:$0xff] }
 0x3ec   : > { %v4514_v40 = vadd.f32 %v4513_v38, %v3841_v13  ;;  %v3843_v23 = vadd.f32 %v3842_v53, %v10571_v8  ;;  %v4963_v60 = vmax.f32 %v4512_v22, 0.0 }
 0x3ed   : > { %v3846_v29 = vpop.f32.mrf.mxu0  ;;  %4085 = vmatmul.mubr.bf16.gmra.mxu0 %v13013_v25  ;;  %v4519_v63 = vpop.f32.mrf.mxu1  ;;  %4758 = vmatmul.mubr.bf16.gmra.mxu1 %v13014_v32 }
 0x3ee   : > { %v4964_v37 = vmax.f32 %v4514_v40, 0.0  ;;  %v4516_v55 = vadd.f32 %v4515_v26, %v3843_v23  ;;  %v3847_v7 = vadd.f32 %v3846_v29, %v10567_v33  ;;  %4094 = vmatprep.mubr.bf16.mxu0 %v13015_v54  ;;  %4767 = vmatprep.mubr.bf16.mxu1 %v10886_v49 }
 0x3ef   : > { %v3848_v43 = vpop.f32.mrf.mxu0  ;;  %v4521_v58 = vpop.f32.mrf.mxu1 }
 0x3f0   : > { %v11128_v45 = vpack.c.bf16 %v4964_v37, %v4962_v57  ;;  %v4965_v38 = vmax.f32 %v4516_v55, 0.0  ;;  %v4520_v13 = vadd.f32 %v4519_v63, %v3847_v7  ;;  %v3849_v25 = vadd.f32 %v3848_v43, %v10571_v8  ;;  %v13017_v37 = vld [vmem:[#allocation58_spill] sm:$0xff] }
 0x3f1   : > { %v3850_v53 = vpop.f32.mrf.mxu0  ;;  %v4523_v32 = vpop.f32.mrf.mxu1 }
 0x3f2   : > { %v4522_v41 = vadd.f32 %v4521_v58, %v3849_v25  ;;  %v3851_v26 = vadd.f32 %v3850_v53, %v10567_v33  ;;  %v11132_v40 = vpack.c.bf16 %v4965_v38, %v4963_v60  ;;  %v4966_v63 = vmax.f32 %v4520_v13, 0.0  ;;  %v13018_v58 = vld [vmem:[#allocation133_spill] sm:$0xff] }
 0x3f3   : > { %v3852_v23 = vpop.f32.mrf.mxu0  ;;  %v4525_v29 = vpop.f32.mrf.mxu1 }
 0x3f4   : > { %v4524_v54 = vadd.f32 %v4523_v32, %v3851_v26  ;;  %v3853_v49 = vadd.f32 %v3852_v23, %v10571_v8  ;;  %v4967_v60 = vmax.f32 %v4522_v41, 0.0  ;;  %v8575_v41 = vld [vmem:[%s12513_s4 + $0x50] ss:$8 sps:$4 sm:$0xff]  }
 0x3f5   : > { %v3856_v22 = vpop.f32.mrf.mxu0  ;;  %4095 = vmatmul.mubr.bf16.gmra.mxu0 %v13016_v27  ;;  %v4529_v57 = vpop.f32.mrf.mxu1  ;;  %4768 = vmatmul.mubr.bf16.gmra.mxu1 %v13017_v37 }
 0x3f6   : > { %v4968_v55 = vmax.f32 %v4524_v54, 0.0  ;;  %v4526_v7 = vadd.f32 %v4525_v29, %v3853_v49  ;;  %v3857_v43 = vadd.f32 %v3856_v22, %v10567_v33  ;;  %4104 = vmatprep.mubr.bf16.mxu0 %v13018_v58  ;;  %4777 = vmatprep.mubr.bf16.mxu1 %v10907_v42 }
 0x3f7   : > { %v3858_v38 = vpop.f32.mrf.mxu0  ;;  %v4531_v25 = vpop.f32.mrf.mxu1  ;;  %8056 = vmatprep.subr.bf16.mxu1 %v8575_v41 }
 0x3f8   : > { %v11140_v53 = vpack.c.bf16 %v4968_v55, %v4966_v63  ;;  %v4969_v32 = vmax.f32 %v4526_v7, 0.0  ;;  %v4530_v26 = vadd.f32 %v4529_v57, %v3857_v43  ;;  %v3859_v27 = vadd.f32 %v3858_v38, %v10571_v8  ;;  %v13021_v57 = vld [vmem:[#allocation56_spill] sm:$0xff]  ;;  %v13022_v7 = vld [vmem:[#allocation63_spill] sm:$0xff]  ;;  %8057 = vmatpush3.bf16.msra.mxu1 %v8575_v41 }
 0x3f9   : > { %v3860_v23 = vpop.f32.mrf.mxu0  ;;  %v4533_v37 = vpop.f32.mrf.mxu1 }
 0x3fa   : > { %13019 = vst [vmem:[#allocation114_spill] sm:$0xff] %v11140_v53  ;;  %v4532_v13 = vadd.f32 %v4531_v25, %v3859_v27  ;;  %v3861_v29 = vadd.f32 %v3860_v23, %v10567_v33  ;;  %v11144_v54 = vpack.c.bf16 %v4969_v32, %v4967_v60  ;;  %v4970_v43 = vmax.f32 %v4530_v26, 0.0  ;;  %v13023_v32 = vld [vmem:[#allocation137_spill] sm:$0xff] }
 0x3fb   : > { %v3862_v49 = vpop.f32.mrf.mxu0  ;;  %v4535_v22 = vpop.f32.mrf.mxu1 }
 0x3fc   : > { %13020 = vst [vmem:[#allocation111_spill] sm:$0xff] %v11144_v54  ;;  %v4534_v58 = vadd.f32 %v4533_v37, %v3861_v29  ;;  %v3863_v42 = vadd.f32 %v3862_v49, %v10571_v8  ;;  %v4971_v27 = vmax.f32 %v4532_v13, 0.0 }
 0x3fd   : > { %v3866_v63 = vpop.f32.mrf.mxu0  ;;  %4105 = vmatmul.mubr.bf16.gmra.mxu0 %v13021_v57  ;;  %v4539_v55 = vpop.f32.mrf.mxu1  ;;  %4778 = vmatmul.mubr.bf16.gmra.mxu1 %v13022_v7 }
 0x3fe   : > { %v4972_v38 = vmax.f32 %v4534_v58, 0.0  ;;  %v4536_v25 = vadd.f32 %v4535_v22, %v3863_v42  ;;  %v3867_v60 = vadd.f32 %v3866_v63, %v10567_v33  ;;  %4114 = vmatprep.mubr.bf16.mxu0 %v13023_v32  ;;  %4787 = vmatprep.mubr.bf16.mxu1 %v10929_v2 }
 0x3ff   : > { %v3868_v23 = vpop.f32.mrf.mxu0  ;;  %v4541_v37 = vpop.f32.mrf.mxu1 }
 0x400   : > { %v11155_v29 = vpack.c.bf16 %v4972_v38, %v4970_v43  ;;  %v4973_v49 = vmax.f32 %v4536_v25, 0.0  ;;  %v4540_v57 = vadd.f32 %v4539_v55, %v3867_v60  ;;  %v3869_v53 = vadd.f32 %v3868_v23, %v10571_v8  ;;  %v13025_v43 = vld [vmem:[#allocation61_spill] sm:$0xff]  ;;  %v13026_v55 = vld [vmem:[#allocation67_spill] sm:$0xff]  ;;  %v13027_v23 = vld [vmem:[#allocation72_spill] sm:$0xff] }
 0x401   : > { %v3870_v26 = vpop.f32.mrf.mxu0  ;;  %v4543_v58 = vpop.f32.mrf.mxu1 }
 0x402   : > { %13024 = vst [vmem:[#allocation112_spill] sm:$0xff] %v11155_v29  ;;  %v4542_v22 = vadd.f32 %v4541_v37, %v3869_v53  ;;  %v3871_v42 = vadd.f32 %v3870_v26, %v10567_v33  ;;  %v11159_v63 = vpack.c.bf16 %v4973_v49, %v4971_v27  ;;  %v4974_v25 = vmax.f32 %v4540_v57, 0.0  ;;  %v13029_v29 = vld [vmem:[#allocation64_spill] sm:$0xff] }
 0x403   : > { %v3872_v7 = vpop.f32.mrf.mxu0  ;;  %v4545_v2 = vpop.f32.mrf.mxu1 }
 0x404   : > { %v4544_v13 = vadd.f32 %v4543_v58, %v3871_v42  ;;  %v3873_v32 = vadd.f32 %v3872_v7, %v10571_v8  ;;  %v4975_v27 = vmax.f32 %v4542_v22, 0.0 }
 0x405   : > { %v3876_v54 = vpop.f32.mrf.mxu0  ;;  %4115 = vmatmul.mubr.bf16.gmra.mxu0 %v13025_v43  ;;  %v4549_v38 = vpop.f32.mrf.mxu1  ;;  %4788 = vmatmul.mubr.bf16.gmra.mxu1 %v13026_v55 }
 0x406   : > { %v4976_v41 = vmax.f32 %v4544_v13, 0.0  ;;  %v4546_v60 = vadd.f32 %v4545_v2, %v3873_v32  ;;  %v3877_v53 = vadd.f32 %v3876_v54, %v10567_v33  ;;  %4124 = vmatprep.mubr.bf16.mxu0 %v13027_v23  ;;  %4797 = vmatprep.mubr.bf16.mxu1 %v10947_v47 }
 0x407   : > { %v3878_v37 = vpop.f32.mrf.mxu0  ;;  %v4551_v49 = vpop.f32.mrf.mxu1 }
 0x408   : > { %v11167_v26 = vpack.c.bf16 %v4976_v41, %v4974_v25  ;;  %v4977_v58 = vmax.f32 %v4546_v60, 0.0  ;;  %v4550_v42 = vadd.f32 %v4549_v38, %v3877_v53  ;;  %v3879_v7 = vadd.f32 %v3878_v37, %v10571_v8  ;;  %v13030_v41 = vld [vmem:[#allocation65_spill] sm:$0xff] }
 0x409   : > { %v3880_v43 = vpop.f32.mrf.mxu0  ;;  %v4553_v55 = vpop.f32.mrf.mxu1 }
 0x40a   : > { %13028 = vst [vmem:[#allocation118_spill] sm:$0xff] %v11167_v26  ;;  %v4552_v57 = vadd.f32 %v4551_v49, %v3879_v7  ;;  %v3881_v2 = vadd.f32 %v3880_v43, %v10567_v33  ;;  %v11171_v13 = vpack.c.bf16 %v4977_v58, %v4975_v27  ;;  %v4978_v38 = vmax.f32 %v4550_v42, 0.0  ;;  %v13031_v49 = vld [vmem:[#allocation143_spill] sm:$0xff]  ;;  %v13033_v26 = vld [vmem:[#allocation70_spill] sm:$0xff] }
 0x40b   : > { %v3882_v54 = vpop.f32.mrf.mxu0  ;;  %v4555_v32 = vpop.f32.mrf.mxu1 }
 0x40c   : > { %v4554_v23 = vadd.f32 %v4553_v55, %v3881_v2  ;;  %v3883_v47 = vadd.f32 %v3882_v54, %v10571_v8  ;;  %v4979_v27 = vmax.f32 %v4552_v57, 0.0 }
 0x40d   : > { %v3886_v22 = vpop.f32.mrf.mxu0  ;;  %4125 = vmatmul.mubr.bf16.gmra.mxu0 %v13029_v29  ;;  %v4559_v25 = vpop.f32.mrf.mxu1  ;;  %4798 = vmatmul.mubr.bf16.gmra.mxu1 %v13030_v41 }
 0x40e   : > { %v4980_v60 = vmax.f32 %v4554_v23, 0.0  ;;  %v4556_v53 = vadd.f32 %v4555_v32, %v3883_v47  ;;  %v3887_v37 = vadd.f32 %v3886_v22, %v10567_v33  ;;  %4134 = vmatprep.mubr.bf16.mxu0 %v13031_v49  ;;  %4807 = vmatprep.mubr.bf16.mxu1 %v10965_v14 }
 0x40f   : > { %v3888_v58 = vpop.f32.mrf.mxu0  ;;  %v4561_v7 = vpop.f32.mrf.mxu1 }
 0x410   : > { %v11179_v43 = vpack.c.bf16 %v4980_v60, %v4978_v38  ;;  %v4981_v55 = vmax.f32 %v4556_v53, 0.0  ;;  %v4560_v2 = vadd.f32 %v4559_v25, %v3887_v37  ;;  %v3889_v29 = vadd.f32 %v3888_v58, %v10571_v8  ;;  %v13034_v60 = vld [vmem:[#allocation77_spill] sm:$0xff] }
 0x411   : > { %v3890_v54 = vpop.f32.mrf.mxu0  ;;  %v4563_v41 = vpop.f32.mrf.mxu1 }
 0x412   : > { %13032 = vst [vmem:[#allocation31_spill] sm:$0xff] %v11179_v43  ;;  %v4562_v42 = vadd.f32 %v4561_v7, %v3889_v29  ;;  %v3891_v32 = vadd.f32 %v3890_v54, %v10567_v33  ;;  %v11183_v23 = vpack.c.bf16 %v4981_v55, %v4979_v27  ;;  %v4982_v25 = vmax.f32 %v4560_v2, 0.0  ;;  %v13035_v7 = vld [vmem:[#allocation79_spill] sm:$0xff] }
 0x413   : > { %v3892_v47 = vpop.f32.mrf.mxu0  ;;  %v4565_v22 = vpop.f32.mrf.mxu1  ;;  %v13037_v43 = vld [vmem:[#allocation75_spill] sm:$0xff] }
 0x414   : > { %v4564_v49 = vadd.f32 %v4563_v41, %v3891_v32  ;;  %v3893_v14 = vadd.f32 %v3892_v47, %v10571_v8  ;;  %v4983_v27 = vmax.f32 %v4562_v42, 0.0 }
 0x415   : > { %v3896_v57 = vpop.f32.mrf.mxu0  ;;  %4135 = vmatmul.mubr.bf16.gmra.mxu0 %v13033_v26  ;;  %v4569_v38 = vpop.f32.mrf.mxu1  ;;  %4808 = vmatmul.mubr.bf16.gmra.mxu1 %v13034_v60 }
 0x416   : > { %v4984_v53 = vmax.f32 %v4564_v49, 0.0  ;;  %v4566_v37 = vadd.f32 %v4565_v22, %v3893_v14  ;;  %v3897_v58 = vadd.f32 %v3896_v57, %v10567_v33  ;;  %4144 = vmatprep.mubr.bf16.mxu0 %v13035_v7  ;;  %4817 = vmatprep.mubr.bf16.mxu1 %v10986_v21 }
 0x417   : > { %v3898_v55 = vpop.f32.mrf.mxu0  ;;  %v4571_v29 = vpop.f32.mrf.mxu1 }
 0x418   : > { %v11191_v54 = vpack.c.bf16 %v4984_v53, %v4982_v25  ;;  %v4985_v41 = vmax.f32 %v4566_v37, 0.0  ;;  %v4570_v32 = vadd.f32 %v4569_v38, %v3897_v58  ;;  %v3899_v26 = vadd.f32 %v3898_v55, %v10571_v8  ;;  %v13038_v53 = vld [vmem:[#allocation82_spill] sm:$0xff] }
 0x419   : > { %v3900_v47 = vpop.f32.mrf.mxu0  ;;  %v4573_v60 = vpop.f32.mrf.mxu1 }
 0x41a   : > { %13036 = vst [vmem:[#allocation115_spill] sm:$0xff] %v11191_v54  ;;  %v3901_v2 = vadd.f32 %v3900_v47, %v10567_v33  ;;  %v11195_v22 = vpack.c.bf16 %v4985_v41, %v4983_v27  ;;  %v4572_v57 = vadd.f32 %v4571_v29, %v3899_v26  ;;  %v4986_v38 = vmax.f32 %v4570_v32, 0.0  ;;  %v13039_v47 = vld [vmem:[#allocation8_spill] sm:$0xff] }
 0x41b   : > { %v3902_v49 = vpop.f32.mrf.mxu0  ;;  %v4575_v14 = vpop.f32.mrf.mxu1 }
 0x41c   : > { %v4574_v7 = vadd.f32 %v4573_v60, %v3901_v2  ;;  %v3903_v21 = vadd.f32 %v3902_v49, %v10571_v8  ;;  %v4987_v41 = vmax.f32 %v4572_v57, 0.0  ;;  %v13042_v57 = vld [vmem:[#allocation86_spill] sm:$0xff] }
 0x41d   : > { %v3906_v42 = vpop.f32.mrf.mxu0  ;;  %4145 = vmatmul.mubr.bf16.gmra.mxu0 %v13037_v43  ;;  %v4579_v25 = vpop.f32.mrf.mxu1  ;;  %4818 = vmatmul.mubr.bf16.gmra.mxu1 %v13038_v53 }
 0x41e   : > { %v4988_v37 = vmax.f32 %v4574_v7, 0.0  ;;  %v4576_v58 = vadd.f32 %v4575_v14, %v3903_v21  ;;  %v3907_v55 = vadd.f32 %v3906_v42, %v10567_v33  ;;  %4154 = vmatprep.mubr.bf16.mxu0 %v13039_v47  ;;  %4827 = vmatprep.mubr.bf16.mxu1 %v11000_v48 }
 0x41f   : > { %v3908_v27 = vpop.f32.mrf.mxu0  ;;  %v4581_v29 = vpop.f32.mrf.mxu1 }
 0x420   : > { %v11203_v26 = vpack.c.bf16 %v4988_v37, %v4986_v38  ;;  %v4989_v60 = vmax.f32 %v4576_v58, 0.0  ;;  %v3909_v43 = vadd.f32 %v3908_v27, %v10571_v8  ;;  %v4580_v53 = vadd.f32 %v4579_v25, %v3907_v55  ;;  %v13043_v37 = vld [vmem:[#allocation2_spill] sm:$0xff]  ;;  %v13044_v55 = vld [vmem:[#allocation84_spill] sm:$0xff] }
 0x421   : > { %v3910_v2 = vpop.f32.mrf.mxu0  ;;  %v4583_v49 = vpop.f32.mrf.mxu1 }
 0x422   : > { %13040 = vst [vmem:[#allocation116_spill] sm:$0xff] %v11203_v26  ;;  %v3911_v32 = vadd.f32 %v3910_v2, %v10567_v33  ;;  %v11207_v14 = vpack.c.bf16 %v4989_v60, %v4987_v41  ;;  %v4582_v42 = vadd.f32 %v4581_v29, %v3909_v43  ;;  %v4990_v58 = vmax.f32 %v4580_v53, 0.0 }
 0x423   : > { %v3912_v7 = vpop.f32.mrf.mxu0  ;;  %v4585_v21 = vpop.f32.mrf.mxu1 }
 0x424   : > { %13041 = vst [vmem:[#allocation122_spill] sm:$0xff] %v11207_v14  ;;  %v4584_v47 = vadd.f32 %v4583_v49, %v3911_v32  ;;  %v3913_v48 = vadd.f32 %v3912_v7, %v10571_v8  ;;  %v4991_v2 = vmax.f32 %v4582_v42, 0.0 }
 0x425   : > { %v3916_v54 = vpop.f32.mrf.mxu0  ;;  %4155 = vmatmul.mubr.bf16.gmra.mxu0 %v13042_v57  ;;  %v4589_v38 = vpop.f32.mrf.mxu1  ;;  %4828 = vmatmul.mubr.bf16.gmra.mxu1 %v13043_v37 }
 0x426   : > { %v4992_v27 = vmax.f32 %v4584_v47, 0.0  ;;  %v4586_v26 = vadd.f32 %v4585_v21, %v3913_v48  ;;  %v3917_v25 = vadd.f32 %v3916_v54, %v10567_v33  ;;  %5389 = vmatprep.mubr.bf16.mxu0 %v13044_v55 }
 0x427   : > { %v3918_v41 = vpop.f32.mrf.mxu0  ;;  %v4591_v60 = vpop.f32.mrf.mxu1 }
 0x428   : > { %v11214_v29 = vpack.c.bf16 %v4992_v27, %v4990_v58  ;;  %v4993_v43 = vmax.f32 %v4586_v26, 0.0  ;;  %v3919_v49 = vadd.f32 %v3918_v41, %v10571_v8  ;;  %v4590_v57 = vadd.f32 %v4589_v38, %v3917_v25  ;;  %v13046_v58 = vld [vmem:[#allocation83_spill] sm:$0xff] }
 0x429   : > { %v3920_v32 = vpop.f32.mrf.mxu0  ;;  %v4593_v7 = vpop.f32.mrf.mxu1 }
 0x42a   : > { %13045 = vst [vmem:[#allocation34_spill] sm:$0xff] %v11214_v29  ;;  %v3921_v37 = vadd.f32 %v3920_v32, %v10567_v33  ;;  %v11218_v53 = vpack.c.bf16 %v4993_v43, %v4991_v2  ;;  %v4592_v54 = vadd.f32 %v4591_v60, %v3919_v49  ;;  %v4994_v26 = vmax.f32 %v4590_v57, 0.0 }
 0x42b   : > { %v3922_v21 = vpop.f32.mrf.mxu0  ;;  %v4595_v47 = vpop.f32.mrf.mxu1 }
 0x42c   : > { %v4594_v48 = vadd.f32 %v4593_v7, %v3921_v37  ;;  %v3923_v55 = vadd.f32 %v3922_v21, %v10571_v8  ;;  %v4995_v2 = vmax.f32 %v4592_v54, 0.0 }
 0x42d   : > { %v3926_v14 = vpop.f32.mrf.mxu0  ;;  %v4599_v42 = vpop.f32.mrf.mxu1  ;;  %5390 = vmatmul.mubr.bf16.vlgmr.msra.gmra.mxu0 %v13046_v58 }
 0x42e   : > { %v4996_v27 = vmax.f32 %v4594_v48, 0.0  ;;  %v4596_v41 = vadd.f32 %v4595_v47, %v3923_v55  ;;  %v3927_v29 = vadd.f32 %v3926_v14, %v10567_v33  ;;  %5397 = vmatprep.mubr.bf16.mxu0 %v10631_v24 }
 0x42f   : > { %v3928_v38 = vpop.f32.mrf.mxu0  ;;  %v4601_v25 = vpop.f32.mrf.mxu1 }
 0x430   : > { %v11224_v43 = vpack.c.bf16 %v4996_v27, %v4994_v26  ;;  %v4997_v60 = vmax.f32 %v4596_v41, 0.0  ;;  %v3929_v49 = vadd.f32 %v3928_v38, %v10571_v8  ;;  %v4600_v37 = vadd.f32 %v4599_v42, %v3927_v29  ;;  %v13048_v26 = vld [vmem:[#allocation90_spill] sm:$0xff] }
 0x431   : > { %v3930_v32 = vpop.f32.mrf.mxu0  ;;  %v4603_v7 = vpop.f32.mrf.mxu1 }
 0x432   : > { %13047 = vst [vmem:[#allocation119_spill] sm:$0xff] %v11224_v43  ;;  %v3931_v21 = vadd.f32 %v3930_v32, %v10567_v33  ;;  %v11228_v57 = vpack.c.bf16 %v4997_v60, %v4995_v2  ;;  %v4602_v14 = vadd.f32 %v4601_v25, %v3929_v49  ;;  %v4998_v27 = vmax.f32 %v4600_v37, 0.0 }
 0x433   : > { %v3932_v47 = vpop.f32.mrf.mxu0  ;;  %v4605_v48 = vpop.f32.mrf.mxu1 }
 0x434   : > { %v4604_v55 = vadd.f32 %v4603_v7, %v3931_v21  ;;  %v3933_v24 = vadd.f32 %v3932_v47, %v10571_v8  ;;  %v4999_v2 = vmax.f32 %v4602_v14, 0.0  ;;  %v8576_v14 = vld [vmem:[%s12513_s4 + $0x40] ss:$8 sps:$4 sm:$0xff]  }
 0x435   : > { %v3936_v58 = vpop.f32.mrf.mxu0  ;;  %v4609_v54 = vpop.f32.mrf.mxu1  ;;  %5398 = vmatmul.mubr.bf16.gmra.mxu0 %v13048_v26  ;;  %8058 = vmatprep.subr.bf16.mxu1 %v8576_v14 }
 0x436   : > { %v5000_v41 = vmax.f32 %v4604_v55, 0.0  ;;  %v4606_v38 = vadd.f32 %v4605_v48, %v3933_v24  ;;  %v3937_v43 = vadd.f32 %v3936_v58, %v10567_v33  ;;  %5405 = vmatprep.mubr.bf16.mxu0 %v10649_v56  ;;  %8059 = vmatpush3.bf16.msra.mxu1 %v8576_v14 }
 0x437   : > { %v3938_v29 = vpop.f32.mrf.mxu0  ;;  %v4611_v42 = vpop.f32.mrf.mxu1 }
 0x438   : > { %v11234_v60 = vpack.c.bf16 %v5000_v41, %v4998_v27  ;;  %v5001_v25 = vmax.f32 %v4606_v38, 0.0  ;;  %v3939_v49 = vadd.f32 %v3938_v29, %v10571_v8  ;;  %v4610_v21 = vadd.f32 %v4609_v54, %v3937_v43  ;;  %v13050_v29 = vld [vmem:[#allocation11_spill] sm:$0xff] }
 0x439   : > { %v3940_v32 = vpop.f32.mrf.mxu0  ;;  %v4613_v7 = vpop.f32.mrf.mxu1 }
 0x43a   : > { %13049 = vst [vmem:[#allocation120_spill] sm:$0xff] %v11234_v60  ;;  %v3941_v47 = vadd.f32 %v3940_v32, %v10567_v33  ;;  %v11238_v37 = vpack.c.bf16 %v5001_v25, %v4999_v2  ;;  %v4612_v24 = vadd.f32 %v4611_v42, %v3939_v49  ;;  %v5002_v41 = vmax.f32 %v4610_v21, 0.0 }
 0x43b   : > { %v3942_v48 = vpop.f32.mrf.mxu0  ;;  %v4615_v55 = vpop.f32.mrf.mxu1 }
 0x43c   : > { %v4614_v58 = vadd.f32 %v4613_v7, %v3941_v47  ;;  %v3943_v56 = vadd.f32 %v3942_v48, %v10571_v8  ;;  %v5003_v25 = vmax.f32 %v4612_v24, 0.0 }
 0x43d   : > { %v3946_v26 = vpop.f32.mrf.mxu0  ;;  %v4619_v27 = vpop.f32.mrf.mxu1  ;;  %5406 = vmatmul.mubr.bf16.gmra.mxu0 %v10645_v44 }
 0x43e   : > { %v5004_v43 = vmax.f32 %v4614_v58, 0.0  ;;  %v4616_v54 = vadd.f32 %v4615_v55, %v3943_v56  ;;  %v3947_v38 = vadd.f32 %v3946_v26, %v10567_v33  ;;  %5413 = vmatprep.mubr.bf16.mxu0 %v13050_v29 }
 0x43f   : > { %v3948_v42 = vpop.f32.mrf.mxu0  ;;  %v4621_v2 = vpop.f32.mrf.mxu1 }
 0x440   : > { %v11247_v49 = vpack.c.bf16 %v5004_v43, %v5002_v41  ;;  %v5005_v32 = vmax.f32 %v4616_v54, 0.0  ;;  %v3949_v7 = vadd.f32 %v3948_v42, %v10571_v8  ;;  %v4620_v44 = vadd.f32 %v4619_v27, %v3947_v38  ;;  %v13053_v41 = vld [vmem:[#allocation68_spill] sm:$0xff] }
 0x441   : > { %v3950_v47 = vpop.f32.mrf.mxu0  ;;  %v4623_v48 = vpop.f32.mrf.mxu1  ;;  %v13054_v27 = vld [vmem:[#allocation88_spill] sm:$0xff] }
 0x442   : > { %13051 = vst [vmem:[#allocation126_spill] sm:$0xff] %v11247_v49  ;;  %v3951_v21 = vadd.f32 %v3950_v47, %v10567_v33  ;;  %v11251_v55 = vpack.c.bf16 %v5005_v32, %v5003_v25  ;;  %v4622_v26 = vadd.f32 %v4621_v2, %v3949_v7  ;;  %v5006_v43 = vmax.f32 %v4620_v44, 0.0 }
 0x443   : > { %v3952_v58 = vpop.f32.mrf.mxu0  ;;  %v4625_v56 = vpop.f32.mrf.mxu1 }
 0x444   : > { %13052 = vst [vmem:[#allocation37_spill] sm:$0xff] %v11251_v55  ;;  %v4624_v29 = vadd.f32 %v4623_v48, %v3951_v21  ;;  %v3953_v60 = vadd.f32 %v3952_v58, %v10571_v8  ;;  %v5007_v32 = vmax.f32 %v4622_v26, 0.0 }
 0x445   : > { %v3956_v14 = vpop.f32.mrf.mxu0  ;;  %v4629_v24 = vpop.f32.mrf.mxu1  ;;  %5414 = vmatmul.mubr.bf16.gmra.mxu0 %v13053_v41 }
 0x446   : > { %v5008_v54 = vmax.f32 %v4624_v29, 0.0  ;;  %v4626_v42 = vadd.f32 %v4625_v56, %v3953_v60  ;;  %v3957_v49 = vadd.f32 %v3956_v14, %v10567_v33  ;;  %5421 = vmatprep.mubr.bf16.mxu0 %v13054_v27 }
 0x447   : > { %v3958_v38 = vpop.f32.mrf.mxu0  ;;  %v4631_v25 = vpop.f32.mrf.mxu1 }
 0x448   : > { %v11257_v47 = vpack.c.bf16 %v5008_v54, %v5006_v43  ;;  %v5009_v2 = vmax.f32 %v4626_v42, 0.0  ;;  %v3959_v7 = vadd.f32 %v3958_v38, %v10571_v8  ;;  %v4630_v58 = vadd.f32 %v4629_v24, %v3957_v49  ;;  %v13056_v43 = vld [vmem:[#allocation87_spill] sm:$0xff] }
 0x449   : > { %v3960_v48 = vpop.f32.mrf.mxu0  ;;  %v4633_v21 = vpop.f32.mrf.mxu1 }
 0x44a   : > { %13055 = vst [vmem:[#allocation123_spill] sm:$0xff] %v11257_v47  ;;  %v3961_v41 = vadd.f32 %v3960_v48, %v10567_v33  ;;  %v11261_v44 = vpack.c.bf16 %v5009_v2, %v5007_v32  ;;  %v4632_v29 = vadd.f32 %v4631_v25, %v3959_v7  ;;  %v5010_v54 = vmax.f32 %v4630_v58, 0.0 }
 0x44b   : > { %v3962_v60 = vpop.f32.mrf.mxu0  ;;  %v4635_v56 = vpop.f32.mrf.mxu1 }
 0x44c   : > { %v4634_v14 = vadd.f32 %v4633_v21, %v3961_v41  ;;  %v3963_v27 = vadd.f32 %v3962_v60, %v10571_v8  ;;  %v5011_v32 = vmax.f32 %v4632_v29, 0.0 }
 0x44d   : > { %v3966_v55 = vpop.f32.mrf.mxu0  ;;  %v4639_v26 = vpop.f32.mrf.mxu1  ;;  %5422 = vmatmul.mubr.bf16.gmra.mxu0 %v13056_v43 }
 0x44e   : > { %v5012_v42 = vmax.f32 %v4634_v14, 0.0  ;;  %v4636_v38 = vadd.f32 %v4635_v56, %v3963_v27  ;;  %v3967_v47 = vadd.f32 %v3966_v55, %v10567_v33  ;;  %5429 = vmatprep.mubr.bf16.mxu0 %v10707_v28 }
 0x44f   : > { %v3968_v49 = vpop.f32.mrf.mxu0  ;;  %v4641_v24 = vpop.f32.mrf.mxu1 }
 0x450   : > { %v11267_v2 = vpack.c.bf16 %v5012_v42, %v5010_v54  ;;  %v5013_v25 = vmax.f32 %v4636_v38, 0.0  ;;  %v3969_v7 = vadd.f32 %v3968_v49, %v10571_v8  ;;  %v4640_v41 = vadd.f32 %v4639_v26, %v3967_v47 }
 0x451   : > { %v3970_v48 = vpop.f32.mrf.mxu0  ;;  %v4643_v21 = vpop.f32.mrf.mxu1 }
 0x452   : > { %v3971_v60 = vadd.f32 %v3970_v48, %v10567_v33  ;;  %v11271_v58 = vpack.c.bf16 %v5013_v25, %v5011_v32  ;;  %v4642_v55 = vadd.f32 %v4641_v24, %v3969_v7  ;;  %v5014_v54 = vmax.f32 %v4640_v41, 0.0 }
 0x453   : > { %v3972_v56 = vpop.f32.mrf.mxu0  ;;  %v4645_v14 = vpop.f32.mrf.mxu1 }
 0x454   : > { %v4644_v27 = vadd.f32 %v4643_v21, %v3971_v60  ;;  %v3973_v28 = vadd.f32 %v3972_v56, %v10571_v8  ;;  %v5015_v32 = vmax.f32 %v4642_v55, 0.0 }
 0x455   : > { %v3976_v43 = vpop.f32.mrf.mxu0  ;;  %v4649_v29 = vpop.f32.mrf.mxu1  ;;  %5430 = vmatmul.mubr.bf16.gmra.mxu0 %v10703_v36 }
 0x456   : > { %v5016_v42 = vmax.f32 %v4644_v27, 0.0  ;;  %v4646_v38 = vadd.f32 %v4645_v14, %v3973_v28  ;;  %v3977_v49 = vadd.f32 %v3976_v43, %v10567_v33  ;;  %5437 = vmatprep.mubr.bf16.mxu0 %v10725_v5 }
 0x457   : > { %v3978_v47 = vpop.f32.mrf.mxu0  ;;  %v4651_v26 = vpop.f32.mrf.mxu1 }
 0x458   : > { %v11277_v25 = vpack.c.bf16 %v5016_v42, %v5014_v54  ;;  %v5017_v24 = vmax.f32 %v4646_v38, 0.0  ;;  %v3979_v7 = vadd.f32 %v3978_v47, %v10571_v8  ;;  %v4650_v60 = vadd.f32 %v4649_v29, %v3977_v49  ;;  %v13058_v29 = vld [vmem:[#allocation73_spill] sm:$0xff] }
 0x459   : > { %v3980_v48 = vpop.f32.mrf.mxu0  ;;  %v4653_v21 = vpop.f32.mrf.mxu1 }
 0x45a   : > { %13057 = vst [vmem:[#allocation124_spill] sm:$0xff] %v11277_v25  ;;  %v3981_v36 = vadd.f32 %v3980_v48, %v10567_v33  ;;  %v11281_v41 = vpack.c.bf16 %v5017_v24, %v5015_v32  ;;  %v4652_v27 = vadd.f32 %v4651_v26, %v3979_v7  ;;  %v5018_v54 = vmax.f32 %v4650_v60, 0.0 }
 0x45b   : > { %v3982_v56 = vpop.f32.mrf.mxu0  ;;  %v4655_v14 = vpop.f32.mrf.mxu1 }
 0x45c   : > { %v4654_v28 = vadd.f32 %v4653_v21, %v3981_v36  ;;  %v3983_v5 = vadd.f32 %v3982_v56, %v10571_v8  ;;  %v5019_v24 = vmax.f32 %v4652_v27, 0.0 }
 0x45d   : > { %v3986_v43 = vpop.f32.mrf.mxu0  ;;  %v4659_v55 = vpop.f32.mrf.mxu1  ;;  %5438 = vmatmul.mubr.bf16.gmra.mxu0 %v10721_v59 }
 0x45e   : > { %v5020_v42 = vmax.f32 %v4654_v28, 0.0  ;;  %v4656_v38 = vadd.f32 %v4655_v14, %v3983_v5  ;;  %v3987_v47 = vadd.f32 %v3986_v43, %v10567_v33  ;;  %5445 = vmatprep.mubr.bf16.mxu0 %v13058_v29 }
 0x45f   : > { %v3988_v49 = vpop.f32.mrf.mxu0  ;;  %v4661_v32 = vpop.f32.mrf.mxu1 }
 0x460   : > { %v11287_v48 = vpack.c.bf16 %v5020_v42, %v5018_v54  ;;  %v5021_v26 = vmax.f32 %v4656_v38, 0.0  ;;  %v3989_v7 = vadd.f32 %v3988_v49, %v10571_v8  ;;  %v4660_v56 = vadd.f32 %v4659_v55, %v3987_v47  ;;  %v13060_v54 = vld [vmem:[#allocation94_spill] sm:$0xff] }
 0x461   : > { %v3990_v21 = vpop.f32.mrf.mxu0  ;;  %v4663_v36 = vpop.f32.mrf.mxu1 }
 0x462   : > { %13059 = vst [vmem:[#allocation130_spill] sm:$0xff] %v11287_v48  ;;  %v3991_v59 = vadd.f32 %v3990_v21, %v10567_v33  ;;  %v11291_v60 = vpack.c.bf16 %v5021_v26, %v5019_v24  ;;  %v4662_v5 = vadd.f32 %v4661_v32, %v3989_v7  ;;  %v5022_v42 = vmax.f32 %v4660_v56, 0.0 }
 0x463   : > { %v3992_v14 = vpop.f32.mrf.mxu0  ;;  %v4665_v28 = vpop.f32.mrf.mxu1 }
 0x464   : > { %v4664_v43 = vadd.f32 %v4663_v36, %v3991_v59  ;;  %v3993_v29 = vadd.f32 %v3992_v14, %v10571_v8  ;;  %v5023_v24 = vmax.f32 %v4662_v5, 0.0 }
 0x465   : > { %v3996_v25 = vpop.f32.mrf.mxu0  ;;  %v4669_v27 = vpop.f32.mrf.mxu1  ;;  %5446 = vmatmul.mubr.bf16.gmra.mxu0 %v13060_v54 }
 0x466   : > { %v5024_v38 = vmax.f32 %v4664_v43, 0.0  ;;  %v4666_v49 = vadd.f32 %v4665_v28, %v3993_v29  ;;  %v3997_v48 = vadd.f32 %v3996_v25, %v10567_v33  ;;  %5453 = vmatprep.mubr.bf16.mxu0 %v10765_v16 }
 0x467   : > { %v3998_v55 = vpop.f32.mrf.mxu0  ;;  %v4671_v47 = vpop.f32.mrf.mxu1 }
 0x468   : > { %v11297_v26 = vpack.c.bf16 %v5024_v38, %v5022_v42  ;;  %v5025_v32 = vmax.f32 %v4666_v49, 0.0  ;;  %v3999_v7 = vadd.f32 %v3998_v55, %v10571_v8  ;;  %v4670_v59 = vadd.f32 %v4669_v27, %v3997_v48  ;;  %v13062_v42 = vld [vmem:[#allocation14_spill] sm:$0xff] }
 0x469   : > { %v4000_v21 = vpop.f32.mrf.mxu0  ;;  %v4673_v36 = vpop.f32.mrf.mxu1 }
 0x46a   : > { %13061 = vst [vmem:[#allocation40_spill] sm:$0xff] %v11297_v26  ;;  %v4001_v14 = vadd.f32 %v4000_v21, %v10567_v33  ;;  %v11301_v56 = vpack.c.bf16 %v5025_v32, %v5023_v24  ;;  %v4672_v25 = vadd.f32 %v4671_v47, %v3999_v7  ;;  %v5026_v38 = vmax.f32 %v4670_v59, 0.0  ;;  %v8577_v47 = vld [vmem:[%s12513_s4 + $0x30] ss:$8 sps:$4 sm:$0xff]  }
 0x46b   : > { %v4002_v28 = vpop.f32.mrf.mxu0  ;;  %v4675_v43 = vpop.f32.mrf.mxu1  ;;  %8060 = vmatprep.subr.bf16.mxu1 %v8577_v47 }
 0x46c   : > { %v4674_v29 = vadd.f32 %v4673_v36, %v4001_v14  ;;  %v4003_v16 = vadd.f32 %v4002_v28, %v10571_v8  ;;  %v5027_v24 = vmax.f32 %v4672_v25, 0.0  ;;  %8061 = vmatpush3.bf16.msra.mxu1 %v8577_v47  ;;  %v8578_v25 = vld [vmem:[%s12513_s4 + $0x20] ss:$8 sps:$4 sm:$0xff]  }
 0x46d   : > { %v4006_v54 = vpop.f32.mrf.mxu0  ;;  %v4679_v5 = vpop.f32.mrf.mxu1  ;;  %5454 = vmatmul.mubr.bf16.gmra.mxu0 %v13062_v42  ;;  %8062 = vmatprep.subr.bf16.mxu1 %v8578_v25 }
 0x46e   : > { %v5028_v49 = vmax.f32 %v4674_v29, 0.0  ;;  %v4676_v55 = vadd.f32 %v4675_v43, %v4003_v16  ;;  %v4007_v26 = vadd.f32 %v4006_v54, %v10567_v33  ;;  %5461 = vmatprep.mubr.bf16.mxu0 %v10783_v9 }
 0x46f   : > { %v4008_v48 = vpop.f32.mrf.mxu0  ;;  %v4681_v27 = vpop.f32.mrf.mxu1 }
 0x470   : > { %v11310_v32 = vpack.c.bf16 %v5028_v49, %v5026_v38  ;;  %v5029_v7 = vmax.f32 %v4676_v55, 0.0  ;;  %v4009_v21 = vadd.f32 %v4008_v48, %v10571_v8  ;;  %v4680_v14 = vadd.f32 %v4679_v5, %v4007_v26  ;;  %v13063_v55 = vld [vmem:[#allocation91_spill] sm:$0xff]  ;;  %8063 = vmatpush3.bf16.msra.mxu1 %v8578_v25 }
 0x471   : > { %v4010_v36 = vpop.f32.mrf.mxu0  ;;  %v4683_v59 = vpop.f32.mrf.mxu1 }
 0x472   : > { %v4011_v28 = vadd.f32 %v4010_v36, %v10567_v33  ;;  %v11314_v9 = vpack.c.bf16 %v5029_v7, %v5027_v24  ;;  %v4682_v16 = vadd.f32 %v4681_v27, %v4009_v21  ;;  %v5030_v26 = vmax.f32 %v4680_v14, 0.0  ;;  %v8579_v27 = vld [vmem:[%s12513_s4 + $0x10] ss:$8 sps:$4 sm:$0xff]  }
 0x473   : > { %v4012_v43 = vpop.f32.mrf.mxu0  ;;  %v4685_v29 = vpop.f32.mrf.mxu1  ;;  %8064 = vmatprep.subr.bf16.mxu1 %v8579_v27 }
 0x474   : > { %v4684_v54 = vadd.f32 %v4683_v59, %v4011_v28  ;;  %v4013_v42 = vadd.f32 %v4012_v43, %v10571_v8  ;;  %v5031_v21 = vmax.f32 %v4682_v16, 0.0  ;;  %8065 = vmatpush3.bf16.msra.mxu1 %v8579_v27  ;;  %v8580_v16 = vld [vmem:[%s12513_s4] ss:$8 sps:$4 sm:$0xff]  }
 0x475   : > { %v4016_v38 = vpop.f32.mrf.mxu0  ;;  %v4689_v49 = vpop.f32.mrf.mxu1  ;;  %5462 = vmatmul.mubr.bf16.gmra.mxu0 %v13063_v55  ;;  %8066 = vmatprep.subr.bf16.mxu1 %v8580_v16 }
 0x476   : > { %v5032_v5 = vmax.f32 %v4684_v54, 0.0  ;;  %v4686_v48 = vadd.f32 %v4685_v29, %v4013_v42  ;;  %v4017_v47 = vadd.f32 %v4016_v38, %v10567_v33  ;;  %5469 = vmatprep.mubr.bf16.mxu0 %v10801_v19 }
 0x477   : > { %v4018_v24 = vpop.f32.mrf.mxu0  ;;  %v4691_v7 = vpop.f32.mrf.mxu1 }
 0x478   : > { %v11326_v36 = vpack.c.bf16 %v5032_v5, %v5030_v26  ;;  %v5033_v59 = vmax.f32 %v4686_v48, 0.0  ;;  %v4019_v28 = vadd.f32 %v4018_v24, %v10571_v8  ;;  %v4690_v29 = vadd.f32 %v4689_v49, %v4017_v47  ;;  %8067 = vmatpush3.bf16.msra.mxu1 %v8580_v16 }
 0x479   : > { %v4020_v14 = vpop.f32.mrf.mxu0  ;;  %v4693_v43 = vpop.f32.mrf.mxu1 }
 0x47a   : > { %13064 = vst [vmem:[#allocation127_spill] sm:$0xff] %v11326_v36  ;;  %v4021_v54 = vadd.f32 %v4020_v14, %v10567_v33  ;;  %v11330_v19 = vpack.c.bf16 %v5033_v59, %v5031_v21  ;;  %v4692_v38 = vadd.f32 %v4691_v7, %v4019_v28  ;;  %v5034_v49 = vmax.f32 %v4690_v29, 0.0  ;;  %v13066_v21 = vld [vmem:[#allocation98_spill] sm:$0xff] }
 0x47b   : > { %v4022_v25 = vpop.f32.mrf.mxu0  ;;  %v4695_v42 = vpop.f32.mrf.mxu1 }
 0x47c   : > { %13065 = vst [vmem:[#allocation128_spill] sm:$0xff] %v11330_v19  ;;  %v4694_v55 = vadd.f32 %v4693_v43, %v4021_v54  ;;  %v4023_v26 = vadd.f32 %v4022_v25, %v10571_v8  ;;  %v5035_v36 = vmax.f32 %v4692_v38, 0.0 }
 0x47d   : > { %v4026_v5 = vpop.f32.mrf.mxu0  ;;  %v4699_v48 = vpop.f32.mrf.mxu1  ;;  %5470 = vmatmul.mubr.bf16.gmra.mxu0 %v10797_v17 }
 0x47e   : > { %v5036_v47 = vmax.f32 %v4694_v55, 0.0  ;;  %v4696_v24 = vadd.f32 %v4695_v42, %v4023_v26  ;;  %v4027_v27 = vadd.f32 %v4026_v5, %v10567_v33  ;;  %5477 = vmatprep.mubr.bf16.mxu0 %v13066_v21 }
 0x47f   : > { %v4028_v59 = vpop.f32.mrf.mxu0  ;;  %v4701_v14 = vpop.f32.mrf.mxu1 }
 0x480   : > { %v11339_v7 = vpack.c.bf16 %v5036_v47, %v5034_v49  ;;  %v5037_v28 = vmax.f32 %v4696_v24, 0.0  ;;  %v4029_v43 = vadd.f32 %v4028_v59, %v10571_v8  ;;  %v4700_v17 = vadd.f32 %v4699_v48, %v4027_v27  ;;  %v13068_v49 = vld [vmem:[#allocation92_spill] sm:$0xff] }
 0x481   : > { %v4030_v54 = vpop.f32.mrf.mxu0  ;;  %v4703_v25 = vpop.f32.mrf.mxu1 }
 0x482   : > { %13067 = vst [vmem:[#allocation134_spill] sm:$0xff] %v11339_v7  ;;  %v4031_v29 = vadd.f32 %v4030_v54, %v10567_v33  ;;  %v11343_v55 = vpack.c.bf16 %v5037_v28, %v5035_v36  ;;  %v4702_v5 = vadd.f32 %v4701_v14, %v4029_v43  ;;  %v5038_v47 = vmax.f32 %v4700_v17, 0.0 }
 0x483   : > { %v4032_v42 = vpop.f32.mrf.mxu0  ;;  %v4705_v26 = vpop.f32.mrf.mxu1 }
 0x484   : > { %v4704_v21 = vadd.f32 %v4703_v25, %v4031_v29  ;;  %v4033_v16 = vadd.f32 %v4032_v42, %v10571_v8  ;;  %v5039_v27 = vmax.f32 %v4702_v5, 0.0 }
 0x485   : > { %v4036_v19 = vpop.f32.mrf.mxu0  ;;  %v4709_v38 = vpop.f32.mrf.mxu1  ;;  %5478 = vmatmul.mubr.bf16.gmra.mxu0 %v13068_v49 }
 0x486   : > { %v5040_v24 = vmax.f32 %v4704_v21, 0.0  ;;  %v4706_v59 = vadd.f32 %v4705_v26, %v4033_v16  ;;  %v4037_v7 = vadd.f32 %v4036_v19, %v10567_v33  ;;  %5485 = vmatprep.mubr.bf16.mxu0 %v10841_v10 }
 0x487   : > { %v4038_v48 = vpop.f32.mrf.mxu0  ;;  %v4711_v36 = vpop.f32.mrf.mxu1 }
 0x488   : > { %v11349_v28 = vpack.c.bf16 %v5040_v24, %v5038_v47  ;;  %v5041_v14 = vmax.f32 %v4706_v59, 0.0  ;;  %v4039_v43 = vadd.f32 %v4038_v48, %v10571_v8  ;;  %v4710_v29 = vadd.f32 %v4709_v38, %v4037_v7  ;;  %v13070_v47 = vld [vmem:[#allocation16_spill] sm:$0xff] }
 0x489   : > { %v4040_v54 = vpop.f32.mrf.mxu0  ;;  %v4713_v25 = vpop.f32.mrf.mxu1 }
 0x48a   : > { %13069 = vst [vmem:[#allocation43_spill] sm:$0xff] %v11349_v28  ;;  %v4041_v42 = vadd.f32 %v4040_v54, %v10567_v33  ;;  %v11353_v17 = vpack.c.bf16 %v5041_v14, %v5039_v27  ;;  %v4712_v19 = vadd.f32 %v4711_v36, %v4039_v43  ;;  %v5042_v24 = vmax.f32 %v4710_v29, 0.0 }
 0x48b   : > { %v4042_v26 = vpop.f32.mrf.mxu0  ;;  %v4715_v21 = vpop.f32.mrf.mxu1 }
 0x48c   : > { %v4714_v16 = vadd.f32 %v4713_v25, %v4041_v42  ;;  %v4043_v10 = vadd.f32 %v4042_v26, %v10571_v8  ;;  %v5043_v27 = vmax.f32 %v4712_v19, 0.0 }
 0x48d   : > { %v4046_v49 = vpop.f32.mrf.mxu0  ;;  %v4719_v5 = vpop.f32.mrf.mxu1  ;;  %5486 = vmatmul.mubr.bf16.gmra.mxu0 %v13070_v47 }
 0x48e   : > { %v5044_v59 = vmax.f32 %v4714_v16, 0.0  ;;  %v4716_v48 = vadd.f32 %v4715_v21, %v4043_v10  ;;  %v4047_v28 = vadd.f32 %v4046_v49, %v10567_v33  ;;  %5493 = vmatprep.mubr.bf16.mxu0 %v10859_v51 }
 0x48f   : > { %v4048_v7 = vpop.f32.mrf.mxu0  ;;  %v4721_v38 = vpop.f32.mrf.mxu1 }
 0x490   : > { %v11359_v14 = vpack.c.bf16 %v5044_v59, %v5042_v24  ;;  %v5045_v36 = vmax.f32 %v4716_v48, 0.0  ;;  %v4049_v43 = vadd.f32 %v4048_v7, %v10571_v8  ;;  %v4720_v42 = vadd.f32 %v4719_v5, %v4047_v28  ;;  %v13072_v24 = vld [vmem:[#allocation95_spill] sm:$0xff] }
 0x491   : > { %v4050_v54 = vpop.f32.mrf.mxu0  ;;  %v4723_v25 = vpop.f32.mrf.mxu1 }
 0x492   : > { %13071 = vst [vmem:[#allocation131_spill] sm:$0xff] %v11359_v14  ;;  %v4051_v26 = vadd.f32 %v4050_v54, %v10567_v33  ;;  %v11363_v29 = vpack.c.bf16 %v5045_v36, %v5043_v27  ;;  %v4722_v10 = vadd.f32 %v4721_v38, %v4049_v43  ;;  %v5046_v59 = vmax.f32 %v4720_v42, 0.0 }
 0x493   : > { %v4052_v21 = vpop.f32.mrf.mxu0  ;;  %v4725_v16 = vpop.f32.mrf.mxu1 }
 0x494   : > { %v4724_v49 = vadd.f32 %v4723_v25, %v4051_v26  ;;  %v4053_v51 = vadd.f32 %v4052_v21, %v10571_v8  ;;  %v5047_v27 = vmax.f32 %v4722_v10, 0.0 }
 0x495   : > { %v4056_v47 = vpop.f32.mrf.mxu0  ;;  %v4729_v19 = vpop.f32.mrf.mxu1  ;;  %5494 = vmatmul.mubr.bf16.gmra.mxu0 %v13072_v24 }
 0x496   : > { %v5048_v48 = vmax.f32 %v4724_v49, 0.0  ;;  %v4726_v7 = vadd.f32 %v4725_v16, %v4053_v51  ;;  %v4057_v14 = vadd.f32 %v4056_v47, %v10567_v33  ;;  %5501 = vmatprep.mubr.bf16.mxu0 %v10877_v52 }
 0x497   : > { %v4058_v28 = vpop.f32.mrf.mxu0  ;;  %v4731_v5 = vpop.f32.mrf.mxu1 }
 0x498   : > { %v11369_v36 = vpack.c.bf16 %v5048_v48, %v5046_v59  ;;  %v5049_v38 = vmax.f32 %v4726_v7, 0.0  ;;  %v4059_v43 = vadd.f32 %v4058_v28, %v10571_v8  ;;  %v4730_v26 = vadd.f32 %v4729_v19, %v4057_v14 }
 0x499   : > { %v4060_v54 = vpop.f32.mrf.mxu0  ;;  %v4733_v25 = vpop.f32.mrf.mxu1 }
 0x49a   : > { %v4061_v21 = vadd.f32 %v4060_v54, %v10567_v33  ;;  %v11373_v42 = vpack.c.bf16 %v5049_v38, %v5047_v27  ;;  %v4732_v51 = vadd.f32 %v4731_v5, %v4059_v43  ;;  %v5050_v59 = vmax.f32 %v4730_v26, 0.0 }
 0x49b   : > { %v4062_v16 = vpop.f32.mrf.mxu0  ;;  %v4735_v49 = vpop.f32.mrf.mxu1 }
 0x49c   : > { %v4734_v47 = vadd.f32 %v4733_v25, %v4061_v21  ;;  %v4063_v52 = vadd.f32 %v4062_v16, %v10571_v8  ;;  %v5051_v27 = vmax.f32 %v4732_v51, 0.0 }
 0x49d   : > { %v4066_v24 = vpop.f32.mrf.mxu0  ;;  %v4739_v10 = vpop.f32.mrf.mxu1  ;;  %5502 = vmatmul.mubr.bf16.gmra.mxu0 %v10873_v39 }
 0x49e   : > { %v5052_v48 = vmax.f32 %v4734_v47, 0.0  ;;  %v4736_v7 = vadd.f32 %v4735_v49, %v4063_v52  ;;  %v4067_v28 = vadd.f32 %v4066_v24, %v10567_v33  ;;  %5509 = vmatprep.mubr.bf16.mxu0 %v10898_v34 }
 0x49f   : > { %v4068_v14 = vpop.f32.mrf.mxu0  ;;  %v4741_v19 = vpop.f32.mrf.mxu1 }
 0x4a0   : > { %v11379_v38 = vpack.c.bf16 %v5052_v48, %v5050_v59  ;;  %v5053_v5 = vmax.f32 %v4736_v7, 0.0  ;;  %v4069_v43 = vadd.f32 %v4068_v14, %v10571_v8  ;;  %v4740_v21 = vadd.f32 %v4739_v10, %v4067_v28  ;;  %v13074_v59 = vld [vmem:[#allocation96_spill] sm:$0xff] }
 0x4a1   : > { %v4070_v54 = vpop.f32.mrf.mxu0  ;;  %v4743_v25 = vpop.f32.mrf.mxu1 }
 0x4a2   : > { %13073 = vst [vmem:[#allocation132_spill] sm:$0xff] %v11379_v38  ;;  %v4071_v39 = vadd.f32 %v4070_v54, %v10567_v33  ;;  %v11383_v26 = vpack.c.bf16 %v5053_v5, %v5051_v27  ;;  %v4742_v47 = vadd.f32 %v4741_v19, %v4069_v43  ;;  %v5054_v48 = vmax.f32 %v4740_v21, 0.0 }
 0x4a3   : > { %v4072_v16 = vpop.f32.mrf.mxu0  ;;  %v4745_v49 = vpop.f32.mrf.mxu1 }
 0x4a4   : > { %v4744_v52 = vadd.f32 %v4743_v25, %v4071_v39  ;;  %v4073_v34 = vadd.f32 %v4072_v16, %v10571_v8  ;;  %v5055_v27 = vmax.f32 %v4742_v47, 0.0 }
 0x4a5   : > { %v4076_v24 = vpop.f32.mrf.mxu0  ;;  %v4749_v51 = vpop.f32.mrf.mxu1  ;;  %5510 = vmatmul.mubr.bf16.gmra.mxu0 %v13074_v59 }
 0x4a6   : > { %v5056_v7 = vmax.f32 %v4744_v52, 0.0  ;;  %v4746_v14 = vadd.f32 %v4745_v49, %v4073_v34  ;;  %v4077_v38 = vadd.f32 %v4076_v24, %v10567_v33  ;;  %5517 = vmatprep.mubr.bf16.mxu0 %v10917_v1 }
 0x4a7   : > { %v4078_v10 = vpop.f32.mrf.mxu0  ;;  %v4751_v28 = vpop.f32.mrf.mxu1 }
 0x4a8   : > { %v11389_v5 = vpack.c.bf16 %v5056_v7, %v5054_v48  ;;  %v5057_v19 = vmax.f32 %v4746_v14, 0.0  ;;  %v4079_v43 = vadd.f32 %v4078_v10, %v10571_v8  ;;  %v4750_v39 = vadd.f32 %v4749_v51, %v4077_v38 }
 0x4a9   : > { %v4080_v54 = vpop.f32.mrf.mxu0  ;;  %v4753_v25 = vpop.f32.mrf.mxu1 }
 0x4aa   : > { %v4081_v16 = vadd.f32 %v4080_v54, %v10567_v33  ;;  %v11393_v21 = vpack.c.bf16 %v5057_v19, %v5055_v27  ;;  %v4752_v34 = vadd.f32 %v4751_v28, %v4079_v43  ;;  %v5058_v48 = vmax.f32 %v4750_v39, 0.0 }
 0x4ab   : > { %v4082_v49 = vpop.f32.mrf.mxu0  ;;  %v4755_v52 = vpop.f32.mrf.mxu1 }
 0x4ac   : > { %v4754_v24 = vadd.f32 %v4753_v25, %v4081_v16  ;;  %v4083_v1 = vadd.f32 %v4082_v49, %v10571_v8  ;;  %v5059_v27 = vmax.f32 %v4752_v34, 0.0 }
 0x4ad   : > { %v4086_v59 = vpop.f32.mrf.mxu0  ;;  %v4759_v47 = vpop.f32.mrf.mxu1  ;;  %5518 = vmatmul.mubr.bf16.gmra.mxu0 %v10913_v61 }
 0x4ae   : > { %v5060_v7 = vmax.f32 %v4754_v24, 0.0  ;;  %v4756_v14 = vadd.f32 %v4755_v52, %v4083_v1  ;;  %v4087_v10 = vadd.f32 %v4086_v59, %v10567_v33  ;;  %5525 = vmatprep.mubr.bf16.mxu0 %v10938_v15 }
 0x4af   : > { %v4088_v38 = vpop.f32.mrf.mxu0  ;;  %v4761_v51 = vpop.f32.mrf.mxu1 }
 0x4b0   : > { %v11399_v19 = vpack.c.bf16 %v5060_v7, %v5058_v48  ;;  %v5061_v28 = vmax.f32 %v4756_v14, 0.0  ;;  %v4089_v43 = vadd.f32 %v4088_v38, %v10571_v8  ;;  %v4760_v16 = vadd.f32 %v4759_v47, %v4087_v10  ;;  %v13076_v48 = vld [vmem:[#allocation102_spill] sm:$0xff] }
 0x4b1   : > { %v4090_v54 = vpop.f32.mrf.mxu0  ;;  %v4763_v25 = vpop.f32.mrf.mxu1 }
 0x4b2   : > { %13075 = vst [vmem:[#allocation138_spill] sm:$0xff] %v11399_v19  ;;  %v4091_v61 = vadd.f32 %v4090_v54, %v10567_v33  ;;  %v11403_v39 = vpack.c.bf16 %v5061_v28, %v5059_v27  ;;  %v4762_v24 = vadd.f32 %v4761_v51, %v4089_v43  ;;  %v5062_v7 = vmax.f32 %v4760_v16, 0.0 }
 0x4b3   : > { %v4092_v49 = vpop.f32.mrf.mxu0  ;;  %v4765_v52 = vpop.f32.mrf.mxu1 }
 0x4b4   : > { %v4764_v1 = vadd.f32 %v4763_v25, %v4091_v61  ;;  %v4093_v15 = vadd.f32 %v4092_v49, %v10571_v8  ;;  %v5063_v27 = vmax.f32 %v4762_v24, 0.0 }
 0x4b5   : > { %v4096_v59 = vpop.f32.mrf.mxu0  ;;  %v4769_v34 = vpop.f32.mrf.mxu1  ;;  %5526 = vmatmul.mubr.bf16.gmra.mxu0 %v13076_v48 }
 0x4b6   : > { %v5064_v14 = vmax.f32 %v4764_v1, 0.0  ;;  %v4766_v38 = vadd.f32 %v4765_v52, %v4093_v15  ;;  %v4097_v19 = vadd.f32 %v4096_v59, %v10567_v33  ;;  %5533 = vmatprep.mubr.bf16.mxu0 %v10956_v11 }
 0x4b7   : > { %v4098_v47 = vpop.f32.mrf.mxu0  ;;  %v4771_v10 = vpop.f32.mrf.mxu1 }
 0x4b8   : > { %v11409_v28 = vpack.c.bf16 %v5064_v14, %v5062_v7  ;;  %v5065_v51 = vmax.f32 %v4766_v38, 0.0  ;;  %v4099_v43 = vadd.f32 %v4098_v47, %v10571_v8  ;;  %v4770_v61 = vadd.f32 %v4769_v34, %v4097_v19  ;;  %v13078_v19 = vld [vmem:[#allocation99_spill] sm:$0xff] }
 0x4b9   : > { %v4100_v54 = vpop.f32.mrf.mxu0  ;;  %v4773_v25 = vpop.f32.mrf.mxu1 }
 0x4ba   : > { %13077 = vst [vmem:[#allocation46_spill] sm:$0xff] %v11409_v28  ;;  %v4101_v49 = vadd.f32 %v4100_v54, %v10567_v33  ;;  %v11413_v16 = vpack.c.bf16 %v5065_v51, %v5063_v27  ;;  %v4772_v15 = vadd.f32 %v4771_v10, %v4099_v43  ;;  %v5066_v7 = vmax.f32 %v4770_v61, 0.0 }
 0x4bb   : > { %v4102_v52 = vpop.f32.mrf.mxu0  ;;  %v4775_v1 = vpop.f32.mrf.mxu1 }
 0x4bc   : > { %v4774_v59 = vadd.f32 %v4773_v25, %v4101_v49  ;;  %v4103_v11 = vadd.f32 %v4102_v52, %v10571_v8  ;;  %v5067_v51 = vmax.f32 %v4772_v15, 0.0 }
 0x4bd   : > { %v4106_v48 = vpop.f32.mrf.mxu0  ;;  %v4779_v24 = vpop.f32.mrf.mxu1  ;;  %5534 = vmatmul.mubr.bf16.gmra.mxu0 %v10952_v20 }
 0x4be   : > { %v5068_v14 = vmax.f32 %v4774_v59, 0.0  ;;  %v4776_v38 = vadd.f32 %v4775_v1, %v4103_v11  ;;  %v4107_v47 = vadd.f32 %v4106_v48, %v10567_v33  ;;  %5541 = vmatprep.mubr.bf16.mxu0 %v13078_v19 }
 0x4bf   : > { %v4108_v34 = vpop.f32.mrf.mxu0  ;;  %v4781_v27 = vpop.f32.mrf.mxu1 }
 0x4c0   : > { %v11419_v54 = vpack.c.bf16 %v5068_v14, %v5066_v7  ;;  %v5069_v10 = vmax.f32 %v4776_v38, 0.0  ;;  %v4109_v43 = vadd.f32 %v4108_v34, %v10571_v8  ;;  %v4780_v52 = vadd.f32 %v4779_v24, %v4107_v47  ;;  %v13080_v7 = vld [vmem:[#allocation19_spill] sm:$0xff] }
 0x4c1   : > { %v4110_v25 = vpop.f32.mrf.mxu0  ;;  %v4783_v49 = vpop.f32.mrf.mxu1 }
 0x4c2   : > { %13079 = vst [vmem:[#allocation135_spill] sm:$0xff] %v11419_v54  ;;  %v4111_v20 = vadd.f32 %v4110_v25, %v10567_v33  ;;  %v11423_v61 = vpack.c.bf16 %v5069_v10, %v5067_v51  ;;  %v4782_v11 = vadd.f32 %v4781_v27, %v4109_v43  ;;  %v5070_v14 = vmax.f32 %v4780_v52, 0.0 }
 0x4c3   : > { %v4112_v1 = vpop.f32.mrf.mxu0  ;;  %v4785_v59 = vpop.f32.mrf.mxu1 }
 0x4c4   : > { %v4784_v48 = vadd.f32 %v4783_v49, %v4111_v20  ;;  %v4113_v19 = vadd.f32 %v4112_v1, %v10571_v8  ;;  %v5071_v51 = vmax.f32 %v4782_v11, 0.0 }
 0x4c5   : > { %v4116_v28 = vpop.f32.mrf.mxu0  ;;  %v4789_v15 = vpop.f32.mrf.mxu1  ;;  %5542 = vmatmul.mubr.bf16.gmra.mxu0 %v13080_v7 }
 0x4c6   : > { %v5072_v38 = vmax.f32 %v4784_v48, 0.0  ;;  %v4786_v34 = vadd.f32 %v4785_v59, %v4113_v19  ;;  %v4117_v54 = vadd.f32 %v4116_v28, %v10567_v33  ;;  %5549 = vmatprep.mubr.bf16.mxu0 %v10995_v6 }
 0x4c7   : > { %v4118_v24 = vpop.f32.mrf.mxu0  ;;  %v4791_v47 = vpop.f32.mrf.mxu1 }
 0x4c8   : > { %v11429_v10 = vpack.c.bf16 %v5072_v38, %v5070_v14  ;;  %v5073_v27 = vmax.f32 %v4786_v34, 0.0  ;;  %v4119_v43 = vadd.f32 %v4118_v24, %v10571_v8  ;;  %v4790_v20 = vadd.f32 %v4789_v15, %v4117_v54 }
 0x4c9   : > { %v4120_v25 = vpop.f32.mrf.mxu0  ;;  %v4793_v49 = vpop.f32.mrf.mxu1 }
 0x4ca   : > { %v4121_v1 = vadd.f32 %v4120_v25, %v10567_v33  ;;  %v11433_v52 = vpack.c.bf16 %v5073_v27, %v5071_v51  ;;  %v4792_v28 = vadd.f32 %v4791_v47, %v4119_v43  ;;  %v5074_v14 = vmax.f32 %v4790_v20, 0.0 }
 0x4cb   : > { %v4122_v59 = vpop.f32.mrf.mxu0  ;;  %v4795_v48 = vpop.f32.mrf.mxu1 }
 0x4cc   : > { %v4794_v19 = vadd.f32 %v4793_v49, %v4121_v1  ;;  %v4123_v6 = vadd.f32 %v4122_v59, %v10571_v8  ;;  %v5075_v51 = vmax.f32 %v4792_v28, 0.0 }
 0x4cd   : > { %v4126_v7 = vpop.f32.mrf.mxu0  ;;  %v4799_v11 = vpop.f32.mrf.mxu1  ;;  %5550 = vmatmul.mubr.bf16.gmra.mxu0 %v10991_v62 }
 0x4ce   : > { %v5076_v38 = vmax.f32 %v4794_v19, 0.0  ;;  %v4796_v34 = vadd.f32 %v4795_v48, %v4123_v6  ;;  %v4127_v24 = vadd.f32 %v4126_v7, %v10567_v33  ;;  %5557 = vmatprep.mubr.bf16.mxu0 %v11009_v4 }
 0x4cf   : > { %v4128_v54 = vpop.f32.mrf.mxu0  ;;  %v4801_v15 = vpop.f32.mrf.mxu1 }
 0x4d0   : > { %v11439_v27 = vpack.c.bf16 %v5076_v38, %v5074_v14  ;;  %v5077_v47 = vmax.f32 %v4796_v34, 0.0  ;;  %v4129_v43 = vadd.f32 %v4128_v54, %v10571_v8  ;;  %v4800_v1 = vadd.f32 %v4799_v11, %v4127_v24  ;;  %v13082_v14 = vld [vmem:[#allocation100_spill] sm:$0xff] }
 0x4d1   : > { %v4130_v25 = vpop.f32.mrf.mxu0  ;;  %v4803_v49 = vpop.f32.mrf.mxu1 }
 0x4d2   : > { %13081 = vst [vmem:[#allocation136_spill] sm:$0xff] %v11439_v27  ;;  %v4131_v62 = vadd.f32 %v4130_v25, %v10567_v33  ;;  %v11443_v20 = vpack.c.bf16 %v5077_v47, %v5075_v51  ;;  %v4802_v19 = vadd.f32 %v4801_v15, %v4129_v43  ;;  %v5078_v38 = vmax.f32 %v4800_v1, 0.0 }
 0x4d3   : > { %v4132_v59 = vpop.f32.mrf.mxu0  ;;  %v4805_v48 = vpop.f32.mrf.mxu1 }
 0x4d4   : > { %v4804_v6 = vadd.f32 %v4803_v49, %v4131_v62  ;;  %v4133_v4 = vadd.f32 %v4132_v59, %v10571_v8  ;;  %v5079_v51 = vmax.f32 %v4802_v19, 0.0 }
 0x4d5   : > { %v4136_v7 = vpop.f32.mrf.mxu0  ;;  %v4809_v28 = vpop.f32.mrf.mxu1  ;;  %5558 = vmatmul.mubr.bf16.gmra.mxu0 %v13082_v14 }
 0x4d6   : > { %v5080_v34 = vmax.f32 %v4804_v6, 0.0  ;;  %v4806_v54 = vadd.f32 %v4805_v48, %v4133_v4  ;;  %v4137_v27 = vadd.f32 %v4136_v7, %v10567_v33  ;;  %5565 = vmatprep.mubr.bf16.mxu0 %v11021_v31 }
 0x4d7   : > { %v4138_v11 = vpop.f32.mrf.mxu0  ;;  %v4811_v24 = vpop.f32.mrf.mxu1 }
 0x4d8   : > { %v11449_v47 = vpack.c.bf16 %v5080_v34, %v5078_v38  ;;  %v5081_v15 = vmax.f32 %v4806_v54, 0.0  ;;  %v4139_v43 = vadd.f32 %v4138_v11, %v10571_v8  ;;  %v4810_v62 = vadd.f32 %v4809_v28, %v4137_v27  ;;  %v13084_v38 = vld [vmem:[#allocation106_spill] sm:$0xff] }
 0x4d9   : > { %v4140_v25 = vpop.f32.mrf.mxu0  ;;  %v4813_v49 = vpop.f32.mrf.mxu1 }
 0x4da   : > { %13083 = vst [vmem:[#allocation141_spill] sm:$0xff] %v11449_v47  ;;  %v4141_v59 = vadd.f32 %v4140_v25, %v10567_v33  ;;  %v11453_v1 = vpack.c.bf16 %v5081_v15, %v5079_v51  ;;  %v4812_v4 = vadd.f32 %v4811_v24, %v4139_v43  ;;  %v5082_v34 = vmax.f32 %v4810_v62, 0.0 }
 0x4db   : > { %v4142_v48 = vpop.f32.mrf.mxu0  ;;  %v4815_v6 = vpop.f32.mrf.mxu1 }
 0x4dc   : > { %v4814_v7 = vadd.f32 %v4813_v49, %v4141_v59  ;;  %v4143_v31 = vadd.f32 %v4142_v48, %v10571_v8  ;;  %v5083_v51 = vmax.f32 %v4812_v4, 0.0 }
 0x4dd   : > { %v4146_v14 = vpop.f32.mrf.mxu0  ;;  %v4819_v19 = vpop.f32.mrf.mxu1  ;;  %5566 = vmatmul.mubr.bf16.gmra.mxu0 %v13084_v38 }
 0x4de   : > { %v5084_v54 = vmax.f32 %v4814_v7, 0.0  ;;  %v4816_v11 = vadd.f32 %v4815_v6, %v4143_v31  ;;  %v4147_v47 = vadd.f32 %v4146_v14, %v10567_v33  ;;  %5573 = vmatprep.mubr.bf16.mxu0 %v11033_v0 }
 0x4df   : > { %v4148_v27 = vpop.f32.mrf.mxu0  ;;  %v4821_v28 = vpop.f32.mrf.mxu1 }
 0x4e0   : > { %v11459_v15 = vpack.c.bf16 %v5084_v54, %v5082_v34  ;;  %v5085_v24 = vmax.f32 %v4816_v11, 0.0  ;;  %v4149_v43 = vadd.f32 %v4148_v27, %v10571_v8  ;;  %v4820_v59 = vadd.f32 %v4819_v19, %v4147_v47  ;;  %v13085_v47 = vld [vmem:[#allocation103_spill] sm:$0xff] }
 0x4e1   : > { %v4150_v25 = vpop.f32.mrf.mxu0  ;;  %v4823_v49 = vpop.f32.mrf.mxu1 }
 0x4e2   : > { %v4151_v48 = vadd.f32 %v4150_v25, %v10567_v33  ;;  %v11463_v62 = vpack.c.bf16 %v5085_v24, %v5083_v51  ;;  %v4822_v31 = vadd.f32 %v4821_v28, %v4149_v43  ;;  %v5086_v34 = vmax.f32 %v4820_v59, 0.0 }
 0x4e3   : > { %v4152_v6 = vpop.f32.mrf.mxu0  ;;  %v4825_v7 = vpop.f32.mrf.mxu1 }
 0x4e4   : > { %v4824_v14 = vadd.f32 %v4823_v49, %v4151_v48  ;;  %v4153_v0 = vadd.f32 %v4152_v6, %v10571_v8  ;;  %v5087_v24 = vmax.f32 %v4822_v31, 0.0  ;;  %v11479_v31 = vld [vmem:[%s12514_s5 + $0x6] ss:$0 sm:$0xff] }
 0x4e5   : > { %v4156_v38 = vpop.f32.mrf.mxu0  ;;  %v4829_v4 = vpop.f32.mrf.mxu1  ;;  %5574 = vmatmul.mubr.bf16.gmra.mxu0 %v11029_v46 }
 0x4e6   : > { %v5088_v54 = vmax.f32 %v4824_v14, 0.0  ;;  %v4826_v11 = vadd.f32 %v4825_v7, %v4153_v0  ;;  %v4157_v27 = vadd.f32 %v4156_v38, %v10567_v33  ;;  %5581 = vmatprep.mubr.bf16.mxu0 %v13085_v47 }
 0x4e7   : > { %v4158_v19 = vpop.f32.mrf.mxu0  ;;  %v4831_v51 = vpop.f32.mrf.mxu1 }
 0x4e8   : > { %v11469_v25 = vpack.c.bf16 %v5088_v54, %v5086_v34  ;;  %v5089_v28 = vmax.f32 %v4826_v11, 0.0  ;;  %v4159_v43 = vadd.f32 %v4158_v19, %v10571_v8  ;;  %v4830_v6 = vadd.f32 %v4829_v4, %v4157_v27  ;;  %v13086_v54 = vld [vmem:[#allocation22_spill] sm:$0xff] }
 0x4e9   : > { %v4160_v49 = vpop.f32.mrf.mxu0  ;;  %v4833_v48 = vpop.f32.mrf.mxu1 }
 0x4ea   : > { %v4161_v46 = vadd.f32 %v4160_v49, %v10567_v33  ;;  %v11473_v59 = vpack.c.bf16 %v5089_v28, %v5087_v24  ;;  %v4832_v14 = vadd.f32 %v4831_v51, %v4159_v43  ;;  %v5090_v11 = vmax.f32 %v4830_v6, 0.0 }
 0x4eb   : > { %v4162_v7 = vpop.f32.mrf.mxu0  ;;  %v4835_v47 = vpop.f32.mrf.mxu1 }
 0x4ec   : > { %v4834_v0 = vadd.f32 %v4833_v48, %v4161_v46  ;;  %v4163_v38 = vadd.f32 %v4162_v7, %v10571_v8  ;;  %v5091_v19 = vmax.f32 %v4832_v14, 0.0 }
 0x4ed   : > { %v5391_v34 = vpop.f32.mrf.mxu0  ;;  %5582 = vmatmul.mubr.bf16.gmra.mxu0 %v13086_v54 }
 0x4ee   : > { %v5092_v4 = vmax.f32 %v4834_v0, 0.0  ;;  %v4836_v27 = vadd.f32 %v4835_v47, %v4163_v38  ;;  %5589 = vmatprep.mubr.bf16.mxu0 %v11060_v18  ;;  %v5392_v8 = vadd.f32 %v11479_v31, %v5391_v34  ;;  %v13087_v0 = vld [vmem:[#allocation104_spill] sm:$0xff] }
 0x4ef   : > { %v5393_v33 = vpop.f32.mrf.mxu0 }
 0x4f0   : > { %v11483_v51 = vpack.c.bf16 %v5092_v4, %v5090_v11  ;;  %v5093_v24 = vmax.f32 %v4836_v27, 0.0  ;;  %v5902_v46 = vmax.f32 %v5392_v8, 0.0  ;;  %v13088_v33 = vld [vmem:[#allocation110_spill] sm:$0xff] }
 0x4f1   : > { %v5394_v28 = vpop.f32.mrf.mxu0 }
 0x4f2   : > { %v5395_v43 = vadd.f32 %v11479_v31, %v5394_v28  ;;  %v11487_v49 = vpack.c.bf16 %v5093_v24, %v5091_v19 }
 0x4f3   : > { %v5396_v48 = vpop.f32.mrf.mxu0 }
 0x4f4   : > { %v5903_v7 = vmax.f32 %v5395_v43, 0.0 }
 0x4f5   : > { %v5399_v6 = vpop.f32.mrf.mxu0  ;;  %5590 = vmatmul.mubr.bf16.gmra.mxu0 %v13087_v0 }
 0x4f6   : > { %v6030_v38 = vpack.c.bf16 %v5903_v7, %v5902_v46  ;;  %5597 = vmatprep.mubr.bf16.mxu0 %v11072_v30  ;;  %v5400_v14 = vadd.f32 %v11479_v31, %v5399_v6  ;;  %v13089_v6 = vld [vmem:[#allocation89_spill] sm:$0xff] }
 0x4f7   : > { %v5401_v18 = vpop.f32.mrf.mxu0 }
 0x4f8   : > { %8068 = vmatprep.mubr.bf16.mxu1 %v6030_v38  ;;  %v5904_v11 = vmax.f32 %v5400_v14, 0.0 }
 0x4f9   : > { %v5402_v47 = vpop.f32.mrf.mxu0 }
 0x4fa   : > { %v5403_v34 = vadd.f32 %v11479_v31, %v5402_v47 }
 0x4fb   : > { %v5404_v54 = vpop.f32.mrf.mxu0 }
 0x4fc   : > { %v5905_v4 = vmax.f32 %v5403_v34, 0.0 }
 0x4fd   : > { %v5407_v27 = vpop.f32.mrf.mxu0  ;;  %5598 = vmatmul.mubr.bf16.gmra.mxu0 %v13088_v33 }
 0x4fe   : > { %v6031_v19 = vpack.c.bf16 %v5905_v4, %v5904_v11  ;;  %5605 = vmatprep.mubr.bf16.mxu0 %v11084_v35  ;;  %v5408_v8 = vadd.f32 %v11479_v31, %v5407_v27  ;;  %v13090_v4 = vld [vmem:[#allocation26_spill] sm:$0xff] }
 0x4ff   : > { %v5409_v24 = vpop.f32.mrf.mxu0 }
 0x500   : > { %8069 = vmatmul.mubr.bf16.vlgmr.msra.gmra.mxu1 %v6031_v19  ;;  %v5906_v48 = vmax.f32 %v5408_v8, 0.0 }
 0x501   : > { %v5410_v30 = vpop.f32.mrf.mxu0 }
 0x502   : > { %v5411_v28 = vadd.f32 %v11479_v31, %v5410_v30 }
 0x503   : > { %v5412_v43 = vpop.f32.mrf.mxu0 }
 0x504   : > { %v5907_v46 = vmax.f32 %v5411_v28, 0.0 }
 0x505   : > { %v5415_v7 = vpop.f32.mrf.mxu0  ;;  %5606 = vmatmul.mubr.bf16.gmra.mxu0 %v13089_v6 }
 0x506   : > { %v6032_v0 = vpack.c.bf16 %v5907_v46, %v5906_v48  ;;  %5613 = vmatprep.mubr.bf16.mxu0 %v11096_v12  ;;  %v5416_v18 = vadd.f32 %v11479_v31, %v5415_v7  ;;  %v13091_v48 = vld [vmem:[#allocation107_spill] sm:$0xff] }
 0x507   : > { %v5417_v38 = vpop.f32.mrf.mxu0 }
 0x508   : > { %8072 = vmatprep.mubr.bf16.mxu1 %v6032_v0  ;;  %v5908_v34 = vmax.f32 %v5416_v18, 0.0 }
 0x509   : > { %v5418_v35 = vpop.f32.mrf.mxu0 }
 0x50a   : > { %v5419_v14 = vadd.f32 %v11479_v31, %v5418_v35 }
 0x50b   : > { %v5420_v47 = vpop.f32.mrf.mxu0 }
 0x50c   : > { %v5909_v54 = vmax.f32 %v5419_v14, 0.0  ;;  %v13092_v47 = vld [vmem:[#allocation108_spill] sm:$0xff] }
 0x50d   : > { %v5423_v11 = vpop.f32.mrf.mxu0  ;;  %5614 = vmatmul.mubr.bf16.gmra.mxu0 %v13090_v4 }
 0x50e   : > { %v6033_v27 = vpack.c.bf16 %v5909_v54, %v5908_v34  ;;  %5621 = vmatprep.mubr.bf16.mxu0 %v11108_v3  ;;  %v5424_v19 = vadd.f32 %v11479_v31, %v5423_v11 }
 0x50f   : > { %v5425_v33 = vpop.f32.mrf.mxu0 }
 0x510   : > { %8073 = vmatmul.mubr.bf16.gmra.mxu1 %v6033_v27  ;;  %v5910_v30 = vmax.f32 %v5424_v19, 0.0 }
 0x511   : > { %v5426_v12 = vpop.f32.mrf.mxu0 }
 0x512   : > { %v5427_v24 = vadd.f32 %v11479_v31, %v5426_v12 }
 0x513   : > { %v5428_v8 = vpop.f32.mrf.mxu0 }
 0x514   : > { %v5911_v28 = vmax.f32 %v5427_v24, 0.0  ;;  %v13093_v8 = vld [vmem:[#allocation111_spill] sm:$0xff] }
 0x515   : > { %v5431_v43 = vpop.f32.mrf.mxu0  ;;  %5622 = vmatmul.mubr.bf16.gmra.mxu0 %v13091_v48 }
 0x516   : > { %v6034_v46 = vpack.c.bf16 %v5911_v28, %v5910_v30  ;;  %5629 = vmatprep.mubr.bf16.mxu0 %v11120_v50  ;;  %v5432_v6 = vadd.f32 %v11479_v31, %v5431_v43 }
 0x517   : > { %v5433_v7 = vpop.f32.mrf.mxu0 }
 0x518   : > { %8076 = vmatprep.mubr.bf16.mxu1 %v6034_v46  ;;  %v5912_v18 = vmax.f32 %v5432_v6, 0.0 }
 0x519   : > { %v5434_v3 = vpop.f32.mrf.mxu0 }
 0x51a   : > { %v5435_v0 = vadd.f32 %v11479_v31, %v5434_v3  ;;  %v13094_v3 = vld [vmem:[#allocation114_spill] sm:$0xff] }
 0x51b   : > { %v5436_v38 = vpop.f32.mrf.mxu0 }
 0x51c   : > { %v5913_v35 = vmax.f32 %v5435_v0, 0.0 }
 0x51d   : > { %v5439_v14 = vpop.f32.mrf.mxu0  ;;  %5630 = vmatmul.mubr.bf16.gmra.mxu0 %v13092_v47 }
 0x51e   : > { %v6035_v34 = vpack.c.bf16 %v5913_v35, %v5912_v18  ;;  %5637 = vmatprep.mubr.bf16.mxu0 %v11132_v40  ;;  %v5440_v11 = vadd.f32 %v11479_v31, %v5439_v14 }
 0x51f   : > { %v5441_v54 = vpop.f32.mrf.mxu0 }
 0x520   : > { %8077 = vmatmul.mubr.bf16.gmra.mxu1 %v6035_v34  ;;  %v5914_v33 = vmax.f32 %v5440_v11, 0.0  ;;  %v13095_v11 = vld [vmem:[#allocation112_spill] sm:$0xff] }
 0x521   : > { %v5442_v50 = vpop.f32.mrf.mxu0 }
 0x522   : > { %v5443_v4 = vadd.f32 %v11479_v31, %v5442_v50 }
 0x523   : > { %v5444_v27 = vpop.f32.mrf.mxu0 }
 0x524   : > { %v5915_v19 = vmax.f32 %v5443_v4, 0.0 }
 0x525   : > { %v5447_v12 = vpop.f32.mrf.mxu0  ;;  %5638 = vmatmul.mubr.bf16.gmra.mxu0 %v11128_v45 }
 0x526   : > { %v6036_v24 = vpack.c.bf16 %v5915_v19, %v5914_v33  ;;  %5645 = vmatprep.mubr.bf16.mxu0 %v13093_v8  ;;  %v5448_v28 = vadd.f32 %v11479_v31, %v5447_v12 }
 0x527   : > { %v5449_v30 = vpop.f32.mrf.mxu0 }
 0x528   : > { %8080 = vmatprep.mubr.bf16.mxu1 %v6036_v24  ;;  %v5916_v46 = vmax.f32 %v5448_v28, 0.0  ;;  %v13096_v30 = vld [vmem:[#allocation118_spill] sm:$0xff] }
 0x529   : > { %v5450_v40 = vpop.f32.mrf.mxu0 }
 0x52a   : > { %v5451_v43 = vadd.f32 %v11479_v31, %v5450_v40 }
 0x52b   : > { %v5452_v48 = vpop.f32.mrf.mxu0 }
 0x52c   : > { %v5917_v7 = vmax.f32 %v5451_v43, 0.0 }
 0x52d   : > { %v5455_v6 = vpop.f32.mrf.mxu0  ;;  %5646 = vmatmul.mubr.bf16.gmra.mxu0 %v13094_v3 }
 0x52e   : > { %v6037_v0 = vpack.c.bf16 %v5917_v7, %v5916_v46  ;;  %5653 = vmatprep.mubr.bf16.mxu0 %v11159_v63  ;;  %v5456_v38 = vadd.f32 %v11479_v31, %v5455_v6 }
 0x52f   : > { %v5457_v45 = vpop.f32.mrf.mxu0 }
 0x530   : > { %8081 = vmatmul.mubr.bf16.gmra.mxu1 %v6037_v0  ;;  %v5918_v47 = vmax.f32 %v5456_v38, 0.0  ;;  %v13097_v0 = vld [vmem:[#allocation31_spill] sm:$0xff] }
 0x531   : > { %v5458_v18 = vpop.f32.mrf.mxu0 }
 0x532   : > { %v5459_v35 = vadd.f32 %v11479_v31, %v5458_v18 }
 0x533   : > { %v5460_v14 = vpop.f32.mrf.mxu0 }
 0x534   : > { %v5919_v34 = vmax.f32 %v5459_v35, 0.0 }
 0x535   : > { %v5463_v54 = vpop.f32.mrf.mxu0  ;;  %5654 = vmatmul.mubr.bf16.gmra.mxu0 %v13095_v11  ;;  %v13098_v11 = vld [vmem:[#allocation115_spill] sm:$0xff] }
 0x536   : > { %v6038_v50 = vpack.c.bf16 %v5919_v34, %v5918_v47  ;;  %5661 = vmatprep.mubr.bf16.mxu0 %v11171_v13  ;;  %v5464_v27 = vadd.f32 %v11479_v31, %v5463_v54 }
 0x537   : > { %v5465_v4 = vpop.f32.mrf.mxu0 }
 0x538   : > { %8084 = vmatprep.mubr.bf16.mxu1 %v6038_v50  ;;  %v5920_v12 = vmax.f32 %v5464_v27, 0.0  ;;  %v13099_v4 = vld [vmem:[#allocation122_spill] sm:$0xff] }
 0x539   : > { %v5466_v63 = vpop.f32.mrf.mxu0 }
 0x53a   : > { %v5467_v33 = vadd.f32 %v11479_v31, %v5466_v63 }
 0x53b   : > { %v5468_v19 = vpop.f32.mrf.mxu0 }
 0x53c   : > { %v5921_v24 = vmax.f32 %v5467_v33, 0.0 }
 0x53d   : > { %v5471_v8 = vpop.f32.mrf.mxu0  ;;  %5662 = vmatmul.mubr.bf16.gmra.mxu0 %v13096_v30  ;;  %v13100_v30 = vld [vmem:[#allocation116_spill] sm:$0xff] }
 0x53e   : > { %v6039_v28 = vpack.c.bf16 %v5921_v24, %v5920_v12  ;;  %5669 = vmatprep.mubr.bf16.mxu0 %v11183_v23  ;;  %v5472_v43 = vadd.f32 %v11479_v31, %v5471_v8 }
 0x53f   : > { %v5473_v40 = vpop.f32.mrf.mxu0 }
 0x540   : > { %8085 = vmatmul.mubr.bf16.gmra.mxu1 %v6039_v28  ;;  %v5922_v7 = vmax.f32 %v5472_v43, 0.0 }
 0x541   : > { %v5474_v13 = vpop.f32.mrf.mxu0 }
 0x542   : > { %v5475_v48 = vadd.f32 %v11479_v31, %v5474_v13 }
 0x543   : > { %v5476_v46 = vpop.f32.mrf.mxu0 }
 0x544   : > { %v5923_v6 = vmax.f32 %v5475_v48, 0.0 }
 0x545   : > { %v5479_v3 = vpop.f32.mrf.mxu0  ;;  %5670 = vmatmul.mubr.bf16.gmra.mxu0 %v13097_v0  ;;  %v13101_v0 = vld [vmem:[#allocation34_spill] sm:$0xff] }
 0x546   : > { %v6040_v45 = vpack.c.bf16 %v5923_v6, %v5922_v7  ;;  %5677 = vmatprep.mubr.bf16.mxu0 %v11195_v22  ;;  %v5480_v18 = vadd.f32 %v11479_v31, %v5479_v3 }
 0x547   : > { %v5481_v38 = vpop.f32.mrf.mxu0 }
 0x548   : > { %8088 = vmatprep.mubr.bf16.mxu1 %v6040_v45  ;;  %v5924_v47 = vmax.f32 %v5480_v18, 0.0 }
 0x549   : > { %v5482_v23 = vpop.f32.mrf.mxu0 }
 0x54a   : > { %v5483_v35 = vadd.f32 %v11479_v31, %v5482_v23 }
 0x54b   : > { %v5484_v14 = vpop.f32.mrf.mxu0 }
 0x54c   : > { %v5925_v34 = vmax.f32 %v5483_v35, 0.0 }
 0x54d   : > { %v5487_v54 = vpop.f32.mrf.mxu0  ;;  %5678 = vmatmul.mubr.bf16.gmra.mxu0 %v13098_v11 }
 0x54e   : > { %v6041_v50 = vpack.c.bf16 %v5925_v34, %v5924_v47  ;;  %5685 = vmatprep.mubr.bf16.mxu0 %v13099_v4  ;;  %v5488_v63 = vadd.f32 %v11479_v31, %v5487_v54  ;;  %v13102_v54 = vld [vmem:[#allocation119_spill] sm:$0xff] }
 0x54f   : > { %v5489_v27 = vpop.f32.mrf.mxu0 }
 0x550   : > { %8089 = vmatmul.mubr.bf16.gmra.mxu1 %v6041_v50  ;;  %v5926_v12 = vmax.f32 %v5488_v63, 0.0 }
 0x551   : > { %v5490_v22 = vpop.f32.mrf.mxu0 }
 0x552   : > { %v5491_v33 = vadd.f32 %v11479_v31, %v5490_v22 }
 0x553   : > { %v5492_v19 = vpop.f32.mrf.mxu0 }
 0x554   : > { %v5927_v24 = vmax.f32 %v5491_v33, 0.0 }
 0x555   : > { %v5495_v8 = vpop.f32.mrf.mxu0  ;;  %5686 = vmatmul.mubr.bf16.gmra.mxu0 %v13100_v30 }
 0x556   : > { %v6042_v28 = vpack.c.bf16 %v5927_v24, %v5926_v12  ;;  %5693 = vmatprep.mubr.bf16.mxu0 %v11218_v53  ;;  %v5496_v43 = vadd.f32 %v11479_v31, %v5495_v8  ;;  %v13103_v12 = vld [vmem:[#allocation120_spill] sm:$0xff]  ;;  %v13104_v8 = vld [vmem:[#allocation37_spill] sm:$0xff] }
 0x557   : > { %v5497_v40 = vpop.f32.mrf.mxu0 }
 0x558   : > { %8092 = vmatprep.mubr.bf16.mxu1 %v6042_v28  ;;  %v5928_v7 = vmax.f32 %v5496_v43, 0.0 }
 0x559   : > { %v5498_v13 = vpop.f32.mrf.mxu0 }
 0x55a   : > { %v5499_v48 = vadd.f32 %v11479_v31, %v5498_v13 }
 0x55b   : > { %v5500_v46 = vpop.f32.mrf.mxu0 }
 0x55c   : > { %v5929_v6 = vmax.f32 %v5499_v48, 0.0 }
 0x55d   : > { %v5503_v3 = vpop.f32.mrf.mxu0  ;;  %5694 = vmatmul.mubr.bf16.gmra.mxu0 %v13101_v0 }
 0x55e   : > { %v6043_v45 = vpack.c.bf16 %v5929_v6, %v5928_v7  ;;  %5701 = vmatprep.mubr.bf16.mxu0 %v11228_v57  ;;  %v5504_v18 = vadd.f32 %v11479_v31, %v5503_v3  ;;  %v13105_v7 = vld [vmem:[#allocation126_spill] sm:$0xff] }
 0x55f   : > { %v5505_v38 = vpop.f32.mrf.mxu0 }
 0x560   : > { %8093 = vmatmul.mubr.bf16.gmra.mxu1 %v6043_v45  ;;  %v5930_v14 = vmax.f32 %v5504_v18, 0.0  ;;  %v8581_v38 = vld [vmem:[%s12513_s4 + $0x74] ss:$8 sps:$4 sm:$0xff]  }
 0x561   : > { %v5506_v53 = vpop.f32.mrf.mxu0  ;;  %8196 = vmatprep.subr.bf16.mxu1 %v8581_v38 }
 0x562   : > { %v5507_v23 = vadd.f32 %v11479_v31, %v5506_v53  ;;  %8197 = vmatpush3.bf16.msra.mxu1 %v8581_v38 }
 0x563   : > { %v5508_v35 = vpop.f32.mrf.mxu0 }
 0x564   : > { %v5931_v47 = vmax.f32 %v5507_v23, 0.0 }
 0x565   : > { %v5511_v34 = vpop.f32.mrf.mxu0  ;;  %5702 = vmatmul.mubr.bf16.gmra.mxu0 %v13102_v54 }
 0x566   : > { %v6044_v11 = vpack.c.bf16 %v5931_v47, %v5930_v14  ;;  %5709 = vmatprep.mubr.bf16.mxu0 %v11238_v37  ;;  %v5512_v4 = vadd.f32 %v11479_v31, %v5511_v34  ;;  %v13106_v47 = vld [vmem:[#allocation123_spill] sm:$0xff] }
 0x567   : > { %v5513_v50 = vpop.f32.mrf.mxu0 }
 0x568   : > { %8096 = vmatprep.mubr.bf16.mxu1 %v6044_v11  ;;  %v5932_v22 = vmax.f32 %v5512_v4, 0.0 }
 0x569   : > { %v5514_v57 = vpop.f32.mrf.mxu0 }
 0x56a   : > { %v5515_v27 = vadd.f32 %v11479_v31, %v5514_v57 }
 0x56b   : > { %v5516_v63 = vpop.f32.mrf.mxu0 }
 0x56c   : > { %v5933_v33 = vmax.f32 %v5515_v27, 0.0 }
 0x56d   : > { %v5519_v19 = vpop.f32.mrf.mxu0  ;;  %5710 = vmatmul.mubr.bf16.gmra.mxu0 %v13103_v12 }
 0x56e   : > { %v6045_v24 = vpack.c.bf16 %v5933_v33, %v5932_v22  ;;  %5717 = vmatprep.mubr.bf16.mxu0 %v13104_v8  ;;  %v5520_v28 = vadd.f32 %v11479_v31, %v5519_v19 }
 0x56f   : > { %v5521_v30 = vpop.f32.mrf.mxu0 }
 0x570   : > { %8097 = vmatmul.mubr.bf16.gmra.mxu1 %v6045_v24  ;;  %v5934_v13 = vmax.f32 %v5520_v28, 0.0 }
 0x571   : > { %v5522_v37 = vpop.f32.mrf.mxu0 }
 0x572   : > { %v5523_v40 = vadd.f32 %v11479_v31, %v5522_v37  ;;  %v13107_v37 = vld [vmem:[#allocation124_spill] sm:$0xff] }
 0x573   : > { %v5524_v43 = vpop.f32.mrf.mxu0 }
 0x574   : > { %v5935_v48 = vmax.f32 %v5523_v40, 0.0 }
 0x575   : > { %v5527_v46 = vpop.f32.mrf.mxu0  ;;  %5718 = vmatmul.mubr.bf16.gmra.mxu0 %v13105_v7 }
 0x576   : > { %v6046_v6 = vpack.c.bf16 %v5935_v48, %v5934_v13  ;;  %5725 = vmatprep.mubr.bf16.mxu0 %v11261_v44  ;;  %v5528_v0 = vadd.f32 %v11479_v31, %v5527_v46 }
 0x577   : > { %v5529_v3 = vpop.f32.mrf.mxu0 }
 0x578   : > { %8100 = vmatprep.mubr.bf16.mxu1 %v6046_v6  ;;  %v5936_v23 = vmax.f32 %v5528_v0, 0.0  ;;  %v13108_v3 = vld [vmem:[#allocation130_spill] sm:$0xff] }
 0x579   : > { %v5530_v45 = vpop.f32.mrf.mxu0 }
 0x57a   : > { %v5531_v18 = vadd.f32 %v11479_v31, %v5530_v45 }
 0x57b   : > { %v5532_v53 = vpop.f32.mrf.mxu0 }
 0x57c   : > { %v5937_v35 = vmax.f32 %v5531_v18, 0.0  ;;  %v8582_v18 = vld [vmem:[%s12513_s4 + $0x64] ss:$8 sps:$4 sm:$0xff]  }
 0x57d   : > { %v5535_v14 = vpop.f32.mrf.mxu0  ;;  %5726 = vmatmul.mubr.bf16.gmra.mxu0 %v13106_v47  ;;  %8198 = vmatprep.subr.bf16.mxu1 %v8582_v18 }
 0x57e   : > { %v6047_v44 = vpack.c.bf16 %v5937_v35, %v5936_v23  ;;  %5733 = vmatprep.mubr.bf16.mxu0 %v11271_v58  ;;  %v5536_v54 = vadd.f32 %v11479_v31, %v5535_v14  ;;  %8199 = vmatpush3.bf16.msra.mxu1 %v8582_v18 }
 0x57f   : > { %v5537_v34 = vpop.f32.mrf.mxu0 }
 0x580   : > { %8101 = vmatmul.mubr.bf16.gmra.mxu1 %v6047_v44  ;;  %v5938_v57 = vmax.f32 %v5536_v54, 0.0  ;;  %v13109_v44 = vld [vmem:[#allocation40_spill] sm:$0xff] }
 0x581   : > { %v5538_v11 = vpop.f32.mrf.mxu0 }
 0x582   : > { %v5539_v50 = vadd.f32 %v11479_v31, %v5538_v11 }
 0x583   : > { %v5540_v4 = vpop.f32.mrf.mxu0 }
 0x584   : > { %v5939_v27 = vmax.f32 %v5539_v50, 0.0 }
 0x585   : > { %v5543_v63 = vpop.f32.mrf.mxu0  ;;  %5734 = vmatmul.mubr.bf16.gmra.mxu0 %v11267_v2 }
 0x586   : > { %v6048_v22 = vpack.c.bf16 %v5939_v27, %v5938_v57  ;;  %5741 = vmatprep.mubr.bf16.mxu0 %v11281_v41  ;;  %v5544_v19 = vadd.f32 %v11479_v31, %v5543_v63 }
 0x587   : > { %v5545_v33 = vpop.f32.mrf.mxu0 }
 0x588   : > { %8104 = vmatprep.mubr.bf16.mxu1 %v6048_v22  ;;  %v5940_v8 = vmax.f32 %v5544_v19, 0.0  ;;  %v13110_v33 = vld [vmem:[#allocation128_spill] sm:$0xff] }
 0x589   : > { %v5546_v58 = vpop.f32.mrf.mxu0 }
 0x58a   : > { %v5547_v12 = vadd.f32 %v11479_v31, %v5546_v58 }
 0x58b   : > { %v5548_v24 = vpop.f32.mrf.mxu0 }
 0x58c   : > { %v5941_v30 = vmax.f32 %v5547_v12, 0.0 }
 0x58d   : > { %v5551_v28 = vpop.f32.mrf.mxu0  ;;  %5742 = vmatmul.mubr.bf16.gmra.mxu0 %v13107_v37  ;;  %v13111_v37 = vld [vmem:[#allocation127_spill] sm:$0xff] }
 0x58e   : > { %v6049_v40 = vpack.c.bf16 %v5941_v30, %v5940_v8  ;;  %5749 = vmatprep.mubr.bf16.mxu0 %v11291_v60  ;;  %v5552_v43 = vadd.f32 %v11479_v31, %v5551_v28 }
 0x58f   : > { %v5553_v2 = vpop.f32.mrf.mxu0 }
 0x590   : > { %8105 = vmatmul.mubr.bf16.gmra.mxu1 %v6049_v40  ;;  %v5942_v46 = vmax.f32 %v5552_v43, 0.0 }
 0x591   : > { %v5554_v41 = vpop.f32.mrf.mxu0 }
 0x592   : > { %v5555_v13 = vadd.f32 %v11479_v31, %v5554_v41 }
 0x593   : > { %v5556_v48 = vpop.f32.mrf.mxu0 }
 0x594   : > { %v5943_v7 = vmax.f32 %v5555_v13, 0.0 }
 0x595   : > { %v5559_v6 = vpop.f32.mrf.mxu0  ;;  %5750 = vmatmul.mubr.bf16.gmra.mxu0 %v13108_v3 }
 0x596   : > { %v6050_v0 = vpack.c.bf16 %v5943_v7, %v5942_v46  ;;  %5757 = vmatprep.mubr.bf16.mxu0 %v11301_v56  ;;  %v5560_v38 = vadd.f32 %v11479_v31, %v5559_v6  ;;  %v13112_v6 = vld [vmem:[#allocation134_spill] sm:$0xff] }
 0x597   : > { %v5561_v45 = vpop.f32.mrf.mxu0 }
 0x598   : > { %8108 = vmatprep.mubr.bf16.mxu1 %v6050_v0  ;;  %v5944_v35 = vmax.f32 %v5560_v38, 0.0  ;;  %v8583_v38 = vld [vmem:[%s12513_s4 + $0x54] ss:$8 sps:$4 sm:$0xff]  }
 0x599   : > { %v5562_v60 = vpop.f32.mrf.mxu0  ;;  %8200 = vmatprep.subr.bf16.mxu1 %v8583_v38 }
 0x59a   : > { %v5563_v53 = vadd.f32 %v11479_v31, %v5562_v60  ;;  %8201 = vmatpush3.bf16.msra.mxu1 %v8583_v38 }
 0x59b   : > { %v5564_v23 = vpop.f32.mrf.mxu0 }
 0x59c   : > { %v5945_v14 = vmax.f32 %v5563_v53, 0.0 }
 0x59d   : > { %v5567_v47 = vpop.f32.mrf.mxu0  ;;  %5758 = vmatmul.mubr.bf16.gmra.mxu0 %v13109_v44 }
 0x59e   : > { %v6051_v56 = vpack.c.bf16 %v5945_v14, %v5944_v35  ;;  %5765 = vmatprep.mubr.bf16.mxu0 %v11314_v9  ;;  %v5568_v54 = vadd.f32 %v11479_v31, %v5567_v47  ;;  %v13113_v14 = vld [vmem:[#allocation43_spill] sm:$0xff] }
 0x59f   : > { %v5569_v34 = vpop.f32.mrf.mxu0 }
 0x5a0   : > { %8109 = vmatmul.mubr.bf16.gmra.mxu1 %v6051_v56  ;;  %v5946_v57 = vmax.f32 %v5568_v54, 0.0 }
 0x5a1   : > { %v5570_v11 = vpop.f32.mrf.mxu0 }
 0x5a2   : > { %v5571_v50 = vadd.f32 %v11479_v31, %v5570_v11 }
 0x5a3   : > { %v5572_v4 = vpop.f32.mrf.mxu0 }
 0x5a4   : > { %v5947_v27 = vmax.f32 %v5571_v50, 0.0 }
 0x5a5   : > { %v5575_v63 = vpop.f32.mrf.mxu0  ;;  %5766 = vmatmul.mubr.bf16.gmra.mxu0 %v11310_v32 }
 0x5a6   : > { %v6052_v22 = vpack.c.bf16 %v5947_v27, %v5946_v57  ;;  %5773 = vmatprep.mubr.bf16.mxu0 %v13110_v33  ;;  %v5576_v58 = vadd.f32 %v11479_v31, %v5575_v63  ;;  %v13114_v57 = vld [vmem:[#allocation131_spill] sm:$0xff] }
 0x5a7   : > { %v5577_v19 = vpop.f32.mrf.mxu0 }
 0x5a8   : > { %8112 = vmatprep.mubr.bf16.mxu1 %v6052_v22  ;;  %v5948_v8 = vmax.f32 %v5576_v58, 0.0 }
 0x5a9   : > { %v5578_v9 = vpop.f32.mrf.mxu0 }
 0x5aa   : > { %v5579_v12 = vadd.f32 %v11479_v31, %v5578_v9 }
 0x5ab   : > { %v5580_v24 = vpop.f32.mrf.mxu0 }
 0x5ac   : > { %v5949_v30 = vmax.f32 %v5579_v12, 0.0 }
 0x5ad   : > { %v5583_v28 = vpop.f32.mrf.mxu0  ;;  %5774 = vmatmul.mubr.bf16.gmra.mxu0 %v13111_v37 }
 0x5ae   : > { %v6053_v40 = vpack.c.bf16 %v5949_v30, %v5948_v8  ;;  %5781 = vmatprep.mubr.bf16.mxu0 %v11343_v55  ;;  %v5584_v2 = vadd.f32 %v11479_v31, %v5583_v28 }
 0x5af   : > { %v5585_v32 = vpop.f32.mrf.mxu0 }
 0x5b0   : > { %8113 = vmatmul.mubr.bf16.gmra.mxu1 %v6053_v40  ;;  %v5950_v48 = vmax.f32 %v5584_v2, 0.0 }
 0x5b1   : > { %v5586_v43 = vpop.f32.mrf.mxu0 }
 0x5b2   : > { %v5587_v41 = vadd.f32 %v11479_v31, %v5586_v43  ;;  %v13115_v43 = vld [vmem:[#allocation132_spill] sm:$0xff] }
 0x5b3   : > { %v5588_v13 = vpop.f32.mrf.mxu0 }
 0x5b4   : > { %v5951_v46 = vmax.f32 %v5587_v41, 0.0 }
 0x5b5   : > { %v5591_v7 = vpop.f32.mrf.mxu0  ;;  %5782 = vmatmul.mubr.bf16.gmra.mxu0 %v13112_v6 }
 0x5b6   : > { %v6054_v3 = vpack.c.bf16 %v5951_v46, %v5950_v48  ;;  %5789 = vmatprep.mubr.bf16.mxu0 %v11353_v17  ;;  %v5592_v45 = vadd.f32 %v11479_v31, %v5591_v7  ;;  %v8584_v48 = vld [vmem:[%s12513_s4 + $0x44] ss:$8 sps:$4 sm:$0xff]  }
 0x5b7   : > { %v5593_v0 = vpop.f32.mrf.mxu0  ;;  %8202 = vmatprep.subr.bf16.mxu1 %v8584_v48 }
 0x5b8   : > { %8116 = vmatprep.mubr.bf16.mxu1 %v6054_v3  ;;  %v5952_v53 = vmax.f32 %v5592_v45, 0.0  ;;  %8203 = vmatpush3.bf16.msra.mxu1 %v8584_v48 }
 0x5b9   : > { %v5594_v55 = vpop.f32.mrf.mxu0 }
 0x5ba   : > { %v5595_v60 = vadd.f32 %v11479_v31, %v5594_v55 }
 0x5bb   : > { %v5596_v18 = vpop.f32.mrf.mxu0 }
 0x5bc   : > { %v5953_v23 = vmax.f32 %v5595_v60, 0.0 }
 0x5bd   : > { %v5599_v35 = vpop.f32.mrf.mxu0  ;;  %5790 = vmatmul.mubr.bf16.gmra.mxu0 %v13113_v14  ;;  %v13116_v14 = vld [vmem:[#allocation138_spill] sm:$0xff] }
 0x5be   : > { %v6055_v17 = vpack.c.bf16 %v5953_v23, %v5952_v53  ;;  %5797 = vmatprep.mubr.bf16.mxu0 %v11363_v29  ;;  %v5600_v44 = vadd.f32 %v11479_v31, %v5599_v35 }
 0x5bf   : > { %v5601_v47 = vpop.f32.mrf.mxu0 }
 0x5c0   : > { %8117 = vmatmul.mubr.bf16.gmra.mxu1 %v6055_v17  ;;  %v5954_v11 = vmax.f32 %v5600_v44, 0.0 }
 0x5c1   : > { %v5602_v56 = vpop.f32.mrf.mxu0 }
 0x5c2   : > { %v5603_v34 = vadd.f32 %v11479_v31, %v5602_v56 }
 0x5c3   : > { %v5604_v54 = vpop.f32.mrf.mxu0 }
 0x5c4   : > { %v5955_v50 = vmax.f32 %v5603_v34, 0.0 }
 0x5c5   : > { %v5607_v4 = vpop.f32.mrf.mxu0  ;;  %5798 = vmatmul.mubr.bf16.gmra.mxu0 %v13114_v57 }
 0x5c6   : > { %v6056_v27 = vpack.c.bf16 %v5955_v50, %v5954_v11  ;;  %5805 = vmatprep.mubr.bf16.mxu0 %v11373_v42  ;;  %v5608_v22 = vadd.f32 %v11479_v31, %v5607_v4  ;;  %v13117_v50 = vld [vmem:[#allocation46_spill] sm:$0xff] }
 0x5c7   : > { %v5609_v63 = vpop.f32.mrf.mxu0 }
 0x5c8   : > { %8120 = vmatprep.mubr.bf16.mxu1 %v6056_v27  ;;  %v5956_v58 = vmax.f32 %v5608_v22, 0.0 }
 0x5c9   : > { %v5610_v29 = vpop.f32.mrf.mxu0 }
 0x5ca   : > { %v5611_v33 = vadd.f32 %v11479_v31, %v5610_v29 }
 0x5cb   : > { %v5612_v19 = vpop.f32.mrf.mxu0 }
 0x5cc   : > { %v5957_v9 = vmax.f32 %v5611_v33, 0.0 }
 0x5cd   : > { %v5615_v12 = vpop.f32.mrf.mxu0  ;;  %5806 = vmatmul.mubr.bf16.gmra.mxu0 %v11369_v36 }
 0x5ce   : > { %v6057_v24 = vpack.c.bf16 %v5957_v9, %v5956_v58  ;;  %5813 = vmatprep.mubr.bf16.mxu0 %v11383_v26  ;;  %v5616_v30 = vadd.f32 %v11479_v31, %v5615_v12  ;;  %v13118_v58 = vld [vmem:[#allocation135_spill] sm:$0xff] }
 0x5cf   : > { %v5617_v8 = vpop.f32.mrf.mxu0 }
 0x5d0   : > { %8121 = vmatmul.mubr.bf16.gmra.mxu1 %v6057_v24  ;;  %v5958_v40 = vmax.f32 %v5616_v30, 0.0  ;;  %v8585_v8 = vld [vmem:[%s12513_s4 + $0x34] ss:$8 sps:$4 sm:$0xff]  }
 0x5d1   : > { %v5618_v42 = vpop.f32.mrf.mxu0  ;;  %8204 = vmatprep.subr.bf16.mxu1 %v8585_v8 }
 0x5d2   : > { %v5619_v28 = vadd.f32 %v11479_v31, %v5618_v42  ;;  %8205 = vmatpush3.bf16.msra.mxu1 %v8585_v8 }
 0x5d3   : > { %v5620_v37 = vpop.f32.mrf.mxu0 }
 0x5d4   : > { %v5959_v32 = vmax.f32 %v5619_v28, 0.0 }
 0x5d5   : > { %v5623_v2 = vpop.f32.mrf.mxu0  ;;  %5814 = vmatmul.mubr.bf16.gmra.mxu0 %v13115_v43 }
 0x5d6   : > { %v6058_v41 = vpack.c.bf16 %v5959_v32, %v5958_v40  ;;  %5821 = vmatprep.mubr.bf16.mxu0 %v11393_v21  ;;  %v5624_v13 = vadd.f32 %v11479_v31, %v5623_v2 }
 0x5d7   : > { %v5625_v36 = vpop.f32.mrf.mxu0 }
 0x5d8   : > { %8124 = vmatprep.mubr.bf16.mxu1 %v6058_v41  ;;  %v5960_v6 = vmax.f32 %v5624_v13, 0.0 }
 0x5d9   : > { %v5626_v26 = vpop.f32.mrf.mxu0 }
 0x5da   : > { %v5627_v46 = vadd.f32 %v11479_v31, %v5626_v26 }
 0x5db   : > { %v5628_v7 = vpop.f32.mrf.mxu0 }
 0x5dc   : > { %v5961_v3 = vmax.f32 %v5627_v46, 0.0 }
 0x5dd   : > { %v5631_v0 = vpop.f32.mrf.mxu0  ;;  %5822 = vmatmul.mubr.bf16.gmra.mxu0 %v11389_v5 }
 0x5de   : > { %v6059_v21 = vpack.c.bf16 %v5961_v3, %v5960_v6  ;;  %5829 = vmatprep.mubr.bf16.mxu0 %v11403_v39  ;;  %v5632_v55 = vadd.f32 %v11479_v31, %v5631_v0  ;;  %v13119_v6 = vld [vmem:[#allocation136_spill] sm:$0xff] }
 0x5df   : > { %v5633_v45 = vpop.f32.mrf.mxu0 }
 0x5e0   : > { %8125 = vmatmul.mubr.bf16.gmra.mxu1 %v6059_v21  ;;  %v5962_v53 = vmax.f32 %v5632_v55, 0.0 }
 0x5e1   : > { %v5634_v38 = vpop.f32.mrf.mxu0 }
 0x5e2   : > { %v5635_v60 = vadd.f32 %v11479_v31, %v5634_v38 }
 0x5e3   : > { %v5636_v18 = vpop.f32.mrf.mxu0 }
 0x5e4   : > { %v5963_v23 = vmax.f32 %v5635_v60, 0.0 }
 0x5e5   : > { %v5639_v35 = vpop.f32.mrf.mxu0  ;;  %5830 = vmatmul.mubr.bf16.gmra.mxu0 %v13116_v14 }
 0x5e6   : > { %v6060_v17 = vpack.c.bf16 %v5963_v23, %v5962_v53  ;;  %5837 = vmatprep.mubr.bf16.mxu0 %v11413_v16  ;;  %v5640_v47 = vadd.f32 %v11479_v31, %v5639_v35  ;;  %v13120_v35 = vld [vmem:[#allocation141_spill] sm:$0xff] }
 0x5e7   : > { %v5641_v5 = vpop.f32.mrf.mxu0 }
 0x5e8   : > { %8128 = vmatprep.mubr.bf16.mxu1 %v6060_v17  ;;  %v5964_v34 = vmax.f32 %v5640_v47, 0.0 }
 0x5e9   : > { %v5642_v39 = vpop.f32.mrf.mxu0 }
 0x5ea   : > { %v5643_v44 = vadd.f32 %v11479_v31, %v5642_v39 }
 0x5eb   : > { %v5644_v56 = vpop.f32.mrf.mxu0 }
 0x5ec   : > { %v5965_v54 = vmax.f32 %v5643_v44, 0.0 }
 0x5ed   : > { %v5647_v11 = vpop.f32.mrf.mxu0  ;;  %5838 = vmatmul.mubr.bf16.gmra.mxu0 %v13117_v50 }
 0x5ee   : > { %v6061_v4 = vpack.c.bf16 %v5965_v54, %v5964_v34  ;;  %5845 = vmatprep.mubr.bf16.mxu0 %v11423_v61  ;;  %v5648_v27 = vadd.f32 %v11479_v31, %v5647_v11 }
 0x5ef   : > { %v5649_v57 = vpop.f32.mrf.mxu0 }
 0x5f0   : > { %8129 = vmatmul.mubr.bf16.gmra.mxu1 %v6061_v4  ;;  %v5966_v29 = vmax.f32 %v5648_v27, 0.0 }
 0x5f1   : > { %v5650_v16 = vpop.f32.mrf.mxu0 }
 0x5f2   : > { %v5651_v63 = vadd.f32 %v11479_v31, %v5650_v16  ;;  %v8586_v16 = vld [vmem:[%s12513_s4 + $0x24] ss:$8 sps:$4 sm:$0xff]  }
 0x5f3   : > { %v5652_v22 = vpop.f32.mrf.mxu0  ;;  %8206 = vmatprep.subr.bf16.mxu1 %v8586_v16 }
 0x5f4   : > { %v5967_v33 = vmax.f32 %v5651_v63, 0.0  ;;  %8207 = vmatpush3.bf16.msra.mxu1 %v8586_v16 }
 0x5f5   : > { %v5655_v19 = vpop.f32.mrf.mxu0  ;;  %5846 = vmatmul.mubr.bf16.gmra.mxu0 %v13118_v58 }
 0x5f6   : > { %v6062_v9 = vpack.c.bf16 %v5967_v33, %v5966_v29  ;;  %5853 = vmatprep.mubr.bf16.mxu0 %v11433_v52  ;;  %v5656_v24 = vadd.f32 %v11479_v31, %v5655_v19  ;;  %v11637_v52 = vpop.f32.mrf.mxu1 }
 0x5f7   : > { %v5657_v12 = vpop.f32.mrf.mxu0 }
 0x5f8   : > { %8132 = vmatprep.mubr.bf16.mxu1 %v6062_v9  ;;  %v5968_v28 = vmax.f32 %v5656_v24, 0.0  ;;  %v11641_v36 = vpop.f32.mrf.mxu1 }
 0x5f9   : > { %v5658_v61 = vpop.f32.mrf.mxu0 }
 0x5fa   : > { %v5659_v30 = vadd.f32 %v11479_v31, %v5658_v61 }
 0x5fb   : > { %v5660_v42 = vpop.f32.mrf.mxu0 }
 0x5fc   : > { %v5969_v37 = vmax.f32 %v5659_v30, 0.0 }
 0x5fd   : > { %v5663_v40 = vpop.f32.mrf.mxu0  ;;  %5854 = vmatmul.mubr.bf16.gmra.mxu0 %v11429_v10  ;;  %v11645_v10 = vpop.f32.mrf.mxu1 }
 0x5fe   : > { %v6063_v32 = vpack.c.bf16 %v5969_v37, %v5968_v28  ;;  %5861 = vmatprep.mubr.bf16.mxu0 %v11443_v20  ;;  %v5664_v43 = vadd.f32 %v11479_v31, %v5663_v40 }
 0x5ff   : > { %v5665_v2 = vpop.f32.mrf.mxu0  ;;  %v11649_v45 = vpop.f32.mrf.mxu1 }
 0x600   : > { %8133 = vmatmul.mubr.bf16.gmra.mxu1 %v6063_v32  ;;  %v5970_v48 = vmax.f32 %v5664_v43, 0.0 }
 0x601   : > { %v5666_v41 = vpop.f32.mrf.mxu0  ;;  %v11652_v60 = vpop.f32.mrf.mxu1 }
 0x602   : > { %v5667_v13 = vadd.f32 %v11479_v31, %v5666_v41  ;;  %v11690_v41 = vld [vmem:[%s12514_s5 + $0x6] ss:$0 sm:$0xff] }
 0x603   : > { %v5668_v26 = vpop.f32.mrf.mxu0  ;;  %v11656_v17 = vpop.f32.mrf.mxu1 }
 0x604   : > { %v5971_v46 = vmax.f32 %v5667_v13, 0.0 }
 0x605   : > { %v5671_v7 = vpop.f32.mrf.mxu0  ;;  %5862 = vmatmul.mubr.bf16.gmra.mxu0 %v13119_v6  ;;  %v11660_v56 = vpop.f32.mrf.mxu1 }
 0x606   : > { %v6064_v3 = vpack.c.bf16 %v5971_v46, %v5970_v48  ;;  %5869 = vmatprep.mubr.bf16.mxu0 %v11453_v1  ;;  %v5672_v0 = vadd.f32 %v11479_v31, %v5671_v7 }
 0x607   : > { %v5673_v20 = vpop.f32.mrf.mxu0  ;;  %v11664_v4 = vpop.f32.mrf.mxu1 }
 0x608   : > { %8136 = vmatprep.mubr.bf16.mxu1 %v6064_v3  ;;  %v5972_v18 = vmax.f32 %v5672_v0, 0.0 }
 0x609   : > { %v5674_v21 = vpop.f32.mrf.mxu0  ;;  %v11670_v63 = vpop.f32.mrf.mxu1 }
 0x60a   : > { %v5675_v55 = vadd.f32 %v11479_v31, %v5674_v21 }
 0x60b   : > { %v5676_v38 = vpop.f32.mrf.mxu0  ;;  %v11674_v19 = vpop.f32.mrf.mxu1 }
 0x60c   : > { %v5973_v53 = vmax.f32 %v5675_v55, 0.0 }
 0x60d   : > { %v5679_v23 = vpop.f32.mrf.mxu0  ;;  %5870 = vmatmul.mubr.bf16.gmra.mxu0 %v13120_v35  ;;  %v11678_v61 = vpop.f32.mrf.mxu1 }
 0x60e   : > { %v6065_v14 = vpack.c.bf16 %v5973_v53, %v5972_v18  ;;  %5877 = vmatprep.mubr.bf16.mxu0 %v11463_v62  ;;  %v5680_v5 = vadd.f32 %v11479_v31, %v5679_v23 }
 0x60f   : > { %v5681_v1 = vpop.f32.mrf.mxu0 }
 0x610   : > { %8137 = vmatmul.mubr.bf16.gmra.mxu1 %v6065_v14  ;;  %v5974_v34 = vmax.f32 %v5680_v5, 0.0 }
 0x611   : > { %v5682_v47 = vpop.f32.mrf.mxu0 }
 0x612   : > { %v5683_v39 = vadd.f32 %v11479_v31, %v5682_v47 }
 0x613   : > { %v5684_v44 = vpop.f32.mrf.mxu0 }
 0x614   : > { %v5975_v54 = vmax.f32 %v5683_v39, 0.0  ;;  %v8587_v39 = vld [vmem:[%s12513_s4 + $0x14] ss:$8 sps:$4 sm:$0xff]  }
 0x615   : > { %v5687_v11 = vpop.f32.mrf.mxu0  ;;  %5878 = vmatmul.mubr.bf16.gmra.mxu0 %v11459_v15  ;;  %8208 = vmatprep.subr.bf16.mxu1 %v8587_v39 }
 0x616   : > { %v6066_v50 = vpack.c.bf16 %v5975_v54, %v5974_v34  ;;  %5885 = vmatprep.mubr.bf16.mxu0 %v11473_v59  ;;  %v5688_v57 = vadd.f32 %v11479_v31, %v5687_v11  ;;  %8209 = vmatpush3.bf16.msra.mxu1 %v8587_v39  ;;  %v8588_v39 = vld [vmem:[%s12513_s4 + $0x4] ss:$8 sps:$4 sm:$0xff]  }
 0x617   : > { %v5689_v62 = vpop.f32.mrf.mxu0  ;;  %8210 = vmatprep.subr.bf16.mxu1 %v8588_v39 }
 0x618   : > { %8140 = vmatprep.mubr.bf16.mxu1 %v6066_v50  ;;  %v5976_v15 = vmax.f32 %v5688_v57, 0.0 }
 0x619   : > { %v5690_v27 = vpop.f32.mrf.mxu0 }
 0x61a   : > { %v5691_v22 = vadd.f32 %v11479_v31, %v5690_v27  ;;  %8211 = vmatpush3.bf16.msra.mxu1 %v8588_v39 }
 0x61b   : > { %v5692_v29 = vpop.f32.mrf.mxu0 }
 0x61c   : > { %v5977_v33 = vmax.f32 %v5691_v22, 0.0 }
 0x61d   : > { %v5695_v59 = vpop.f32.mrf.mxu0  ;;  %5886 = vmatmul.mubr.bf16.gmra.mxu0 %v11469_v25  ;;  %v11682_v25 = vpop.f32.mrf.mxu1 }
 0x61e   : > { %v6067_v58 = vpack.c.bf16 %v5977_v33, %v5976_v15  ;;  %5893 = vmatprep.mubr.bf16.mxu0 %v11487_v49  ;;  %v5696_v12 = vadd.f32 %v11479_v31, %v5695_v59 }
 0x61f   : > { %v5697_v9 = vpop.f32.mrf.mxu0  ;;  %v11684_v49 = vpop.f32.mrf.mxu1 }
 0x620   : > { %8141 = vmatmul.mubr.bf16.gmra.mxu1 %v6067_v58  ;;  %v5978_v42 = vmax.f32 %v5696_v12, 0.0 }
 0x621   : > { %v5698_v24 = vpop.f32.mrf.mxu0  ;;  %v11693_v48 = vpop.f32.mrf.mxu1 }
 0x622   : > { %v5699_v8 = vadd.f32 %v11479_v31, %v5698_v24 }
 0x623   : > { %v5700_v30 = vpop.f32.mrf.mxu0  ;;  %v11695_v20 = vpop.f32.mrf.mxu1 }
 0x624   : > { %v5979_v28 = vmax.f32 %v5699_v8, 0.0 }
 0x625   : > { %v5703_v37 = vpop.f32.mrf.mxu0  ;;  %5894 = vmatmul.mubr.bf16.gmra.mxu0 %v11483_v51  ;;  %v11699_v38 = vpop.f32.mrf.mxu1 }
 0x626   : > { %v6068_v40 = vpack.c.bf16 %v5979_v28, %v5978_v42  ;;  %v5704_v2 = vadd.f32 %v11479_v31, %v5703_v37 }
 0x627   : > { %v5705_v32 = vpop.f32.mrf.mxu0  ;;  %v11701_v35 = vpop.f32.mrf.mxu1 }
 0x628   : > { %8144 = vmatprep.mubr.bf16.mxu1 %v6068_v40  ;;  %v5980_v51 = vmax.f32 %v5704_v2, 0.0 }
 0x629   : > { %v5706_v43 = vpop.f32.mrf.mxu0  ;;  %v11707_v44 = vpop.f32.mrf.mxu1 }
 0x62a   : > { %v5707_v13 = vadd.f32 %v11690_v41, %v5706_v43 }
 0x62b   : > { %v5708_v26 = vpop.f32.mrf.mxu0  ;;  %v11710_v57 = vpop.f32.mrf.mxu1 }
 0x62c   : > { %v5981_v46 = vmax.f32 %v5707_v13, 0.0 }
 0x62d   : > { %v5711_v7 = vpop.f32.mrf.mxu0  ;;  %v11713_v15 = vpop.f32.mrf.mxu1 }
 0x62e   : > { %v6069_v6 = vpack.c.bf16 %v5981_v46, %v5980_v51  ;;  %v5712_v31 = vadd.f32 %v11690_v41, %v5711_v7 }
 0x62f   : > { %v5713_v3 = vpop.f32.mrf.mxu0  ;;  %v11716_v58 = vpop.f32.mrf.mxu1 }
 0x630   : > { %8145 = vmatmul.mubr.bf16.gmra.mxu1 %v6069_v6  ;;  %v5982_v18 = vmax.f32 %v5712_v31, 0.0 }
 0x631   : > { %v5714_v0 = vpop.f32.mrf.mxu0  ;;  %v11718_v42 = vpop.f32.mrf.mxu1 }
 0x632   : > { %v5715_v21 = vadd.f32 %v11690_v41, %v5714_v0 }
 0x633   : > { %v5716_v55 = vpop.f32.mrf.mxu0  ;;  %v11722_v2 = vpop.f32.mrf.mxu1 }
 0x634   : > { %v5983_v53 = vmax.f32 %v5715_v21, 0.0 }
 0x635   : > { %v5719_v23 = vpop.f32.mrf.mxu0  ;;  %v11724_v7 = vpop.f32.mrf.mxu1 }
 0x636   : > { %v6070_v14 = vpack.c.bf16 %v5983_v53, %v5982_v18  ;;  %v5720_v5 = vadd.f32 %v11690_v41, %v5719_v23 }
 0x637   : > { %v5721_v1 = vpop.f32.mrf.mxu0  ;;  %v11727_v31 = vpop.f32.mrf.mxu1 }
 0x638   : > { %8148 = vmatprep.mubr.bf16.mxu1 %v6070_v14  ;;  %v5984_v11 = vmax.f32 %v5720_v5, 0.0 }
 0x639   : > { %v5722_v47 = vpop.f32.mrf.mxu0  ;;  %v11730_v23 = vpop.f32.mrf.mxu1 }
 0x63a   : > { %v5723_v34 = vadd.f32 %v11690_v41, %v5722_v47 }
 0x63b   : > { %v5724_v54 = vpop.f32.mrf.mxu0 }
 0x63c   : > { %v5985_v50 = vmax.f32 %v5723_v34, 0.0  ;;  %v11736_v34 = vpop.f32.mrf.mxu1 }
 0x63d   : > { %v5727_v62 = vpop.f32.mrf.mxu0 }
 0x63e   : > { %v6071_v27 = vpack.c.bf16 %v5985_v50, %v5984_v11  ;;  %v5728_v22 = vadd.f32 %v11690_v41, %v5727_v62 }
 0x63f   : > { %v5729_v16 = vpop.f32.mrf.mxu0 }
 0x640   : > { %8149 = vmatmul.mubr.bf16.gmra.mxu1 %v6071_v27  ;;  %v5986_v9 = vmax.f32 %v5728_v22, 0.0  ;;  %v11739_v16 = vpop.f32.mrf.mxu1 }
 0x641   : > { %v5730_v29 = vpop.f32.mrf.mxu0 }
 0x642   : > { %v5731_v33 = vadd.f32 %v11690_v41, %v5730_v29 }
 0x643   : > { %v5732_v59 = vpop.f32.mrf.mxu0 }
 0x644   : > { %v5987_v12 = vmax.f32 %v5731_v33, 0.0  ;;  %v11741_v33 = vpop.f32.mrf.mxu1 }
 0x645   : > { %v5735_v24 = vpop.f32.mrf.mxu0 }
 0x646   : > { %v6072_v8 = vpack.c.bf16 %v5987_v12, %v5986_v9  ;;  %v5736_v28 = vadd.f32 %v11690_v41, %v5735_v24 }
 0x647   : > { %v5737_v30 = vpop.f32.mrf.mxu0 }
 0x648   : > { %8152 = vmatprep.mubr.bf16.mxu1 %v6072_v8  ;;  %v5988_v43 = vmax.f32 %v5736_v28, 0.0  ;;  %v11745_v8 = vpop.f32.mrf.mxu1 }
 0x649   : > { %v5738_v37 = vpop.f32.mrf.mxu0 }
 0x64a   : > { %v5739_v40 = vadd.f32 %v11690_v41, %v5738_v37 }
 0x64b   : > { %v5740_v32 = vpop.f32.mrf.mxu0 }
 0x64c   : > { %v5989_v13 = vmax.f32 %v5739_v40, 0.0 }
 0x64d   : > { %v5743_v26 = vpop.f32.mrf.mxu0 }
 0x64e   : > { %v6073_v51 = vpack.c.bf16 %v5989_v13, %v5988_v43  ;;  %v5744_v6 = vadd.f32 %v11690_v41, %v5743_v26  ;;  %v11747_v43 = vpop.f32.mrf.mxu1 }
 0x64f   : > { %v5745_v46 = vpop.f32.mrf.mxu0 }
 0x650   : > { %8153 = vmatmul.mubr.bf16.gmra.mxu1 %v6073_v51  ;;  %v5990_v55 = vmax.f32 %v5744_v6, 0.0  ;;  %v11751_v6 = vpop.f32.mrf.mxu1 }
 0x651   : > { %v5746_v3 = vpop.f32.mrf.mxu0 }
 0x652   : > { %v5747_v0 = vadd.f32 %v11690_v41, %v5746_v3 }
 0x653   : > { %v5748_v21 = vpop.f32.mrf.mxu0 }
 0x654   : > { %v5991_v18 = vmax.f32 %v5747_v0, 0.0 }
 0x655   : > { %v5751_v53 = vpop.f32.mrf.mxu0 }
 0x656   : > { %v6074_v14 = vpack.c.bf16 %v5991_v18, %v5990_v55  ;;  %v5752_v5 = vadd.f32 %v11690_v41, %v5751_v53  ;;  %v11753_v55 = vpop.f32.mrf.mxu1 }
 0x657   : > { %v5753_v1 = vpop.f32.mrf.mxu0 }
 0x658   : > { %8156 = vmatprep.mubr.bf16.mxu1 %v6074_v14  ;;  %v5992_v50 = vmax.f32 %v5752_v5, 0.0  ;;  %v11756_v5 = vpop.f32.mrf.mxu1 }
 0x659   : > { %v5754_v47 = vpop.f32.mrf.mxu0 }
 0x65a   : > { %v5755_v54 = vadd.f32 %v11690_v41, %v5754_v47 }
 0x65b   : > { %v5756_v11 = vpop.f32.mrf.mxu0 }
 0x65c   : > { %v5993_v62 = vmax.f32 %v5755_v54, 0.0 }
 0x65d   : > { %v5759_v27 = vpop.f32.mrf.mxu0 }
 0x65e   : > { %v6075_v22 = vpack.c.bf16 %v5993_v62, %v5992_v50  ;;  %v5760_v59 = vadd.f32 %v11690_v41, %v5759_v27  ;;  %v11759_v62 = vpop.f32.mrf.mxu1 }
 0x65f   : > { %v5761_v29 = vpop.f32.mrf.mxu0 }
 0x660   : > { %8157 = vmatmul.mubr.bf16.gmra.mxu1 %v6075_v22  ;;  %v5994_v30 = vmax.f32 %v5760_v59, 0.0 }
 0x661   : > { %v5762_v9 = vpop.f32.mrf.mxu0 }
 0x662   : > { %v5763_v12 = vadd.f32 %v11690_v41, %v5762_v9  ;;  %v11762_v9 = vpop.f32.mrf.mxu1 }
 0x663   : > { %v5764_v24 = vpop.f32.mrf.mxu0 }
 0x664   : > { %v5995_v28 = vmax.f32 %v5763_v12, 0.0 }
 0x665   : > { %v5767_v37 = vpop.f32.mrf.mxu0 }
 0x666   : > { %v6076_v40 = vpack.c.bf16 %v5995_v28, %v5994_v30  ;;  %v5768_v13 = vadd.f32 %v11690_v41, %v5767_v37  ;;  %v11765_v30 = vpop.f32.mrf.mxu1 }
 0x667   : > { %v5769_v32 = vpop.f32.mrf.mxu0 }
 0x668   : > { %8160 = vmatprep.mubr.bf16.mxu1 %v6076_v40  ;;  %v5996_v3 = vmax.f32 %v5768_v13, 0.0 }
 0x669   : > { %v5770_v26 = vpop.f32.mrf.mxu0 }
 0x66a   : > { %v5771_v51 = vadd.f32 %v11690_v41, %v5770_v26  ;;  %v11767_v26 = vpop.f32.mrf.mxu1 }
 0x66b   : > { %v5772_v46 = vpop.f32.mrf.mxu0 }
 0x66c   : > { %v5997_v0 = vmax.f32 %v5771_v51, 0.0 }
 0x66d   : > { %v5775_v21 = vpop.f32.mrf.mxu0 }
 0x66e   : > { %v6077_v18 = vpack.c.bf16 %v5997_v0, %v5996_v3  ;;  %v5776_v14 = vadd.f32 %v11690_v41, %v5775_v21  ;;  %v11771_v21 = vpop.f32.mrf.mxu1 }
 0x66f   : > { %v5777_v53 = vpop.f32.mrf.mxu0 }
 0x670   : > { %8161 = vmatmul.mubr.bf16.gmra.mxu1 %v6077_v18  ;;  %v5998_v54 = vmax.f32 %v5776_v14, 0.0 }
 0x671   : > { %v5778_v1 = vpop.f32.mrf.mxu0 }
 0x672   : > { %v5779_v47 = vadd.f32 %v11690_v41, %v5778_v1 }
 0x673   : > { %v5780_v39 = vpop.f32.mrf.mxu0 }
 0x674   : > { %v5999_v11 = vmax.f32 %v5779_v47, 0.0  ;;  %v11773_v39 = vpop.f32.mrf.mxu1 }
 0x675   : > { %v5783_v50 = vpop.f32.mrf.mxu0 }
 0x676   : > { %v6078_v27 = vpack.c.bf16 %v5999_v11, %v5998_v54  ;;  %v5784_v29 = vadd.f32 %v11690_v41, %v5783_v50  ;;  %v11776_v50 = vpop.f32.mrf.mxu1 }
 0x677   : > { %v5785_v22 = vpop.f32.mrf.mxu0 }
 0x678   : > { %8164 = vmatprep.mubr.bf16.mxu1 %v6078_v27  ;;  %v6000_v28 = vmax.f32 %v5784_v29, 0.0 }
 0x679   : > { %v5786_v59 = vpop.f32.mrf.mxu0 }
 0x67a   : > { %v5787_v12 = vadd.f32 %v11690_v41, %v5786_v59 }
 0x67b   : > { %v5788_v24 = vpop.f32.mrf.mxu0 }
 0x67c   : > { %v6001_v37 = vmax.f32 %v5787_v12, 0.0  ;;  %v11779_v24 = vpop.f32.mrf.mxu1 }
 0x67d   : > { %v5791_v40 = vpop.f32.mrf.mxu0 }
 0x67e   : > { %v6079_v32 = vpack.c.bf16 %v6001_v37, %v6000_v28  ;;  %v5792_v51 = vadd.f32 %v11690_v41, %v5791_v40 }
 0x67f   : > { %v5793_v13 = vpop.f32.mrf.mxu0 }
 0x680   : > { %8165 = vmatmul.mubr.bf16.gmra.mxu1 %v6079_v32  ;;  %v6002_v18 = vmax.f32 %v5792_v51, 0.0  ;;  %v11782_v13 = vpop.f32.mrf.mxu1 }
 0x681   : > { %v5794_v46 = vpop.f32.mrf.mxu0 }
 0x682   : > { %v5795_v3 = vadd.f32 %v11690_v41, %v5794_v46 }
 0x683   : > { %v5796_v0 = vpop.f32.mrf.mxu0 }
 0x684   : > { %v6003_v53 = vmax.f32 %v5795_v3, 0.0 }
 0x685   : > { %v5799_v14 = vpop.f32.mrf.mxu0 }
 0x686   : > { %v6080_v1 = vpack.c.bf16 %v6003_v53, %v6002_v18  ;;  %v5800_v54 = vadd.f32 %v11690_v41, %v5799_v14  ;;  %v11785_v53 = vpop.f32.mrf.mxu1 }
 0x687   : > { %v5801_v47 = vpop.f32.mrf.mxu0 }
 0x688   : > { %8168 = vmatprep.mubr.bf16.mxu1 %v6080_v1  ;;  %v6004_v29 = vmax.f32 %v5800_v54, 0.0  ;;  %v11787_v47 = vpop.f32.mrf.mxu1 }
 0x689   : > { %v5802_v11 = vpop.f32.mrf.mxu0  ;;  %13121 = vst [vmem:[#allocation49_spill] sm:$0xff] %v11787_v47 }
 0x68a   : > { %v5803_v27 = vadd.f32 %v11690_v41, %v5802_v11 }
 0x68b   : > { %v5804_v22 = vpop.f32.mrf.mxu0 }
 0x68c   : > { %v6005_v59 = vmax.f32 %v5803_v27, 0.0 }
 0x68d   : > { %v5807_v12 = vpop.f32.mrf.mxu0 }
 0x68e   : > { %v6081_v28 = vpack.c.bf16 %v6005_v59, %v6004_v29  ;;  %v5808_v40 = vadd.f32 %v11690_v41, %v5807_v12  ;;  %v11791_v29 = vpop.f32.mrf.mxu1 }
 0x68f   : > { %v5809_v37 = vpop.f32.mrf.mxu0  ;;  %13122 = vst [vmem:[#allocation139_spill] sm:$0xff] %v11791_v29 }
 0x690   : > { %8169 = vmatmul.mubr.bf16.gmra.mxu1 %v6081_v28  ;;  %v6006_v3 = vmax.f32 %v5808_v40, 0.0 }
 0x691   : > { %v5810_v32 = vpop.f32.mrf.mxu0 }
 0x692   : > { %v5811_v51 = vadd.f32 %v11690_v41, %v5810_v32  ;;  %v11793_v32 = vpop.f32.mrf.mxu1 }
 0x693   : > { %v5812_v46 = vpop.f32.mrf.mxu0  ;;  %13123 = vst [vmem:[#allocation140_spill] sm:$0xff] %v11793_v32 }
 0x694   : > { %v6007_v0 = vmax.f32 %v5811_v51, 0.0 }
 0x695   : > { %v5815_v18 = vpop.f32.mrf.mxu0 }
 0x696   : > { %v6082_v14 = vpack.c.bf16 %v6007_v0, %v6006_v3  ;;  %v5816_v54 = vadd.f32 %v11690_v41, %v5815_v18  ;;  %v11797_v18 = vpop.f32.mrf.mxu1 }
 0x697   : > { %v5817_v1 = vpop.f32.mrf.mxu0 }
 0x698   : > { %8172 = vmatprep.mubr.bf16.mxu1 %v6082_v14  ;;  %v6008_v59 = vmax.f32 %v5816_v54, 0.0 }
 0x699   : > { %v5818_v11 = vpop.f32.mrf.mxu0 }
 0x69a   : > { %v5819_v27 = vadd.f32 %v11690_v41, %v5818_v11 }
 0x69b   : > { %v5820_v22 = vpop.f32.mrf.mxu0 }
 0x69c   : > { %v6009_v12 = vmax.f32 %v5819_v27, 0.0  ;;  %v11799_v22 = vpop.f32.mrf.mxu1 }
 0x69d   : > { %v5823_v28 = vpop.f32.mrf.mxu0  ;;  %13124 = vst [vmem:[#allocation6_spill] sm:$0xff] %v11799_v22 }
 0x69e   : > { %v6083_v37 = vpack.c.bf16 %v6009_v12, %v6008_v59  ;;  %v5824_v51 = vadd.f32 %v11690_v41, %v5823_v28 }
 0x69f   : > { %v5825_v40 = vpop.f32.mrf.mxu0 }
 0x6a0   : > { %8173 = vmatmul.mubr.bf16.gmra.mxu1 %v6083_v37  ;;  %v6010_v14 = vmax.f32 %v5824_v51, 0.0  ;;  %v11802_v40 = vpop.f32.mrf.mxu1 }
 0x6a1   : > { %v5826_v46 = vpop.f32.mrf.mxu0  ;;  %13125 = vst [vmem:[#allocation52_spill] sm:$0xff] %v11802_v40 }
 0x6a2   : > { %v5827_v3 = vadd.f32 %v11690_v41, %v5826_v46  ;;  %v11805_v32 = vpop.f32.mrf.mxu1 }
 0x6a3   : > { %v5828_v0 = vpop.f32.mrf.mxu0  ;;  %13126 = vst [vmem:[#allocation3_spill] sm:$0xff] %v11805_v32 }
 0x6a4   : > { %v6011_v1 = vmax.f32 %v5827_v3, 0.0 }
 0x6a5   : > { %v5831_v11 = vpop.f32.mrf.mxu0 }
 0x6a6   : > { %v6084_v54 = vpack.c.bf16 %v6011_v1, %v6010_v14  ;;  %v5832_v59 = vadd.f32 %v11690_v41, %v5831_v11  ;;  %v11808_v1 = vpop.f32.mrf.mxu1 }
 0x6a7   : > { %v5833_v27 = vpop.f32.mrf.mxu0  ;;  %13127 = vst [vmem:[#allocation142_spill] sm:$0xff] %v11808_v1 }
 0x6a8   : > { %8176 = vmatprep.mubr.bf16.mxu1 %v6084_v54  ;;  %v6012_v46 = vmax.f32 %v5832_v59, 0.0  ;;  %v11811_v27 = vpop.f32.mrf.mxu1 }
 0x6a9   : > { %v5834_v12 = vpop.f32.mrf.mxu0  ;;  %13128 = vst [vmem:[#allocation4_spill] sm:$0xff] %v11811_v27 }
 0x6aa   : > { %v5835_v28 = vadd.f32 %v11690_v41, %v5834_v12  ;;  %v11813_v29 = vpop.f32.mrf.mxu1 }
 0x6ab   : > { %v5836_v37 = vpop.f32.mrf.mxu0  ;;  %13129 = vst [vmem:[#allocation55_spill] sm:$0xff] %v11813_v29 }
 0x6ac   : > { %v6013_v0 = vmax.f32 %v5835_v28, 0.0 }
 0x6ad   : > { %v5839_v47 = vpop.f32.mrf.mxu0 }
 0x6ae   : > { %v6085_v51 = vpack.c.bf16 %v6013_v0, %v6012_v46  ;;  %v5840_v22 = vadd.f32 %v11690_v41, %v5839_v47 }
 0x6af   : > { %v5841_v3 = vpop.f32.mrf.mxu0 }
 0x6b0   : > { %8177 = vmatmul.mubr.bf16.gmra.mxu1 %v6085_v51  ;;  %v6014_v12 = vmax.f32 %v5840_v22, 0.0  ;;  %v11817_v3 = vpop.f32.mrf.mxu1 }
 0x6b1   : > { %v5842_v14 = vpop.f32.mrf.mxu0  ;;  %13130 = vst [vmem:[#allocation57_spill] sm:$0xff] %v11817_v3 }
 0x6b2   : > { %v5843_v11 = vadd.f32 %v11690_v41, %v5842_v14 }
 0x6b3   : > { %v5844_v54 = vpop.f32.mrf.mxu0 }
 0x6b4   : > { %v6015_v37 = vmax.f32 %v5843_v11, 0.0  ;;  %v11819_v11 = vpop.f32.mrf.mxu1 }
 0x6b5   : > { %v5847_v59 = vpop.f32.mrf.mxu0  ;;  %13131 = vst [vmem:[#allocation59_spill] sm:$0xff] %v11819_v11 }
 0x6b6   : > { %v6086_v28 = vpack.c.bf16 %v6015_v37, %v6014_v12  ;;  %v5848_v46 = vadd.f32 %v11690_v41, %v5847_v59  ;;  %v11822_v37 = vpop.f32.mrf.mxu1 }
 0x6b7   : > { %v5849_v40 = vpop.f32.mrf.mxu0  ;;  %13132 = vst [vmem:[#allocation7_spill] sm:$0xff] %v11822_v37 }
 0x6b8   : > { %8180 = vmatprep.mubr.bf16.mxu1 %v6086_v28  ;;  %v6016_v14 = vmax.f32 %v5848_v46, 0.0  ;;  %v11825_v3 = vpop.f32.mrf.mxu1 }
 0x6b9   : > { %v5850_v47 = vpop.f32.mrf.mxu0  ;;  %13133 = vst [vmem:[#allocation60_spill] sm:$0xff] %v11825_v3 }
 0x6ba   : > { %v5851_v0 = vadd.f32 %v11690_v41, %v5850_v47 }
 0x6bb   : > { %v5852_v51 = vpop.f32.mrf.mxu0 }
 0x6bc   : > { %v6017_v54 = vmax.f32 %v5851_v0, 0.0 }
 0x6bd   : > { %v5855_v32 = vpop.f32.mrf.mxu0 }
 0x6be   : > { %v6087_v27 = vpack.c.bf16 %v6017_v54, %v6016_v14  ;;  %v5856_v40 = vadd.f32 %v11690_v41, %v5855_v32 }
 0x6bf   : > { %v5857_v22 = vpop.f32.mrf.mxu0 }
 0x6c0   : > { %8181 = vmatmul.mubr.bf16.gmra.mxu1 %v6087_v27  ;;  %v6018_v47 = vmax.f32 %v5856_v40, 0.0  ;;  %v11828_v22 = vpop.f32.mrf.mxu1 }
 0x6c1   : > { %v5858_v12 = vpop.f32.mrf.mxu0  ;;  %13134 = vst [vmem:[#allocation9_spill] sm:$0xff] %v11828_v22 }
 0x6c2   : > { %v5859_v59 = vadd.f32 %v11690_v41, %v5858_v12 }
 0x6c3   : > { %v5860_v28 = vpop.f32.mrf.mxu0 }
 0x6c4   : > { %v6019_v51 = vmax.f32 %v5859_v59, 0.0  ;;  %v11831_v28 = vpop.f32.mrf.mxu1 }
 0x6c5   : > { %v5863_v29 = vpop.f32.mrf.mxu0 }
 0x6c6   : > { %v6088_v46 = vpack.c.bf16 %v6019_v51, %v6018_v47  ;;  %v5864_v14 = vadd.f32 %v11690_v41, %v5863_v29  ;;  %v11833_v1 = vpop.f32.mrf.mxu1 }
 0x6c7   : > { %v5865_v0 = vpop.f32.mrf.mxu0  ;;  %13135 = vst [vmem:[#allocation62_spill] sm:$0xff] %v11833_v1 }
 0x6c8   : > { %8184 = vmatprep.mubr.bf16.mxu1 %v6088_v46  ;;  %v6020_v37 = vmax.f32 %v5864_v14, 0.0  ;;  %v11837_v0 = vpop.f32.mrf.mxu1 }
 0x6c9   : > { %v5866_v54 = vpop.f32.mrf.mxu0  ;;  %13136 = vst [vmem:[#allocation10_spill] sm:$0xff] %v11837_v0 }
 0x6ca   : > { %v5867_v32 = vadd.f32 %v11690_v41, %v5866_v54  ;;  %v11839_v3 = vpop.f32.mrf.mxu1 }
 0x6cb   : > { %v5868_v27 = vpop.f32.mrf.mxu0  ;;  %13137 = vst [vmem:[#allocation12_spill] sm:$0xff] %v11839_v3 }
 0x6cc   : > { %v6021_v11 = vmax.f32 %v5867_v32, 0.0 }
 0x6cd   : > { %v5871_v12 = vpop.f32.mrf.mxu0 }
 0x6ce   : > { %v6089_v40 = vpack.c.bf16 %v6021_v11, %v6020_v37  ;;  %v5872_v47 = vadd.f32 %v11690_v41, %v5871_v12 }
 0x6cf   : > { %v5873_v59 = vpop.f32.mrf.mxu0 }
 0x6d0   : > { %8185 = vmatmul.mubr.bf16.gmra.mxu1 %v6089_v40  ;;  %v6022_v54 = vmax.f32 %v5872_v47, 0.0  ;;  %v11843_v59 = vpop.f32.mrf.mxu1 }
 0x6d1   : > { %v5874_v29 = vpop.f32.mrf.mxu0 }
 0x6d2   : > { %v5875_v51 = vadd.f32 %v11690_v41, %v5874_v29  ;;  %v11845_v0 = vpop.f32.mrf.mxu1 }
 0x6d3   : > { %v5876_v46 = vpop.f32.mrf.mxu0  ;;  %13138 = vst [vmem:[#allocation66_spill] sm:$0xff] %v11845_v0 }
 0x6d4   : > { %v6023_v27 = vmax.f32 %v5875_v51, 0.0 }
 0x6d5   : > { %v5879_v14 = vpop.f32.mrf.mxu0 }
 0x6d6   : > { %v6090_v32 = vpack.c.bf16 %v6023_v27, %v6022_v54  ;;  %v5880_v11 = vadd.f32 %v11690_v41, %v5879_v14  ;;  %v11848_v27 = vpop.f32.mrf.mxu1 }
 0x6d7   : > { %v5881_v22 = vpop.f32.mrf.mxu0  ;;  %13139 = vst [vmem:[#allocation13_spill] sm:$0xff] %v11848_v27 }
 0x6d8   : > { %8188 = vmatprep.mubr.bf16.mxu1 %v6090_v32  ;;  %v6024_v29 = vmax.f32 %v5880_v11, 0.0  ;;  %v11854_v11 = vld [vmem:[%s12514_s5 + $0x7] ss:$0 sm:$0xff] }
 0x6d9   : > { %v5882_v37 = vpop.f32.mrf.mxu0 }
 0x6da   : > { %v5883_v12 = vadd.f32 %v11690_v41, %v5882_v37 }
 0x6db   : > { %v5884_v40 = vpop.f32.mrf.mxu0 }
 0x6dc   : > { %v6025_v46 = vmax.f32 %v5883_v12, 0.0  ;;  %v11856_v12 = vpop.f32.mrf.mxu1 }
 0x6dd   : > { %v5887_v1 = vpop.f32.mrf.mxu0  ;;  %13140 = vst [vmem:[#allocation69_spill] sm:$0xff] %v11856_v12 }
 0x6de   : > { %v6091_v47 = vpack.c.bf16 %v6025_v46, %v6024_v29  ;;  %v5888_v22 = vadd.f32 %v11690_v41, %v5887_v1  ;;  %v6203_v1 = vadd.f32 %v11854_v11, %v11649_v45  ;;  %v6211_v45 = vadd.f32 %v11645_v10, %v11854_v11 }
 0x6df   : > { %v5889_v51 = vpop.f32.mrf.mxu0 }
 0x6e0   : > { %8189 = vmatmul.mubr.bf16.gmra.mxu1 %v6091_v47  ;;  %v6026_v37 = vmax.f32 %v5888_v22, 0.0  ;;  %v6200_v51 = vadd.f32 %v11854_v11, %v11641_v36 }
 0x6e1   : > { %v5890_v54 = vpop.f32.mrf.mxu0 }
 0x6e2   : > { %v5891_v14 = vadd.f32 %v11690_v41, %v5890_v54  ;;  %v11863_v54 = vpop.f32.mrf.mxu1  ;;  %v6710_v12 = vmax.f32 %v6200_v51, 0.0 }
 0x6e3   : > { %v5892_v32 = vpop.f32.mrf.mxu0  ;;  %13141 = vst [vmem:[#allocation15_spill] sm:$0xff] %v11863_v54 }
 0x6e4   : > { %v6027_v40 = vmax.f32 %v5891_v14, 0.0  ;;  %v6711_v32 = vmax.f32 %v6203_v1, 0.0  ;;  %v11866_v27 = vpop.f32.mrf.mxu1 }
 0x6e5   : > { %v5895_v3 = vpop.f32.mrf.mxu0 }
 0x6e6   : > { %v6092_v29 = vpack.c.bf16 %v6027_v40, %v6026_v37  ;;  %v5896_v47 = vadd.f32 %v11690_v41, %v5895_v3  ;;  %v6838_v36 = vpack.c.bf16 %v6711_v32, %v6710_v12  ;;  %v11874_v54 = vpop.f32.mrf.mxu1 }
 0x6e7   : > { %v5897_v46 = vpop.f32.mrf.mxu0 }
 0x6e8   : > { %8192 = vmatprep.mubr.bf16.mxu1 %v6092_v29  ;;  %v6028_v37 = vmax.f32 %v5896_v47, 0.0  ;;  %v6219_v29 = vadd.f32 %v11854_v11, %v11664_v4  ;;  %v6208_v46 = vadd.f32 %v11637_v52, %v11854_v11  ;;  %v11878_v51 = vpop.f32.mrf.mxu1  ;;  %v6227_v4 = vadd.f32 %v11660_v56, %v11854_v11 }
 0x6e9   : > { %v5898_v22 = vpop.f32.mrf.mxu0  ;;  %v6235_v52 = vadd.f32 %v11854_v11, %v11682_v25  ;;  %v6243_v25 = vadd.f32 %v11678_v61, %v11854_v11 }
 0x6ea   : > { %v5899_v14 = vadd.f32 %v11690_v41, %v5898_v22  ;;  %v6216_v41 = vadd.f32 %v11854_v11, %v11656_v17  ;;  %v6715_v1 = vmax.f32 %v6219_v29, 0.0  ;;  %v6712_v47 = vmax.f32 %v6208_v46, 0.0  ;;  %v11886_v32 = vpop.f32.mrf.mxu1 }
 0x6eb   : > { %v5900_v0 = vpop.f32.mrf.mxu0  ;;  %v6232_v17 = vadd.f32 %v11854_v11, %v11674_v19  ;;  %v6240_v19 = vadd.f32 %v11670_v63, %v11854_v11  ;;  %v6267_v63 = vadd.f32 %v11854_v11, %v11713_v15  ;;  %v6275_v15 = vadd.f32 %v11710_v57, %v11854_v11 }
 0x6ec   : > { %v6029_v40 = vmax.f32 %v5899_v14, 0.0  ;;  %v6713_v0 = vmax.f32 %v6211_v45, 0.0  ;;  %v6714_v10 = vmax.f32 %v6216_v41, 0.0  ;;  %v6224_v14 = vadd.f32 %v11652_v60, %v11854_v11 }
 0x6ed   : > { %v6719_v45 = vmax.f32 %v6235_v52, 0.0  ;;  %v6718_v56 = vmax.f32 %v6232_v17, 0.0  ;;  %v6251_v60 = vadd.f32 %v11854_v11, %v11699_v38  ;;  %v6248_v41 = vadd.f32 %v11854_v11, %v11693_v48 }
 0x6ee   : > { %v6093_v3 = vpack.c.bf16 %v6029_v40, %v6028_v37  ;;  %v6839_v22 = vpack.c.bf16 %v6713_v0, %v6712_v47  ;;  %v6840_v12 = vpack.c.bf16 %v6715_v1, %v6714_v10  ;;  %v6717_v37 = vmax.f32 %v6227_v4, 0.0  ;;  %v11890_v40 = vpop.f32.mrf.mxu1 }
 0x6ef   : > { %v6842_v46 = vpack.c.bf16 %v6719_v45, %v6718_v56  ;;  %v6721_v0 = vmax.f32 %v6243_v25, 0.0  ;;  %v6723_v47 = vmax.f32 %v6251_v60, 0.0  ;;  %v6720_v10 = vmax.f32 %v6240_v19, 0.0 }
 0x6f0   : > { %8193 = vmatmul.mubr.bf16.gmra.mxu1 %v6093_v3  ;;  %v6716_v3 = vmax.f32 %v6224_v14, 0.0  ;;  %v6722_v61 = vmax.f32 %v6248_v41, 0.0  ;;  %v6259_v4 = vadd.f32 %v11695_v20, %v11854_v11  ;;  %v6256_v48 = vadd.f32 %v11684_v49, %v11854_v11 }
 0x6f1   : > { %8212 = vmatprep.mubr.bf16.mxu1 %v6838_v36  ;;  %v11894_v36 = vpop.f32.mrf.mxu1  ;;  %v6264_v14 = vadd.f32 %v11854_v11, %v11707_v44  ;;  %v6283_v49 = vadd.f32 %v11854_v11, %v11724_v7  ;;  %v6272_v25 = vadd.f32 %v11701_v35, %v11854_v11  ;;  %v6280_v44 = vadd.f32 %v11854_v11, %v11718_v42 }
 0x6f2   : > { %v6841_v29 = vpack.c.bf16 %v6717_v37, %v6716_v3  ;;  %v6844_v52 = vpack.c.bf16 %v6723_v47, %v6722_v61  ;;  %v6725_v17 = vmax.f32 %v6259_v4, 0.0  ;;  %v6727_v37 = vmax.f32 %v6267_v63, 0.0 }
 0x6f3   : > { %v11902_v1 = vpop.f32.mrf.mxu1  ;;  %v6724_v45 = vmax.f32 %v6256_v48, 0.0  ;;  %v6726_v3 = vmax.f32 %v6264_v14, 0.0  ;;  %v6731_v19 = vmax.f32 %v6283_v49, 0.0  ;;  %v6728_v41 = vmax.f32 %v6272_v25, 0.0 }
 0x6f4   : > { %v6730_v57 = vmax.f32 %v6280_v44, 0.0  ;;  %v6291_v7 = vadd.f32 %v11722_v2, %v11854_v11  ;;  %v6299_v35 = vadd.f32 %v11854_v11, %v11739_v16  ;;  %v6288_v42 = vadd.f32 %v11716_v58, %v11854_v11 }
 0x6f5   : > { %v11906_v38 = vpop.f32.mrf.mxu1  ;;  %v6845_v56 = vpack.c.bf16 %v6725_v17, %v6724_v45  ;;  %v6307_v17 = vadd.f32 %v11736_v34, %v11854_v11  ;;  %v6315_v58 = vadd.f32 %v11854_v11, %v11751_v6  ;;  %v6312_v45 = vadd.f32 %v11854_v11, %v11745_v8 }
 0x6f6   : > { %v6848_v61 = vpack.c.bf16 %v6731_v19, %v6730_v57  ;;  %v6733_v4 = vmax.f32 %v6291_v7, 0.0  ;;  %v6732_v48 = vmax.f32 %v6288_v42, 0.0  ;;  %v6323_v6 = vadd.f32 %v11747_v43, %v11854_v11 }
 0x6f7   : > { %v6320_v8 = vadd.f32 %v11741_v33, %v11854_v11  ;;  %v6328_v19 = vadd.f32 %v11854_v11, %v11756_v5  ;;  %v6347_v33 = vadd.f32 %v11854_v11, %v11773_v39  ;;  %v6336_v42 = vadd.f32 %v11753_v55, %v11854_v11 }
 0x6f8   : > { %8213 = vmatmul.mubr.bf16.vlgmr.msra.gmra.mxu1 %v6839_v22  ;;  %v6843_v22 = vpack.c.bf16 %v6721_v0, %v6720_v10  ;;  %v6849_v14 = vpack.c.bf16 %v6733_v4, %v6732_v48  ;;  %v6344_v5 = vadd.f32 %v11854_v11, %v11767_v26  ;;  %v6355_v39 = vadd.f32 %v11771_v21, %v11854_v11 }
 0x6f9   : > { %8216 = vmatprep.mubr.bf16.mxu1 %v6840_v12  ;;  %v11912_v12 = vpop.f32.mrf.mxu1  ;;  %v6742_v43 = vmax.f32 %v6328_v19, 0.0  ;;  %v6747_v48 = vmax.f32 %v6347_v33, 0.0  ;;  %v6363_v55 = vadd.f32 %v11854_v11, %v11785_v53  ;;  %v6352_v26 = vadd.f32 %v11765_v30, %v11854_v11  ;;  %v13145_v33 = vld [vmem:[#allocation49_spill] sm:$0xff] }
 0x6fa   : > { %v6379_v30 = vadd.f32 %v11854_v11, %v11797_v18  ;;  %v13143_v18 = vld [vmem:[#allocation140_spill] sm:$0xff] }
 0x6fb   : > { %v11916_v20 = vpop.f32.mrf.mxu1 }
 0x6fc   : > { %v6755_v19 = vmax.f32 %v6379_v30, 0.0 }
 0x6fd   : > { %v11924_v60 = vpop.f32.mrf.mxu1 }
 0x6ff   : > { %v11928_v0 = vpop.f32.mrf.mxu1 }
 0x700   : > { %8217 = vmatmul.mubr.bf16.gmra.mxu1 %v6841_v29  ;;  %v6846_v29 = vpack.c.bf16 %v6727_v37, %v6726_v3  ;;  %v6737_v3 = vmax.f32 %v6307_v17, 0.0 }
 0x701   : > { %8220 = vmatprep.mubr.bf16.mxu1 %v6842_v46  ;;  %v6729_v46 = vmax.f32 %v6275_v15, 0.0  ;;  %v11932_v10 = vpop.f32.mrf.mxu1  ;;  %v6739_v15 = vmax.f32 %v6315_v58, 0.0 }
 0x703   : > { %v6847_v47 = vpack.c.bf16 %v6729_v46, %v6728_v41  ;;  %v11940_v63 = vpop.f32.mrf.mxu1  ;;  %v6741_v41 = vmax.f32 %v6323_v6, 0.0 }
 0x705   : > { %v11944_v16 = vpop.f32.mrf.mxu1 }
 0x708   : > { %8221 = vmatmul.mubr.bf16.gmra.mxu1 %v6843_v22  ;;  %v6296_v22 = vadd.f32 %v11854_v11, %v11730_v23  ;;  %v6304_v23 = vadd.f32 %v11727_v31, %v11854_v11  ;;  %v6331_v31 = vadd.f32 %v11854_v11, %v11762_v9  ;;  %v6339_v9 = vadd.f32 %v11759_v62, %v11854_v11 }
 0x709   : > { %8224 = vmatprep.mubr.bf16.mxu1 %v6844_v52  ;;  %v6735_v52 = vmax.f32 %v6299_v35, 0.0  ;;  %v6746_v62 = vmax.f32 %v6344_v5, 0.0  ;;  %v13146_v5 = vld [vmem:[#allocation52_spill] sm:$0xff] }
 0x70a   : > { %v6734_v2 = vmax.f32 %v6296_v22, 0.0  ;;  %v6736_v49 = vmax.f32 %v6304_v23, 0.0  ;;  %v6743_v57 = vmax.f32 %v6331_v31, 0.0  ;;  %v6745_v4 = vmax.f32 %v6339_v9, 0.0  ;;  %v13142_v31 = vld [vmem:[#allocation139_spill] sm:$0xff] }
 0x70b   : > { %v6856_v58 = vpack.c.bf16 %v6747_v48, %v6746_v62  ;;  %v6749_v23 = vmax.f32 %v6355_v39, 0.0 }
 0x70c   : > { %v6850_v37 = vpack.c.bf16 %v6735_v52, %v6734_v2  ;;  %v6851_v25 = vpack.c.bf16 %v6737_v3, %v6736_v49  ;;  %v6744_v2 = vmax.f32 %v6336_v42, 0.0  ;;  %v6751_v3 = vmax.f32 %v6363_v55, 0.0 }
 0x710   : > { %8225 = vmatmul.mubr.bf16.gmra.mxu1 %v6845_v56  ;;  %v11952_v56 = vpop.f32.mrf.mxu1 }
 0x711   : > { %8228 = vmatprep.mubr.bf16.mxu1 %v6846_v29  ;;  %v6738_v29 = vmax.f32 %v6312_v45, 0.0 }
 0x712   : > { %v11954_v34 = vpop.f32.mrf.mxu1 }
 0x713   : > { %v6852_v44 = vpack.c.bf16 %v6739_v15, %v6738_v29  ;;  %v6748_v15 = vmax.f32 %v6352_v26, 0.0  ;;  %v6371_v29 = vadd.f32 %v11782_v13, %v11854_v11 }
 0x714   : > { %v11962_v46 = vpop.f32.mrf.mxu1 }
 0x715   : > { %v6857_v49 = vpack.c.bf16 %v6749_v23, %v6748_v15  ;;  %v13148_v23 = vld [vmem:[#allocation59_spill] sm:$0xff] }
 0x716   : > { %v11966_v7 = vpop.f32.mrf.mxu1 }
 0x718   : > { %8229 = vmatmul.mubr.bf16.gmra.mxu1 %v6847_v47  ;;  %v6740_v47 = vmax.f32 %v6320_v8, 0.0  ;;  %v11974_v22 = vpop.f32.mrf.mxu1  ;;  %v6753_v8 = vmax.f32 %v6371_v29, 0.0  ;;  %v13150_v29 = vld [vmem:[#allocation55_spill] sm:$0xff] }
 0x719   : > { %8232 = vmatprep.mubr.bf16.mxu1 %v6848_v61  ;;  %v6854_v61 = vpack.c.bf16 %v6743_v57, %v6742_v43  ;;  %v6387_v43 = vadd.f32 %v13143_v18, %v11854_v11  ;;  %v6408_v30 = vadd.f32 %v11854_v11, %v13150_v29  ;;  %v6427_v18 = vadd.f32 %v11854_v11, %v11831_v28  ;;  %v13154_v28 = vld [vmem:[#allocation9_spill] sm:$0xff] }
 0x71a   : > { %v6853_v35 = vpack.c.bf16 %v6741_v41, %v6740_v47 }
 0x71b   : > { %v6757_v48 = vmax.f32 %v6387_v43, 0.0 }
 0x720   : > { %8233 = vmatmul.mubr.bf16.gmra.mxu1 %v6849_v14  ;;  %v11978_v52 = vpop.f32.mrf.mxu1  ;;  %v6855_v14 = vpack.c.bf16 %v6745_v4, %v6744_v2  ;;  %v6392_v4 = vadd.f32 %v11854_v11, %v13146_v5 }
 0x721   : > { %8236 = vmatprep.mubr.bf16.mxu1 %v6850_v37  ;;  %v6360_v37 = vadd.f32 %v11854_v11, %v11779_v24  ;;  %v6368_v24 = vadd.f32 %v11776_v50, %v11854_v11 }
 0x722   : > { %v11982_v17 = vpop.f32.mrf.mxu1  ;;  %v6758_v39 = vmax.f32 %v6392_v4, 0.0  ;;  %v6767_v4 = vmax.f32 %v6427_v18, 0.0 }
 0x723   : > { %v6750_v21 = vmax.f32 %v6360_v37, 0.0  ;;  %v6752_v41 = vmax.f32 %v6368_v24, 0.0 }
 0x724   : > { %v11990_v45 = vpop.f32.mrf.mxu1 }
 0x725   : > { %v6859_v47 = vpack.c.bf16 %v6753_v8, %v6752_v41  ;;  %v6762_v8 = vmax.f32 %v6408_v30, 0.0  ;;  %v13151_v41 = vld [vmem:[#allocation57_spill] sm:$0xff] }
 0x726   : > { %v11994_v53 = vpop.f32.mrf.mxu1 }
 0x728   : > { %8237 = vmatmul.mubr.bf16.gmra.mxu1 %v6851_v25  ;;  %v6858_v25 = vpack.c.bf16 %v6751_v3, %v6750_v21  ;;  %v6411_v3 = vadd.f32 %v11854_v11, %v13148_v23  ;;  %v13149_v21 = vld [vmem:[#allocation6_spill] sm:$0xff]  ;;  %v13155_v23 = vld [vmem:[#allocation7_spill] sm:$0xff] }
 0x729   : > { %8240 = vmatprep.mubr.bf16.mxu1 %v6852_v44  ;;  %v6376_v44 = vadd.f32 %v11854_v11, %v13142_v31 }
 0x72a   : > { %v6763_v31 = vmax.f32 %v6411_v3, 0.0  ;;  %v6432_v3 = vadd.f32 %v13155_v23, %v11854_v11  ;;  %v6475_v23 = vadd.f32 %v11854_v11, %v11886_v32 }
 0x72b   : > { %v6754_v57 = vmax.f32 %v6376_v44, 0.0 }
 0x72c   : > { %v6864_v43 = vpack.c.bf16 %v6763_v31, %v6762_v8 }
 0x72d   : > { %v6860_v9 = vpack.c.bf16 %v6755_v19, %v6754_v57  ;;  %v6419_v57 = vadd.f32 %v13151_v41, %v11854_v11  ;;  %v13158_v41 = vld [vmem:[#allocation15_spill] sm:$0xff] }
 0x730   : > { %8241 = vmatmul.mubr.bf16.gmra.mxu1 %v6853_v35  ;;  %v12000_v6 = vpop.f32.mrf.mxu1  ;;  %v13144_v35 = vld [vmem:[#allocation142_spill] sm:$0xff] }
 0x731   : > { %8244 = vmatprep.mubr.bf16.mxu1 %v6854_v61  ;;  %v6395_v50 = vadd.f32 %v11854_v11, %v13144_v35  ;;  %v6384_v61 = vadd.f32 %v13145_v33, %v11854_v11  ;;  %v13152_v35 = vld [vmem:[#allocation4_spill] sm:$0xff] }
 0x732   : > { %v12004_v13 = vpop.f32.mrf.mxu1 }
 0x733   : > { %v6759_v2 = vmax.f32 %v6395_v50, 0.0  ;;  %v6756_v62 = vmax.f32 %v6384_v61, 0.0  ;;  %v6416_v50 = vadd.f32 %v13152_v35, %v11854_v11  ;;  %v6765_v61 = vmax.f32 %v6419_v57, 0.0 }
 0x734   : > { %v12012_v42 = vpop.f32.mrf.mxu1  ;;  %v6459_v57 = vadd.f32 %v11854_v11, %v13158_v41  ;;  %v6483_v41 = vadd.f32 %v11878_v51, %v11854_v11 }
 0x735   : > { %v6861_v55 = vpack.c.bf16 %v6757_v48, %v6756_v62  ;;  %v6862_v15 = vpack.c.bf16 %v6759_v2, %v6758_v39  ;;  %v6764_v48 = vmax.f32 %v6416_v50, 0.0 }
 0x737   : > { %v6865_v39 = vpack.c.bf16 %v6765_v61, %v6764_v48  ;;  %v6775_v48 = vmax.f32 %v6459_v57, 0.0  ;;  %v6491_v57 = vadd.f32 %v11854_v11, %v11906_v38  ;;  %v6499_v38 = vadd.f32 %v11902_v1, %v11854_v11 }
 0x738   : > { %8245 = vmatmul.mubr.bf16.gmra.mxu1 %v6855_v14  ;;  %v12016_v14 = vpop.f32.mrf.mxu1 }
 0x739   : > { %8248 = vmatprep.mubr.bf16.mxu1 %v6856_v58  ;;  %v13147_v58 = vld [vmem:[#allocation3_spill] sm:$0xff] }
 0x73a   : > { %v6403_v26 = vadd.f32 %v13147_v58, %v11854_v11  ;;  %v6443_v58 = vadd.f32 %v11854_v11, %v11843_v59  ;;  %v13157_v59 = vld [vmem:[#allocation12_spill] sm:$0xff] }
 0x73c   : > { %v6771_v30 = vmax.f32 %v6443_v58, 0.0 }
 0x740   : > { %8249 = vmatmul.mubr.bf16.gmra.mxu1 %v6857_v49  ;;  %v12020_v37 = vpop.f32.mrf.mxu1  ;;  %v6400_v49 = vadd.f32 %v13149_v21, %v11854_v11  ;;  %v13156_v21 = vld [vmem:[#allocation10_spill] sm:$0xff] }
 0x741   : > { %8252 = vmatprep.mubr.bf16.mxu1 %v6858_v25  ;;  %v6761_v25 = vmax.f32 %v6403_v26, 0.0 }
 0x742   : > { %v12028_v24 = vpop.f32.mrf.mxu1  ;;  %v6760_v44 = vmax.f32 %v6400_v49, 0.0  ;;  %v6440_v49 = vadd.f32 %v11854_v11, %v13156_v21  ;;  %v13162_v21 = vld [vmem:[#allocation66_spill] sm:$0xff] }
 0x744   : > { %v6863_v19 = vpack.c.bf16 %v6761_v25, %v6760_v44  ;;  %v6768_v25 = vmax.f32 %v6432_v3, 0.0  ;;  %v6770_v44 = vmax.f32 %v6440_v49, 0.0  ;;  %v6464_v49 = vadd.f32 %v13162_v21, %v11854_v11 }
 0x746   : > { %v6868_v18 = vpack.c.bf16 %v6771_v30, %v6770_v44  ;;  %v6779_v44 = vmax.f32 %v6475_v23, 0.0 }
 0x748   : > { %8253 = vmatmul.mubr.bf16.gmra.mxu1 %v6859_v47  ;;  %v12032_v47 = vpop.f32.mrf.mxu1 }
 0x749   : > { %8256 = vmatprep.mubr.bf16.mxu1 %v6860_v9  ;;  %v13153_v9 = vld [vmem:[#allocation60_spill] sm:$0xff] }
 0x74a   : > { %v6424_v33 = vadd.f32 %v11854_v11, %v13153_v9  ;;  %v12040_v5 = vpop.f32.mrf.mxu1  ;;  %v13160_v9 = vld [vmem:[#allocation13_spill] sm:$0xff] }
 0x74c   : > { %v6766_v62 = vmax.f32 %v6424_v33, 0.0  ;;  %v6456_v33 = vadd.f32 %v11854_v11, %v13160_v9  ;;  %v6781_v9 = vmax.f32 %v6483_v41, 0.0 }
 0x74e   : > { %v6866_v26 = vpack.c.bf16 %v6767_v4, %v6766_v62 }
 0x750   : > { %8257 = vmatmul.mubr.bf16.gmra.mxu1 %v6861_v55  ;;  %v12042_v2 = vpop.f32.mrf.mxu1  ;;  %v6435_v55 = vadd.f32 %v13154_v28, %v11854_v11 }
 0x751   : > { %8260 = vmatprep.mubr.bf16.mxu1 %v6862_v15 }
 0x752   : > { %v12050_v15 = vpop.f32.mrf.mxu1  ;;  %v6769_v29 = vmax.f32 %v6435_v55, 0.0  ;;  %v13161_v55 = vld [vmem:[#allocation69_spill] sm:$0xff] }
 0x753   : > { %v6467_v58 = vadd.f32 %v13161_v55, %v11854_v11 }
 0x754   : > { %v12054_v31 = vpop.f32.mrf.mxu1  ;;  %v6867_v8 = vpack.c.bf16 %v6769_v29, %v6768_v25  ;;  %v6472_v29 = vadd.f32 %v11854_v11, %v11874_v54  ;;  %v6480_v54 = vadd.f32 %v11866_v27, %v11854_v11  ;;  %v6507_v27 = vadd.f32 %v11854_v11, %v11928_v0 }
 0x755   : > { %v6777_v30 = vmax.f32 %v6467_v58, 0.0  ;;  %v6785_v58 = vmax.f32 %v6499_v38, 0.0  ;;  %v6515_v0 = vadd.f32 %v11924_v60, %v11854_v11 }
 0x756   : > { %v12062_v50 = vpop.f32.mrf.mxu1  ;;  %v6787_v23 = vmax.f32 %v6507_v27, 0.0 }
 0x758   : > { %8261 = vmatmul.mubr.bf16.gmra.mxu1 %v6863_v19  ;;  %v6451_v19 = vadd.f32 %v13157_v59, %v11854_v11  ;;  %v6778_v59 = vmax.f32 %v6472_v29, 0.0 }
 0x759   : > { %8264 = vmatprep.mubr.bf16.mxu1 %v6864_v43  ;;  %v13159_v43 = vld [vmem:[#allocation62_spill] sm:$0xff] }
 0x75a   : > { %v6448_v35 = vadd.f32 %v13159_v43, %v11854_v11  ;;  %v6773_v61 = vmax.f32 %v6451_v19, 0.0 }
 0x75c   : > { %v6772_v62 = vmax.f32 %v6448_v35, 0.0  ;;  %v6488_v35 = vadd.f32 %v11854_v11, %v11894_v36  ;;  %v6504_v36 = vadd.f32 %v11854_v11, %v11916_v20  ;;  %v6512_v20 = vadd.f32 %v11912_v12, %v11854_v11 }
 0x75d   : > { %v6539_v12 = vadd.f32 %v11854_v11, %v11974_v22  ;;  %v6547_v22 = vadd.f32 %v11966_v7, %v11854_v11 }
 0x75e   : > { %v6869_v28 = vpack.c.bf16 %v6773_v61, %v6772_v62  ;;  %v6780_v61 = vmax.f32 %v6480_v54, 0.0  ;;  %v6786_v1 = vmax.f32 %v6504_v36, 0.0  ;;  %v6788_v41 = vmax.f32 %v6512_v20, 0.0 }
 0x75f   : > { %v6797_v36 = vmax.f32 %v6547_v22, 0.0 }
 0x760   : > { %8265 = vmatmul.mubr.bf16.gmra.mxu1 %v6865_v39  ;;  %v12066_v4 = vpop.f32.mrf.mxu1  ;;  %v6774_v39 = vmax.f32 %v6456_v33, 0.0  ;;  %v6783_v33 = vmax.f32 %v6491_v57, 0.0  ;;  %v6873_v62 = vpack.c.bf16 %v6781_v9, %v6780_v61  ;;  %v6795_v61 = vmax.f32 %v6539_v12, 0.0 }
 0x761   : > { %8268 = vmatprep.mubr.bf16.mxu1 %v6866_v26 }
 0x762   : > { %v12070_v26 = vpop.f32.mrf.mxu1  ;;  %v6870_v3 = vpack.c.bf16 %v6775_v48, %v6774_v39  ;;  %v6782_v48 = vmax.f32 %v6488_v35, 0.0  ;;  %v6536_v35 = vadd.f32 %v11854_v11, %v11962_v46  ;;  %v6544_v46 = vadd.f32 %v11954_v34, %v11854_v11 }
 0x763   : > { %v6571_v34 = vadd.f32 %v11854_v11, %v12016_v14  ;;  %v6579_v14 = vadd.f32 %v12012_v42, %v11854_v11 }
 0x764   : > { %v12078_v25 = vpop.f32.mrf.mxu1  ;;  %v6874_v39 = vpack.c.bf16 %v6783_v33, %v6782_v48 }
 0x766   : > { %v12082_v32 = vpop.f32.mrf.mxu1 }
 0x768   : > { %8269 = vmatmul.mubr.bf16.gmra.mxu1 %v6867_v8  ;;  %v6776_v8 = vmax.f32 %v6464_v49, 0.0 }
 0x769   : > { %8272 = vmatprep.mubr.bf16.mxu1 %v6868_v18  ;;  %v6872_v18 = vpack.c.bf16 %v6779_v44, %v6778_v59  ;;  %v6520_v44 = vadd.f32 %v11854_v11, %v11940_v63  ;;  %v6528_v63 = vadd.f32 %v11932_v10, %v11854_v11  ;;  %v6555_v10 = vadd.f32 %v11854_v11, %v11994_v53 }
 0x76a   : > { %v6871_v19 = vpack.c.bf16 %v6777_v30, %v6776_v8  ;;  %v6876_v30 = vpack.c.bf16 %v6787_v23, %v6786_v1  ;;  %v6789_v8 = vmax.f32 %v6515_v0, 0.0  ;;  %v6796_v23 = vmax.f32 %v6544_v46, 0.0 }
 0x76b   : > { %v6790_v60 = vmax.f32 %v6520_v44, 0.0  ;;  %v6792_v48 = vmax.f32 %v6528_v63, 0.0  ;;  %v6563_v53 = vadd.f32 %v11990_v45, %v11854_v11  ;;  %v6560_v0 = vadd.f32 %v11978_v52, %v11854_v11 }
 0x76c   : > { %v6877_v57 = vpack.c.bf16 %v6789_v8, %v6788_v41  ;;  %v6881_v1 = vpack.c.bf16 %v6797_v36, %v6796_v23  ;;  %v6803_v44 = vmax.f32 %v6571_v34, 0.0  ;;  %v6587_v52 = vadd.f32 %v11854_v11, %v12040_v5 }
 0x76d   : > { %v6800_v8 = vmax.f32 %v6560_v0, 0.0  ;;  %v6595_v5 = vadd.f32 %v12032_v47, %v11854_v11  ;;  %v6619_v36 = vadd.f32 %v11854_v11, %v12082_v32  ;;  %v6608_v23 = vadd.f32 %v12042_v2, %v11854_v11 }
 0x76f   : > { %v6815_v34 = vmax.f32 %v6619_v36, 0.0 }
 0x770   : > { %8273 = vmatmul.mubr.bf16.gmra.mxu1 %v6869_v28  ;;  %v12088_v43 = vpop.f32.mrf.mxu1  ;;  %v6496_v28 = vadd.f32 %v11890_v40, %v11854_v11  ;;  %v6523_v40 = vadd.f32 %v11854_v11, %v11952_v56 }
 0x771   : > { %8276 = vmatprep.mubr.bf16.mxu1 %v6870_v3 }
 0x772   : > { %v12092_v51 = vpop.f32.mrf.mxu1  ;;  %v6784_v3 = vmax.f32 %v6496_v28, 0.0  ;;  %v6552_v28 = vadd.f32 %v11854_v11, %v11982_v17  ;;  %v6568_v17 = vadd.f32 %v11854_v11, %v12004_v13  ;;  %v6576_v13 = vadd.f32 %v12000_v6, %v11854_v11 }
 0x773   : > { %v6603_v6 = vadd.f32 %v11854_v11, %v12062_v50 }
 0x774   : > { %v12100_v55 = vpop.f32.mrf.mxu1  ;;  %v6875_v49 = vpack.c.bf16 %v6785_v58, %v6784_v3  ;;  %v6799_v58 = vmax.f32 %v6555_v10, 0.0  ;;  %v6798_v7 = vmax.f32 %v6552_v28, 0.0  ;;  %v6802_v45 = vmax.f32 %v6568_v17, 0.0 }
 0x775   : > { %v6804_v63 = vmax.f32 %v6576_v13, 0.0  ;;  %v6811_v47 = vmax.f32 %v6603_v6, 0.0  ;;  %v6632_v13 = vadd.f32 %v11854_v11, %v12092_v51  ;;  %v6643_v51 = vadd.f32 %v12100_v55, %v11854_v11 }
 0x776   : > { %v12104_v21 = vpop.f32.mrf.mxu1 }
 0x778   : > { %8277 = vmatmul.mubr.bf16.gmra.mxu1 %v6871_v19  ;;  %v6791_v19 = vmax.f32 %v6523_v40, 0.0 }
 0x779   : > { %8280 = vmatprep.mubr.bf16.mxu1 %v6872_v18  ;;  %v6531_v18 = vadd.f32 %v11944_v16, %v11854_v11 }
 0x77a   : > { %v6878_v54 = vpack.c.bf16 %v6791_v19, %v6790_v60  ;;  %v6884_v60 = vpack.c.bf16 %v6803_v44, %v6802_v45  ;;  %v6635_v45 = vadd.f32 %v11854_v11, %v12104_v21 }
 0x77b   : > { %v6793_v9 = vmax.f32 %v6531_v18, 0.0  ;;  %v6805_v18 = vmax.f32 %v6579_v14, 0.0 }
 0x77d   : > { %v6879_v38 = vpack.c.bf16 %v6793_v9, %v6792_v48 }
 0x780   : > { %8281 = vmatmul.mubr.bf16.gmra.mxu1 %v6873_v62  ;;  %v12108_v29 = vpop.f32.mrf.mxu1  ;;  %v6794_v62 = vmax.f32 %v6536_v35, 0.0  ;;  %v6885_v35 = vpack.c.bf16 %v6805_v18, %v6804_v63  ;;  %v6819_v18 = vmax.f32 %v6635_v45, 0.0 }
 0x781   : > { %8284 = vmatprep.mubr.bf16.mxu1 %v6874_v39 }
 0x782   : > { %v12116_v59 = vpop.f32.mrf.mxu1  ;;  %v6880_v27 = vpack.c.bf16 %v6795_v61, %v6794_v62  ;;  %v6600_v62 = vadd.f32 %v11854_v11, %v12050_v15  ;;  %v12192_v15 = vld [vmem:[%s12514_s5 + $0x8] ss:$0 sm:$0xff] }
 0x784   : > { %v12120_v56 = vpop.f32.mrf.mxu1  ;;  %v6810_v46 = vmax.f32 %v6600_v62, 0.0 }
 0x786   : > { %v12128_v33 = vpop.f32.mrf.mxu1 }
 0x788   : > { %8285 = vmatmul.mubr.bf16.gmra.mxu1 %v6875_v49  ;;  %v6882_v49 = vpack.c.bf16 %v6799_v58, %v6798_v7  ;;  %v6888_v58 = vpack.c.bf16 %v6811_v47, %v6810_v46  ;;  %v6616_v7 = vadd.f32 %v11854_v11, %v12070_v26  ;;  %v6627_v26 = vadd.f32 %v12078_v25, %v11854_v11 }
 0x789   : > { %8288 = vmatprep.mubr.bf16.mxu1 %v6876_v30  ;;  %v6801_v30 = vmax.f32 %v6563_v53, 0.0  ;;  %v6821_v46 = vmax.f32 %v6643_v51, 0.0 }
 0x78a   : > { %v6814_v17 = vmax.f32 %v6616_v7, 0.0 }
 0x78b   : > { %v6883_v19 = vpack.c.bf16 %v6801_v30, %v6800_v8 }
 0x78c   : > { %v6890_v14 = vpack.c.bf16 %v6815_v34, %v6814_v17  ;;  %v6656_v34 = vadd.f32 %v12108_v29, %v11854_v11 }
 0x790   : > { %8289 = vmatmul.mubr.bf16.gmra.mxu1 %v6877_v57  ;;  %v12130_v16 = vpop.f32.mrf.mxu1  ;;  %v6584_v57 = vadd.f32 %v11854_v11, %v12028_v24  ;;  %v6592_v24 = vadd.f32 %v12020_v37, %v11854_v11  ;;  %v6611_v37 = vadd.f32 %v12054_v31, %v11854_v11 }
 0x791   : > { %8292 = vmatprep.mubr.bf16.mxu1 %v6878_v54  ;;  %v6807_v54 = vmax.f32 %v6587_v52, 0.0  ;;  %v6624_v52 = vadd.f32 %v12066_v4, %v11854_v11  ;;  %v6818_v4 = vmax.f32 %v6632_v13, 0.0  ;;  %v6672_v13 = vadd.f32 %v12130_v16, %v11854_v11 }
 0x792   : > { %v12138_v39 = vpop.f32.mrf.mxu1  ;;  %v6806_v42 = vmax.f32 %v6584_v57, 0.0  ;;  %v6808_v10 = vmax.f32 %v6592_v24, 0.0  ;;  %v6813_v32 = vmax.f32 %v6611_v37, 0.0  ;;  %v6817_v57 = vmax.f32 %v6627_v26, 0.0 }
 0x793   : > { %v6816_v63 = vmax.f32 %v6624_v52, 0.0  ;;  %v6892_v62 = vpack.c.bf16 %v6819_v18, %v6818_v4 }
 0x794   : > { %v12142_v3 = vpop.f32.mrf.mxu1  ;;  %v6886_v61 = vpack.c.bf16 %v6807_v54, %v6806_v42 }
 0x796   : > { %v12150_v40 = vpop.f32.mrf.mxu1 }
 0x798   : > { %8293 = vmatmul.mubr.bf16.gmra.mxu1 %v6879_v38  ;;  %v6809_v38 = vmax.f32 %v6595_v5, 0.0  ;;  %v6891_v5 = vpack.c.bf16 %v6817_v57, %v6816_v63  ;;  %v6828_v63 = vmax.f32 %v6672_v13, 0.0 }
 0x799   : > { %8296 = vmatprep.mubr.bf16.mxu1 %v6880_v27 }
 0x79a   : > { %v6887_v50 = vpack.c.bf16 %v6809_v38, %v6808_v10  ;;  %v6640_v38 = vadd.f32 %v12088_v43, %v11854_v11  ;;  %v6648_v10 = vadd.f32 %v11854_v11, %v12116_v59  ;;  %v6659_v59 = vadd.f32 %v12120_v56, %v11854_v11 }
 0x79c   : > { %v6820_v36 = vmax.f32 %v6640_v38, 0.0  ;;  %v6822_v43 = vmax.f32 %v6648_v10, 0.0 }
 0x7a0   : > { %8297 = vmatmul.mubr.bf16.gmra.mxu1 %v6881_v1  ;;  %v12154_v20 = vpop.f32.mrf.mxu1 }
 0x7a1   : > { %8300 = vmatprep.mubr.bf16.mxu1 %v6882_v49  ;;  %v6812_v49 = vmax.f32 %v6608_v23, 0.0 }
 0x7a2   : > { %v12158_v41 = vpop.f32.mrf.mxu1 }
 0x7a3   : > { %v6889_v44 = vpack.c.bf16 %v6813_v32, %v6812_v49  ;;  %v6664_v49 = vadd.f32 %v11854_v11, %v12138_v39  ;;  %v6675_v39 = vadd.f32 %v12142_v3, %v11854_v11  ;;  %v6680_v57 = vadd.f32 %v11854_v11, %v12158_v41 }
 0x7a4   : > { %v12166_v12 = vpop.f32.mrf.mxu1 }
 0x7a5   : > { %v6826_v29 = vmax.f32 %v6664_v49, 0.0  ;;  %v6830_v16 = vmax.f32 %v6680_v57, 0.0  ;;  %v6691_v41 = vadd.f32 %v12166_v12, %v11854_v11 }
 0x7a6   : > { %v12170_v9 = vpop.f32.mrf.mxu1 }
 0x7a8   : > { %8301 = vmatmul.mubr.bf16.gmra.mxu1 %v6883_v19 }
 0x7a9   : > { %8304 = vmatprep.mubr.bf16.mxu1 %v6884_v60 }
 0x7b0   : > { %v12176_v48 = vpop.f32.mrf.mxu1  ;;  %8305 = vmatmul.mubr.bf16.gmra.mxu1 %v6885_v35 }
 0x7b1   : > { %8308 = vmatprep.mubr.bf16.mxu1 %v6886_v61  ;;  %v6651_v61 = vadd.f32 %v11854_v11, %v12128_v33 }
 0x7b2   : > { %v12180_v22 = vpop.f32.mrf.mxu1 }
 0x7b3   : > { %v6696_v38 = vadd.f32 %v11854_v11, %v12180_v22  ;;  %v8591_v22 = vld [vmem:[%s12514_s5 + $0x7] ss:$0 sm:$0xff] }
 0x7b4   : > { %v12182_v27 = vpop.f32.mrf.mxu1 }
 0x7b6   : > { %v12187_v28 = vpop.f32.mrf.mxu1 }
 0x7b7   : > { %v6699_v51 = vadd.f32 %v11854_v11, %v12187_v28 }
 0x7b8   : > { %v8214_v31 = vpop.f32.mrf.mxu1  ;;  %8309 = vmatmul.mubr.bf16.gmra.mxu1 %v6887_v50  ;;  %v6823_v50 = vmax.f32 %v6651_v61, 0.0 }
 0x7b9   : > { %v7016_v1 = vadd.f32 %v8214_v31, %v12192_v15  ;;  %8312 = vmatprep.mubr.bf16.mxu1 %v6888_v58  ;;  %v6893_v31 = vpack.c.bf16 %v6821_v46, %v6820_v36  ;;  %v6835_v10 = vmax.f32 %v6699_v51, 0.0 }
 0x7ba   : > { %v7007_v53 = vpop.f32.mrf.mxu1 }
 0x7bb   : > { %7520 = vst [vmem:[%s12201_s18 + $0x10] sm:$0xff] %v7016_v1  ;;  %v7008_v2 = vadd.f32 %v12192_v15, %v7007_v53  ;;  %v6667_v1 = vadd.f32 %v11854_v11, %v12150_v40  ;;  %v6894_v53 = vpack.c.bf16 %v6823_v50, %v6822_v43 }
 0x7bc   : > { %v8215_v0 = vpop.f32.mrf.mxu1 }
 0x7bd   : > { %7518 = vst [vmem:[%s12201_s18] sm:$0xff] %v7008_v2  ;;  %v7019_v30 = vadd.f32 %v8215_v0, %v12192_v15  ;;  %v6825_v0 = vmax.f32 %v6659_v59, 0.0  ;;  %v6827_v17 = vmax.f32 %v6667_v1, 0.0 }
 0x7be   : > { %v7010_v8 = vpop.f32.mrf.mxu1 }
 0x7bf   : > { %7521 = vst [vmem:[%s12201_s18 + $0x18] sm:$0xff] %v7019_v30  ;;  %v7011_v19 = vadd.f32 %v12192_v15, %v7010_v8 }
 0x7c0   : > { %v8218_v60 = vpop.f32.mrf.mxu1  ;;  %8313 = vmatmul.mubr.bf16.gmra.mxu1 %v6889_v44  ;;  %v6824_v44 = vmax.f32 %v6656_v34, 0.0 }
 0x7c1   : > { %7519 = vst [vmem:[%s12201_s18 + $0x8] sm:$0xff] %v7011_v19  ;;  %v7032_v25 = vadd.f32 %v8218_v60, %v12192_v15  ;;  %8316 = vmatprep.mubr.bf16.mxu1 %v6890_v14  ;;  %v6683_v14 = vadd.f32 %v11854_v11, %v12170_v9  ;;  %v6896_v60 = vpack.c.bf16 %v6827_v17, %v6826_v29 }
 0x7c2   : > { %v7023_v21 = vpop.f32.mrf.mxu1  ;;  %v6895_v45 = vpack.c.bf16 %v6825_v0, %v6824_v44 }
 0x7c3   : > { %7524 = vst [vmem:[%s12201_s18 + $0x30] sm:$0xff] %v7032_v25  ;;  %v7024_v54 = vadd.f32 %v12192_v15, %v7023_v21  ;;  %v6829_v21 = vmax.f32 %v6675_v39, 0.0  ;;  %v6831_v18 = vmax.f32 %v6683_v14, 0.0 }
 0x7c4   : > { %v8219_v42 = vpop.f32.mrf.mxu1 }
 0x7c5   : > { %7522 = vst [vmem:[%s12201_s18 + $0x20] sm:$0xff] %v7024_v54  ;;  %v7035_v35 = vadd.f32 %v8219_v42, %v12192_v15  ;;  %v6898_v61 = vpack.c.bf16 %v6831_v18, %v6830_v16 }
 0x7c6   : > { %v7026_v6 = vpop.f32.mrf.mxu1 }
 0x7c7   : > { %7525 = vst [vmem:[%s12201_s18 + $0x38] sm:$0xff] %v7035_v35  ;;  %v7027_v24 = vadd.f32 %v12192_v15, %v7026_v6  ;;  %v6897_v35 = vpack.c.bf16 %v6829_v21, %v6828_v63 }
 0x7c8   : > { %v8222_v47 = vpop.f32.mrf.mxu1  ;;  %8317 = vmatmul.mubr.bf16.gmra.mxu1 %v6891_v5 }
 0x7c9   : > { %7523 = vst [vmem:[%s12201_s18 + $0x28] sm:$0xff] %v7027_v24  ;;  %v7048_v55 = vadd.f32 %v8222_v47, %v12192_v15  ;;  %8320 = vmatprep.mubr.bf16.mxu1 %v6892_v62  ;;  %v6688_v24 = vadd.f32 %v12154_v20, %v11854_v11  ;;  %v6833_v47 = vmax.f32 %v6691_v41, 0.0  ;;  %v6834_v20 = vmax.f32 %v6696_v38, 0.0 }
 0x7ca   : > { %v7039_v33 = vpop.f32.mrf.mxu1 }
 0x7cb   : > { %7528 = vst [vmem:[%s12201_s18 + $0x50] sm:$0xff] %v7048_v55  ;;  %v7040_v37 = vadd.f32 %v12192_v15, %v7039_v33  ;;  %v6832_v46 = vmax.f32 %v6688_v24, 0.0  ;;  %v6900_v43 = vpack.c.bf16 %v6835_v10, %v6834_v20 }
 0x7cc   : > { %v8223_v58 = vpop.f32.mrf.mxu1 }
 0x7cd   : > { %7526 = vst [vmem:[%s12201_s18 + $0x40] sm:$0xff] %v7040_v37  ;;  %v7051_v23 = vadd.f32 %v8223_v58, %v12192_v15  ;;  %v6899_v11 = vpack.c.bf16 %v6833_v47, %v6832_v46  ;;  %v6707_v37 = vadd.f32 %v8591_v22, %v12182_v27 }
 0x7ce   : > { %v7042_v7 = vpop.f32.mrf.mxu1 }
 0x7cf   : > { %7529 = vst [vmem:[%s12201_s18 + $0x58] sm:$0xff] %v7051_v23  ;;  %v7043_v32 = vadd.f32 %v12192_v15, %v7042_v7  ;;  %v6704_v23 = vadd.f32 %v8591_v22, %v12176_v48  ;;  %v6837_v7 = vmax.f32 %v6707_v37, 0.0 }
 0x7d0   : > { %v8226_v2 = vpop.f32.mrf.mxu1  ;;  %8321 = vmatmul.mubr.bf16.gmra.mxu1 %v6893_v31 }
 0x7d1   : > { %7527 = vst [vmem:[%s12201_s18 + $0x48] sm:$0xff] %v7043_v32  ;;  %v7064_v56 = vadd.f32 %v8226_v2, %v12192_v15  ;;  %8324 = vmatprep.mubr.bf16.mxu1 %v6894_v53  ;;  %v6836_v32 = vmax.f32 %v6704_v23, 0.0 }
 0x7d2   : > { %v7055_v40 = vpop.f32.mrf.mxu1 }
 0x7d3   : > { %7532 = vst [vmem:[%s12201_s18 + $0x70] sm:$0xff] %v7064_v56  ;;  %v7056_v30 = vadd.f32 %v12192_v15, %v7055_v40  ;;  %v6901_v34 = vpack.c.bf16 %v6837_v7, %v6836_v32 }
 0x7d4   : > { %v8227_v26 = vpop.f32.mrf.mxu1 }
 0x7d5   : > { %7530 = vst [vmem:[%s12201_s18 + $0x60] sm:$0xff] %v7056_v30  ;;  %v7067_v8 = vadd.f32 %v8227_v26, %v12192_v15 }
 0x7d6   : > { %v7058_v19 = vpop.f32.mrf.mxu1 }
 0x7d7   : > { %7533 = vst [vmem:[%s12201_s18 + $0x78] sm:$0xff] %v7067_v8  ;;  %v7059_v52 = vadd.f32 %v12192_v15, %v7058_v19 }
 0x7d8   : > { %v8230_v25 = vpop.f32.mrf.mxu1  ;;  %8325 = vmatmul.mubr.bf16.gmra.mxu1 %v6895_v45 }
 0x7d9   : > { %7531 = vst [vmem:[%s12201_s18 + $0x68] sm:$0xff] %v7059_v52  ;;  %v7080_v3 = vadd.f32 %v8230_v25, %v12192_v15  ;;  %8328 = vmatprep.mubr.bf16.mxu1 %v6896_v60 }
 0x7da   : > { %v7071_v9 = vpop.f32.mrf.mxu1 }
 0x7db   : > { %7536 = vst [vmem:[%s12201_s18 + $0x90] sm:$0xff] %v7080_v3  ;;  %v7072_v54 = vadd.f32 %v12192_v15, %v7071_v9 }
 0x7dc   : > { %v8231_v42 = vpop.f32.mrf.mxu1 }
 0x7dd   : > { %7534 = vst [vmem:[%s12201_s18 + $0x80] sm:$0xff] %v7072_v54  ;;  %v7083_v4 = vadd.f32 %v8231_v42, %v12192_v15 }
 0x7de   : > { %v7074_v5 = vpop.f32.mrf.mxu1 }
 0x7df   : > { %7537 = vst [vmem:[%s12201_s18 + $0x98] sm:$0xff] %v7083_v4  ;;  %v7075_v6 = vadd.f32 %v12192_v15, %v7074_v5 }
 0x7e0   : > { %v8234_v62 = vpop.f32.mrf.mxu1  ;;  %8329 = vmatmul.mubr.bf16.gmra.mxu1 %v6897_v35 }
 0x7e1   : > { %7535 = vst [vmem:[%s12201_s18 + $0x88] sm:$0xff] %v7075_v6  ;;  %v7096_v12 = vadd.f32 %v8234_v62, %v12192_v15  ;;  %8332 = vmatprep.mubr.bf16.mxu1 %v6898_v61 }
 0x7e2   : > { %v7087_v28 = vpop.f32.mrf.mxu1 }
 0x7e3   : > { %7540 = vst [vmem:[%s12201_s18 + $0xb0] sm:$0xff] %v7096_v12  ;;  %v7088_v55 = vadd.f32 %v12192_v15, %v7087_v28 }
 0x7e4   : > { %v8235_v33 = vpop.f32.mrf.mxu1 }
 0x7e5   : > { %7538 = vst [vmem:[%s12201_s18 + $0xa0] sm:$0xff] %v7088_v55  ;;  %v7099_v50 = vadd.f32 %v8235_v33, %v12192_v15 }
 0x7e6   : > { %v7090_v36 = vpop.f32.mrf.mxu1 }
 0x7e7   : > { %7541 = vst [vmem:[%s12201_s18 + $0xb8] sm:$0xff] %v7099_v50  ;;  %v7091_v58 = vadd.f32 %v12192_v15, %v7090_v36 }
 0x7e8   : > { %v8238_v31 = vpop.f32.mrf.mxu1  ;;  %8333 = vmatmul.mubr.bf16.gmra.mxu1 %v6899_v11 }
 0x7e9   : > { %7539 = vst [vmem:[%s12201_s18 + $0xa8] sm:$0xff] %v7091_v58  ;;  %v7112_v59 = vadd.f32 %v8238_v31, %v12192_v15  ;;  %8336 = vmatprep.mubr.bf16.mxu1 %v6900_v43 }
 0x7ea   : > { %v7103_v1 = vpop.f32.mrf.mxu1 }
 0x7eb   : > { %7544 = vst [vmem:[%s12201_s18 + $0xd0] sm:$0xff] %v7112_v59  ;;  %v7104_v27 = vadd.f32 %v12192_v15, %v7103_v1 }
 0x7ec   : > { %v8239_v53 = vpop.f32.mrf.mxu1 }
 0x7ed   : > { %7542 = vst [vmem:[%s12201_s18 + $0xc0] sm:$0xff] %v7104_v27  ;;  %v7115_v48 = vadd.f32 %v8239_v53, %v12192_v15 }
 0x7ee   : > { %v7106_v2 = vpop.f32.mrf.mxu1 }
 0x7ef   : > { %7545 = vst [vmem:[%s12201_s18 + $0xd8] sm:$0xff] %v7115_v48  ;;  %v7107_v49 = vadd.f32 %v12192_v15, %v7106_v2 }
 0x7f0   : > { %v8242_v56 = vpop.f32.mrf.mxu1  ;;  %8337 = vmatmul.mubr.bf16.gmra.mxu1 %v6901_v34 }
 0x7f1   : > { %7543 = vst [vmem:[%s12201_s18 + $0xc8] sm:$0xff] %v7107_v49  ;;  %v7128_v0 = vadd.f32 %v8242_v56, %v12192_v15 }
 0x7f2   : > { %v7119_v40 = vpop.f32.mrf.mxu1 }
 0x7f3   : > { %7548 = vst [vmem:[%s12201_s18 + $0xf0] sm:$0xff] %v7128_v0  ;;  %v7120_v17 = vadd.f32 %v12192_v15, %v7119_v40 }
 0x7f4   : > { %v8243_v30 = vpop.f32.mrf.mxu1 }
 0x7f5   : > { %7546 = vst [vmem:[%s12201_s18 + $0xe0] sm:$0xff] %v7120_v17  ;;  %v7131_v44 = vadd.f32 %v8243_v30, %v12192_v15 }
 0x7f6   : > { %v7122_v26 = vpop.f32.mrf.mxu1 }
 0x7f7   : > { %7549 = vst [vmem:[%s12201_s18 + $0xf8] sm:$0xff] %v7131_v44  ;;  %v7123_v29 = vadd.f32 %v12192_v15, %v7122_v26 }
 0x7f8   : > { %v8246_v8 = vpop.f32.mrf.mxu1 }
 0x7f9   : > { %7547 = vst [vmem:[%s12201_s18 + $0xe8] sm:$0xff] %v7123_v29  ;;  %v7144_v45 = vadd.f32 %v8246_v8, %v12192_v15 }
 0x7fa   : > { %v7135_v39 = vpop.f32.mrf.mxu1 }
 0x7fb   : > { %7552 = vst [vmem:[%s12201_s18 + $0x110] sm:$0xff] %v7144_v45  ;;  %v7136_v19 = vadd.f32 %v12192_v15, %v7135_v39 }
 0x7fc   : > { %v8247_v14 = vpop.f32.mrf.mxu1 }
 0x7fd   : > { %7550 = vst [vmem:[%s12201_s18 + $0x100] sm:$0xff] %v7136_v19  ;;  %v7147_v52 = vadd.f32 %v8247_v14, %v12192_v15 }
 0x7fe   : > { %v7138_v60 = vpop.f32.mrf.mxu1 }
 0x7ff   : > { %7553 = vst [vmem:[%s12201_s18 + $0x118] sm:$0xff] %v7147_v52  ;;  %v7139_v13 = vadd.f32 %v12192_v15, %v7138_v60 }
 0x800   : > { %v8250_v25 = vpop.f32.mrf.mxu1 }
 0x801   : > { %7551 = vst [vmem:[%s12201_s18 + $0x108] sm:$0xff] %v7139_v13  ;;  %v7160_v57 = vadd.f32 %v8250_v25, %v12192_v15 }
 0x802   : > { %v7151_v3 = vpop.f32.mrf.mxu1 }
 0x803   : > { %7556 = vst [vmem:[%s12201_s18 + $0x130] sm:$0xff] %v7160_v57  ;;  %v7152_v21 = vadd.f32 %v12192_v15, %v7151_v3 }
 0x804   : > { %v8251_v9 = vpop.f32.mrf.mxu1 }
 0x805   : > { %7554 = vst [vmem:[%s12201_s18 + $0x120] sm:$0xff] %v7152_v21  ;;  %v7163_v18 = vadd.f32 %v8251_v9, %v12192_v15 }
 0x806   : > { %v7154_v54 = vpop.f32.mrf.mxu1 }
 0x807   : > { %7557 = vst [vmem:[%s12201_s18 + $0x138] sm:$0xff] %v7163_v18  ;;  %v7155_v63 = vadd.f32 %v12192_v15, %v7154_v54 }
 0x808   : > { %v8254_v42 = vpop.f32.mrf.mxu1 }
 0x809   : > { %7555 = vst [vmem:[%s12201_s18 + $0x128] sm:$0xff] %v7155_v63  ;;  %v7176_v16 = vadd.f32 %v8254_v42, %v12192_v15 }
 0x80a   : > { %v7167_v4 = vpop.f32.mrf.mxu1 }
 0x80b   : > { %7560 = vst [vmem:[%s12201_s18 + $0x150] sm:$0xff] %v7176_v16  ;;  %v7168_v35 = vadd.f32 %v12192_v15, %v7167_v4 }
 0x80c   : > { %v8255_v41 = vpop.f32.mrf.mxu1 }
 0x80d   : > { %7558 = vst [vmem:[%s12201_s18 + $0x140] sm:$0xff] %v7168_v35  ;;  %v7179_v5 = vadd.f32 %v8255_v41, %v12192_v15 }
 0x80e   : > { %v7170_v51 = vpop.f32.mrf.mxu1 }
 0x80f   : > { %7561 = vst [vmem:[%s12201_s18 + $0x158] sm:$0xff] %v7179_v5  ;;  %v7171_v6 = vadd.f32 %v12192_v15, %v7170_v51 }
 0x810   : > { %v8258_v61 = vpop.f32.mrf.mxu1 }
 0x811   : > { %7559 = vst [vmem:[%s12201_s18 + $0x148] sm:$0xff] %v7171_v6  ;;  %v7192_v24 = vadd.f32 %v8258_v61, %v12192_v15 }
 0x812   : > { %v7183_v62 = vpop.f32.mrf.mxu1 }
 0x813   : > { %7564 = vst [vmem:[%s12201_s18 + $0x170] sm:$0xff] %v7192_v24  ;;  %v7184_v38 = vadd.f32 %v12192_v15, %v7183_v62 }
 0x814   : > { %v8259_v12 = vpop.f32.mrf.mxu1 }
 0x815   : > { %7562 = vst [vmem:[%s12201_s18 + $0x160] sm:$0xff] %v7184_v38  ;;  %v7195_v47 = vadd.f32 %v8259_v12, %v12192_v15 }
 0x816   : > { %v7186_v28 = vpop.f32.mrf.mxu1 }
 0x817   : > { %7565 = vst [vmem:[%s12201_s18 + $0x178] sm:$0xff] %v7195_v47  ;;  %v7187_v10 = vadd.f32 %v12192_v15, %v7186_v28 }
 0x818   : > { %v8262_v55 = vpop.f32.mrf.mxu1 }
 0x819   : > { %7563 = vst [vmem:[%s12201_s18 + $0x168] sm:$0xff] %v7187_v10  ;;  %v7208_v46 = vadd.f32 %v8262_v55, %v12192_v15 }
 0x81a   : > { %v7199_v33 = vpop.f32.mrf.mxu1 }
 0x81b   : > { %7568 = vst [vmem:[%s12201_s18 + $0x190] sm:$0xff] %v7208_v46  ;;  %v7200_v20 = vadd.f32 %v12192_v15, %v7199_v33 }
 0x81c   : > { %v8263_v50 = vpop.f32.mrf.mxu1 }
 0x81d   : > { %7566 = vst [vmem:[%s12201_s18 + $0x180] sm:$0xff] %v7200_v20  ;;  %v7211_v11 = vadd.f32 %v8263_v50, %v12192_v15 }
 0x81e   : > { %v7202_v22 = vpop.f32.mrf.mxu1 }
 0x81f   : > { %7569 = vst [vmem:[%s12201_s18 + $0x198] sm:$0xff] %v7211_v11  ;;  %v7203_v37 = vadd.f32 %v12192_v15, %v7202_v22 }
 0x820   : > { %v8266_v36 = vpop.f32.mrf.mxu1 }
 0x821   : > { %7567 = vst [vmem:[%s12201_s18 + $0x188] sm:$0xff] %v7203_v37  ;;  %v7224_v58 = vadd.f32 %v8266_v36, %v12192_v15 }
 0x822   : > { %v7215_v43 = vpop.f32.mrf.mxu1 }
 0x823   : > { %7572 = vst [vmem:[%s12201_s18 + $0x1b0] sm:$0xff] %v7224_v58  ;;  %v7216_v23 = vadd.f32 %v12192_v15, %v7215_v43 }
 0x824   : > { %v8267_v31 = vpop.f32.mrf.mxu1 }
 0x825   : > { %7570 = vst [vmem:[%s12201_s18 + $0x1a0] sm:$0xff] %v7216_v23  ;;  %v7227_v59 = vadd.f32 %v8267_v31, %v12192_v15 }
 0x826   : > { %v7218_v7 = vpop.f32.mrf.mxu1 }
 0x827   : > { %7573 = vst [vmem:[%s12201_s18 + $0x1b8] sm:$0xff] %v7227_v59  ;;  %v7219_v1 = vadd.f32 %v12192_v15, %v7218_v7 }
 0x828   : > { %v8270_v27 = vpop.f32.mrf.mxu1 }
 0x829   : > { %7571 = vst [vmem:[%s12201_s18 + $0x1a8] sm:$0xff] %v7219_v1  ;;  %v7240_v32 = vadd.f32 %v8270_v27, %v12192_v15 }
 0x82a   : > { %v7231_v53 = vpop.f32.mrf.mxu1 }
 0x82b   : > { %7576 = vst [vmem:[%s12201_s18 + $0x1d0] sm:$0xff] %v7240_v32  ;;  %v7232_v48 = vadd.f32 %v12192_v15, %v7231_v53 }
 0x82c   : > { %v8271_v34 = vpop.f32.mrf.mxu1 }
 0x82d   : > { %7574 = vst [vmem:[%s12201_s18 + $0x1c0] sm:$0xff] %v7232_v48  ;;  %v7243_v2 = vadd.f32 %v8271_v34, %v12192_v15 }
 0x82e   : > { %v7234_v49 = vpop.f32.mrf.mxu1 }
 0x82f   : > { %7577 = vst [vmem:[%s12201_s18 + $0x1d8] sm:$0xff] %v7243_v2  ;;  %v7235_v56 = vadd.f32 %v12192_v15, %v7234_v49 }
 0x830   : > { %v8274_v0 = vpop.f32.mrf.mxu1 }
 0x831   : > { %7575 = vst [vmem:[%s12201_s18 + $0x1c8] sm:$0xff] %v7235_v56  ;;  %v7256_v40 = vadd.f32 %v8274_v0, %v12192_v15 }
 0x832   : > { %v7247_v17 = vpop.f32.mrf.mxu1 }
 0x833   : > { %7580 = vst [vmem:[%s12201_s18 + $0x1f0] sm:$0xff] %v7256_v40  ;;  %v7248_v30 = vadd.f32 %v12192_v15, %v7247_v17 }
 0x834   : > { %v8275_v44 = vpop.f32.mrf.mxu1 }
 0x835   : > { %7578 = vst [vmem:[%s12201_s18 + $0x1e0] sm:$0xff] %v7248_v30  ;;  %v7259_v26 = vadd.f32 %v8275_v44, %v12192_v15 }
 0x836   : > { %v7250_v29 = vpop.f32.mrf.mxu1 }
 0x837   : > { %7581 = vst [vmem:[%s12201_s18 + $0x1f8] sm:$0xff] %v7259_v26  ;;  %v7251_v8 = vadd.f32 %v12192_v15, %v7250_v29 }
 0x838   : > { %v8278_v45 = vpop.f32.mrf.mxu1 }
 0x839   : > { %7579 = vst [vmem:[%s12201_s18 + $0x1e8] sm:$0xff] %v7251_v8  ;;  %v7272_v39 = vadd.f32 %v8278_v45, %v12192_v15 }
 0x83a   : > { %v7263_v19 = vpop.f32.mrf.mxu1 }
 0x83b   : > { %7584 = vst [vmem:[%s12201_s18 + $0x210] sm:$0xff] %v7272_v39  ;;  %v7264_v14 = vadd.f32 %v12192_v15, %v7263_v19 }
 0x83c   : > { %v8279_v52 = vpop.f32.mrf.mxu1 }
 0x83d   : > { %7582 = vst [vmem:[%s12201_s18 + $0x200] sm:$0xff] %v7264_v14  ;;  %v7275_v60 = vadd.f32 %v8279_v52, %v12192_v15 }
 0x83e   : > { %v7266_v13 = vpop.f32.mrf.mxu1 }
 0x83f   : > { %7585 = vst [vmem:[%s12201_s18 + $0x218] sm:$0xff] %v7275_v60  ;;  %v7267_v25 = vadd.f32 %v12192_v15, %v7266_v13 }
 0x840   : > { %v8282_v57 = vpop.f32.mrf.mxu1 }
 0x841   : > { %7583 = vst [vmem:[%s12201_s18 + $0x208] sm:$0xff] %v7267_v25  ;;  %v7288_v3 = vadd.f32 %v8282_v57, %v12192_v15 }
 0x842   : > { %v7279_v21 = vpop.f32.mrf.mxu1 }
 0x843   : > { %7588 = vst [vmem:[%s12201_s18 + $0x230] sm:$0xff] %v7288_v3  ;;  %v7280_v9 = vadd.f32 %v12192_v15, %v7279_v21 }
 0x844   : > { %v8283_v18 = vpop.f32.mrf.mxu1 }
 0x845   : > { %7586 = vst [vmem:[%s12201_s18 + $0x220] sm:$0xff] %v7280_v9  ;;  %v7291_v54 = vadd.f32 %v8283_v18, %v12192_v15 }
 0x846   : > { %v7282_v63 = vpop.f32.mrf.mxu1 }
 0x847   : > { %7589 = vst [vmem:[%s12201_s18 + $0x238] sm:$0xff] %v7291_v54  ;;  %v7283_v42 = vadd.f32 %v12192_v15, %v7282_v63 }
 0x848   : > { %v8286_v16 = vpop.f32.mrf.mxu1 }
 0x849   : > { %7587 = vst [vmem:[%s12201_s18 + $0x228] sm:$0xff] %v7283_v42  ;;  %v7304_v4 = vadd.f32 %v8286_v16, %v12192_v15 }
 0x84a   : > { %v7295_v35 = vpop.f32.mrf.mxu1 }
 0x84b   : > { %7592 = vst [vmem:[%s12201_s18 + $0x250] sm:$0xff] %v7304_v4  ;;  %v7296_v41 = vadd.f32 %v12192_v15, %v7295_v35 }
 0x84c   : > { %v8287_v5 = vpop.f32.mrf.mxu1 }
 0x84d   : > { %7590 = vst [vmem:[%s12201_s18 + $0x240] sm:$0xff] %v7296_v41  ;;  %v7307_v51 = vadd.f32 %v8287_v5, %v12192_v15 }
 0x84e   : > { %v7298_v6 = vpop.f32.mrf.mxu1 }
 0x84f   : > { %7593 = vst [vmem:[%s12201_s18 + $0x258] sm:$0xff] %v7307_v51  ;;  %v7299_v61 = vadd.f32 %v12192_v15, %v7298_v6 }
 0x850   : > { %v8290_v24 = vpop.f32.mrf.mxu1 }
 0x851   : > { %7591 = vst [vmem:[%s12201_s18 + $0x248] sm:$0xff] %v7299_v61  ;;  %v7320_v62 = vadd.f32 %v8290_v24, %v12192_v15 }
 0x852   : > { %v7311_v38 = vpop.f32.mrf.mxu1 }
 0x853   : > { %7596 = vst [vmem:[%s12201_s18 + $0x270] sm:$0xff] %v7320_v62  ;;  %v7312_v12 = vadd.f32 %v12192_v15, %v7311_v38 }
 0x854   : > { %v8291_v47 = vpop.f32.mrf.mxu1 }
 0x855   : > { %7594 = vst [vmem:[%s12201_s18 + $0x260] sm:$0xff] %v7312_v12  ;;  %v7323_v28 = vadd.f32 %v8291_v47, %v12192_v15 }
 0x856   : > { %v7314_v10 = vpop.f32.mrf.mxu1 }
 0x857   : > { %7597 = vst [vmem:[%s12201_s18 + $0x278] sm:$0xff] %v7323_v28  ;;  %v7315_v55 = vadd.f32 %v12192_v15, %v7314_v10 }
 0x858   : > { %v8294_v46 = vpop.f32.mrf.mxu1 }
 0x859   : > { %7595 = vst [vmem:[%s12201_s18 + $0x268] sm:$0xff] %v7315_v55  ;;  %v7336_v33 = vadd.f32 %v8294_v46, %v12192_v15 }
 0x85a   : > { %v7327_v20 = vpop.f32.mrf.mxu1 }
 0x85b   : > { %7600 = vst [vmem:[%s12201_s18 + $0x290] sm:$0xff] %v7336_v33  ;;  %v7328_v50 = vadd.f32 %v12192_v15, %v7327_v20 }
 0x85c   : > { %v8295_v11 = vpop.f32.mrf.mxu1 }
 0x85d   : > { %7598 = vst [vmem:[%s12201_s18 + $0x280] sm:$0xff] %v7328_v50  ;;  %v7339_v22 = vadd.f32 %v8295_v11, %v12192_v15 }
 0x85e   : > { %v7330_v37 = vpop.f32.mrf.mxu1 }
 0x85f   : > { %7601 = vst [vmem:[%s12201_s18 + $0x298] sm:$0xff] %v7339_v22  ;;  %v7331_v36 = vadd.f32 %v12192_v15, %v7330_v37 }
 0x860   : > { %v8298_v58 = vpop.f32.mrf.mxu1 }
 0x861   : > { %7599 = vst [vmem:[%s12201_s18 + $0x288] sm:$0xff] %v7331_v36  ;;  %v7352_v43 = vadd.f32 %v8298_v58, %v12192_v15 }
 0x862   : > { %v7343_v23 = vpop.f32.mrf.mxu1 }
 0x863   : > { %7604 = vst [vmem:[%s12201_s18 + $0x2b0] sm:$0xff] %v7352_v43  ;;  %v7344_v31 = vadd.f32 %v12192_v15, %v7343_v23 }
 0x864   : > { %v8299_v59 = vpop.f32.mrf.mxu1 }
 0x865   : > { %7602 = vst [vmem:[%s12201_s18 + $0x2a0] sm:$0xff] %v7344_v31  ;;  %v7355_v7 = vadd.f32 %v8299_v59, %v12192_v15 }
 0x866   : > { %v7346_v1 = vpop.f32.mrf.mxu1 }
 0x867   : > { %7605 = vst [vmem:[%s12201_s18 + $0x2b8] sm:$0xff] %v7355_v7  ;;  %v7347_v27 = vadd.f32 %v12192_v15, %v7346_v1 }
 0x868   : > { %v8302_v32 = vpop.f32.mrf.mxu1 }
 0x869   : > { %7603 = vst [vmem:[%s12201_s18 + $0x2a8] sm:$0xff] %v7347_v27  ;;  %v7368_v53 = vadd.f32 %v8302_v32, %v12192_v15 }
 0x86a   : > { %v7359_v48 = vpop.f32.mrf.mxu1 }
 0x86b   : > { %7608 = vst [vmem:[%s12201_s18 + $0x2d0] sm:$0xff] %v7368_v53  ;;  %v7360_v34 = vadd.f32 %v12192_v15, %v7359_v48 }
 0x86c   : > { %v8303_v2 = vpop.f32.mrf.mxu1 }
 0x86d   : > { %7606 = vst [vmem:[%s12201_s18 + $0x2c0] sm:$0xff] %v7360_v34  ;;  %v7371_v49 = vadd.f32 %v8303_v2, %v12192_v15 }
 0x86e   : > { %v7362_v56 = vpop.f32.mrf.mxu1 }
 0x86f   : > { %7609 = vst [vmem:[%s12201_s18 + $0x2d8] sm:$0xff] %v7371_v49  ;;  %v7363_v0 = vadd.f32 %v12192_v15, %v7362_v56 }
 0x870   : > { %v8306_v40 = vpop.f32.mrf.mxu1 }
 0x871   : > { %7607 = vst [vmem:[%s12201_s18 + $0x2c8] sm:$0xff] %v7363_v0  ;;  %v7384_v17 = vadd.f32 %v8306_v40, %v12192_v15 }
 0x872   : > { %v7375_v30 = vpop.f32.mrf.mxu1 }
 0x873   : > { %7612 = vst [vmem:[%s12201_s18 + $0x2f0] sm:$0xff] %v7384_v17  ;;  %v7376_v44 = vadd.f32 %v12192_v15, %v7375_v30 }
 0x874   : > { %v8307_v26 = vpop.f32.mrf.mxu1 }
 0x875   : > { %7610 = vst [vmem:[%s12201_s18 + $0x2e0] sm:$0xff] %v7376_v44  ;;  %v7387_v29 = vadd.f32 %v8307_v26, %v12192_v15 }
 0x876   : > { %v7378_v8 = vpop.f32.mrf.mxu1 }
 0x877   : > { %7613 = vst [vmem:[%s12201_s18 + $0x2f8] sm:$0xff] %v7387_v29  ;;  %v7379_v45 = vadd.f32 %v12192_v15, %v7378_v8 }
 0x878   : > { %v8310_v39 = vpop.f32.mrf.mxu1 }
 0x879   : > { %7611 = vst [vmem:[%s12201_s18 + $0x2e8] sm:$0xff] %v7379_v45  ;;  %v7400_v19 = vadd.f32 %v8310_v39, %v12192_v15 }
 0x87a   : > { %v7391_v14 = vpop.f32.mrf.mxu1 }
 0x87b   : > { %7616 = vst [vmem:[%s12201_s18 + $0x310] sm:$0xff] %v7400_v19  ;;  %v7392_v52 = vadd.f32 %v12192_v15, %v7391_v14 }
 0x87c   : > { %v8311_v60 = vpop.f32.mrf.mxu1 }
 0x87d   : > { %7614 = vst [vmem:[%s12201_s18 + $0x300] sm:$0xff] %v7392_v52  ;;  %v7403_v13 = vadd.f32 %v8311_v60, %v12192_v15 }
 0x87e   : > { %v7394_v25 = vpop.f32.mrf.mxu1 }
 0x87f   : > { %7617 = vst [vmem:[%s12201_s18 + $0x318] sm:$0xff] %v7403_v13  ;;  %v7395_v57 = vadd.f32 %v12192_v15, %v7394_v25 }
 0x880   : > { %v8314_v3 = vpop.f32.mrf.mxu1 }
 0x881   : > { %7615 = vst [vmem:[%s12201_s18 + $0x308] sm:$0xff] %v7395_v57  ;;  %v7416_v21 = vadd.f32 %v8314_v3, %v12192_v15 }
 0x882   : > { %v7407_v9 = vpop.f32.mrf.mxu1 }
 0x883   : > { %7620 = vst [vmem:[%s12201_s18 + $0x330] sm:$0xff] %v7416_v21  ;;  %v7408_v18 = vadd.f32 %v12192_v15, %v7407_v9 }
 0x884   : > { %v8315_v54 = vpop.f32.mrf.mxu1 }
 0x885   : > { %7618 = vst [vmem:[%s12201_s18 + $0x320] sm:$0xff] %v7408_v18  ;;  %v7419_v63 = vadd.f32 %v8315_v54, %v12192_v15 }
 0x886   : > { %v7410_v42 = vpop.f32.mrf.mxu1 }
 0x887   : > { %7621 = vst [vmem:[%s12201_s18 + $0x338] sm:$0xff] %v7419_v63  ;;  %v7411_v16 = vadd.f32 %v12192_v15, %v7410_v42 }
 0x888   : > { %v8318_v4 = vpop.f32.mrf.mxu1 }
 0x889   : > { %7619 = vst [vmem:[%s12201_s18 + $0x328] sm:$0xff] %v7411_v16  ;;  %v7432_v35 = vadd.f32 %v8318_v4, %v12192_v15 }
 0x88a   : > { %v7423_v41 = vpop.f32.mrf.mxu1 }
 0x88b   : > { %7624 = vst [vmem:[%s12201_s18 + $0x350] sm:$0xff] %v7432_v35  ;;  %v7424_v5 = vadd.f32 %v12192_v15, %v7423_v41 }
 0x88c   : > { %v8319_v51 = vpop.f32.mrf.mxu1 }
 0x88d   : > { %7622 = vst [vmem:[%s12201_s18 + $0x340] sm:$0xff] %v7424_v5  ;;  %v7435_v6 = vadd.f32 %v8319_v51, %v12192_v15 }
 0x88e   : > { %v7426_v61 = vpop.f32.mrf.mxu1 }
 0x88f   : > { %7625 = vst [vmem:[%s12201_s18 + $0x358] sm:$0xff] %v7435_v6  ;;  %v7427_v24 = vadd.f32 %v12192_v15, %v7426_v61 }
 0x890   : > { %v8322_v62 = vpop.f32.mrf.mxu1 }
 0x891   : > { %7623 = vst [vmem:[%s12201_s18 + $0x348] sm:$0xff] %v7427_v24  ;;  %v7448_v38 = vadd.f32 %v8322_v62, %v12192_v15 }
 0x892   : > { %v7439_v12 = vpop.f32.mrf.mxu1 }
 0x893   : > { %7628 = vst [vmem:[%s12201_s18 + $0x370] sm:$0xff] %v7448_v38  ;;  %v7440_v47 = vadd.f32 %v12192_v15, %v7439_v12 }
 0x894   : > { %v8323_v28 = vpop.f32.mrf.mxu1 }
 0x895   : > { %7626 = vst [vmem:[%s12201_s18 + $0x360] sm:$0xff] %v7440_v47  ;;  %v7451_v10 = vadd.f32 %v8323_v28, %v12192_v15 }
 0x896   : > { %v7442_v55 = vpop.f32.mrf.mxu1 }
 0x897   : > { %7629 = vst [vmem:[%s12201_s18 + $0x378] sm:$0xff] %v7451_v10  ;;  %v7443_v46 = vadd.f32 %v12192_v15, %v7442_v55 }
 0x898   : > { %v8326_v33 = vpop.f32.mrf.mxu1 }
 0x899   : > { %7627 = vst [vmem:[%s12201_s18 + $0x368] sm:$0xff] %v7443_v46  ;;  %v7464_v20 = vadd.f32 %v8326_v33, %v12192_v15 }
 0x89a   : > { %v7455_v50 = vpop.f32.mrf.mxu1 }
 0x89b   : > { %7632 = vst [vmem:[%s12201_s18 + $0x390] sm:$0xff] %v7464_v20  ;;  %v7456_v11 = vadd.f32 %v12192_v15, %v7455_v50 }
 0x89c   : > { %v8327_v22 = vpop.f32.mrf.mxu1 }
 0x89d   : > { %7630 = vst [vmem:[%s12201_s18 + $0x380] sm:$0xff] %v7456_v11  ;;  %v7467_v37 = vadd.f32 %v8327_v22, %v12192_v15 }
 0x89e   : > { %v7458_v36 = vpop.f32.mrf.mxu1 }
 0x89f   : > { %7633 = vst [vmem:[%s12201_s18 + $0x398] sm:$0xff] %v7467_v37  ;;  %v7459_v58 = vadd.f32 %v12192_v15, %v7458_v36 }
 0x8a0   : > { %v8330_v43 = vpop.f32.mrf.mxu1 }
 0x8a1   : > { %7631 = vst [vmem:[%s12201_s18 + $0x388] sm:$0xff] %v7459_v58  ;;  %v7480_v23 = vadd.f32 %v8330_v43, %v12192_v15 }
 0x8a2   : > { %v7471_v31 = vpop.f32.mrf.mxu1 }
 0x8a3   : > { %7636 = vst [vmem:[%s12201_s18 + $0x3b0] sm:$0xff] %v7480_v23  ;;  %v7472_v59 = vadd.f32 %v12192_v15, %v7471_v31 }
 0x8a4   : > { %v8331_v7 = vpop.f32.mrf.mxu1 }
 0x8a5   : > { %7634 = vst [vmem:[%s12201_s18 + $0x3a0] sm:$0xff] %v7472_v59  ;;  %v7483_v1 = vadd.f32 %v8331_v7, %v12192_v15 }
 0x8a6   : > { %v7474_v27 = vpop.f32.mrf.mxu1 }
 0x8a7   : > { %7637 = vst [vmem:[%s12201_s18 + $0x3b8] sm:$0xff] %v7483_v1  ;;  %v7475_v32 = vadd.f32 %v12192_v15, %v7474_v27 }
 0x8a8   : > { %v8334_v53 = vpop.f32.mrf.mxu1 }
 0x8a9   : > { %7635 = vst [vmem:[%s12201_s18 + $0x3a8] sm:$0xff] %v7475_v32  ;;  %v7496_v48 = vadd.f32 %v8334_v53, %v12192_v15 }
 0x8aa   : > { %v7487_v34 = vpop.f32.mrf.mxu1 }
 0x8ab   : > { %7640 = vst [vmem:[%s12201_s18 + $0x3d0] sm:$0xff] %v7496_v48  ;;  %v7488_v2 = vadd.f32 %v12192_v15, %v7487_v34 }
 0x8ac   : > { %v8335_v49 = vpop.f32.mrf.mxu1 }
 0x8ad   : > { %7638 = vst [vmem:[%s12201_s18 + $0x3c0] sm:$0xff] %v7488_v2  ;;  %v7499_v56 = vadd.f32 %v8335_v49, %v12192_v15 }
 0x8ae   : > { %v7490_v0 = vpop.f32.mrf.mxu1 }
 0x8af   : > { %7641 = vst [vmem:[%s12201_s18 + $0x3d8] sm:$0xff] %v7499_v56  ;;  %v7491_v40 = vadd.f32 %v12192_v15, %v7490_v0 }
 0x8b0   : > { %v8338_v17 = vpop.f32.mrf.mxu1 }
 0x8b1   : > { %7639 = vst [vmem:[%s12201_s18 + $0x3c8] sm:$0xff] %v7491_v40  ;;  %v7512_v30 = vadd.f32 %v8338_v17, %v12192_v15 }
 0x8b2   : > { %v7503_v44 = vpop.f32.mrf.mxu1 }
 0x8b3   : > { %7644 = vst [vmem:[%s12201_s18 + $0x3f0] sm:$0xff] %v7512_v30  ;;  %v7504_v26 = vadd.f32 %v12192_v15, %v7503_v44 }
 0x8b4   : > { %v8339_v29 = vpop.f32.mrf.mxu1 }
 0x8b5   : > { %7642 = vst [vmem:[%s12201_s18 + $0x3e0] sm:$0xff] %v7504_v26  ;;  %v7515_v8 = vadd.f32 %v8339_v29, %v12192_v15 }
 0x8b6   : > { %v7506_v45 = vpop.f32.mrf.mxu1 }
 0x8b7   : > { %7645 = vst [vmem:[%s12201_s18 + $0x3f8] sm:$0xff] %v7515_v8  ;;  %v7507_v39 = vadd.f32 %v12192_v15, %v7506_v45 }
 0x8b9   : > { %7643 = vst [vmem:[%s12201_s18 + $0x3e8] sm:$0xff] %v7507_v39 }
 0x8ba PF: > { %s16_s21 = sadd.s32 1, %s8598_s21  }
 0x8bb   : > { %p13_p4 = scmp.ge.s32.totalorder %s16_s21, 4  }
 0x8bd   :  { %15 = sbr.rel (!%p13_p4) target bundleno = 1 (0x1), region = 74 }

</bundles_post_ra>
